<compile_context>
chip_gen: v7x
topology: tpu7x:2x2x1
jax: 0.10.0
libtpu: 0.0.40
codegen_flags: <defaults>
</compile_context>

<pallas_src>
import functools

import numpy as np

import jax
import jax.numpy as jnp
from jax import lax
from jax.experimental import pallas as pl
from jax.experimental.pallas import tpu as pltpu

_EPS = 1e-5

# Per-image row strides in the activation scratch buffers (multiples of 16 so
# bf16 packed-sublane tiles start aligned for each image's block).
_A1S, _A2S, _A3S, _A4S = 32, 32, 16, 16

# Static, 128-aligned column offsets inside the packed f32 shift/bias operand.
_SH1_OFF, _SH2_OFF, _SH3_OFF, _SH4_OFF = 0, 128, 512, 768
_BF1_OFF, _BF2_OFF, _BF3_OFF, _SHIFT_W = 1280, 1792, 1920, 2048


# ----------------------------------------------------------------------------
# The single fused Pallas kernel: conv1..conv4 + fc1 + fc2 + fc3.
# ----------------------------------------------------------------------------
def _net_kernel(x_ref, wt1, wt2, wt3, sel3, wt4, wf1_hbm, wf2, wf3, shifts,
                o_ref, a1, a2, a3, a4, wf1_vmem, wf1_sem, *, n_img):
    f32 = jnp.float32
    bf16 = jnp.bfloat16

    # Kick off the big fc1-weight DMA (HBM -> VMEM scratch) immediately so it
    # overlaps with the entire conv stack; waited on right before fc1.
    wf1_cp = pltpu.make_async_copy(wf1_hbm, wf1_vmem, wf1_sem)
    wf1_cp.start()

    def mm(a, b):
        # bf16 MXU matmul with f32 accumulation (astype is a no-op for bf16).
        return jnp.dot(a.astype(bf16), b.astype(bf16),
                       preferred_element_type=f32)

    # Packed shift/bias rows: static, lane-aligned slices of one operand.
    sh1 = shifts[:, _SH1_OFF:_SH1_OFF + 128]
    sh2 = shifts[:, _SH2_OFF:_SH2_OFF + 320]
    sh3 = shifts[:, _SH3_OFF:_SH3_OFF + 160]
    sh4 = shifts[:, _SH4_OFF:_SH4_OFF + 512]
    bfc1 = shifts[:, _BF1_OFF:_BF1_OFF + 512]
    bfc2 = shifts[:, _BF2_OFF:_BF2_OFF + 128]
    bfc3 = shifts[:, _BF3_OFF:_BF3_OFF + 10]

    for m in range(n_img):
        # ---- conv1: 28x28x1 -> 24x24x4 (padded to 128 cols), BN + ReLU -----
        acc = jnp.zeros((24, 128), f32)
        for i in range(5):
            acc = acc + mm(x_ref[m * 28 + i: m * 28 + i + 24, :], wt1[i])
        a1[m * _A1S: m * _A1S + 24, :] = jnp.maximum(acc + sh1, 0.0).astype(bf16)

        # ---- conv2: 24x24x4 -> 20x20x16, BN + ReLU --------------------------
        acc = jnp.zeros((20, 320), f32)
        for i in range(5):
            acc = acc + mm(a1[m * _A1S + i: m * _A1S + i + 20, :], wt2[i])
        a2[m * _A2S: m * _A2S + 20, :] = jnp.maximum(acc + sh2, 0.0).astype(bf16)

        # ---- conv3: 20x20x16 -> 10x10x16 (2x2, stride 2), bias only ---------
        # Select even/odd input rows with tiny 0/1 matmuls *before* the conv
        # matmuls, so the conv products are only 10 rows tall.
        a_full = a2[m * _A2S: m * _A2S + 20, :]              # (20, 320)
        a_even = mm(sel3[0], a_full)                          # (10, 320)
        a_odd = mm(sel3[1], a_full)                           # (10, 320)
        out3 = mm(a_even, wt3[0]) + mm(a_odd, wt3[1]) + sh3   # (10, 160)
        a3[m * _A3S: m * _A3S + 10, :] = out3.astype(bf16)

        # ---- conv4: 10x10x16 -> 8x8x64, BN + ReLU ---------------------------
        acc = jnp.zeros((8, 512), f32)
        for i in range(3):
            acc = acc + mm(a3[m * _A3S + i: m * _A3S + i + 8, :], wt4[i])
        a4[m * _A4S: m * _A4S + 8, :] = jnp.maximum(acc + sh4, 0.0).astype(bf16)

    # ---- fully-connected stack, batched over all images ---------------------
    wf1_cp.wait()                                             # fc1 weight ready

    # fc1: 4096 -> 512, BN + ReLU (torch flatten folded into 8 row blocks).
    acc = jnp.zeros((n_img, 512), f32)
    for r in range(8):
        rows = [a4[m * _A4S + r: m * _A4S + r + 1, :] for m in range(n_img)]
        op = rows[0] if n_img == 1 else jnp.concatenate(rows, axis=0)
        acc = acc + mm(op, wf1_vmem[r])
    h = jnp.maximum(acc + bfc1, 0.0)                          # (n, 512)

    # fc2: 512 -> 84 (padded to 128 with exact-zero columns), BN + ReLU.
    h = jnp.maximum(mm(h, wf2[...]) + bfc2, 0.0)              # (n, 128)

    # fc3: 84 -> 10 (zero rows for the padded inputs).
    o_ref[...] = (mm(h, wf3[...]) + bfc3).astype(o_ref.dtype)


def net_forward(prep, x_nchw):
    """prep: tuple of kernel-ready weight arrays (see prepare_params)."""
    n = x_nchw.shape[0]
    wt1, wt2, wt3, sel3, wt4, wf1, wf2, wf3, shifts = prep
    # Boundary layout change only: NCHW -> (N*H, W*C) channels-last 2-D, bf16.
    x2d = jnp.transpose(x_nchw, (0, 2, 3, 1)).reshape(n * 28, 28)
    x2d = x2d.astype(jnp.bfloat16)
    operands = (x2d, wt1, wt2, wt3, sel3, wt4, wf1, wf2, wf3, shifts)

    def vspec(a):
        zeros = (0,) * a.ndim
        return pl.BlockSpec(a.shape, lambda i, _z=zeros: _z)

    in_specs = [
        vspec(x2d), vspec(wt1), vspec(wt2), vspec(wt3), vspec(sel3),
        vspec(wt4),
        pl.BlockSpec(memory_space=pl.ANY),    # wf1 stays in HBM; manual DMA
        vspec(wf2), vspec(wf3), vspec(shifts),
    ]

    return pl.pallas_call(
        functools.partial(_net_kernel, n_img=n),
        out_shape=jax.ShapeDtypeStruct((n, 10), jnp.float32),
        grid=(1,),
        in_specs=in_specs,
        out_specs=pl.BlockSpec((n, 10), lambda i: (0, 0)),
        scratch_shapes=[
            pltpu.VMEM((n * _A1S, 128), jnp.bfloat16),   # conv1 out (24x24x4, padded)
            pltpu.VMEM((n * _A2S, 320), jnp.bfloat16),   # conv2 out (20x20x16)
            pltpu.VMEM((n * _A3S, 160), jnp.bfloat16),   # conv3 out (10x10x16)
            pltpu.VMEM((n * _A4S, 512), jnp.bfloat16),   # conv4 out (8x8x64)
            pltpu.VMEM((8, 512, 512), jnp.bfloat16),     # fc1 weight landing buffer
            pltpu.SemaphoreType.DMA(()),                 # fc1 weight DMA semaphore
        ],
        compiler_params=pltpu.CompilerParams(
            dimension_semantics=("arbitrary",),
            vmem_limit_bytes=32 * 1024 * 1024),
    )(*operands)


# ----------------------------------------------------------------------------
# Host-side (one-time) weight preparation: BN folding, row-Toeplitz expansion,
# flatten-order permutation, lane padding, packing, transposes, bf16 casts.
# ----------------------------------------------------------------------------
def _fold_bn(bias, gamma, beta, mean, var, eps=_EPS):
    scale = gamma / np.sqrt(var + eps)
    shift = (bias - mean) * scale + beta
    return scale, shift


def _conv_row_toeplitz(w, scale, shift, wdt, stride):
    """w: (cout, cin, kh, kw) torch layout.
    Returns wt (kh, wdt*cin, ow*cout) and shift_row (1, ow*cout) such that the
    conv output row oy (channels-last, cols = ox*cout+co) equals
        sum_i act2d[stride*oy + i, :] @ wt[i]  + shift_row.
    """
    cout, cin, kh, kw = w.shape
    ow = (wdt - kw) // stride + 1
    ws = w * scale[:, None, None, None]            # fold BN scale into weights
    wt = np.zeros((kh, wdt * cin, ow * cout), np.float32)
    for i in range(kh):
        for ox in range(ow):
            for j in range(kw):
                x = stride * ox + j
                wt[i, x * cin:(x + 1) * cin,
                   ox * cout:(ox + 1) * cout] = ws[:, :, i, j].T
    shift_row = np.tile(shift, ow).reshape(1, ow * cout)
    return wt, shift_row


def prepare_params(p):
    f = lambda a: np.asarray(a, np.float32)
    bf = lambda a: jnp.asarray(a, jnp.bfloat16)

    # conv1: Conv(1->4,5) + BN.  Output width padded 96 -> 128 (lane-dense).
    s, sh = _fold_bn(f(p["c1_b"]), *[f(t) for t in p["bn1"]])
    wt, shr = _conv_row_toeplitz(f(p["c1_w"]), s, sh, 28, 1)        # (5,28,96)
    wt1 = np.zeros((5, 28, 128), np.float32); wt1[:, :, :96] = wt
    sh1 = np.zeros((1, 128), np.float32); sh1[:, :96] = shr

    # conv2: Conv(4->16,5) + BN.  K dim padded 96 -> 128 to match conv1 pad.
    s, sh = _fold_bn(f(p["c2_b"]), *[f(t) for t in p["bn2"]])
    wt, sh2 = _conv_row_toeplitz(f(p["c2_w"]), s, sh, 24, 1)        # (5,96,320)
    wt2 = np.zeros((5, 128, 320), np.float32); wt2[:, :96, :] = wt

    # conv3: Conv(16->16,2,stride=2), bias only.  Even/odd row selectors.
    wt3, sh3 = _conv_row_toeplitz(f(p["c3_w"]), np.ones(16, np.float32),
                                  f(p["c3_b"]), 20, 2)              # (2,320,160)
    sel = np.zeros((2, 10, 20), np.float32)
    for oy in range(10):
        sel[0, oy, 2 * oy] = 1.0
        sel[1, oy, 2 * oy + 1] = 1.0

    # conv4: Conv(16->64,3) + BN.
    s, sh = _fold_bn(f(p["c4_b"]), *[f(t) for t in p["bn4"]])
    wt4, sh4 = _conv_row_toeplitz(f(p["c4_w"]), s, sh, 10, 1)       # (3,160,512)

    # fc1: Linear(4096,512) + BN.  Fold BN scale, permute torch NCHW flatten
    # order (c*64 + y*8 + x) into the kernel's (y; x*64 + c) row-block layout.
    s, shf1 = _fold_bn(f(p["l1_b"]), *[f(t) for t in p["bn5"]])
    w1 = f(p["l1_w"]) * s[:, None]                                  # (512,4096)
    w1 = w1.reshape(512, 64, 8, 8).transpose(2, 3, 1, 0).reshape(8, 512, 512)

    # fc2: Linear(512,84) + BN.  Pre-transposed, output padded 84 -> 128 with
    # exact-zero columns / zero shift (so ReLU keeps them at 0).
    s, shf2 = _fold_bn(f(p["l2_b"]), *[f(t) for t in p["bn6"]])
    w2 = (f(p["l2_w"]) * s[:, None]).T                              # (512,84)
    wf2 = np.zeros((512, 128), np.float32); wf2[:, :84] = w2

    # fc3: Linear(84,10).  Zero rows for the padded fc2 columns.
    w3 = f(p["l3_w"]).T                                             # (84,10)
    wf3 = np.zeros((128, 10), np.float32); wf3[:84, :] = w3

    # Pack every small f32 shift / bias row into one lane-aligned operand.
    shifts = np.zeros((1, _SHIFT_W), np.float32)
    shifts[:, _SH1_OFF:_SH1_OFF + 128] = sh1
    shifts[:, _SH2_OFF:_SH2_OFF + 320] = sh2
    shifts[:, _SH3_OFF:_SH3_OFF + 160] = sh3
    shifts[:, _SH4_OFF:_SH4_OFF + 512] = sh4
    shifts[0, _BF1_OFF:_BF1_OFF + 512] = shf1
    shifts[0, _BF2_OFF:_BF2_OFF + 84] = shf2
    shifts[0, _BF3_OFF:_BF3_OFF + 10] = f(p["l3_b"])

    return (bf(wt1), bf(wt2), bf(wt3), bf(sel), bf(wt4), bf(w1), bf(wf2),
            bf(wf3), jnp.asarray(shifts, jnp.float32))


# ----------------------------------------------------------------------------
# Deterministic parameter construction (inference-mode BN with non-trivial
# gamma/beta/running stats so the normalization math is exercised).
# ----------------------------------------------------------------------------
def make_params(key):
    def nrm(key, shape, std=0.05):
        return std * jax.random.normal(key, shape, dtype=jnp.float32)

    def bn(key, c):
        k1, k2, k3, k4 = jax.random.split(key, 4)
        gamma = 1.0 + 0.1 * jax.random.normal(k1, (c,), dtype=jnp.float32)
        beta = 0.1 * jax.random.normal(k2, (c,), dtype=jnp.float32)
        mean = 0.1 * jax.random.normal(k3, (c,), dtype=jnp.float32)
        var = 1.0 + 0.2 * jax.random.uniform(k4, (c,), dtype=jnp.float32)
        return gamma, beta, mean, var

    ks = jax.random.split(key, 20)
    p = {}
    p["c1_w"] = nrm(ks[0], (4, 1, 5, 5));   p["c1_b"] = nrm(ks[1], (4,))
    p["bn1"] = bn(ks[2], 4)
    p["c2_w"] = nrm(ks[3], (16, 4, 5, 5));  p["c2_b"] = nrm(ks[4], (16,))
    p["bn2"] = bn(ks[5], 16)
    p["c3_w"] = nrm(ks[6], (16, 16, 2, 2)); p["c3_b"] = nrm(ks[7], (16,))
    p["c4_w"] = nrm(ks[8], (64, 16, 3, 3)); p["c4_b"] = nrm(ks[9], (64,))
    p["bn4"] = bn(ks[10], 64)
    p["l1_w"] = nrm(ks[11], (512, 4096), std=0.02); p["l1_b"] = nrm(ks[12], (512,))
    p["bn5"] = bn(ks[13], 512)
    p["l2_w"] = nrm(ks[14], (84, 512), std=0.02);   p["l2_b"] = nrm(ks[15], (84,))
    p["bn6"] = bn(ks[16], 84)
    p["l3_w"] = nrm(ks[17], (10, 84), std=0.02);    p["l3_b"] = nrm(ks[18], (10,))
    return p


# ----------------------------------------------------------------------------
# Pure-JAX f32 reference (mirrors the PyTorch forward) for in-script checking.
# ----------------------------------------------------------------------------
def _reference_forward(params, x):
    p = params
    hp = lax.Precision.HIGHEST

    def conv(x, w, b, stride=1):
        y = lax.conv_general_dilated(
            x, w, (stride, stride), "VALID",
            dimension_numbers=("NCHW", "OIHW", "NCHW"), precision=hp)
        return y + b.reshape(1, -1, 1, 1)

    def bn2d(x, gamma, beta, mean, var):
        s = gamma / jnp.sqrt(var + _EPS)
        return (x - mean.reshape(1, -1, 1, 1)) * s.reshape(1, -1, 1, 1) \
            + beta.reshape(1, -1, 1, 1)

    def bn1d(x, gamma, beta, mean, var):
        return (x - mean) * (gamma / jnp.sqrt(var + _EPS)) + beta

    x = jax.nn.relu(bn2d(conv(x, p["c1_w"], p["c1_b"]), *p["bn1"]))
    x = jax.nn.relu(bn2d(conv(x, p["c2_w"], p["c2_b"]), *p["bn2"]))
    x = conv(x, p["c3_w"], p["c3_b"], stride=2)
    x = jax.nn.relu(bn2d(conv(x, p["c4_w"], p["c4_b"]), *p["bn4"]))
    x = x.reshape(x.shape[0], -1)
    x = jax.nn.relu(bn1d(jnp.dot(x, p["l1_w"].T, precision=hp) + p["l1_b"], *p["bn5"]))
    x = jax.nn.relu(bn1d(jnp.dot(x, p["l2_w"].T, precision=hp) + p["l2_b"], *p["bn6"]))
    return jnp.dot(x, p["l3_w"].T, precision=hp) + p["l3_b"]


if __name__ == "__main__":
    key = jax.random.PRNGKey(0)
    kx, kp = jax.random.split(key)
    # Input shape is forced by the architecture: fc1 expects 4096 = 64*8*8,
    # which back-propagates to a (N, 1, 28, 28) input. Small batch N=2.
    x = jax.random.normal(kx, (2, 1, 28, 28), dtype=jnp.float32)
    params = make_params(kp)
    prep = prepare_params(params)        # one-time host-side weight folding

    fwd = jax.jit(net_forward)
    out = fwd(prep, x)
    jax.block_until_ready(out)

    assert out.shape == (2, 10), out.shape
    assert bool(jnp.all(jnp.isfinite(out)))
    # Numerical check against the f32 XLA reference (kernel uses bf16 MXU
    # operands / bf16 activation scratch with f32 accumulation -> loose tol).
    ref = _reference_forward(params, x)
    err = float(jnp.max(jnp.abs(out - ref)))
    assert err < 3e-2, f"max abs err vs reference: {err}"
    print("KERNEL_OK")
</pallas_src>

<mosaic_0001>
module attributes {stable_mosaic.version = 11 : i64} {
  func.func @_net_kernel(%arg0: i32, %arg1: memref<56x28xbf16, #tpu.memory_space<vmem>>, %arg2: memref<5x28x128xbf16, #tpu.memory_space<vmem>>, %arg3: memref<5x128x320xbf16, #tpu.memory_space<vmem>>, %arg4: memref<2x320x160xbf16, #tpu.memory_space<vmem>>, %arg5: memref<2x10x20xbf16, #tpu.memory_space<vmem>>, %arg6: memref<3x160x512xbf16, #tpu.memory_space<vmem>>, %arg7: memref<8x512x512xbf16, #tpu.memory_space<any>>, %arg8: memref<512x128xbf16, #tpu.memory_space<vmem>>, %arg9: memref<128x10xbf16, #tpu.memory_space<vmem>>, %arg10: memref<1x2048xf32, #tpu.memory_space<vmem>>, %arg11: memref<2x10xf32, #tpu.memory_space<vmem>>, %arg12: memref<64x128xbf16, #tpu.memory_space<vmem>>, %arg13: memref<64x320xbf16, #tpu.memory_space<vmem>>, %arg14: memref<32x160xbf16, #tpu.memory_space<vmem>>, %arg15: memref<32x512xbf16, #tpu.memory_space<vmem>>, %arg16: memref<8x512x512xbf16, #tpu.memory_space<vmem>>, %arg17: memref<!tpu.dma_semaphore, #tpu.memory_space<semaphore_mem>>) attributes {dimension_semantics = [#tpu.dimension_semantics<arbitrary>], iteration_bounds = array<i64: 1>, scalar_prefetch = 0 : i64, scratch_operands = 6 : i64, tpu.core_type = #tpu.core_type<tc>, window_params = [{pipeline_mode = #tpu.pipeline_mode<synchronous>, transform_indices = @transform_0, window_bounds = array<i64: 56, 28>}, {pipeline_mode = #tpu.pipeline_mode<synchronous>, transform_indices = @transform_1, window_bounds = array<i64: 5, 28, 128>}, {pipeline_mode = #tpu.pipeline_mode<synchronous>, transform_indices = @transform_2, window_bounds = array<i64: 5, 128, 320>}, {pipeline_mode = #tpu.pipeline_mode<synchronous>, transform_indices = @transform_3, window_bounds = array<i64: 2, 320, 160>}, {pipeline_mode = #tpu.pipeline_mode<synchronous>, transform_indices = @transform_4, window_bounds = array<i64: 2, 10, 20>}, {pipeline_mode = #tpu.pipeline_mode<synchronous>, transform_indices = @transform_5, window_bounds = array<i64: 3, 160, 512>}, {}, {pipeline_mode = #tpu.pipeline_mode<synchronous>, transform_indices = @transform_7, window_bounds = array<i64: 512, 128>}, {pipeline_mode = #tpu.pipeline_mode<synchronous>, transform_indices = @transform_8, window_bounds = array<i64: 128, 10>}, {pipeline_mode = #tpu.pipeline_mode<synchronous>, transform_indices = @transform_9, window_bounds = array<i64: 1, 2048>}, {pipeline_mode = #tpu.pipeline_mode<synchronous>, transform_indices = @transform_10, window_bounds = array<i64: 2, 10>}]} {
    tpu.enqueue_dma source(%arg7 : memref<8x512x512xbf16, #tpu.memory_space<any>>) target(%arg16 : memref<8x512x512xbf16, #tpu.memory_space<vmem>>) target_semaphore(%arg17 : memref<!tpu.dma_semaphore, #tpu.memory_space<semaphore_mem>>)
    %c0 = arith.constant 0 : index
    %c0_0 = arith.constant 0 : index
    %0 = vector.load %arg10[%c0, %c0_0] : memref<1x2048xf32, #tpu.memory_space<vmem>>, vector<1x128xf32>
    %c0_1 = arith.constant 0 : index
    %c128 = arith.constant 128 : index
    %1 = vector.load %arg10[%c0_1, %c128] : memref<1x2048xf32, #tpu.memory_space<vmem>>, vector<1x320xf32>
    %c0_2 = arith.constant 0 : index
    %c512 = arith.constant 512 : index
    %2 = vector.load %arg10[%c0_2, %c512] : memref<1x2048xf32, #tpu.memory_space<vmem>>, vector<1x160xf32>
    %c0_3 = arith.constant 0 : index
    %c768 = arith.constant 768 : index
    %3 = vector.load %arg10[%c0_3, %c768] : memref<1x2048xf32, #tpu.memory_space<vmem>>, vector<1x512xf32>
    %c0_4 = arith.constant 0 : index
    %c1280 = arith.constant 1280 : index
    %4 = vector.load %arg10[%c0_4, %c1280] : memref<1x2048xf32, #tpu.memory_space<vmem>>, vector<1x512xf32>
    %c0_5 = arith.constant 0 : index
    %c1792 = arith.constant 1792 : index
    %5 = vector.load %arg10[%c0_5, %c1792] : memref<1x2048xf32, #tpu.memory_space<vmem>>, vector<1x128xf32>
    %c0_6 = arith.constant 0 : index
    %c1920 = arith.constant 1920 : index
    %6 = vector.load %arg10[%c0_6, %c1920] : memref<1x2048xf32, #tpu.memory_space<vmem>>, vector<1x10xf32>
    %cst = arith.constant 0.000000e+00 : f32
    %7 = vector.broadcast %cst : f32 to vector<24x128xf32>
    %c0_7 = arith.constant 0 : index
    %c0_8 = arith.constant 0 : index
    %8 = vector.load %arg1[%c0_7, %c0_8] : memref<56x28xbf16, #tpu.memory_space<vmem>>, vector<24x28xbf16>
    %c0_9 = arith.constant 0 : index
    %c0_10 = arith.constant 0 : index
    %c0_11 = arith.constant 0 : index
    %9 = vector.load %arg2[%c0_9, %c0_10, %c0_11] : memref<5x28x128xbf16, #tpu.memory_space<vmem>>, vector<1x28x128xbf16>
    %10 = vector.shape_cast %9 : vector<1x28x128xbf16> to vector<28x128xbf16>
    %cst_12 = arith.constant dense<0.000000e+00> : vector<24x128xf32>
    %11 = tpu.matmul %8, %10, %cst_12 {dimension_numbers = #tpu.dot_dimension_numbers<[1], [0], [0], [1], [0, 0, 1, 1], [], []>} : vector<24x28xbf16>, vector<28x128xbf16>, vector<24x128xf32> -> vector<24x128xf32>
    %12 = arith.addf %7, %11 : vector<24x128xf32>
    %c1 = arith.constant 1 : index
    %c0_13 = arith.constant 0 : index
    %13 = vector.load %arg1[%c1, %c0_13] : memref<56x28xbf16, #tpu.memory_space<vmem>>, vector<24x28xbf16>
    %c1_14 = arith.constant 1 : index
    %c0_15 = arith.constant 0 : index
    %c0_16 = arith.constant 0 : index
    %14 = vector.load %arg2[%c1_14, %c0_15, %c0_16] : memref<5x28x128xbf16, #tpu.memory_space<vmem>>, vector<1x28x128xbf16>
    %15 = vector.shape_cast %14 : vector<1x28x128xbf16> to vector<28x128xbf16>
    %cst_17 = arith.constant dense<0.000000e+00> : vector<24x128xf32>
    %16 = tpu.matmul %13, %15, %cst_17 {dimension_numbers = #tpu.dot_dimension_numbers<[1], [0], [0], [1], [0, 0, 1, 1], [], []>} : vector<24x28xbf16>, vector<28x128xbf16>, vector<24x128xf32> -> vector<24x128xf32>
    %17 = arith.addf %12, %16 : vector<24x128xf32>
    %c2 = arith.constant 2 : index
    %c0_18 = arith.constant 0 : index
    %18 = vector.load %arg1[%c2, %c0_18] : memref<56x28xbf16, #tpu.memory_space<vmem>>, vector<24x28xbf16>
    %c2_19 = arith.constant 2 : index
    %c0_20 = arith.constant 0 : index
    %c0_21 = arith.constant 0 : index
    %19 = vector.load %arg2[%c2_19, %c0_20, %c0_21] : memref<5x28x128xbf16, #tpu.memory_space<vmem>>, vector<1x28x128xbf16>
    %20 = vector.shape_cast %19 : vector<1x28x128xbf16> to vector<28x128xbf16>
    %cst_22 = arith.constant dense<0.000000e+00> : vector<24x128xf32>
    %21 = tpu.matmul %18, %20, %cst_22 {dimension_numbers = #tpu.dot_dimension_numbers<[1], [0], [0], [1], [0, 0, 1, 1], [], []>} : vector<24x28xbf16>, vector<28x128xbf16>, vector<24x128xf32> -> vector<24x128xf32>
    %22 = arith.addf %17, %21 : vector<24x128xf32>
    %c3 = arith.constant 3 : index
    %c0_23 = arith.constant 0 : index
    %23 = vector.load %arg1[%c3, %c0_23] : memref<56x28xbf16, #tpu.memory_space<vmem>>, vector<24x28xbf16>
    %c3_24 = arith.constant 3 : index
    %c0_25 = arith.constant 0 : index
    %c0_26 = arith.constant 0 : index
    %24 = vector.load %arg2[%c3_24, %c0_25, %c0_26] : memref<5x28x128xbf16, #tpu.memory_space<vmem>>, vector<1x28x128xbf16>
    %25 = vector.shape_cast %24 : vector<1x28x128xbf16> to vector<28x128xbf16>
    %cst_27 = arith.constant dense<0.000000e+00> : vector<24x128xf32>
    %26 = tpu.matmul %23, %25, %cst_27 {dimension_numbers = #tpu.dot_dimension_numbers<[1], [0], [0], [1], [0, 0, 1, 1], [], []>} : vector<24x28xbf16>, vector<28x128xbf16>, vector<24x128xf32> -> vector<24x128xf32>
    %27 = arith.addf %22, %26 : vector<24x128xf32>
    %c4 = arith.constant 4 : index
    %c0_28 = arith.constant 0 : index
    %28 = vector.load %arg1[%c4, %c0_28] : memref<56x28xbf16, #tpu.memory_space<vmem>>, vector<24x28xbf16>
    %c4_29 = arith.constant 4 : index
    %c0_30 = arith.constant 0 : index
    %c0_31 = arith.constant 0 : index
    %29 = vector.load %arg2[%c4_29, %c0_30, %c0_31] : memref<5x28x128xbf16, #tpu.memory_space<vmem>>, vector<1x28x128xbf16>
    %30 = vector.shape_cast %29 : vector<1x28x128xbf16> to vector<28x128xbf16>
    %cst_32 = arith.constant dense<0.000000e+00> : vector<24x128xf32>
    %31 = tpu.matmul %28, %30, %cst_32 {dimension_numbers = #tpu.dot_dimension_numbers<[1], [0], [0], [1], [0, 0, 1, 1], [], []>} : vector<24x28xbf16>, vector<28x128xbf16>, vector<24x128xf32> -> vector<24x128xf32>
    %32 = arith.addf %27, %31 : vector<24x128xf32>
    %33 = vector.broadcast %0 : vector<1x128xf32> to vector<24x128xf32>
    %34 = arith.addf %32, %33 : vector<24x128xf32>
    %cst_33 = arith.constant 0.000000e+00 : f32
    %35 = vector.broadcast %cst_33 : f32 to vector<24x128xf32>
    %36 = arith.maximumf %34, %35 : vector<24x128xf32>
    %37 = arith.truncf %36 : vector<24x128xf32> to vector<24x128xbf16>
    %c0_34 = arith.constant 0 : index
    %c0_35 = arith.constant 0 : index
    %38 = vector.load %arg12[%c0_34, %c0_35] : memref<64x128xbf16, #tpu.memory_space<vmem>>, vector<24x128xbf16>
    tpu.vector_store %arg12[%c0_34, %c0_35], %37 {strides = array<i32>} : memref<64x128xbf16, #tpu.memory_space<vmem>>, vector<24x128xbf16>,
    %cst_36 = arith.constant 0.000000e+00 : f32
    %39 = vector.broadcast %cst_36 : f32 to vector<20x320xf32>
    %c0_37 = arith.constant 0 : index
    %c0_38 = arith.constant 0 : index
    %40 = vector.load %arg12[%c0_37, %c0_38] : memref<64x128xbf16, #tpu.memory_space<vmem>>, vector<20x128xbf16>
    %c0_39 = arith.constant 0 : index
    %c0_40 = arith.constant 0 : index
    %c0_41 = arith.constant 0 : index
    %41 = vector.load %arg3[%c0_39, %c0_40, %c0_41] : memref<5x128x320xbf16, #tpu.memory_space<vmem>>, vector<1x128x320xbf16>
    %42 = vector.shape_cast %41 : vector<1x128x320xbf16> to vector<128x320xbf16>
    %cst_42 = arith.constant dense<0.000000e+00> : vector<20x320xf32>
    %43 = tpu.matmul %40, %42, %cst_42 {dimension_numbers = #tpu.dot_dimension_numbers<[1], [0], [0], [1], [0, 0, 1, 1], [], []>} : vector<20x128xbf16>, vector<128x320xbf16>, vector<20x320xf32> -> vector<20x320xf32>
    %44 = arith.addf %39, %43 : vector<20x320xf32>
    %c1_43 = arith.constant 1 : index
    %c0_44 = arith.constant 0 : index
    %45 = vector.load %arg12[%c1_43, %c0_44] : memref<64x128xbf16, #tpu.memory_space<vmem>>, vector<20x128xbf16>
    %c1_45 = arith.constant 1 : index
    %c0_46 = arith.constant 0 : index
    %c0_47 = arith.constant 0 : index
    %46 = vector.load %arg3[%c1_45, %c0_46, %c0_47] : memref<5x128x320xbf16, #tpu.memory_space<vmem>>, vector<1x128x320xbf16>
    %47 = vector.shape_cast %46 : vector<1x128x320xbf16> to vector<128x320xbf16>
    %cst_48 = arith.constant dense<0.000000e+00> : vector<20x320xf32>
    %48 = tpu.matmul %45, %47, %cst_48 {dimension_numbers = #tpu.dot_dimension_numbers<[1], [0], [0], [1], [0, 0, 1, 1], [], []>} : vector<20x128xbf16>, vector<128x320xbf16>, vector<20x320xf32> -> vector<20x320xf32>
    %49 = arith.addf %44, %48 : vector<20x320xf32>
    %c2_49 = arith.constant 2 : index
    %c0_50 = arith.constant 0 : index
    %50 = vector.load %arg12[%c2_49, %c0_50] : memref<64x128xbf16, #tpu.memory_space<vmem>>, vector<20x128xbf16>
    %c2_51 = arith.constant 2 : index
    %c0_52 = arith.constant 0 : index
    %c0_53 = arith.constant 0 : index
    %51 = vector.load %arg3[%c2_51, %c0_52, %c0_53] : memref<5x128x320xbf16, #tpu.memory_space<vmem>>, vector<1x128x320xbf16>
    %52 = vector.shape_cast %51 : vector<1x128x320xbf16> to vector<128x320xbf16>
    %cst_54 = arith.constant dense<0.000000e+00> : vector<20x320xf32>
    %53 = tpu.matmul %50, %52, %cst_54 {dimension_numbers = #tpu.dot_dimension_numbers<[1], [0], [0], [1], [0, 0, 1, 1], [], []>} : vector<20x128xbf16>, vector<128x320xbf16>, vector<20x320xf32> -> vector<20x320xf32>
    %54 = arith.addf %49, %53 : vector<20x320xf32>
    %c3_55 = arith.constant 3 : index
    %c0_56 = arith.constant 0 : index
    %55 = vector.load %arg12[%c3_55, %c0_56] : memref<64x128xbf16, #tpu.memory_space<vmem>>, vector<20x128xbf16>
    %c3_57 = arith.constant 3 : index
    %c0_58 = arith.constant 0 : index
    %c0_59 = arith.constant 0 : index
    %56 = vector.load %arg3[%c3_57, %c0_58, %c0_59] : memref<5x128x320xbf16, #tpu.memory_space<vmem>>, vector<1x128x320xbf16>
    %57 = vector.shape_cast %56 : vector<1x128x320xbf16> to vector<128x320xbf16>
    %cst_60 = arith.constant dense<0.000000e+00> : vector<20x320xf32>
    %58 = tpu.matmul %55, %57, %cst_60 {dimension_numbers = #tpu.dot_dimension_numbers<[1], [0], [0], [1], [0, 0, 1, 1], [], []>} : vector<20x128xbf16>, vector<128x320xbf16>, vector<20x320xf32> -> vector<20x320xf32>
    %59 = arith.addf %54, %58 : vector<20x320xf32>
    %c4_61 = arith.constant 4 : index
    %c0_62 = arith.constant 0 : index
    %60 = vector.load %arg12[%c4_61, %c0_62] : memref<64x128xbf16, #tpu.memory_space<vmem>>, vector<20x128xbf16>
    %c4_63 = arith.constant 4 : index
    %c0_64 = arith.constant 0 : index
    %c0_65 = arith.constant 0 : index
    %61 = vector.load %arg3[%c4_63, %c0_64, %c0_65] : memref<5x128x320xbf16, #tpu.memory_space<vmem>>, vector<1x128x320xbf16>
    %62 = vector.shape_cast %61 : vector<1x128x320xbf16> to vector<128x320xbf16>
    %cst_66 = arith.constant dense<0.000000e+00> : vector<20x320xf32>
    %63 = tpu.matmul %60, %62, %cst_66 {dimension_numbers = #tpu.dot_dimension_numbers<[1], [0], [0], [1], [0, 0, 1, 1], [], []>} : vector<20x128xbf16>, vector<128x320xbf16>, vector<20x320xf32> -> vector<20x320xf32>
    %64 = arith.addf %59, %63 : vector<20x320xf32>
    %65 = vector.broadcast %1 : vector<1x320xf32> to vector<20x320xf32>
    %66 = arith.addf %64, %65 : vector<20x320xf32>
    %cst_67 = arith.constant 0.000000e+00 : f32
    %67 = vector.broadcast %cst_67 : f32 to vector<20x320xf32>
    %68 = arith.maximumf %66, %67 : vector<20x320xf32>
    %69 = arith.truncf %68 : vector<20x320xf32> to vector<20x320xbf16>
    %c0_68 = arith.constant 0 : index
    %c0_69 = arith.constant 0 : index
    %70 = vector.load %arg13[%c0_68, %c0_69] : memref<64x320xbf16, #tpu.memory_space<vmem>>, vector<20x320xbf16>
    tpu.vector_store %arg13[%c0_68, %c0_69], %69 {strides = array<i32>} : memref<64x320xbf16, #tpu.memory_space<vmem>>, vector<20x320xbf16>,
    %c0_70 = arith.constant 0 : index
    %c0_71 = arith.constant 0 : index
    %71 = vector.load %arg13[%c0_70, %c0_71] : memref<64x320xbf16, #tpu.memory_space<vmem>>, vector<20x320xbf16>
    %c0_72 = arith.constant 0 : index
    %c0_73 = arith.constant 0 : index
    %c0_74 = arith.constant 0 : index
    %72 = vector.load %arg5[%c0_72, %c0_73, %c0_74] : memref<2x10x20xbf16, #tpu.memory_space<vmem>>, vector<1x10x20xbf16>
    %73 = vector.shape_cast %72 : vector<1x10x20xbf16> to vector<10x20xbf16>
    %cst_75 = arith.constant dense<0.000000e+00> : vector<10x320xf32>
    %74 = tpu.matmul %73, %71, %cst_75 {dimension_numbers = #tpu.dot_dimension_numbers<[1], [0], [0], [1], [0, 0, 1, 1], [], []>} : vector<10x20xbf16>, vector<20x320xbf16>, vector<10x320xf32> -> vector<10x320xf32>
    %c1_76 = arith.constant 1 : index
    %c0_77 = arith.constant 0 : index
    %c0_78 = arith.constant 0 : index
    %75 = vector.load %arg5[%c1_76, %c0_77, %c0_78] : memref<2x10x20xbf16, #tpu.memory_space<vmem>>, vector<1x10x20xbf16>
    %76 = vector.shape_cast %75 : vector<1x10x20xbf16> to vector<10x20xbf16>
    %cst_79 = arith.constant dense<0.000000e+00> : vector<10x320xf32>
    %77 = tpu.matmul %76, %71, %cst_79 {dimension_numbers = #tpu.dot_dimension_numbers<[1], [0], [0], [1], [0, 0, 1, 1], [], []>} : vector<10x20xbf16>, vector<20x320xbf16>, vector<10x320xf32> -> vector<10x320xf32>
    %c0_80 = arith.constant 0 : index
    %c0_81 = arith.constant 0 : index
    %c0_82 = arith.constant 0 : index
    %78 = vector.load %arg4[%c0_80, %c0_81, %c0_82] : memref<2x320x160xbf16, #tpu.memory_space<vmem>>, vector<1x320x160xbf16>
    %79 = vector.shape_cast %78 : vector<1x320x160xbf16> to vector<320x160xbf16>
    %80 = arith.truncf %74 : vector<10x320xf32> to vector<10x320xbf16>
    %cst_83 = arith.constant dense<0.000000e+00> : vector<10x160xf32>
    %81 = tpu.matmul %80, %79, %cst_83 {dimension_numbers = #tpu.dot_dimension_numbers<[1], [0], [0], [1], [0, 0, 1, 1], [], []>} : vector<10x320xbf16>, vector<320x160xbf16>, vector<10x160xf32> -> vector<10x160xf32>
    %c1_84 = arith.constant 1 : index
    %c0_85 = arith.constant 0 : index
    %c0_86 = arith.constant 0 : index
    %82 = vector.load %arg4[%c1_84, %c0_85, %c0_86] : memref<2x320x160xbf16, #tpu.memory_space<vmem>>, vector<1x320x160xbf16>
    %83 = vector.shape_cast %82 : vector<1x320x160xbf16> to vector<320x160xbf16>
    %84 = arith.truncf %77 : vector<10x320xf32> to vector<10x320xbf16>
    %cst_87 = arith.constant dense<0.000000e+00> : vector<10x160xf32>
    %85 = tpu.matmul %84, %83, %cst_87 {dimension_numbers = #tpu.dot_dimension_numbers<[1], [0], [0], [1], [0, 0, 1, 1], [], []>} : vector<10x320xbf16>, vector<320x160xbf16>, vector<10x160xf32> -> vector<10x160xf32>
    %86 = arith.addf %81, %85 : vector<10x160xf32>
    %87 = vector.broadcast %2 : vector<1x160xf32> to vector<10x160xf32>
    %88 = arith.addf %86, %87 : vector<10x160xf32>
    %89 = arith.truncf %88 : vector<10x160xf32> to vector<10x160xbf16>
    %c0_88 = arith.constant 0 : index
    %c0_89 = arith.constant 0 : index
    %90 = vector.load %arg14[%c0_88, %c0_89] : memref<32x160xbf16, #tpu.memory_space<vmem>>, vector<10x160xbf16>
    tpu.vector_store %arg14[%c0_88, %c0_89], %89 {strides = array<i32>} : memref<32x160xbf16, #tpu.memory_space<vmem>>, vector<10x160xbf16>,
    %cst_90 = arith.constant 0.000000e+00 : f32
    %91 = vector.broadcast %cst_90 : f32 to vector<8x512xf32>
    %c0_91 = arith.constant 0 : index
    %c0_92 = arith.constant 0 : index
    %92 = vector.load %arg14[%c0_91, %c0_92] : memref<32x160xbf16, #tpu.memory_space<vmem>>, vector<8x160xbf16>
    %c0_93 = arith.constant 0 : index
    %c0_94 = arith.constant 0 : index
    %c0_95 = arith.constant 0 : index
    %93 = vector.load %arg6[%c0_93, %c0_94, %c0_95] : memref<3x160x512xbf16, #tpu.memory_space<vmem>>, vector<1x160x512xbf16>
    %94 = vector.shape_cast %93 : vector<1x160x512xbf16> to vector<160x512xbf16>
    %cst_96 = arith.constant dense<0.000000e+00> : vector<8x512xf32>
    %95 = tpu.matmul %92, %94, %cst_96 {dimension_numbers = #tpu.dot_dimension_numbers<[1], [0], [0], [1], [0, 0, 1, 1], [], []>} : vector<8x160xbf16>, vector<160x512xbf16>, vector<8x512xf32> -> vector<8x512xf32>
    %96 = arith.addf %91, %95 : vector<8x512xf32>
    %c1_97 = arith.constant 1 : index
    %c0_98 = arith.constant 0 : index
    %97 = vector.load %arg14[%c1_97, %c0_98] : memref<32x160xbf16, #tpu.memory_space<vmem>>, vector<8x160xbf16>
    %c1_99 = arith.constant 1 : index
    %c0_100 = arith.constant 0 : index
    %c0_101 = arith.constant 0 : index
    %98 = vector.load %arg6[%c1_99, %c0_100, %c0_101] : memref<3x160x512xbf16, #tpu.memory_space<vmem>>, vector<1x160x512xbf16>
    %99 = vector.shape_cast %98 : vector<1x160x512xbf16> to vector<160x512xbf16>
    %cst_102 = arith.constant dense<0.000000e+00> : vector<8x512xf32>
    %100 = tpu.matmul %97, %99, %cst_102 {dimension_numbers = #tpu.dot_dimension_numbers<[1], [0], [0], [1], [0, 0, 1, 1], [], []>} : vector<8x160xbf16>, vector<160x512xbf16>, vector<8x512xf32> -> vector<8x512xf32>
    %101 = arith.addf %96, %100 : vector<8x512xf32>
    %c2_103 = arith.constant 2 : index
    %c0_104 = arith.constant 0 : index
    %102 = vector.load %arg14[%c2_103, %c0_104] : memref<32x160xbf16, #tpu.memory_space<vmem>>, vector<8x160xbf16>
    %c2_105 = arith.constant 2 : index
    %c0_106 = arith.constant 0 : index
    %c0_107 = arith.constant 0 : index
    %103 = vector.load %arg6[%c2_105, %c0_106, %c0_107] : memref<3x160x512xbf16, #tpu.memory_space<vmem>>, vector<1x160x512xbf16>
    %104 = vector.shape_cast %103 : vector<1x160x512xbf16> to vector<160x512xbf16>
    %cst_108 = arith.constant dense<0.000000e+00> : vector<8x512xf32>
    %105 = tpu.matmul %102, %104, %cst_108 {dimension_numbers = #tpu.dot_dimension_numbers<[1], [0], [0], [1], [0, 0, 1, 1], [], []>} : vector<8x160xbf16>, vector<160x512xbf16>, vector<8x512xf32> -> vector<8x512xf32>
    %106 = arith.addf %101, %105 : vector<8x512xf32>
    %107 = vector.broadcast %3 : vector<1x512xf32> to vector<8x512xf32>
    %108 = arith.addf %106, %107 : vector<8x512xf32>
    %cst_109 = arith.constant 0.000000e+00 : f32
    %109 = vector.broadcast %cst_109 : f32 to vector<8x512xf32>
    %110 = arith.maximumf %108, %109 : vector<8x512xf32>
    %111 = arith.truncf %110 : vector<8x512xf32> to vector<8x512xbf16>
    %c0_110 = arith.constant 0 : index
    %c0_111 = arith.constant 0 : index
    %112 = vector.load %arg15[%c0_110, %c0_111] : memref<32x512xbf16, #tpu.memory_space<vmem>>, vector<8x512xbf16>
    tpu.vector_store %arg15[%c0_110, %c0_111], %111 {strides = array<i32>} : memref<32x512xbf16, #tpu.memory_space<vmem>>, vector<8x512xbf16>,
    %cst_112 = arith.constant 0.000000e+00 : f32
    %113 = vector.broadcast %cst_112 : f32 to vector<24x128xf32>
    %c28 = arith.constant 28 : index
    %c0_113 = arith.constant 0 : index
    %114 = vector.load %arg1[%c28, %c0_113] : memref<56x28xbf16, #tpu.memory_space<vmem>>, vector<24x28xbf16>
    %c0_114 = arith.constant 0 : index
    %c0_115 = arith.constant 0 : index
    %c0_116 = arith.constant 0 : index
    %115 = vector.load %arg2[%c0_114, %c0_115, %c0_116] : memref<5x28x128xbf16, #tpu.memory_space<vmem>>, vector<1x28x128xbf16>
    %116 = vector.shape_cast %115 : vector<1x28x128xbf16> to vector<28x128xbf16>
    %cst_117 = arith.constant dense<0.000000e+00> : vector<24x128xf32>
    %117 = tpu.matmul %114, %116, %cst_117 {dimension_numbers = #tpu.dot_dimension_numbers<[1], [0], [0], [1], [0, 0, 1, 1], [], []>} : vector<24x28xbf16>, vector<28x128xbf16>, vector<24x128xf32> -> vector<24x128xf32>
    %118 = arith.addf %113, %117 : vector<24x128xf32>
    %c29 = arith.constant 29 : index
    %c0_118 = arith.constant 0 : index
    %119 = vector.load %arg1[%c29, %c0_118] : memref<56x28xbf16, #tpu.memory_space<vmem>>, vector<24x28xbf16>
    %c1_119 = arith.constant 1 : index
    %c0_120 = arith.constant 0 : index
    %c0_121 = arith.constant 0 : index
    %120 = vector.load %arg2[%c1_119, %c0_120, %c0_121] : memref<5x28x128xbf16, #tpu.memory_space<vmem>>, vector<1x28x128xbf16>
    %121 = vector.shape_cast %120 : vector<1x28x128xbf16> to vector<28x128xbf16>
    %cst_122 = arith.constant dense<0.000000e+00> : vector<24x128xf32>
    %122 = tpu.matmul %119, %121, %cst_122 {dimension_numbers = #tpu.dot_dimension_numbers<[1], [0], [0], [1], [0, 0, 1, 1], [], []>} : vector<24x28xbf16>, vector<28x128xbf16>, vector<24x128xf32> -> vector<24x128xf32>
    %123 = arith.addf %118, %122 : vector<24x128xf32>
    %c30 = arith.constant 30 : index
    %c0_123 = arith.constant 0 : index
    %124 = vector.load %arg1[%c30, %c0_123] : memref<56x28xbf16, #tpu.memory_space<vmem>>, vector<24x28xbf16>
    %c2_124 = arith.constant 2 : index
    %c0_125 = arith.constant 0 : index
    %c0_126 = arith.constant 0 : index
    %125 = vector.load %arg2[%c2_124, %c0_125, %c0_126] : memref<5x28x128xbf16, #tpu.memory_space<vmem>>, vector<1x28x128xbf16>
    %126 = vector.shape_cast %125 : vector<1x28x128xbf16> to vector<28x128xbf16>
    %cst_127 = arith.constant dense<0.000000e+00> : vector<24x128xf32>
    %127 = tpu.matmul %124, %126, %cst_127 {dimension_numbers = #tpu.dot_dimension_numbers<[1], [0], [0], [1], [0, 0, 1, 1], [], []>} : vector<24x28xbf16>, vector<28x128xbf16>, vector<24x128xf32> -> vector<24x128xf32>
    %128 = arith.addf %123, %127 : vector<24x128xf32>
    %c31 = arith.constant 31 : index
    %c0_128 = arith.constant 0 : index
    %129 = vector.load %arg1[%c31, %c0_128] : memref<56x28xbf16, #tpu.memory_space<vmem>>, vector<24x28xbf16>
    %c3_129 = arith.constant 3 : index
    %c0_130 = arith.constant 0 : index
    %c0_131 = arith.constant 0 : index
    %130 = vector.load %arg2[%c3_129, %c0_130, %c0_131] : memref<5x28x128xbf16, #tpu.memory_space<vmem>>, vector<1x28x128xbf16>
    %131 = vector.shape_cast %130 : vector<1x28x128xbf16> to vector<28x128xbf16>
    %cst_132 = arith.constant dense<0.000000e+00> : vector<24x128xf32>
    %132 = tpu.matmul %129, %131, %cst_132 {dimension_numbers = #tpu.dot_dimension_numbers<[1], [0], [0], [1], [0, 0, 1, 1], [], []>} : vector<24x28xbf16>, vector<28x128xbf16>, vector<24x128xf32> -> vector<24x128xf32>
    %133 = arith.addf %128, %132 : vector<24x128xf32>
    %c32 = arith.constant 32 : index
    %c0_133 = arith.constant 0 : index
    %134 = vector.load %arg1[%c32, %c0_133] : memref<56x28xbf16, #tpu.memory_space<vmem>>, vector<24x28xbf16>
    %c4_134 = arith.constant 4 : index
    %c0_135 = arith.constant 0 : index
    %c0_136 = arith.constant 0 : index
    %135 = vector.load %arg2[%c4_134, %c0_135, %c0_136] : memref<5x28x128xbf16, #tpu.memory_space<vmem>>, vector<1x28x128xbf16>
    %136 = vector.shape_cast %135 : vector<1x28x128xbf16> to vector<28x128xbf16>
    %cst_137 = arith.constant dense<0.000000e+00> : vector<24x128xf32>
    %137 = tpu.matmul %134, %136, %cst_137 {dimension_numbers = #tpu.dot_dimension_numbers<[1], [0], [0], [1], [0, 0, 1, 1], [], []>} : vector<24x28xbf16>, vector<28x128xbf16>, vector<24x128xf32> -> vector<24x128xf32>
    %138 = arith.addf %133, %137 : vector<24x128xf32>
    %139 = vector.broadcast %0 : vector<1x128xf32> to vector<24x128xf32>
    %140 = arith.addf %138, %139 : vector<24x128xf32>
    %cst_138 = arith.constant 0.000000e+00 : f32
    %141 = vector.broadcast %cst_138 : f32 to vector<24x128xf32>
    %142 = arith.maximumf %140, %141 : vector<24x128xf32>
    %143 = arith.truncf %142 : vector<24x128xf32> to vector<24x128xbf16>
    %c32_139 = arith.constant 32 : index
    %c0_140 = arith.constant 0 : index
    %144 = vector.load %arg12[%c32_139, %c0_140] : memref<64x128xbf16, #tpu.memory_space<vmem>>, vector<24x128xbf16>
    tpu.vector_store %arg12[%c32_139, %c0_140], %143 {strides = array<i32>} : memref<64x128xbf16, #tpu.memory_space<vmem>>, vector<24x128xbf16>,
    %cst_141 = arith.constant 0.000000e+00 : f32
    %145 = vector.broadcast %cst_141 : f32 to vector<20x320xf32>
    %c32_142 = arith.constant 32 : index
    %c0_143 = arith.constant 0 : index
    %146 = vector.load %arg12[%c32_142, %c0_143] : memref<64x128xbf16, #tpu.memory_space<vmem>>, vector<20x128xbf16>
    %c0_144 = arith.constant 0 : index
    %c0_145 = arith.constant 0 : index
    %c0_146 = arith.constant 0 : index
    %147 = vector.load %arg3[%c0_144, %c0_145, %c0_146] : memref<5x128x320xbf16, #tpu.memory_space<vmem>>, vector<1x128x320xbf16>
    %148 = vector.shape_cast %147 : vector<1x128x320xbf16> to vector<128x320xbf16>
    %cst_147 = arith.constant dense<0.000000e+00> : vector<20x320xf32>
    %149 = tpu.matmul %146, %148, %cst_147 {dimension_numbers = #tpu.dot_dimension_numbers<[1], [0], [0], [1], [0, 0, 1, 1], [], []>} : vector<20x128xbf16>, vector<128x320xbf16>, vector<20x320xf32> -> vector<20x320xf32>
    %150 = arith.addf %145, %149 : vector<20x320xf32>
    %c33 = arith.constant 33 : index
    %c0_148 = arith.constant 0 : index
    %151 = vector.load %arg12[%c33, %c0_148] : memref<64x128xbf16, #tpu.memory_space<vmem>>, vector<20x128xbf16>
    %c1_149 = arith.constant 1 : index
    %c0_150 = arith.constant 0 : index
    %c0_151 = arith.constant 0 : index
    %152 = vector.load %arg3[%c1_149, %c0_150, %c0_151] : memref<5x128x320xbf16, #tpu.memory_space<vmem>>, vector<1x128x320xbf16>
    %153 = vector.shape_cast %152 : vector<1x128x320xbf16> to vector<128x320xbf16>
    %cst_152 = arith.constant dense<0.000000e+00> : vector<20x320xf32>
    %154 = tpu.matmul %151, %153, %cst_152 {dimension_numbers = #tpu.dot_dimension_numbers<[1], [0], [0], [1], [0, 0, 1, 1], [], []>} : vector<20x128xbf16>, vector<128x320xbf16>, vector<20x320xf32> -> vector<20x320xf32>
    %155 = arith.addf %150, %154 : vector<20x320xf32>
    %c34 = arith.constant 34 : index
    %c0_153 = arith.constant 0 : index
    %156 = vector.load %arg12[%c34, %c0_153] : memref<64x128xbf16, #tpu.memory_space<vmem>>, vector<20x128xbf16>
    %c2_154 = arith.constant 2 : index
    %c0_155 = arith.constant 0 : index
    %c0_156 = arith.constant 0 : index
    %157 = vector.load %arg3[%c2_154, %c0_155, %c0_156] : memref<5x128x320xbf16, #tpu.memory_space<vmem>>, vector<1x128x320xbf16>
    %158 = vector.shape_cast %157 : vector<1x128x320xbf16> to vector<128x320xbf16>
    %cst_157 = arith.constant dense<0.000000e+00> : vector<20x320xf32>
    %159 = tpu.matmul %156, %158, %cst_157 {dimension_numbers = #tpu.dot_dimension_numbers<[1], [0], [0], [1], [0, 0, 1, 1], [], []>} : vector<20x128xbf16>, vector<128x320xbf16>, vector<20x320xf32> -> vector<20x320xf32>
    %160 = arith.addf %155, %159 : vector<20x320xf32>
    %c35 = arith.constant 35 : index
    %c0_158 = arith.constant 0 : index
    %161 = vector.load %arg12[%c35, %c0_158] : memref<64x128xbf16, #tpu.memory_space<vmem>>, vector<20x128xbf16>
    %c3_159 = arith.constant 3 : index
    %c0_160 = arith.constant 0 : index
    %c0_161 = arith.constant 0 : index
    %162 = vector.load %arg3[%c3_159, %c0_160, %c0_161] : memref<5x128x320xbf16, #tpu.memory_space<vmem>>, vector<1x128x320xbf16>
    %163 = vector.shape_cast %162 : vector<1x128x320xbf16> to vector<128x320xbf16>
    %cst_162 = arith.constant dense<0.000000e+00> : vector<20x320xf32>
    %164 = tpu.matmul %161, %163, %cst_162 {dimension_numbers = #tpu.dot_dimension_numbers<[1], [0], [0], [1], [0, 0, 1, 1], [], []>} : vector<20x128xbf16>, vector<128x320xbf16>, vector<20x320xf32> -> vector<20x320xf32>
    %165 = arith.addf %160, %164 : vector<20x320xf32>
    %c36 = arith.constant 36 : index
    %c0_163 = arith.constant 0 : index
    %166 = vector.load %arg12[%c36, %c0_163] : memref<64x128xbf16, #tpu.memory_space<vmem>>, vector<20x128xbf16>
    %c4_164 = arith.constant 4 : index
    %c0_165 = arith.constant 0 : index
    %c0_166 = arith.constant 0 : index
    %167 = vector.load %arg3[%c4_164, %c0_165, %c0_166] : memref<5x128x320xbf16, #tpu.memory_space<vmem>>, vector<1x128x320xbf16>
    %168 = vector.shape_cast %167 : vector<1x128x320xbf16> to vector<128x320xbf16>
    %cst_167 = arith.constant dense<0.000000e+00> : vector<20x320xf32>
    %169 = tpu.matmul %166, %168, %cst_167 {dimension_numbers = #tpu.dot_dimension_numbers<[1], [0], [0], [1], [0, 0, 1, 1], [], []>} : vector<20x128xbf16>, vector<128x320xbf16>, vector<20x320xf32> -> vector<20x320xf32>
    %170 = arith.addf %165, %169 : vector<20x320xf32>
    %171 = vector.broadcast %1 : vector<1x320xf32> to vector<20x320xf32>
    %172 = arith.addf %170, %171 : vector<20x320xf32>
    %cst_168 = arith.constant 0.000000e+00 : f32
    %173 = vector.broadcast %cst_168 : f32 to vector<20x320xf32>
    %174 = arith.maximumf %172, %173 : vector<20x320xf32>
    %175 = arith.truncf %174 : vector<20x320xf32> to vector<20x320xbf16>
    %c32_169 = arith.constant 32 : index
    %c0_170 = arith.constant 0 : index
    %176 = vector.load %arg13[%c32_169, %c0_170] : memref<64x320xbf16, #tpu.memory_space<vmem>>, vector<20x320xbf16>
    tpu.vector_store %arg13[%c32_169, %c0_170], %175 {strides = array<i32>} : memref<64x320xbf16, #tpu.memory_space<vmem>>, vector<20x320xbf16>,
    %c32_171 = arith.constant 32 : index
    %c0_172 = arith.constant 0 : index
    %177 = vector.load %arg13[%c32_171, %c0_172] : memref<64x320xbf16, #tpu.memory_space<vmem>>, vector<20x320xbf16>
    %c0_173 = arith.constant 0 : index
    %c0_174 = arith.constant 0 : index
    %c0_175 = arith.constant 0 : index
    %178 = vector.load %arg5[%c0_173, %c0_174, %c0_175] : memref<2x10x20xbf16, #tpu.memory_space<vmem>>, vector<1x10x20xbf16>
    %179 = vector.shape_cast %178 : vector<1x10x20xbf16> to vector<10x20xbf16>
    %cst_176 = arith.constant dense<0.000000e+00> : vector<10x320xf32>
    %180 = tpu.matmul %179, %177, %cst_176 {dimension_numbers = #tpu.dot_dimension_numbers<[1], [0], [0], [1], [0, 0, 1, 1], [], []>} : vector<10x20xbf16>, vector<20x320xbf16>, vector<10x320xf32> -> vector<10x320xf32>
    %c1_177 = arith.constant 1 : index
    %c0_178 = arith.constant 0 : index
    %c0_179 = arith.constant 0 : index
    %181 = vector.load %arg5[%c1_177, %c0_178, %c0_179] : memref<2x10x20xbf16, #tpu.memory_space<vmem>>, vector<1x10x20xbf16>
    %182 = vector.shape_cast %181 : vector<1x10x20xbf16> to vector<10x20xbf16>
    %cst_180 = arith.constant dense<0.000000e+00> : vector<10x320xf32>
    %183 = tpu.matmul %182, %177, %cst_180 {dimension_numbers = #tpu.dot_dimension_numbers<[1], [0], [0], [1], [0, 0, 1, 1], [], []>} : vector<10x20xbf16>, vector<20x320xbf16>, vector<10x320xf32> -> vector<10x320xf32>
    %c0_181 = arith.constant 0 : index
    %c0_182 = arith.constant 0 : index
    %c0_183 = arith.constant 0 : index
    %184 = vector.load %arg4[%c0_181, %c0_182, %c0_183] : memref<2x320x160xbf16, #tpu.memory_space<vmem>>, vector<1x320x160xbf16>
    %185 = vector.shape_cast %184 : vector<1x320x160xbf16> to vector<320x160xbf16>
    %186 = arith.truncf %180 : vector<10x320xf32> to vector<10x320xbf16>
    %cst_184 = arith.constant dense<0.000000e+00> : vector<10x160xf32>
    %187 = tpu.matmul %186, %185, %cst_184 {dimension_numbers = #tpu.dot_dimension_numbers<[1], [0], [0], [1], [0, 0, 1, 1], [], []>} : vector<10x320xbf16>, vector<320x160xbf16>, vector<10x160xf32> -> vector<10x160xf32>
    %c1_185 = arith.constant 1 : index
    %c0_186 = arith.constant 0 : index
    %c0_187 = arith.constant 0 : index
    %188 = vector.load %arg4[%c1_185, %c0_186, %c0_187] : memref<2x320x160xbf16, #tpu.memory_space<vmem>>, vector<1x320x160xbf16>
    %189 = vector.shape_cast %188 : vector<1x320x160xbf16> to vector<320x160xbf16>
    %190 = arith.truncf %183 : vector<10x320xf32> to vector<10x320xbf16>
    %cst_188 = arith.constant dense<0.000000e+00> : vector<10x160xf32>
    %191 = tpu.matmul %190, %189, %cst_188 {dimension_numbers = #tpu.dot_dimension_numbers<[1], [0], [0], [1], [0, 0, 1, 1], [], []>} : vector<10x320xbf16>, vector<320x160xbf16>, vector<10x160xf32> -> vector<10x160xf32>
    %192 = arith.addf %187, %191 : vector<10x160xf32>
    %193 = vector.broadcast %2 : vector<1x160xf32> to vector<10x160xf32>
    %194 = arith.addf %192, %193 : vector<10x160xf32>
    %195 = arith.truncf %194 : vector<10x160xf32> to vector<10x160xbf16>
    %c16 = arith.constant 16 : index
    %c0_189 = arith.constant 0 : index
    %196 = vector.load %arg14[%c16, %c0_189] : memref<32x160xbf16, #tpu.memory_space<vmem>>, vector<10x160xbf16>
    tpu.vector_store %arg14[%c16, %c0_189], %195 {strides = array<i32>} : memref<32x160xbf16, #tpu.memory_space<vmem>>, vector<10x160xbf16>,
    %cst_190 = arith.constant 0.000000e+00 : f32
    %197 = vector.broadcast %cst_190 : f32 to vector<8x512xf32>
    %c16_191 = arith.constant 16 : index
    %c0_192 = arith.constant 0 : index
    %198 = vector.load %arg14[%c16_191, %c0_192] : memref<32x160xbf16, #tpu.memory_space<vmem>>, vector<8x160xbf16>
    %c0_193 = arith.constant 0 : index
    %c0_194 = arith.constant 0 : index
    %c0_195 = arith.constant 0 : index
    %199 = vector.load %arg6[%c0_193, %c0_194, %c0_195] : memref<3x160x512xbf16, #tpu.memory_space<vmem>>, vector<1x160x512xbf16>
    %200 = vector.shape_cast %199 : vector<1x160x512xbf16> to vector<160x512xbf16>
    %cst_196 = arith.constant dense<0.000000e+00> : vector<8x512xf32>
    %201 = tpu.matmul %198, %200, %cst_196 {dimension_numbers = #tpu.dot_dimension_numbers<[1], [0], [0], [1], [0, 0, 1, 1], [], []>} : vector<8x160xbf16>, vector<160x512xbf16>, vector<8x512xf32> -> vector<8x512xf32>
    %202 = arith.addf %197, %201 : vector<8x512xf32>
    %c17 = arith.constant 17 : index
    %c0_197 = arith.constant 0 : index
    %203 = vector.load %arg14[%c17, %c0_197] : memref<32x160xbf16, #tpu.memory_space<vmem>>, vector<8x160xbf16>
    %c1_198 = arith.constant 1 : index
    %c0_199 = arith.constant 0 : index
    %c0_200 = arith.constant 0 : index
    %204 = vector.load %arg6[%c1_198, %c0_199, %c0_200] : memref<3x160x512xbf16, #tpu.memory_space<vmem>>, vector<1x160x512xbf16>
    %205 = vector.shape_cast %204 : vector<1x160x512xbf16> to vector<160x512xbf16>
    %cst_201 = arith.constant dense<0.000000e+00> : vector<8x512xf32>
    %206 = tpu.matmul %203, %205, %cst_201 {dimension_numbers = #tpu.dot_dimension_numbers<[1], [0], [0], [1], [0, 0, 1, 1], [], []>} : vector<8x160xbf16>, vector<160x512xbf16>, vector<8x512xf32> -> vector<8x512xf32>
    %207 = arith.addf %202, %206 : vector<8x512xf32>
    %c18 = arith.constant 18 : index
    %c0_202 = arith.constant 0 : index
    %208 = vector.load %arg14[%c18, %c0_202] : memref<32x160xbf16, #tpu.memory_space<vmem>>, vector<8x160xbf16>
    %c2_203 = arith.constant 2 : index
    %c0_204 = arith.constant 0 : index
    %c0_205 = arith.constant 0 : index
    %209 = vector.load %arg6[%c2_203, %c0_204, %c0_205] : memref<3x160x512xbf16, #tpu.memory_space<vmem>>, vector<1x160x512xbf16>
    %210 = vector.shape_cast %209 : vector<1x160x512xbf16> to vector<160x512xbf16>
    %cst_206 = arith.constant dense<0.000000e+00> : vector<8x512xf32>
    %211 = tpu.matmul %208, %210, %cst_206 {dimension_numbers = #tpu.dot_dimension_numbers<[1], [0], [0], [1], [0, 0, 1, 1], [], []>} : vector<8x160xbf16>, vector<160x512xbf16>, vector<8x512xf32> -> vector<8x512xf32>
    %212 = arith.addf %207, %211 : vector<8x512xf32>
    %213 = vector.broadcast %3 : vector<1x512xf32> to vector<8x512xf32>
    %214 = arith.addf %212, %213 : vector<8x512xf32>
    %cst_207 = arith.constant 0.000000e+00 : f32
    %215 = vector.broadcast %cst_207 : f32 to vector<8x512xf32>
    %216 = arith.maximumf %214, %215 : vector<8x512xf32>
    %217 = arith.truncf %216 : vector<8x512xf32> to vector<8x512xbf16>
    %c16_208 = arith.constant 16 : index
    %c0_209 = arith.constant 0 : index
    %218 = vector.load %arg15[%c16_208, %c0_209] : memref<32x512xbf16, #tpu.memory_space<vmem>>, vector<8x512xbf16>
    tpu.vector_store %arg15[%c16_208, %c0_209], %217 {strides = array<i32>} : memref<32x512xbf16, #tpu.memory_space<vmem>>, vector<8x512xbf16>,
    tpu.wait_dma2 semaphore(%arg17 : memref<!tpu.dma_semaphore, #tpu.memory_space<semaphore_mem>>) src(%arg7 : memref<8x512x512xbf16, #tpu.memory_space<any>>) dst(%arg16 : memref<8x512x512xbf16, #tpu.memory_space<vmem>>)
    %cst_210 = arith.constant 0.000000e+00 : f32
    %219 = vector.broadcast %cst_210 : f32 to vector<2x512xf32>
    %c0_211 = arith.constant 0 : index
    %c0_212 = arith.constant 0 : index
    %220 = vector.load %arg15[%c0_211, %c0_212] : memref<32x512xbf16, #tpu.memory_space<vmem>>, vector<1x512xbf16>
    %c16_213 = arith.constant 16 : index
    %c0_214 = arith.constant 0 : index
    %221 = vector.load %arg15[%c16_213, %c0_214] : memref<32x512xbf16, #tpu.memory_space<vmem>>, vector<1x512xbf16>
    %222 = tpu.concatenate %220, %221 in 0 : vector<1x512xbf16>, vector<1x512xbf16> -> vector<2x512xbf16>
    %c0_215 = arith.constant 0 : index
    %c0_216 = arith.constant 0 : index
    %c0_217 = arith.constant 0 : index
    %223 = vector.load %arg16[%c0_215, %c0_216, %c0_217] : memref<8x512x512xbf16, #tpu.memory_space<vmem>>, vector<1x512x512xbf16>
    %224 = vector.shape_cast %223 : vector<1x512x512xbf16> to vector<512x512xbf16>
    %cst_218 = arith.constant dense<0.000000e+00> : vector<2x512xf32>
    %225 = tpu.matmul %222, %224, %cst_218 {dimension_numbers = #tpu.dot_dimension_numbers<[1], [0], [0], [1], [0, 0, 1, 1], [], []>} : vector<2x512xbf16>, vector<512x512xbf16>, vector<2x512xf32> -> vector<2x512xf32>
    %226 = arith.addf %219, %225 : vector<2x512xf32>
    %c1_219 = arith.constant 1 : index
    %c0_220 = arith.constant 0 : index
    %227 = vector.load %arg15[%c1_219, %c0_220] : memref<32x512xbf16, #tpu.memory_space<vmem>>, vector<1x512xbf16>
    %c17_221 = arith.constant 17 : index
    %c0_222 = arith.constant 0 : index
    %228 = vector.load %arg15[%c17_221, %c0_222] : memref<32x512xbf16, #tpu.memory_space<vmem>>, vector<1x512xbf16>
    %229 = tpu.concatenate %227, %228 in 0 : vector<1x512xbf16>, vector<1x512xbf16> -> vector<2x512xbf16>
    %c1_223 = arith.constant 1 : index
    %c0_224 = arith.constant 0 : index
    %c0_225 = arith.constant 0 : index
    %230 = vector.load %arg16[%c1_223, %c0_224, %c0_225] : memref<8x512x512xbf16, #tpu.memory_space<vmem>>, vector<1x512x512xbf16>
    %231 = vector.shape_cast %230 : vector<1x512x512xbf16> to vector<512x512xbf16>
    %cst_226 = arith.constant dense<0.000000e+00> : vector<2x512xf32>
    %232 = tpu.matmul %229, %231, %cst_226 {dimension_numbers = #tpu.dot_dimension_numbers<[1], [0], [0], [1], [0, 0, 1, 1], [], []>} : vector<2x512xbf16>, vector<512x512xbf16>, vector<2x512xf32> -> vector<2x512xf32>
    %233 = arith.addf %226, %232 : vector<2x512xf32>
    %c2_227 = arith.constant 2 : index
    %c0_228 = arith.constant 0 : index
    %234 = vector.load %arg15[%c2_227, %c0_228] : memref<32x512xbf16, #tpu.memory_space<vmem>>, vector<1x512xbf16>
    %c18_229 = arith.constant 18 : index
    %c0_230 = arith.constant 0 : index
    %235 = vector.load %arg15[%c18_229, %c0_230] : memref<32x512xbf16, #tpu.memory_space<vmem>>, vector<1x512xbf16>
    %236 = tpu.concatenate %234, %235 in 0 : vector<1x512xbf16>, vector<1x512xbf16> -> vector<2x512xbf16>
    %c2_231 = arith.constant 2 : index
    %c0_232 = arith.constant 0 : index
    %c0_233 = arith.constant 0 : index
    %237 = vector.load %arg16[%c2_231, %c0_232, %c0_233] : memref<8x512x512xbf16, #tpu.memory_space<vmem>>, vector<1x512x512xbf16>
    %238 = vector.shape_cast %237 : vector<1x512x512xbf16> to vector<512x512xbf16>
    %cst_234 = arith.constant dense<0.000000e+00> : vector<2x512xf32>
    %239 = tpu.matmul %236, %238, %cst_234 {dimension_numbers = #tpu.dot_dimension_numbers<[1], [0], [0], [1], [0, 0, 1, 1], [], []>} : vector<2x512xbf16>, vector<512x512xbf16>, vector<2x512xf32> -> vector<2x512xf32>
    %240 = arith.addf %233, %239 : vector<2x512xf32>
    %c3_235 = arith.constant 3 : index
    %c0_236 = arith.constant 0 : index
    %241 = vector.load %arg15[%c3_235, %c0_236] : memref<32x512xbf16, #tpu.memory_space<vmem>>, vector<1x512xbf16>
    %c19 = arith.constant 19 : index
    %c0_237 = arith.constant 0 : index
    %242 = vector.load %arg15[%c19, %c0_237] : memref<32x512xbf16, #tpu.memory_space<vmem>>, vector<1x512xbf16>
    %243 = tpu.concatenate %241, %242 in 0 : vector<1x512xbf16>, vector<1x512xbf16> -> vector<2x512xbf16>
    %c3_238 = arith.constant 3 : index
    %c0_239 = arith.constant 0 : index
    %c0_240 = arith.constant 0 : index
    %244 = vector.load %arg16[%c3_238, %c0_239, %c0_240] : memref<8x512x512xbf16, #tpu.memory_space<vmem>>, vector<1x512x512xbf16>
    %245 = vector.shape_cast %244 : vector<1x512x512xbf16> to vector<512x512xbf16>
    %cst_241 = arith.constant dense<0.000000e+00> : vector<2x512xf32>
    %246 = tpu.matmul %243, %245, %cst_241 {dimension_numbers = #tpu.dot_dimension_numbers<[1], [0], [0], [1], [0, 0, 1, 1], [], []>} : vector<2x512xbf16>, vector<512x512xbf16>, vector<2x512xf32> -> vector<2x512xf32>
    %247 = arith.addf %240, %246 : vector<2x512xf32>
    %c4_242 = arith.constant 4 : index
    %c0_243 = arith.constant 0 : index
    %248 = vector.load %arg15[%c4_242, %c0_243] : memref<32x512xbf16, #tpu.memory_space<vmem>>, vector<1x512xbf16>
    %c20 = arith.constant 20 : index
    %c0_244 = arith.constant 0 : index
    %249 = vector.load %arg15[%c20, %c0_244] : memref<32x512xbf16, #tpu.memory_space<vmem>>, vector<1x512xbf16>
    %250 = tpu.concatenate %248, %249 in 0 : vector<1x512xbf16>, vector<1x512xbf16> -> vector<2x512xbf16>
    %c4_245 = arith.constant 4 : index
    %c0_246 = arith.constant 0 : index
    %c0_247 = arith.constant 0 : index
    %251 = vector.load %arg16[%c4_245, %c0_246, %c0_247] : memref<8x512x512xbf16, #tpu.memory_space<vmem>>, vector<1x512x512xbf16>
    %252 = vector.shape_cast %251 : vector<1x512x512xbf16> to vector<512x512xbf16>
    %cst_248 = arith.constant dense<0.000000e+00> : vector<2x512xf32>
    %253 = tpu.matmul %250, %252, %cst_248 {dimension_numbers = #tpu.dot_dimension_numbers<[1], [0], [0], [1], [0, 0, 1, 1], [], []>} : vector<2x512xbf16>, vector<512x512xbf16>, vector<2x512xf32> -> vector<2x512xf32>
    %254 = arith.addf %247, %253 : vector<2x512xf32>
    %c5 = arith.constant 5 : index
    %c0_249 = arith.constant 0 : index
    %255 = vector.load %arg15[%c5, %c0_249] : memref<32x512xbf16, #tpu.memory_space<vmem>>, vector<1x512xbf16>
    %c21 = arith.constant 21 : index
    %c0_250 = arith.constant 0 : index
    %256 = vector.load %arg15[%c21, %c0_250] : memref<32x512xbf16, #tpu.memory_space<vmem>>, vector<1x512xbf16>
    %257 = tpu.concatenate %255, %256 in 0 : vector<1x512xbf16>, vector<1x512xbf16> -> vector<2x512xbf16>
    %c5_251 = arith.constant 5 : index
    %c0_252 = arith.constant 0 : index
    %c0_253 = arith.constant 0 : index
    %258 = vector.load %arg16[%c5_251, %c0_252, %c0_253] : memref<8x512x512xbf16, #tpu.memory_space<vmem>>, vector<1x512x512xbf16>
    %259 = vector.shape_cast %258 : vector<1x512x512xbf16> to vector<512x512xbf16>
    %cst_254 = arith.constant dense<0.000000e+00> : vector<2x512xf32>
    %260 = tpu.matmul %257, %259, %cst_254 {dimension_numbers = #tpu.dot_dimension_numbers<[1], [0], [0], [1], [0, 0, 1, 1], [], []>} : vector<2x512xbf16>, vector<512x512xbf16>, vector<2x512xf32> -> vector<2x512xf32>
    %261 = arith.addf %254, %260 : vector<2x512xf32>
    %c6 = arith.constant 6 : index
    %c0_255 = arith.constant 0 : index
    %262 = vector.load %arg15[%c6, %c0_255] : memref<32x512xbf16, #tpu.memory_space<vmem>>, vector<1x512xbf16>
    %c22 = arith.constant 22 : index
    %c0_256 = arith.constant 0 : index
    %263 = vector.load %arg15[%c22, %c0_256] : memref<32x512xbf16, #tpu.memory_space<vmem>>, vector<1x512xbf16>
    %264 = tpu.concatenate %262, %263 in 0 : vector<1x512xbf16>, vector<1x512xbf16> -> vector<2x512xbf16>
    %c6_257 = arith.constant 6 : index
    %c0_258 = arith.constant 0 : index
    %c0_259 = arith.constant 0 : index
    %265 = vector.load %arg16[%c6_257, %c0_258, %c0_259] : memref<8x512x512xbf16, #tpu.memory_space<vmem>>, vector<1x512x512xbf16>
    %266 = vector.shape_cast %265 : vector<1x512x512xbf16> to vector<512x512xbf16>
    %cst_260 = arith.constant dense<0.000000e+00> : vector<2x512xf32>
    %267 = tpu.matmul %264, %266, %cst_260 {dimension_numbers = #tpu.dot_dimension_numbers<[1], [0], [0], [1], [0, 0, 1, 1], [], []>} : vector<2x512xbf16>, vector<512x512xbf16>, vector<2x512xf32> -> vector<2x512xf32>
    %268 = arith.addf %261, %267 : vector<2x512xf32>
    %c7 = arith.constant 7 : index
    %c0_261 = arith.constant 0 : index
    %269 = vector.load %arg15[%c7, %c0_261] : memref<32x512xbf16, #tpu.memory_space<vmem>>, vector<1x512xbf16>
    %c23 = arith.constant 23 : index
    %c0_262 = arith.constant 0 : index
    %270 = vector.load %arg15[%c23, %c0_262] : memref<32x512xbf16, #tpu.memory_space<vmem>>, vector<1x512xbf16>
    %271 = tpu.concatenate %269, %270 in 0 : vector<1x512xbf16>, vector<1x512xbf16> -> vector<2x512xbf16>
    %c7_263 = arith.constant 7 : index
    %c0_264 = arith.constant 0 : index
    %c0_265 = arith.constant 0 : index
    %272 = vector.load %arg16[%c7_263, %c0_264, %c0_265] : memref<8x512x512xbf16, #tpu.memory_space<vmem>>, vector<1x512x512xbf16>
    %273 = vector.shape_cast %272 : vector<1x512x512xbf16> to vector<512x512xbf16>
    %cst_266 = arith.constant dense<0.000000e+00> : vector<2x512xf32>
    %274 = tpu.matmul %271, %273, %cst_266 {dimension_numbers = #tpu.dot_dimension_numbers<[1], [0], [0], [1], [0, 0, 1, 1], [], []>} : vector<2x512xbf16>, vector<512x512xbf16>, vector<2x512xf32> -> vector<2x512xf32>
    %275 = arith.addf %268, %274 : vector<2x512xf32>
    %276 = vector.broadcast %4 : vector<1x512xf32> to vector<2x512xf32>
    %277 = arith.addf %275, %276 : vector<2x512xf32>
    %cst_267 = arith.constant 0.000000e+00 : f32
    %278 = vector.broadcast %cst_267 : f32 to vector<2x512xf32>
    %279 = arith.maximumf %277, %278 : vector<2x512xf32>
    %c0_268 = arith.constant 0 : index
    %c0_269 = arith.constant 0 : index
    %280 = vector.load %arg8[%c0_268, %c0_269] : memref<512x128xbf16, #tpu.memory_space<vmem>>, vector<512x128xbf16>
    %281 = arith.truncf %279 : vector<2x512xf32> to vector<2x512xbf16>
    %cst_270 = arith.constant dense<0.000000e+00> : vector<2x128xf32>
    %282 = tpu.matmul %281, %280, %cst_270 {dimension_numbers = #tpu.dot_dimension_numbers<[1], [0], [0], [1], [0, 0, 1, 1], [], []>} : vector<2x512xbf16>, vector<512x128xbf16>, vector<2x128xf32> -> vector<2x128xf32>
    %283 = vector.broadcast %5 : vector<1x128xf32> to vector<2x128xf32>
    %284 = arith.addf %282, %283 : vector<2x128xf32>
    %cst_271 = arith.constant 0.000000e+00 : f32
    %285 = vector.broadcast %cst_271 : f32 to vector<2x128xf32>
    %286 = arith.maximumf %284, %285 : vector<2x128xf32>
    %c0_272 = arith.constant 0 : index
    %c0_273 = arith.constant 0 : index
    %287 = vector.load %arg9[%c0_272, %c0_273] : memref<128x10xbf16, #tpu.memory_space<vmem>>, vector<128x10xbf16>
    %288 = arith.truncf %286 : vector<2x128xf32> to vector<2x128xbf16>
    %cst_274 = arith.constant dense<0.000000e+00> : vector<2x10xf32>
    %289 = tpu.matmul %288, %287, %cst_274 {dimension_numbers = #tpu.dot_dimension_numbers<[1], [0], [0], [1], [0, 0, 1, 1], [], []>} : vector<2x128xbf16>, vector<128x10xbf16>, vector<2x10xf32> -> vector<2x10xf32>
    %290 = vector.broadcast %6 : vector<1x10xf32> to vector<2x10xf32>
    %291 = arith.addf %289, %290 : vector<2x10xf32>
    %c0_275 = arith.constant 0 : index
    %c0_276 = arith.constant 0 : index
    %292 = vector.load %arg11[%c0_275, %c0_276] : memref<2x10xf32, #tpu.memory_space<vmem>>, vector<2x10xf32>
    tpu.vector_store %arg11[%c0_275, %c0_276], %291 {strides = array<i32>} : memref<2x10xf32, #tpu.memory_space<vmem>>, vector<2x10xf32>,
    return
  }
  func.func @transform_0(%arg0: i32) -> (i32, i32) {
    %c0_i32 = arith.constant 0 : i32
    %c0_i32_0 = arith.constant 0 : i32
    %c0_i32_1 = arith.constant 0 : i32
    return %c0_i32, %c0_i32_0 : i32, i32
  }
  func.func @transform_1(%arg0: i32) -> (i32, i32, i32) {
    %c0_i32 = arith.constant 0 : i32
    %c0_i32_0 = arith.constant 0 : i32
    %c0_i32_1 = arith.constant 0 : i32
    %c0_i32_2 = arith.constant 0 : i32
    return %c0_i32, %c0_i32_0, %c0_i32_1 : i32, i32, i32
  }
  func.func @transform_2(%arg0: i32) -> (i32, i32, i32) {
    %c0_i32 = arith.constant 0 : i32
    %c0_i32_0 = arith.constant 0 : i32
    %c0_i32_1 = arith.constant 0 : i32
    %c0_i32_2 = arith.constant 0 : i32
    return %c0_i32, %c0_i32_0, %c0_i32_1 : i32, i32, i32
  }
  func.func @transform_3(%arg0: i32) -> (i32, i32, i32) {
    %c0_i32 = arith.constant 0 : i32
    %c0_i32_0 = arith.constant 0 : i32
    %c0_i32_1 = arith.constant 0 : i32
    %c0_i32_2 = arith.constant 0 : i32
    return %c0_i32, %c0_i32_0, %c0_i32_1 : i32, i32, i32
  }
  func.func @transform_4(%arg0: i32) -> (i32, i32, i32) {
    %c0_i32 = arith.constant 0 : i32
    %c0_i32_0 = arith.constant 0 : i32
    %c0_i32_1 = arith.constant 0 : i32
    %c0_i32_2 = arith.constant 0 : i32
    return %c0_i32, %c0_i32_0, %c0_i32_1 : i32, i32, i32
  }
  func.func @transform_5(%arg0: i32) -> (i32, i32, i32) {
    %c0_i32 = arith.constant 0 : i32
    %c0_i32_0 = arith.constant 0 : i32
    %c0_i32_1 = arith.constant 0 : i32
    %c0_i32_2 = arith.constant 0 : i32
    return %c0_i32, %c0_i32_0, %c0_i32_1 : i32, i32, i32
  }
  func.func @transform_7(%arg0: i32) -> (i32, i32) {
    %c0_i32 = arith.constant 0 : i32
    %c0_i32_0 = arith.constant 0 : i32
    %c0_i32_1 = arith.constant 0 : i32
    return %c0_i32, %c0_i32_0 : i32, i32
  }
  func.func @transform_8(%arg0: i32) -> (i32, i32) {
    %c0_i32 = arith.constant 0 : i32
    %c0_i32_0 = arith.constant 0 : i32
    %c0_i32_1 = arith.constant 0 : i32
    return %c0_i32, %c0_i32_0 : i32, i32
  }
  func.func @transform_9(%arg0: i32) -> (i32, i32) {
    %c0_i32 = arith.constant 0 : i32
    %c0_i32_0 = arith.constant 0 : i32
    %c0_i32_1 = arith.constant 0 : i32
    return %c0_i32, %c0_i32_0 : i32, i32
  }
  func.func @transform_10(%arg0: i32) -> (i32, i32) {
    %c0_i32 = arith.constant 0 : i32
    %c0_i32_0 = arith.constant 0 : i32
    %c0_i32_1 = arith.constant 0 : i32
    return %c0_i32, %c0_i32_0 : i32, i32
  }
}

</mosaic_0001>

<bundles_post_ra>
// kernel: net_forward.1
= control target key start
LH: loop header
LB: loop body
LE: loop exit
PB: predicated region body
PF: predicated region fallthrough
CT: control target
= control target key end

     0   :  { %15 = vsyncpa [#allocation9], 0  ;;  %s16015_s0 = inlined_call_operand.vmem [shape: bf16[56,28], index: 0, kind: input, shape index: {}]   ;;  %s16016_s1 = inlined_call_operand.hbm [shape: bf16[5,28,128], index: 1, kind: input, shape index: {}]   ;;  %s16017_s2 = inlined_call_operand.vmem [shape: bf16[5,128,320], index: 2, kind: input, shape index: {}]   ;;  %s16018_s3 = inlined_call_operand.vmem [shape: bf16[2,320,160], index: 3, kind: input, shape index: {}]   ;;  %s16019_s4 = inlined_call_operand.vmem [shape: bf16[2,10,20], index: 4, kind: input, shape index: {}]   ;;  %s16020_s5 = inlined_call_operand.hbm [shape: bf16[3,160,512], index: 5, kind: input, shape index: {}]   ;;  %s16021_s6 = inlined_call_operand.hbm [shape: bf16[8,512,512], index: 6, kind: input, shape index: {}]   ;;  %s16022_s7 = inlined_call_operand.hbm [shape: bf16[512,128], index: 7, kind: input, shape index: {}]   ;;  %s16023_s8 = inlined_call_operand.vmem [shape: bf16[128,10], index: 8, kind: input, shape index: {}]   ;;  %s16024_s9 = inlined_call_operand.hbm [shape: f32[1,2048], index: 9, kind: input, shape index: {}]   ;;  %s16025_s10 = inlined_call_operand.hbm [shape: f32[2,10], index: 10, kind: output, shape index: {}]  }
   0x1   :  { %16 = vsyncpa [#allocation12], 0 }
   0x2   :  { %17 = vsyncpa [#allocation15], 0 }
   0x3   :  { %18 = vsyncpa [#allocation10], 0  ;;  %s13734_s13 = smov [#allocation11]   ;;  %s13614_s17 = scalar_lea.hbm %s16020_s5, 15360 }
   0x4   :  { %s44_s14 = sshll.u32 %s13734_s13, 4  ;;  %p13615_p0 = scmp.ne.s32.totalorder %s16020_s5, %s13614_s17  ;;  %s45_s14 = int_to_ptr.vmem [resolvable:$true] %s44_s14 }
   0x5   :  { %p13618_p1 = scmp.lt.u32.totalorder %s13614_s17, %s16020_s5 }
   0x7   :  { %p13620_p2 = pnand %p13618_p1, %p13615_p0 }
   0x9   :  { %13623 = shalt.err (!%p13620_p2)
}
   0xa   :  { %s13624_s22 = scalar_lea.vmem %s45_s14, 15360  ;;  %p13629_p4 = scmp.lt.s32.totalorder %s45_s14, %s45_s14 }
   0xb   :  { %p13625_p3 = scmp.ne.s32.totalorder %s45_s14, %s13624_s22  ;;  %p13630_p5 = scmp.lt.s32.totalorder %s13624_s22, %s13624_s22 }
   0xd   :  { %p13631_p6 = por %p13630_p5, %p13629_p4 }
   0xf   :  { %p13632_p7 = pnand %p13631_p6, %p13625_p3 }
  0x11   :  { %13635 = shalt.err (!%p13632_p7)
}
  0x12   :  { %s13735_s23 = smov 256   ;;  %s13736_s24 = smov 16  }
  0x13   :  { %50 = dma.hbm_to_vmem [thread:$0]  %s16020_s5, 15360, %s45_s14, [#allocation12], %s13735_s23, %s13735_s23, %s13736_s24  }
  0x14   :  { %s13737_s27 = smov [#allocation8]   ;;  %s13636_s11 = scalar_lea.hbm %s16016_s1, 1280 }
  0x15   :  { %s26_s28 = sshll.u32 %s13737_s27, 4  ;;  %p13637_p8 = scmp.ne.s32.totalorder %s16016_s1, %s13636_s11  ;;  %s27_s28 = int_to_ptr.vmem [resolvable:$true] %s26_s28 }
  0x16   :  { %p13640_p9 = scmp.lt.u32.totalorder %s13636_s11, %s16016_s1 }
  0x18   :  { %p13642_p10 = pnand %p13640_p9, %p13637_p8 }
  0x1a   :  { %13645 = shalt.err (!%p13642_p10)
}
  0x1b   :  { %s13646_s17 = scalar_lea.vmem %s27_s28, 1280  ;;  %p13651_p12 = scmp.lt.s32.totalorder %s27_s28, %s27_s28 }
  0x1c   :  { %p13647_p11 = scmp.ne.s32.totalorder %s27_s28, %s13646_s17  ;;  %p13652_p13 = scmp.lt.s32.totalorder %s13646_s17, %s13646_s17 }
  0x1e   :  { %p13653_p0 = por %p13652_p13, %p13651_p12 }
  0x20   :  { %p13654_p1 = pnand %p13653_p0, %p13647_p11 }
  0x22   :  { %13657 = shalt.err (!%p13654_p1)
}
  0x23   :  { %s13738_s5 = smov 64   ;;  %s13739_s14 = smov 4  }
  0x24   :  { %32 = dma.hbm_to_vmem [thread:$0]  %s16016_s1, 1280, %s27_s28, [#allocation9], %s13738_s5, %s13738_s5, %s13739_s14  }
  0x25   :  { %s13740_s20 = smov [#allocation13]   ;;  %s13741_s22 = smov [#allocation14]  }
  0x26   :  { %s56_s21 = sshll.u32 %s13740_s20, 4  ;;  %s71_s24 = sshll.u32 %s13741_s22, 4  ;;  %s57_s21 = int_to_ptr.vmem [resolvable:$true] %s56_s21  ;;  %s72_s24 = int_to_ptr.vmem [resolvable:$true] %s71_s24 }
  0x27   :  { %s13658_s27 = scalar_lea.hbm %s16022_s7, 4096 }
  0x28   :  { %p13659_p2 = scmp.ne.s32.totalorder %s16022_s7, %s13658_s27  ;;  %p13662_p3 = scmp.lt.u32.totalorder %s13658_s27, %s16022_s7 }
  0x2a   :  { %p13664_p4 = pnand %p13662_p3, %p13659_p2 }
  0x2c   :  { %13667 = shalt.err (!%p13664_p4)
}
  0x2d   :  { %s13668_s1 = scalar_lea.vmem %s57_s21, 4096  ;;  %p13673_p6 = scmp.lt.s32.totalorder %s57_s21, %s57_s21 }
  0x2e   :  { %p13669_p5 = scmp.ne.s32.totalorder %s57_s21, %s13668_s1  ;;  %p13674_p7 = scmp.lt.s32.totalorder %s13668_s1, %s13668_s1 }
  0x30   :  { %p13675_p8 = por %p13674_p7, %p13673_p6 }
  0x32   :  { %p13676_p9 = pnand %p13675_p8, %p13669_p5 }
  0x34   :  { %13679 = shalt.err (!%p13676_p9)
}
  0x35   :  { %62 = dma.hbm_to_vmem [thread:$0]  %s16022_s7, 4096, %s57_s21, [#allocation12], %s13738_s5, %s13738_s5, %s13739_s14  }
  0x36   :  { %s13680_s17 = scalar_lea.hbm %s16024_s9, 256 }
  0x37   :  { %p13681_p10 = scmp.ne.s32.totalorder %s16024_s9, %s13680_s17  ;;  %p13684_p11 = scmp.lt.u32.totalorder %s13680_s17, %s16024_s9 }
  0x39   :  { %p13686_p12 = pnand %p13684_p11, %p13681_p10 }
  0x3b   :  { %13689 = shalt.err (!%p13686_p12)
}
  0x3c   :  { %s13690_s25 = scalar_lea.vmem %s72_s24, 256  ;;  %p13695_p0 = scmp.lt.s32.totalorder %s72_s24, %s72_s24 }
  0x3d   :  { %p13691_p13 = scmp.ne.s32.totalorder %s72_s24, %s13690_s25  ;;  %p13696_p1 = scmp.lt.s32.totalorder %s13690_s25, %s13690_s25 }
  0x3f   :  { %p13697_p2 = por %p13696_p1, %p13695_p0 }
  0x41   :  { %p13698_p3 = pnand %p13697_p2, %p13691_p13 }
  0x43   :  { %13701 = shalt.err (!%p13698_p3)
}
  0x44   :  { %74 = dma.hbm_to_vmem [thread:$0]  %s16024_s9, 256, %s72_s24, [#allocation15]  }
  0x45   :  { %13724 = dma.done.wait [#allocation9], 1280  }
  0x46   :  { %13725 = vsyncadd [#allocation9], 4294966016 }
  0x47   :  { %13726 = dma.done.wait [#allocation12], 19456  }
  0x48   :  { %13727 = vsyncadd [#allocation12], 4294947840 }
  0x49   :  { %13728 = dma.done.wait [#allocation15], 256  }
  0x4a   :  { %13729 = vsyncadd [#allocation15], 4294967040  ;;  %s92_s26 = sld [smem:[#allocation0]]   ;;  %s13742_s27 = smov 512   ;;  %vm187_vm0 = vcmask 1045504   ;;  %vm180_vm1 = vcmask 228352  }
  0x4b   :  { %104 = sst [smem:[#allocation18]] %s13742_s27  ;;  %s13743_s29 = smov [#allocation6]   ;;  %vm153_vm2 = vsmask.f32 7424  ;;  %vm316_vm3 = vcmask 1046528   ;;  %vm13750_vm5 = vmmov 0  }
  0x4c   :  { %106 = sst [smem:[#allocation18 + $0x1]] %s13742_s27  ;;  %s100_s30 = sshll.u32 %s13743_s29, 4  ;;  %vm400_vm4 = vsmask.f32 6400  ;;  %vm2017_vm6 = vcmask 517120   ;;  %vm2013_vm7 = vcmask 523264   ;;  %s101_s30 = int_to_ptr.vmem [resolvable:$true] %s100_s30 }
  0x4d   :  { %108 = sst [smem:[#allocation18 + $0x2]] %s13739_s14  ;;  %s13744_s11 = smov 128   ;;  %vm2036_vm8 = vcmask 1041408   ;;  %vm2032_vm9 = vcmask 162816   ;;  %vm2908_vm10 = vcmask 258048   ;;  %vm3210_vm11 = vcmask 261120  }
  0x4e   :  { %110 = sst [smem:[#allocation18 + $0x3]] %s13738_s5  ;;  %s13745_s9 = smov 2   ;;  %vm3978_vm12 = vsmask.f32 5376  ;;  %vm4146_vm13 = vcmask 1044480  }
  0x4f   :  { %112 = sst [smem:[#allocation18 + $0x4]] %s13744_s11  ;;  %s13746_s1 = smov [#allocation7]   ;;  %vm4229_vm14 = vsmask.f32 4352 }
  0x50   :  { %114 = sst [smem:[#allocation18 + $0x5]] %s13745_s9  ;;  %s10884_s24 = sshll.u32 %s92_s26, 26 }
  0x51   :  { %116 = sst [smem:[#allocation18 + $0x6]] %s13735_s23  ;;  %s10885_s12 = sadd.s32 134217728, %s10884_s24 }
  0x52   :  { %118 = sst [smem:[#allocation18 + $0x7]] %s13738_s5  ;;  %s13747_s28 = smov [#allocation17]  }
  0x53   :  { %120 = sst [smem:[#allocation18 + $0x8]] %s13739_s14 }
  0x54   :  { %122 = dma.general %s16021_s6, 131072, %s101_s30, %s13746_s1, %s13747_s28, [#allocation18], %s10885_s12, 0  }
  0x55   :  { %v13871_v0 = vld [vmem:[#allocation14 + $0xa] sm:$0xf]  ;;  %v13873_v1 = vld [vmem:[#allocation14 + $0xe] ss:$0 sm:$0xff]  ;;  %v13875_v2 = vld [vmem:[#allocation14 + $0xf] ss:$0 sm:$0xff] }
  0x56   :  { %v12616_v3 = vld [vmem:[#allocation8 + $0x10] sm:$0xff]   ;;  %v12617_v4 = vld [vmem:[#allocation8] sm:$0xff]   ;;  %v12618_v5 = vld [vmem:[#allocation8 + $0x18] sm:$0x3f]  }
  0x57   :  { %12200 = vmatprep.subr.bf16.mxu0 %v12616_v3  ;;  %12208 = vmatprep.subr.bf16.mxu1 %v12617_v4  ;;  %v12619_v6 = vld [vmem:[#allocation8 + $0x8] sm:$0x3f]   ;;  %v189_v7 = vsel %vm187_vm0, %v12618_v5, 0  ;;  %v130_v8 = vld [vmem:[%s16015_s0] sm:$0xf]  ;;  %v12625_v15 = vld [vmem:[#allocation8 + $0x30] sm:$0xff]  }
  0x58   :  { %12201 = vmatpush3.bf16.msra.mxu0 %v12616_v3  ;;  %12209 = vmatpush3.bf16.msra.mxu1 %v12617_v4  ;;  %v131_v9 = vld [vmem:[%s16015_s0 + $0x4] sm:$0xf]  ;;  %v257_v11 = vsel %vm187_vm0, %v12619_v6, 0  ;;  %v132_v12 = vld [vmem:[%s16015_s0 + $0x8] sm:$0xf] }
  0x59   :  { %12588 = vmatprep.subr.msk.bf16.mxu0 %vm187_vm0, %v12618_v5  ;;  %v12624_v10 = vld [vmem:[#allocation8 + $0x20] sm:$0xff]   ;;  %12589 = vmatprep.subr.msk.bf16.mxu1 %vm187_vm0, %v12619_v6  ;;  %v137_v13 = vld [vmem:[%s16015_s0 + $0xc] sm:$0x1]  ;;  %v10886_v14 = vcombine.low %v130_v8, %v131_v9  ;;  %v10892_v21 = vcombine.low %v132_v12, %v132_v12  ;;  %v12627_v27 = vld [vmem:[#allocation8 + $0x38] sm:$0x3f]  }
  0x5a   :  { %v10887_v16 = vcombine.low %v132_v12, %v137_v13  ;;  %v391_v17 = vld [vmem:[%s16015_s0 + $0xc] sm:$0x3]  ;;  %v307_v29 = vld [vmem:[%s16015_s0] sm:$0xe]  ;;  %v436_v36 = vsel %vm187_vm0, %v12627_v27, 0 }
  0x5b   :  { %v155_v18 = vshrl.u32 %v10886_v14, 16  ;;  %v157_v19 = vshll.u32 %v10886_v14, 16  ;;  %v10902_v20 = vcombine.low %v132_v12, %v391_v17  ;;  %12212 = vmatprep.mubr.msk.bf16.mxu1 %vm180_vm1, %v10886_v14  ;;  %v12626_v25 = vld [vmem:[#allocation8 + $0x28] sm:$0x3f]   ;;  %v10897_v32 = vcombine.low %v307_v29, %v131_v9  ;;  %v489_v42 = vld [vmem:[%s16015_s0] sm:$0xc] }
  0x5c   :  { %12203 = vmatpush3.bf16.msra.mxu0 %v189_v7  ;;  %12211 = vmatpush3.bf16.msra.mxu1 %v257_v11  ;;  %v162_v22 = vshll.u32 %v10887_v16, 16  ;;  %v166_v23 = vshrl.u32 %v10887_v16, 16  ;;  %v318_v33 = vrot.slane %v10887_v16, 1  ;;  %v338_v43 = vsel %vm187_vm0, %v12626_v25, 0  ;;  %v12629_v44 = vld [vmem:[#allocation8 + $0x40] sm:$0xff]  }
  0x5d   :  { %12216 = vmatprep.subr.bf16.mxu0 %v12624_v10  ;;  %v159_v24 = vrot.slane %v157_v19, 1  ;;  %12224 = vmatprep.subr.bf16.mxu1 %v12625_v15  ;;  %v410_v30 = vshrl.u32 %v10902_v20, 16  ;;  %v413_v34 = vshll.u32 %v10902_v20, 16  ;;  %v317_v38 = vrot.slane %v10897_v32, 1  ;;  %v12630_v53 = vld [vmem:[#allocation8 + $0x48] sm:$0x3f]  }
  0x5e   :  { %v164_v26 = vrot.slane %v162_v22, 1  ;;  %v402_v39 = vshrl.u32 %v10897_v32, 16  ;;  %v405_v40 = vshll.u32 %v10897_v32, 16  ;;  %v10907_v45 = vcombine.low %v489_v42, %v131_v9  ;;  %v12634_v57 = vld [vmem:[%s16017_s2 + $0xc4] ss:$12 sps:$4 sm:$0xff]  }
  0x5f   :  { %v160_v28 = vor.u32 %v159_v24, %v155_v18  ;;  %12213 = vmatmul.mubr.msk.bf16.vlgmr.msra.gmra.mrb[0].mxu1 %vm180_vm1, %v10892_v21  ;;  %v412_v37 = vrot.slane %v410_v30, 1  ;;  %v415_v41 = vrot.slane %v413_v34, 2  ;;  %v500_v46 = vrot.slane %v10902_v20, 2  ;;  %v12632_v58 = vld [vmem:[%s16017_s2 + $0xc0] ss:$12 sps:$4 sm:$0xff]  }
  0x60   :  { %v168_v31 = vor.u32 %v166_v23, %v164_v26  ;;  %12225 = vmatpush3.bf16.msra.mxu1 %v12625_v15  ;;  %v319_v47 = vsel %vm316_vm3, %v317_v38, %v318_v33  ;;  %v404_v48 = vrot.slane %v402_v39, 1  ;;  %v407_v49 = vrot.slane %v405_v40, 2  ;;  %v12635_v59 = vld [vmem:[%s16017_s2 + $0xc8] ss:$12 sps:$4 sm:$0xff]   ;;  %v12636_v61 = vld [vmem:[%s16017_s2 + $0xd8] ss:$12 sps:$4 sm:$0xff]  }
  0x61   :  { %v165_v35 = vsel %vm153_vm2, %v160_v28, %v164_v26  ;;  %12591 = vmatprep.subr.msk.bf16.mxu1 %vm187_vm0, %v12627_v27  ;;  %v416_v50 = vor.u32 %v415_v41, %v412_v37  ;;  %v499_v51 = vrot.slane %v10907_v45, 2  ;;  %v520_v56 = vsel %vm187_vm0, %v12630_v53, 0  ;;  %v12638_v60 = vld [vmem:[%s16017_s2 + $0xdc] ss:$12 sps:$4 sm:$0xff]   ;;  %v12639_v62 = vld [vmem:[%s16017_s2 + $0xe0] ss:$12 sps:$4 sm:$0xff]  }
  0x62   :  { %12204 = vmatprep.mubr.msk.bf16.mxu0 %vm180_vm1, %v165_v35  ;;  %v408_v52 = vor.u32 %v407_v49, %v404_v48  ;;  %v12642_v63 = vld [vmem:[%s16017_s2 + $0xf4] ss:$12 sps:$4 sm:$0xff]   ;;  %v12640_v3 = vld [vmem:[%s16017_s2 + $0xf0] ss:$12 sps:$4 sm:$0xff]   ;;  %v12643_v4 = vld [vmem:[%s16017_s2 + $0xf8] ss:$12 sps:$4 sm:$0xff]  }
  0x63   :  { %12205 = vmatmul.mubr.msk.bf16.vlgmr.msra.gmra.mrb[0].mxu0 %vm180_vm1, %v168_v31  ;;  %v501_v55 = vsel %vm187_vm0, %v499_v51, %v500_v46  ;;  %v12646_v5 = vld [vmem:[%s16017_s2 + $0x10c] ss:$12 sps:$4 sm:$0xff]   ;;  %v12644_v6 = vld [vmem:[%s16017_s2 + $0x108] ss:$12 sps:$4 sm:$0xff]   ;;  %v12647_v7 = vld [vmem:[%s16017_s2 + $0x110] ss:$12 sps:$4 sm:$0xff]  }
  0x64   :  { %12217 = vmatpush3.bf16.msra.mxu0 %v12624_v10  ;;  %12227 = vmatpush3.bf16.msra.mxu1 %v436_v36  ;;  %v417_v54 = vsel %vm400_vm4, %v408_v52, %v416_v50  ;;  %v12650_v8 = vld [vmem:[%s16017_s2 + $0x124] ss:$12 sps:$4 sm:$0xff]   ;;  %v12648_v9 = vld [vmem:[%s16017_s2 + $0x120] ss:$12 sps:$4 sm:$0xff]   ;;  %v12651_v10 = vld [vmem:[%s16017_s2 + $0x128] ss:$12 sps:$4 sm:$0xff]  }
  0x65   :  { %12590 = vmatprep.subr.msk.bf16.mxu0 %vm187_vm0, %v12626_v25  ;;  %12220 = vmatprep.mubr.msk.bf16.mxu0 %vm180_vm1, %v319_v47  ;;  %v12654_v11 = vld [vmem:[%s16017_s2 + $0x13c] ss:$12 sps:$4 sm:$0xff]   ;;  %v12652_v12 = vld [vmem:[%s16017_s2 + $0x138] ss:$12 sps:$4 sm:$0xff]   ;;  %v12655_v13 = vld [vmem:[%s16017_s2 + $0x140] ss:$12 sps:$4 sm:$0xff]  }
  0x66   :  { %12228 = vmatprep.mubr.msk.bf16.mxu1 %vm180_vm1, %v417_v54  ;;  %802 = vmatprep.subr.bf16.mxu1 %v12634_v57  ;;  %v12658_v14 = vld [vmem:[%s16017_s2 + $0x154] ss:$12 sps:$4 sm:$0xff]   ;;  %v12656_v15 = vld [vmem:[%s16017_s2 + $0x150] ss:$12 sps:$4 sm:$0xff]   ;;  %v12659_v16 = vld [vmem:[%s16017_s2 + $0x158] ss:$12 sps:$4 sm:$0xff]  }
  0x67   :  { %12229 = vmatmul.mubr.msk.bf16.vlgmr.msra.gmra.mrb[4].mxu1 %vm180_vm1, %v416_v50  ;;  %v12662_v17 = vld [vmem:[%s16017_s2 + $0x16c] ss:$12 sps:$4 sm:$0xff]   ;;  %v12663_v18 = vld [vmem:[%s16017_s2 + $0x170] ss:$12 sps:$4 sm:$0xff]   ;;  %v12660_v19 = vld [vmem:[%s16017_s2 + $0x168] ss:$12 sps:$4 sm:$0xff]  }
  0x68   :  { %12219 = vmatpush3.bf16.msra.mxu0 %v338_v43  ;;  %803 = vmatpush1.bf16.msra.mxu1 %v12632_v58  ;;  %v12666_v20 = vld [vmem:[%s16017_s2 + $0x4] ss:$12 sps:$4 sm:$0xff]   ;;  %v13748_v21 = vmov 0   ;;  %v14001_v22 = vld [vmem:[%s16017_s2 + $0x8] ss:$12 sps:$4 sm:$0xff]  }
  0x69   :  { %12232 = vmatprep.subr.bf16.mxu0 %v12629_v44  ;;  %804 = vmatprep.subr.bf16.mxu1 %v12638_v60  ;;  %v10912_v48 = vld [vmem:[#allocation14] ss:$0 sm:$0xff] }
  0x6a   :  { %834 = vmatprep.mubr.bf16.mxu1 %v13748_v21 }
  0x6b   :  { %12221 = vmatmul.mubr.msk.bf16.vlgmr.msra.gmra.mrb[4].mxu0 %vm180_vm1, %v318_v33 }
  0x6c   :  { %12233 = vmatpush3.bf16.msra.mxu0 %v12629_v44  ;;  %12236 = vmatprep.mubr.msk.bf16.mxu0 %vm180_vm1, %v501_v55 }
  0x6d   :  { %12592 = vmatprep.subr.msk.bf16.mxu0 %vm187_vm0, %v12630_v53  ;;  %805 = vmatpush1.bf16.msra.mxu1 %v12636_v61 }
  0x6e   :  { %806 = vmatprep.subr.bf16.mxu1 %v12642_v63 }
  0x70   :  { %12235 = vmatpush3.bf16.msra.mxu0 %v520_v56 }
  0x71   :  { %12240 = vmatprep.subr.bf16.mxu0 %v12635_v59  ;;  %807 = vmatpush1.bf16.msra.mxu1 %v12640_v3 }
  0x72   :  { %808 = vmatprep.subr.bf16.mxu1 %v12646_v5 }
  0x73   :  { %12237 = vmatmul.mubr.msk.bf16.vlgmr.msra.gmra.mrb[8].mxu0 %vm180_vm1, %v500_v46 }
  0x74   :  { %12241 = vmatpush3.bf16.msra.mxu0 %v12635_v59 }
  0x75   :  { %12242 = vmatprep.subr.bf16.mxu0 %v12639_v62  ;;  %809 = vmatpush1.bf16.msra.mxu1 %v12644_v6 }
  0x76   :  { %810 = vmatprep.subr.bf16.mxu1 %v12650_v8  ;;  %v12664_v8 = vld [vmem:[%s16017_s2] ss:$12 sps:$4 sm:$0xff]  }
  0x78   :  { %12243 = vmatpush3.bf16.msra.mxu0 %v12639_v62 }
  0x79   :  { %12244 = vmatprep.subr.bf16.mxu0 %v12643_v4  ;;  %811 = vmatpush1.bf16.msra.mxu1 %v12648_v9 }
  0x7a   :  { %812 = vmatprep.subr.bf16.mxu1 %v12654_v11 }
  0x7c   :  { %12245 = vmatpush3.bf16.msra.mxu0 %v12643_v4 }
  0x7d   :  { %12246 = vmatprep.subr.bf16.mxu0 %v12647_v7  ;;  %813 = vmatpush1.bf16.msra.mxu1 %v12652_v12  ;;  %v12670_v12 = vld [vmem:[%s16017_s2 + $0x1c] ss:$12 sps:$4 sm:$0xff]  }
  0x7e   :  { %814 = vmatprep.subr.bf16.mxu1 %v12658_v14 }
  0x80   :  { %12247 = vmatpush3.bf16.msra.mxu0 %v12647_v7 }
  0x81   :  { %12248 = vmatprep.subr.bf16.mxu0 %v12651_v10  ;;  %815 = vmatpush1.bf16.msra.mxu1 %v12656_v15 }
  0x82   :  { %816 = vmatprep.subr.bf16.mxu1 %v12662_v17  ;;  %v12674_v17 = vld [vmem:[%s16017_s2 + $0x34] ss:$12 sps:$4 sm:$0xff]  }
  0x84   :  { %12249 = vmatpush3.bf16.msra.mxu0 %v12651_v10 }
  0x85   :  { %12250 = vmatprep.subr.bf16.mxu0 %v12655_v13  ;;  %817 = vmatpush1.bf16.msra.mxu1 %v12660_v19  ;;  %v12672_v19 = vld [vmem:[%s16017_s2 + $0x30] ss:$12 sps:$4 sm:$0xff]  }
  0x86   :  { %1029 = vmatprep.subr.bf16.mxu1 %v12666_v20  ;;  %v12678_v20 = vld [vmem:[%s16017_s2 + $0x4c] ss:$12 sps:$4 sm:$0xff]  }
  0x88   :  { %12251 = vmatpush3.bf16.msra.mxu0 %v12655_v13  ;;  %v12671_v13 = vld [vmem:[%s16017_s2 + $0x20] ss:$12 sps:$4 sm:$0xff]  }
  0x89   :  { %12252 = vmatprep.subr.bf16.mxu0 %v12659_v16 }
  0x8c   :  { %12253 = vmatpush3.bf16.msra.mxu0 %v12659_v16  ;;  %v12668_v16 = vld [vmem:[%s16017_s2 + $0x18] ss:$12 sps:$4 sm:$0xff]  }
  0x8d   :  { %12254 = vmatprep.subr.bf16.mxu0 %v12663_v18 }
  0x90   :  { %12255 = vmatpush3.bf16.msra.mxu0 %v12663_v18  ;;  %v12675_v18 = vld [vmem:[%s16017_s2 + $0x38] ss:$12 sps:$4 sm:$0xff]  }
  0x91   :  { %12260 = vmatprep.subr.bf16.mxu0 %v14001_v22 }
 0x132   :  { %v12214_v23 = vpop.f32.mrb[0].mxu1 }
 0x133   :  { %v293_v24 = vpop.f32.mrb[1].mxu1 }
 0x134   :  { %v12215_v25 = vpop.f32.mrb[2].mxu1 }
 0x135   :  { %v296_v26 = vpop.f32.mrb[3].mxu1  ;;  %v12683_v25 = vld [vmem:[%s16017_s2 + $0x68] ss:$12 sps:$4 sm:$0xff]  }
 0x136   :  { %v12206_v27 = vpop.f32.mrb[0].mxu0 }
 0x137   :  { %v302_v28 = vadd.f32 %v12214_v23, %v12206_v27  ;;  %v225_v29 = vpop.f32.mrb[1].mxu0  ;;  %v12679_v23 = vld [vmem:[%s16017_s2 + $0x50] ss:$12 sps:$4 sm:$0xff]  }
 0x138   :  { %v294_v30 = vadd.f32 %v293_v24, %v225_v29  ;;  %v12207_v31 = vpop.f32.mrb[2].mxu0  ;;  %v12682_v24 = vld [vmem:[%s16017_s2 + $0x64] ss:$12 sps:$4 sm:$0xff]   ;;  %v12686_v27 = vld [vmem:[%s16017_s2 + $0x7c] ss:$12 sps:$4 sm:$0xff]  }
 0x139   :  { %v228_v32 = vpop.f32.mrb[3].mxu0  ;;  %v12684_v29 = vld [vmem:[%s16017_s2 + $0x78] ss:$12 sps:$4 sm:$0xff]  }
 0x13a   :  { %v297_v33 = vadd.f32 %v296_v26, %v228_v32  ;;  %v12230_v34 = vpop.f32.mrb[4].mxu1  ;;  %v12680_v26 = vld [vmem:[%s16017_s2 + $0x60] ss:$12 sps:$4 sm:$0xff]   ;;  %v12691_v31 = vld [vmem:[%s16017_s2 + $0x98] ss:$12 sps:$4 sm:$0xff]  }
 0x13b   :  { %v472_v36 = vpop.f32.mrb[5].mxu1  ;;  %v12688_v32 = vld [vmem:[%s16017_s2 + $0x90] ss:$12 sps:$4 sm:$0xff]  }
 0x13c   :  { %v12231_v39 = vpop.f32.mrb[6].mxu1 }
 0x13d   :  { %v475_v42 = vpop.f32.mrb[7].mxu1  ;;  %v12696_v39 = vld [vmem:[%s16017_s2 + $0x180] ss:$12 sps:$4 sm:$0xff]  }
 0x13e   :  { %v12222_v35 = vpop.f32.mrb[4].mxu0 }
 0x13f   :  { %v390_v37 = vadd.f32 %v12222_v35, %v302_v28  ;;  %v374_v38 = vpop.f32.mrb[5].mxu0  ;;  %v12687_v28 = vld [vmem:[%s16017_s2 + $0x80] ss:$12 sps:$4 sm:$0xff]   ;;  %v12692_v35 = vld [vmem:[%s16017_s2 + $0xa8] ss:$12 sps:$4 sm:$0xff]  }
 0x140   :  { %v388_v40 = vadd.f32 %v374_v38, %v294_v30  ;;  %v12223_v41 = vpop.f32.mrb[6].mxu0  ;;  %v12690_v30 = vld [vmem:[%s16017_s2 + $0x94] ss:$12 sps:$4 sm:$0xff]  }
 0x141   :  { %v488_v43 = vadd.f32 %v12230_v34, %v390_v37  ;;  %v377_v44 = vpop.f32.mrb[7].mxu0  ;;  %v12695_v34 = vld [vmem:[%s16017_s2 + $0xb0] ss:$12 sps:$4 sm:$0xff]   ;;  %v12699_v38 = vld [vmem:[%s16017_s2 + $0x188] ss:$12 sps:$4 sm:$0xff]  }
 0x142   :  { %v389_v45 = vadd.f32 %v377_v44, %v297_v33  ;;  %v486_v46 = vadd.f32 %v472_v36, %v388_v40  ;;  %v12694_v33 = vld [vmem:[%s16017_s2 + $0xac] ss:$12 sps:$4 sm:$0xff]   ;;  %v12698_v36 = vld [vmem:[%s16017_s2 + $0x184] ss:$12 sps:$4 sm:$0xff]   ;;  %v12702_v41 = vld [vmem:[%s16017_s2 + $0x19c] ss:$12 sps:$4 sm:$0xff]  }
 0x144   :  { %v487_v47 = vadd.f32 %v475_v42, %v389_v45  ;;  %v12703_v42 = vld [vmem:[%s16017_s2 + $0x1a0] ss:$12 sps:$4 sm:$0xff]   ;;  %v12700_v45 = vld [vmem:[%s16017_s2 + $0x198] ss:$12 sps:$4 sm:$0xff]  }
 0x146   :  { %v12238_v49 = vpop.f32.mrb[8].mxu0 }
 0x147   :  { %v572_v50 = vadd.f32 %v12238_v49, %v488_v43  ;;  %v556_v51 = vpop.f32.mrb[9].mxu0  ;;  %v12704_v49 = vld [vmem:[%s16017_s2 + $0x1b0] ss:$12 sps:$4 sm:$0xff]  }
 0x148   :  { %v570_v52 = vadd.f32 %v556_v51, %v486_v46  ;;  %v12239_v53 = vpop.f32.mrb[10].mxu0  ;;  %v12706_v46 = vld [vmem:[%s16017_s2 + $0x1b4] ss:$12 sps:$4 sm:$0xff]   ;;  %v12711_v51 = vld [vmem:[%s16017_s2 + $0x1d0] ss:$12 sps:$4 sm:$0xff]  }
 0x149   :  { %v581_v54 = vadd.f32 %v10912_v48, %v572_v50  ;;  %v559_v55 = vpop.f32.mrb[11].mxu0  ;;  %v12710_v50 = vld [vmem:[%s16017_s2 + $0x1cc] ss:$12 sps:$4 sm:$0xff]   ;;  %v12714_v53 = vld [vmem:[%s16017_s2 + $0x1e4] ss:$12 sps:$4 sm:$0xff]  }
 0x14a   :  { %v579_v56 = vadd.f32 %v10912_v48, %v570_v52  ;;  %v571_v57 = vadd.f32 %v559_v55, %v487_v47  ;;  %v12708_v52 = vld [vmem:[%s16017_s2 + $0x1c8] ss:$12 sps:$4 sm:$0xff]   ;;  %v12712_v55 = vld [vmem:[%s16017_s2 + $0x1e0] ss:$12 sps:$4 sm:$0xff]  }
 0x14b   :  { %v584_v58 = vmax.f32 %v581_v54, 0.0  ;;  %v12715_v54 = vld [vmem:[%s16017_s2 + $0x1e8] ss:$12 sps:$4 sm:$0xff]  }
 0x14c   :  { %v580_v59 = vadd.f32 %v10912_v48, %v571_v57  ;;  %v582_v61 = vmax.f32 %v579_v56, 0.0  ;;  %v12707_v48 = vld [vmem:[%s16017_s2 + $0x1b8] ss:$12 sps:$4 sm:$0xff]   ;;  %v12718_v56 = vld [vmem:[%s16017_s2 + $0x1fc] ss:$12 sps:$4 sm:$0xff]  }
 0x14d   :  { %v586_v60 = vpack.c.bf16 %v584_v58, %v584_v58  ;;  %v12719_v57 = vld [vmem:[%s16017_s2 + $0x200] ss:$12 sps:$4 sm:$0xff]   ;;  %v12716_v58 = vld [vmem:[%s16017_s2 + $0x1f8] ss:$12 sps:$4 sm:$0xff]  }
 0x14e   :  { %v583_v62 = vmax.f32 %v580_v59, 0.0  ;;  %v12722_v59 = vld [vmem:[%s16017_s2 + $0x214] ss:$12 sps:$4 sm:$0xff]  }
 0x14f   :  { %588 = vst [vmem:[#allocation2 + $0x8] sm:$0xf] %v586_v60  ;;  %v12723_v60 = vld [vmem:[%s16017_s2 + $0x218] ss:$12 sps:$4 sm:$0xff]  }
 0x150   :  { %v14004_v63 = vpack.c.bf16 %v583_v62, %v582_v61  ;;  %v12720_v62 = vld [vmem:[%s16017_s2 + $0x210] ss:$12 sps:$4 sm:$0xff]  }
 0x152   :  { %587 = vst [vmem:[#allocation2] sm:$0xff] %v14004_v63  ;;  %v660_v3 = vshll.u32 %v14004_v63, 16  ;;  %v658_v6 = vshrl.u32 %v14004_v63, 16 }
 0x154   :  { %v662_v4 = vrot.slane %v660_v3, 1 }
 0x156   :  { %v14008_v5 = vld [vmem:[#allocation2 + $0x8] sm:$0x7]  ;;  %v663_v9 = vor.u32 %v662_v4, %v658_v6  ;;  %v12726_v4 = vld [vmem:[%s16017_s2 + $0x22c] ss:$12 sps:$4 sm:$0xff]  }
 0x157   :  { %v665_v7 = vshll.u32 %v14008_v5, 16  ;;  %v669_v11 = vshrl.u32 %v14008_v5, 16  ;;  %v590_v43 = vld [vmem:[#allocation2 + $0x8] sm:$0x3]  ;;  %v14103_v44 = vrot.slane %v14008_v5, 1 }
 0x158   :  { %v14158_v61 = vld [vmem:[#allocation2 + $0x8] sm:$0xf]  ;;  %v12727_v5 = vld [vmem:[%s16017_s2 + $0x230] ss:$12 sps:$4 sm:$0xff]  }
 0x159   :  { %v667_v10 = vrot.slane %v665_v7, 1  ;;  %v14087_v37 = vld [vmem:[#allocation2] sm:$0xfe]  ;;  %v1448_v6 = vshrl.u32 %v14158_v61, 16  ;;  %v1451_v7 = vshll.u32 %v14158_v61, 16 }
 0x15a   :  { %v1164_v40 = vrot.slane %v14087_v37, 1  ;;  %v1443_v3 = vshll.u32 %v14087_v37, 16 }
 0x15b   :  { %v668_v14 = vsel %vm153_vm2, %v663_v9, %v667_v10  ;;  %v671_v15 = vor.u32 %v669_v11, %v667_v10  ;;  %v12730_v11 = vld [vmem:[%s16017_s2 + $0x244] ss:$12 sps:$4 sm:$0xff]  }
 0x15c   :  { %835 = vmatmul.mubr.bf16.vlgmr.msra.gmra.mrb[8].mxu1 %v668_v14  ;;  %12256 = vmatprep.mubr.bf16.mxu0 %v668_v14  ;;  %v14114_v47 = vsel %vm316_vm3, %v1164_v40, %v14103_v44  ;;  %v1445_v10 = vrot.slane %v1443_v3, 2  ;;  %v1453_v14 = vrot.slane %v1451_v7, 2  ;;  %v12756_v40 = vld [vmem:[%s16017_s2 + $0x2e8] ss:$12 sps:$4 sm:$0xff]   ;;  %v12787_v3 = vld [vmem:[%s16017_s2 + $0x398] ss:$12 sps:$4 sm:$0xff]  }
 0x15d   :  { %1030 = vmatpush1.bf16.msra.mxu1 %v12664_v8  ;;  %12257 = vmatmul.mubr.bf16.vlgmr.msra.gmra.mrb[12].mxu0 %v671_v15  ;;  %v12724_v8 = vld [vmem:[%s16017_s2 + $0x228] ss:$12 sps:$4 sm:$0xff]  }
 0x15e   :  { %12261 = vmatpush3.bf16.msra.mxu0 %v14001_v22  ;;  %12276 = vmatprep.mubr.bf16.mxu0 %v14004_v63  ;;  %v12676_v22 = vld [vmem:[%s16017_s2 + $0x48] ss:$12 sps:$4 sm:$0xff]  }
 0x15f   :  { %1031 = vmatprep.subr.bf16.mxu1 %v12670_v12  ;;  %12262 = vmatprep.subr.bf16.mxu0 %v12671_v13  ;;  %v12731_v12 = vld [vmem:[%s16017_s2 + $0x248] ss:$12 sps:$4 sm:$0xff]  }
 0x160   :  { %844 = vmatprep.mubr.bf16.mxu1 %v13748_v21  ;;  %v12788_v7 = vld [vmem:[%s16017_s2 + $0x3a8] ss:$12 sps:$4 sm:$0xff]  }
 0x161   :  { %1032 = vmatpush1.bf16.msra.mxu1 %v12668_v16 }
 0x162   :  { %12263 = vmatpush3.bf16.msra.mxu0 %v12671_v13  ;;  %1033 = vmatprep.subr.bf16.mxu1 %v12674_v17  ;;  %v1450_v13 = vrot.slane %v1448_v6, 1  ;;  %v12791_v6 = vld [vmem:[%s16017_s2 + $0x3b0] ss:$12 sps:$4 sm:$0xff]  }
 0x163   :  { %12264 = vmatprep.subr.bf16.mxu0 %v12675_v18 }
 0x164   :  { %845 = vmatmul.mubr.bf16.gmra.mrb[12].mxu1 %v671_v15  ;;  %v12728_v15 = vld [vmem:[%s16017_s2 + $0x240] ss:$12 sps:$4 sm:$0xff]   ;;  %v14185_v17 = vor.u32 %v1453_v14, %v1450_v13 }
 0x165   :  { %1034 = vmatpush1.bf16.msra.mxu1 %v12672_v19  ;;  %1061 = vmatprep.mubr.bf16.mxu1 %v13748_v21  ;;  %v12735_v19 = vld [vmem:[%s16017_s2 + $0x260] ss:$12 sps:$4 sm:$0xff]  }
 0x166   :  { %12265 = vmatpush3.bf16.msra.mxu0 %v12675_v18  ;;  %1035 = vmatprep.subr.bf16.mxu1 %v12678_v20  ;;  %v12734_v18 = vld [vmem:[%s16017_s2 + $0x25c] ss:$12 sps:$4 sm:$0xff]  }
 0x167   :  { %12266 = vmatprep.subr.bf16.mxu0 %v12679_v23 }
 0x169   :  { %1036 = vmatpush1.bf16.msra.mxu1 %v12676_v22  ;;  %v12738_v22 = vld [vmem:[%s16017_s2 + $0x274] ss:$12 sps:$4 sm:$0xff]  }
 0x16a   :  { %12267 = vmatpush3.bf16.msra.mxu0 %v12679_v23  ;;  %1037 = vmatprep.subr.bf16.mxu1 %v12682_v24  ;;  %v12732_v23 = vld [vmem:[%s16017_s2 + $0x258] ss:$12 sps:$4 sm:$0xff]  }
 0x16b   :  { %12268 = vmatprep.subr.bf16.mxu0 %v12683_v25  ;;  %v12739_v24 = vld [vmem:[%s16017_s2 + $0x278] ss:$12 sps:$4 sm:$0xff]  }
 0x16d   :  { %1038 = vmatpush1.bf16.msra.mxu1 %v12680_v26  ;;  %v12742_v26 = vld [vmem:[%s16017_s2 + $0x28c] ss:$12 sps:$4 sm:$0xff]  }
 0x16e   :  { %12269 = vmatpush3.bf16.msra.mxu0 %v12683_v25  ;;  %1039 = vmatprep.subr.bf16.mxu1 %v12686_v27  ;;  %v12736_v25 = vld [vmem:[%s16017_s2 + $0x270] ss:$12 sps:$4 sm:$0xff]  }
 0x16f   :  { %12270 = vmatprep.subr.bf16.mxu0 %v12687_v28  ;;  %v12743_v27 = vld [vmem:[%s16017_s2 + $0x290] ss:$12 sps:$4 sm:$0xff]  }
 0x171   :  { %1040 = vmatpush1.bf16.msra.mxu1 %v12684_v29  ;;  %v12746_v29 = vld [vmem:[%s16017_s2 + $0x2a4] ss:$12 sps:$4 sm:$0xff]  }
 0x172   :  { %12271 = vmatpush3.bf16.msra.mxu0 %v12687_v28  ;;  %1041 = vmatprep.subr.bf16.mxu1 %v12690_v30  ;;  %v12740_v28 = vld [vmem:[%s16017_s2 + $0x288] ss:$12 sps:$4 sm:$0xff]  }
 0x173   :  { %12272 = vmatprep.subr.bf16.mxu0 %v12691_v31  ;;  %v12747_v30 = vld [vmem:[%s16017_s2 + $0x2a8] ss:$12 sps:$4 sm:$0xff]  }
 0x175   :  { %1042 = vmatpush1.bf16.msra.mxu1 %v12688_v32  ;;  %v12750_v32 = vld [vmem:[%s16017_s2 + $0x2bc] ss:$12 sps:$4 sm:$0xff]  }
 0x176   :  { %12273 = vmatpush3.bf16.msra.mxu0 %v12691_v31  ;;  %1043 = vmatprep.subr.bf16.mxu1 %v12694_v33  ;;  %v12744_v31 = vld [vmem:[%s16017_s2 + $0x2a0] ss:$12 sps:$4 sm:$0xff]  }
 0x177   :  { %12274 = vmatprep.subr.bf16.mxu0 %v12695_v34  ;;  %v12751_v33 = vld [vmem:[%s16017_s2 + $0x2c0] ss:$12 sps:$4 sm:$0xff]  }
 0x179   :  { %1044 = vmatpush1.bf16.msra.mxu1 %v12692_v35  ;;  %v12754_v35 = vld [vmem:[%s16017_s2 + $0x2d4] ss:$12 sps:$4 sm:$0xff]  }
 0x17a   :  { %12275 = vmatpush3.bf16.msra.mxu0 %v12695_v34  ;;  %1297 = vmatprep.subr.bf16.mxu1 %v12698_v36  ;;  %v12748_v34 = vld [vmem:[%s16017_s2 + $0x2b8] ss:$12 sps:$4 sm:$0xff]  }
 0x17b   :  { %12280 = vmatprep.subr.bf16.mxu0 %v12699_v38  ;;  %v12755_v36 = vld [vmem:[%s16017_s2 + $0x2d8] ss:$12 sps:$4 sm:$0xff]  }
 0x17c   :  { %1062 = vmatmul.mubr.bf16.vlgmr.msra.gmra.mrb[8].mxu1 %v14004_v63  ;;  %v1440_v63 = vshrl.u32 %v14087_v37, 16  ;;  %v12752_v37 = vld [vmem:[%s16017_s2 + $0x2d0] ss:$12 sps:$4 sm:$0xff]  }
 0x17d   :  { %12277 = vmatmul.mubr.bf16.vlgmr.msra.gmra.mrb[16].mxu0 %v590_v43  ;;  %1298 = vmatpush1.bf16.msra.mxu1 %v12696_v39  ;;  %v12759_v39 = vld [vmem:[%s16017_s2 + $0x2f0] ss:$12 sps:$4 sm:$0xff]  }
 0x17e   :  { %12281 = vmatpush3.bf16.msra.mxu0 %v12699_v38  ;;  %12296 = vmatprep.mubr.bf16.mxu0 %v14114_v47  ;;  %v1442_v9 = vrot.slane %v1440_v63, 1  ;;  %v12758_v38 = vld [vmem:[%s16017_s2 + $0x2ec] ss:$12 sps:$4 sm:$0xff]   ;;  %v12786_v63 = vld [vmem:[%s16017_s2 + $0x394] ss:$12 sps:$4 sm:$0xff]  }
 0x17f   :  { %1299 = vmatprep.subr.bf16.mxu1 %v12702_v41  ;;  %12282 = vmatprep.subr.bf16.mxu0 %v12703_v42  ;;  %v12762_v41 = vld [vmem:[%s16017_s2 + $0x304] ss:$12 sps:$4 sm:$0xff]  }
 0x180   :  { %1071 = vmatprep.mubr.bf16.mxu1 %v13748_v21  ;;  %v1446_v16 = vor.u32 %v1445_v10, %v1442_v9 }
 0x181   :  { %1300 = vmatpush1.bf16.msra.mxu1 %v12700_v45 }
 0x182   :  { %12283 = vmatpush3.bf16.msra.mxu0 %v12703_v42  ;;  %1301 = vmatprep.subr.bf16.mxu1 %v12706_v46  ;;  %v1455_v20 = vsel %vm400_vm4, %v1446_v16, %v14185_v17  ;;  %v1694_v42 = vld [vmem:[#allocation2] sm:$0xfc]  ;;  %v1731_v46 = vrot.slane %v14158_v61, 2  ;;  %v13749_v16 = vmov 0.0  }
 0x183   :  { %12284 = vmatprep.subr.bf16.mxu0 %v12707_v48  ;;  %v1730_v45 = vrot.slane %v1694_v42, 2  ;;  %v12783_v61 = vld [vmem:[%s16017_s2 + $0x380] ss:$12 sps:$4 sm:$0xff]  }
 0x184   :  { %1072 = vmatmul.mubr.bf16.gmra.mrb[16].mxu1 %v590_v43  ;;  %v12763_v43 = vld [vmem:[%s16017_s2 + $0x308] ss:$12 sps:$4 sm:$0xff]  }
 0x185   :  { %1302 = vmatpush1.bf16.msra.mxu1 %v12704_v49  ;;  %1329 = vmatprep.mubr.bf16.mxu1 %v13748_v21  ;;  %v1732_v49 = vsel %vm187_vm0, %v1730_v45, %v1731_v46 }
 0x186   :  { %12285 = vmatpush3.bf16.msra.mxu0 %v12707_v48  ;;  %1303 = vmatprep.subr.bf16.mxu1 %v12710_v50  ;;  %v12767_v48 = vld [vmem:[%s16017_s2 + $0x320] ss:$12 sps:$4 sm:$0xff]   ;;  %v12764_v50 = vld [vmem:[%s16017_s2 + $0x318] ss:$12 sps:$4 sm:$0xff]  }
 0x187   :  { %12286 = vmatprep.subr.bf16.mxu0 %v12711_v51 }
 0x189   :  { %1304 = vmatpush1.bf16.msra.mxu1 %v12708_v52  ;;  %v12771_v52 = vld [vmem:[%s16017_s2 + $0x338] ss:$12 sps:$4 sm:$0xff]  }
 0x18a   :  { %12287 = vmatpush3.bf16.msra.mxu0 %v12711_v51  ;;  %1305 = vmatprep.subr.bf16.mxu1 %v12714_v53  ;;  %v12770_v51 = vld [vmem:[%s16017_s2 + $0x334] ss:$12 sps:$4 sm:$0xff]   ;;  %v12768_v53 = vld [vmem:[%s16017_s2 + $0x330] ss:$12 sps:$4 sm:$0xff]  }
 0x18b   :  { %12288 = vmatprep.subr.bf16.mxu0 %v12715_v54 }
 0x18d   :  { %1306 = vmatpush1.bf16.msra.mxu1 %v12712_v55  ;;  %v12775_v55 = vld [vmem:[%s16017_s2 + $0x350] ss:$12 sps:$4 sm:$0xff]  }
 0x18e   :  { %12289 = vmatpush3.bf16.msra.mxu0 %v12715_v54  ;;  %1307 = vmatprep.subr.bf16.mxu1 %v12718_v56  ;;  %v12774_v54 = vld [vmem:[%s16017_s2 + $0x34c] ss:$12 sps:$4 sm:$0xff]   ;;  %v12772_v56 = vld [vmem:[%s16017_s2 + $0x348] ss:$12 sps:$4 sm:$0xff]  }
 0x18f   :  { %12290 = vmatprep.subr.bf16.mxu0 %v12719_v57 }
 0x191   :  { %1308 = vmatpush1.bf16.msra.mxu1 %v12716_v58  ;;  %v12779_v58 = vld [vmem:[%s16017_s2 + $0x368] ss:$12 sps:$4 sm:$0xff]  }
 0x192   :  { %12291 = vmatpush3.bf16.msra.mxu0 %v12719_v57  ;;  %1309 = vmatprep.subr.bf16.mxu1 %v12722_v59  ;;  %v12778_v57 = vld [vmem:[%s16017_s2 + $0x364] ss:$12 sps:$4 sm:$0xff]   ;;  %v12776_v59 = vld [vmem:[%s16017_s2 + $0x360] ss:$12 sps:$4 sm:$0xff]  }
 0x193   :  { %12292 = vmatprep.subr.bf16.mxu0 %v12723_v60 }
 0x195   :  { %1310 = vmatpush1.bf16.msra.mxu1 %v12720_v62  ;;  %v12780_v62 = vld [vmem:[%s16017_s2 + $0x378] ss:$12 sps:$4 sm:$0xff]  }
 0x196   :  { %12293 = vmatpush3.bf16.msra.mxu0 %v12723_v60  ;;  %1311 = vmatprep.subr.bf16.mxu1 %v12726_v4  ;;  %v12782_v60 = vld [vmem:[%s16017_s2 + $0x37c] ss:$12 sps:$4 sm:$0xff]  }
 0x197   :  { %12294 = vmatprep.subr.bf16.mxu0 %v12727_v5  ;;  %v12784_v4 = vld [vmem:[%s16017_s2 + $0x390] ss:$12 sps:$4 sm:$0xff]  }
 0x199   :  { %1312 = vmatpush1.bf16.msra.mxu1 %v12724_v8 }
 0x19a   :  { %12295 = vmatpush3.bf16.msra.mxu0 %v12727_v5  ;;  %1586 = vmatprep.subr.bf16.mxu1 %v12730_v11  ;;  %v12790_v5 = vld [vmem:[%s16017_s2 + $0x3ac] ss:$12 sps:$4 sm:$0xff]  }
 0x19b   :  { %12300 = vmatprep.subr.bf16.mxu0 %v12731_v12 }
 0x19c   :  { %1330 = vmatmul.mubr.bf16.vlgmr.msra.gmra.mrb[8].mxu1 %v14114_v47  ;;  %v12766_v47 = vld [vmem:[%s16017_s2 + $0x31c] ss:$12 sps:$4 sm:$0xff]  }
 0x19d   :  { %12297 = vmatmul.mubr.bf16.vlgmr.msra.gmra.mrb[20].mxu0 %v14103_v44  ;;  %1587 = vmatpush1.bf16.msra.mxu1 %v12728_v15 }
 0x19e   :  { %12301 = vmatpush3.bf16.msra.mxu0 %v12731_v12  ;;  %12316 = vmatprep.mubr.bf16.mxu0 %v1455_v20 }
 0x19f   :  { %1588 = vmatprep.subr.bf16.mxu1 %v12734_v18  ;;  %12302 = vmatprep.subr.bf16.mxu0 %v12735_v19 }
 0x1a0   :  { %1339 = vmatprep.mubr.bf16.mxu1 %v13748_v21 }
 0x1a1   :  { %1589 = vmatpush1.bf16.msra.mxu1 %v12732_v23 }
 0x1a2   :  { %12303 = vmatpush3.bf16.msra.mxu0 %v12735_v19  ;;  %1590 = vmatprep.subr.bf16.mxu1 %v12738_v22 }
 0x1a3   :  { %12304 = vmatprep.subr.bf16.mxu0 %v12739_v24 }
 0x1a4   :  { %1340 = vmatmul.mubr.bf16.gmra.mrb[20].mxu1 %v14103_v44  ;;  %v12760_v44 = vld [vmem:[%s16017_s2 + $0x300] ss:$12 sps:$4 sm:$0xff]  }
 0x1a5   :  { %1591 = vmatpush1.bf16.msra.mxu1 %v12736_v25  ;;  %1618 = vmatprep.mubr.bf16.mxu1 %v13748_v21 }
 0x1a6   :  { %12305 = vmatpush3.bf16.msra.mxu0 %v12739_v24  ;;  %1592 = vmatprep.subr.bf16.mxu1 %v12742_v26 }
 0x1a7   :  { %12306 = vmatprep.subr.bf16.mxu0 %v12743_v27 }
 0x1a9   :  { %1593 = vmatpush1.bf16.msra.mxu1 %v12740_v28 }
 0x1aa   :  { %12307 = vmatpush3.bf16.msra.mxu0 %v12743_v27  ;;  %1594 = vmatprep.subr.bf16.mxu1 %v12746_v29 }
 0x1ab   :  { %12308 = vmatprep.subr.bf16.mxu0 %v12747_v30 }
 0x1ad   :  { %1595 = vmatpush1.bf16.msra.mxu1 %v12744_v31 }
 0x1ae   :  { %12309 = vmatpush3.bf16.msra.mxu0 %v12747_v30  ;;  %1596 = vmatprep.subr.bf16.mxu1 %v12750_v32 }
 0x1af   :  { %12310 = vmatprep.subr.bf16.mxu0 %v12751_v33 }
 0x1b1   :  { %1597 = vmatpush1.bf16.msra.mxu1 %v12748_v34 }
 0x1b2   :  { %12311 = vmatpush3.bf16.msra.mxu0 %v12751_v33  ;;  %1598 = vmatprep.subr.bf16.mxu1 %v12754_v35 }
 0x1b3   :  { %12312 = vmatprep.subr.bf16.mxu0 %v12755_v36 }
 0x1b5   :  { %1599 = vmatpush1.bf16.msra.mxu1 %v12752_v37 }
 0x1b6   :  { %12313 = vmatpush3.bf16.msra.mxu0 %v12755_v36  ;;  %1600 = vmatprep.subr.bf16.mxu1 %v12758_v38 }
 0x1b7   :  { %12314 = vmatprep.subr.bf16.mxu0 %v12759_v39 }
 0x1b9   :  { %1601 = vmatpush1.bf16.msra.mxu1 %v12756_v40 }
 0x1ba   :  { %12315 = vmatpush3.bf16.msra.mxu0 %v12759_v39  ;;  %1863 = vmatprep.subr.bf16.mxu1 %v12762_v41 }
 0x1bb   :  { %12320 = vmatprep.subr.bf16.mxu0 %v12763_v43 }
 0x1bc   :  { %1619 = vmatmul.mubr.bf16.vlgmr.msra.gmra.mrb[8].mxu1 %v1455_v20 }
 0x1bd   :  { %12317 = vmatmul.mubr.bf16.vlgmr.msra.gmra.mrb[24].mxu0 %v14185_v17  ;;  %1864 = vmatpush1.bf16.msra.mxu1 %v12760_v44 }
 0x1be   :  { %12321 = vmatpush3.bf16.msra.mxu0 %v12763_v43  ;;  %12336 = vmatprep.mubr.bf16.mxu0 %v1732_v49 }
 0x1bf   :  { %1865 = vmatprep.subr.bf16.mxu1 %v12766_v47  ;;  %12322 = vmatprep.subr.bf16.mxu0 %v12767_v48 }
 0x1c0   :  { %1628 = vmatprep.mubr.bf16.mxu1 %v13748_v21 }
 0x1c1   :  { %1866 = vmatpush1.bf16.msra.mxu1 %v12764_v50 }
 0x1c2   :  { %12323 = vmatpush3.bf16.msra.mxu0 %v12767_v48  ;;  %1867 = vmatprep.subr.bf16.mxu1 %v12770_v51 }
 0x1c3   :  { %12324 = vmatprep.subr.bf16.mxu0 %v12771_v52 }
 0x1c4   :  { %1629 = vmatmul.mubr.bf16.gmra.mrb[24].mxu1 %v14185_v17 }
 0x1c5   :  { %1868 = vmatpush1.bf16.msra.mxu1 %v12768_v53  ;;  %1895 = vmatprep.mubr.bf16.mxu1 %v13748_v21 }
 0x1c6   :  { %12325 = vmatpush3.bf16.msra.mxu0 %v12771_v52  ;;  %1869 = vmatprep.subr.bf16.mxu1 %v12774_v54 }
 0x1c7   :  { %12326 = vmatprep.subr.bf16.mxu0 %v12775_v55 }
 0x1c9   :  { %1870 = vmatpush1.bf16.msra.mxu1 %v12772_v56 }
 0x1ca   :  { %12327 = vmatpush3.bf16.msra.mxu0 %v12775_v55  ;;  %1871 = vmatprep.subr.bf16.mxu1 %v12778_v57  ;;  %v1972_v57 = vlaneseq }
 0x1cb   :  { %12328 = vmatprep.subr.bf16.mxu0 %v12779_v58 }
 0x1cd   :  { %1872 = vmatpush1.bf16.msra.mxu1 %v12776_v59 }
 0x1ce   :  { %12329 = vmatpush3.bf16.msra.mxu0 %v12779_v58  ;;  %1873 = vmatprep.subr.bf16.mxu1 %v12782_v60  ;;  %v14340_v58 = vshrl.u32 %v1972_v57, 7  ;;  %v124_v60 = vld [vmem:[#allocation14 + $0x1] sm:$0x7]  ;;  %v12833_v57 = vld [vmem:[%s16018_s3 + $0x240] ss:$8 sps:$4 sm:$0xff]  }
 0x1cf   :  { %12330 = vmatprep.subr.bf16.mxu0 %v12783_v61 }
 0x1d0   :  { %v14343_v59 = vsub.s32 0, %v14340_v58 }
 0x1d1   :  { %1874 = vmatpush1.bf16.msra.mxu1 %v12780_v62  ;;  %v14349_v62 = vsub.s32 2, %v14340_v58 }
 0x1d2   :  { %12331 = vmatpush3.bf16.msra.mxu0 %v12783_v61  ;;  %1875 = vmatprep.subr.bf16.mxu1 %v12786_v63  ;;  %v14346_v61 = vsub.s32 1, %v14340_v58  ;;  %v14352_v63 = vrot.slane %v124_v60, %v14343_v59 }
 0x1d3   :  { %12332 = vmatprep.subr.bf16.mxu0 %v12787_v3 }
 0x1d5   :  { %1876 = vmatpush1.bf16.msra.mxu1 %v12784_v4 }
 0x1d6   :  { %12333 = vmatpush3.bf16.msra.mxu0 %v12787_v3  ;;  %1877 = vmatprep.subr.bf16.mxu1 %v12790_v5  ;;  %v14355_v3 = vrot.slane %v124_v60, %v14346_v61  ;;  %v14358_v5 = vrot.slane %v124_v60, %v14349_v62  ;;  %v12793_v60 = vld [vmem:[%s16019_s4 + $0x8] sm:$0x1f]  }
 0x1d7   :  { %12334 = vmatprep.subr.bf16.mxu0 %v12791_v6 }
 0x1d9   :  { %1878 = vmatpush1.bf16.msra.mxu1 %v12788_v7 }
 0x1da   :  { %12335 = vmatpush3.bf16.msra.mxu0 %v12791_v6  ;;  %12340 = vmatprep.subr.bf16.mxu1 %v13749_v16 }
 0x1dc   :  { %1896 = vmatmul.mubr.bf16.vlgmr.msra.gmra.mrb[8].mxu1 %v1732_v49 }
 0x1dd   :  { %12337 = vmatmul.mubr.bf16.vlgmr.msra.gmra.mrb[28].mxu0 %v1731_v46  ;;  %1905 = vmatprep.mubr.bf16.mxu1 %v13748_v21 }
 0x1de   :  { %2078 = vmatprep.mubr.bf16.mxu0 %v13748_v21 }
 0x1e4   :  { %1906 = vmatmul.mubr.bf16.gmra.mrb[28].mxu1 %v1731_v46 }
 0x1e5   :  { %12344 = vmatprep.mubr.msk.bf16.mxu1 %vm13750_vm5, %v13749_v16 }
 0x230   :  { %v12258_v8 = vpop.f32.mrb[12].mxu0 }
 0x231   :  { %v887_v9 = vpop.f32.mrb[13].mxu0 }
 0x232   :  { %v12259_v10 = vpop.f32.mrb[14].mxu0 }
 0x233   :  { %v890_v11 = vpop.f32.mrb[15].mxu0 }
 0x237   :  { %v846_v12 = vpop.f32.mrb[12].mxu1 }
 0x238   :  { %v848_v13 = vpop.f32.mrb[13].mxu1 }
 0x239   :  { %v850_v14 = vpop.f32.mrb[14].mxu1 }
 0x23a   :  { %v851_v15 = vpop.f32.mrb[15].mxu1 }
 0x250   :  { %v12278_v17 = vpop.f32.mrb[16].mxu0 }
 0x251   :  { %v1123_v18 = vadd.f32 %v12278_v17, %v12258_v8  ;;  %v1114_v19 = vpop.f32.mrb[17].mxu0 }
 0x252   :  { %v1115_v20 = vadd.f32 %v1114_v19, %v887_v9  ;;  %v12279_v23 = vpop.f32.mrb[18].mxu0 }
 0x253   :  { %v1117_v22 = vpop.f32.mrb[19].mxu0 }
 0x254   :  { %v1118_v24 = vadd.f32 %v1117_v22, %v890_v11 }
 0x257   :  { %v1073_v25 = vpop.f32.mrb[16].mxu1 }
 0x258   :  { %v1074_v26 = vadd.f32 %v1073_v25, %v846_v12  ;;  %v1075_v27 = vpop.f32.mrb[17].mxu1 }
 0x259   :  { %v1076_v28 = vadd.f32 %v1075_v27, %v848_v13  ;;  %v1077_v29 = vpop.f32.mrb[18].mxu1 }
 0x25a   :  { %v1078_v30 = vpop.f32.mrb[19].mxu1 }
 0x270   :  { %v12298_v31 = vpop.f32.mrb[20].mxu0 }
 0x271   :  { %v1404_v32 = vadd.f32 %v12298_v31, %v1123_v18  ;;  %v1382_v33 = vpop.f32.mrb[21].mxu0 }
 0x272   :  { %v1398_v34 = vadd.f32 %v1382_v33, %v1115_v20  ;;  %v12299_v35 = vpop.f32.mrb[22].mxu0 }
 0x273   :  { %v1385_v36 = vpop.f32.mrb[23].mxu0 }
 0x274   :  { %v1401_v37 = vadd.f32 %v1385_v36, %v1118_v24 }
 0x277   :  { %v1341_v38 = vpop.f32.mrb[20].mxu1 }
 0x278   :  { %v1402_v39 = vadd.f32 %v1341_v38, %v1074_v26  ;;  %v1343_v40 = vpop.f32.mrb[21].mxu1 }
 0x279   :  { %v1403_v41 = vadd.f32 %v1343_v40, %v1076_v28  ;;  %v1345_v42 = vpop.f32.mrb[22].mxu1 }
 0x27a   :  { %v1346_v43 = vpop.f32.mrb[23].mxu1 }
 0x290   :  { %v12318_v44 = vpop.f32.mrb[24].mxu0 }
 0x291   :  { %v1693_v45 = vadd.f32 %v12318_v44, %v1404_v32  ;;  %v1671_v46 = vpop.f32.mrb[25].mxu0 }
 0x292   :  { %v1687_v47 = vadd.f32 %v1671_v46, %v1398_v34  ;;  %v12319_v48 = vpop.f32.mrb[26].mxu0 }
 0x293   :  { %v1674_v49 = vpop.f32.mrb[27].mxu0 }
 0x294   :  { %v1690_v50 = vadd.f32 %v1674_v49, %v1401_v37 }
 0x297   :  { %v1630_v51 = vpop.f32.mrb[24].mxu1 }
 0x298   :  { %v1691_v52 = vadd.f32 %v1630_v51, %v1402_v39  ;;  %v1632_v53 = vpop.f32.mrb[25].mxu1 }
 0x299   :  { %v1692_v54 = vadd.f32 %v1632_v53, %v1403_v41  ;;  %v1634_v55 = vpop.f32.mrb[26].mxu1 }
 0x29a   :  { %v1635_v56 = vpop.f32.mrb[27].mxu1  ;;  %v12835_v55 = vld [vmem:[%s16018_s3 + $0x244] ss:$8 sps:$4 sm:$0xff]  }
 0x29b   :  { %v12796_v56 = vld [vmem:[%s16018_s3 + $0x144] ss:$8 sps:$4 sm:$0xff]  }
 0x2af   :  { %v1897_v4 = vpop.f32.mrb[8].mxu1 }
 0x2b0   :  { %v1987_v6 = vadd.f32 %v14352_v63, %v1897_v4  ;;  %v1899_v7 = vpop.f32.mrb[9].mxu1  ;;  %v12338_v8 = vpop.f32.mrb[28].mxu0  ;;  %v12794_v4 = vld [vmem:[%s16018_s3 + $0x140] ss:$8 sps:$4 sm:$0xff]  }
 0x2b1   :  { %v1988_v9 = vadd.f32 %v14355_v3, %v1899_v7  ;;  %v1970_v10 = vadd.f32 %v12338_v8, %v1693_v45  ;;  %v1901_v11 = vpop.f32.mrb[10].mxu1  ;;  %v1948_v12 = vpop.f32.mrb[29].mxu0  ;;  %v12797_v7 = vld [vmem:[%s16018_s3 + $0x150] ss:$8 sps:$4 sm:$0xff]   ;;  %v12802_v8 = vld [vmem:[%s16018_s3 + $0x164] ss:$8 sps:$4 sm:$0xff]  }
 0x2b2   :  { %v1990_v13 = vadd.f32 %v14352_v63, %v1901_v11  ;;  %v1964_v14 = vadd.f32 %v1948_v12, %v1687_v47  ;;  %v1903_v15 = vpop.f32.mrb[11].mxu1  ;;  %v12339_v17 = vpop.f32.mrb[30].mxu0  ;;  %v1996_v23 = vmax.f32 %v1987_v6, 0.0  ;;  %v12799_v6 = vld [vmem:[%s16018_s3 + $0x154] ss:$8 sps:$4 sm:$0xff]  }
 0x2b3   :  { %v1995_v18 = vadd.f32 %v14358_v5, %v1970_v10  ;;  %v1991_v19 = vadd.f32 %v14355_v3, %v1903_v15  ;;  %v1951_v20 = vpop.f32.mrb[31].mxu0  ;;  %v1997_v26 = vmax.f32 %v1988_v9, 0.0  ;;  %v12800_v9 = vld [vmem:[%s16018_s3 + $0x160] ss:$8 sps:$4 sm:$0xff]   ;;  %v12805_v10 = vld [vmem:[%s16018_s3 + $0x174] ss:$8 sps:$4 sm:$0xff]  }
 0x2b4   :  { %v1999_v22 = vmax.f32 %v1990_v13, 0.0  ;;  %v1989_v24 = vadd.f32 %v14358_v5, %v1964_v14  ;;  %v1967_v25 = vadd.f32 %v1951_v20, %v1690_v50  ;;  %v12803_v11 = vld [vmem:[%s16018_s3 + $0x170] ss:$8 sps:$4 sm:$0xff]   ;;  %v12808_v12 = vld [vmem:[%s16018_s3 + $0x184] ss:$8 sps:$4 sm:$0xff]  }
 0x2b5   :  { %v2004_v27 = vmax.f32 %v1995_v18, 0.0  ;;  %v2000_v28 = vmax.f32 %v1991_v19, 0.0  ;;  %v12806_v13 = vld [vmem:[%s16018_s3 + $0x180] ss:$8 sps:$4 sm:$0xff]   ;;  %v12811_v14 = vld [vmem:[%s16018_s3 + $0x194] ss:$8 sps:$4 sm:$0xff]  }
 0x2b6   :  { %v2005_v29 = vpack.c.bf16 %v1999_v22, %v1996_v23  ;;  %v1992_v30 = vadd.f32 %v14358_v5, %v1967_v25  ;;  %v1998_v34 = vmax.f32 %v1989_v24, 0.0  ;;  %v12809_v15 = vld [vmem:[%s16018_s3 + $0x190] ss:$8 sps:$4 sm:$0xff]   ;;  %v12814_v17 = vld [vmem:[%s16018_s3 + $0x1a4] ss:$8 sps:$4 sm:$0xff]  }
 0x2b7   :  { %v2010_v31 = vpack.c.bf16 %v2004_v27, %v2004_v27  ;;  %v2006_v32 = vpack.c.bf16 %v2000_v28, %v1997_v26  ;;  %v1907_v33 = vpop.f32.mrb[28].mxu1  ;;  %v12812_v18 = vld [vmem:[%s16018_s3 + $0x1a0] ss:$8 sps:$4 sm:$0xff]   ;;  %v12817_v19 = vld [vmem:[%s16018_s3 + $0x1b4] ss:$8 sps:$4 sm:$0xff]  }
 0x2b8   :  { %v2001_v35 = vmax.f32 %v1992_v30, 0.0  ;;  %v1968_v36 = vadd.f32 %v1907_v33, %v1691_v52  ;;  %v1909_v37 = vpop.f32.mrb[29].mxu1  ;;  %v12792_v52 = vld [vmem:[%s16019_s4] sm:$0x1f]   ;;  %v12815_v20 = vld [vmem:[%s16018_s3 + $0x1b0] ss:$8 sps:$4 sm:$0xff]  }
 0x2b9   :  { %2018 = vst.msk [vmem:[#allocation3 + $0x28] sm:$0x3] %vm2017_vm6, %v2010_v31  ;;  %v1969_v38 = vadd.f32 %v1909_v37, %v1692_v54  ;;  %v1911_v39 = vpop.f32.mrb[30].mxu1  ;;  %2046 = vmatprep.subr.bf16.mxu0 %v2006_v32  ;;  %v12820_v23 = vld [vmem:[%s16018_s3 + $0x1c4] ss:$8 sps:$4 sm:$0xff]  }
 0x2ba   :  { %v2007_v40 = vpack.c.bf16 %v2001_v35, %v1998_v34  ;;  %v1993_v41 = vadd.f32 %v14352_v63, %v1968_v36  ;;  %v1912_v42 = vpop.f32.mrb[31].mxu1  ;;  %2047 = vmatpush1.bf16.msra.mxu0 %v2005_v29  ;;  %v12818_v22 = vld [vmem:[%s16018_s3 + $0x1c0] ss:$8 sps:$4 sm:$0xff]   ;;  %v12823_v24 = vld [vmem:[%s16018_s3 + $0x1d4] ss:$8 sps:$4 sm:$0xff]  }
 0x2bb   :  { %v1994_v43 = vadd.f32 %v14355_v3, %v1969_v38  ;;  %v12821_v25 = vld [vmem:[%s16018_s3 + $0x1d0] ss:$8 sps:$4 sm:$0xff]   ;;  %v12826_v26 = vld [vmem:[%s16018_s3 + $0x1e4] ss:$8 sps:$4 sm:$0xff]   ;;  %v12824_v27 = vld [vmem:[%s16018_s3 + $0x1e0] ss:$8 sps:$4 sm:$0xff]  }
 0x2bc   :  { %2014 = vst.msk [vmem:[#allocation3 + $0x10] sm:$0xff] %vm2013_vm7, %v2007_v40  ;;  %v2002_v44 = vmax.f32 %v1993_v41, 0.0  ;;  %v12829_v28 = vld [vmem:[%s16018_s3 + $0x1f4] ss:$8 sps:$4 sm:$0xff]   ;;  %v12832_v30 = vld [vmem:[%s16018_s3 + $0x204] ss:$8 sps:$4 sm:$0xff]  }
 0x2bd   :  { %v2003_v45 = vmax.f32 %v1994_v43, 0.0  ;;  %v12830_v31 = vld [vmem:[%s16018_s3 + $0x200] ss:$8 sps:$4 sm:$0xff]   ;;  %v12836_v33 = vld [vmem:[%s16018_s3 + $0x210] ss:$8 sps:$4 sm:$0xff]  }
 0x2be   :  { %v2008_v46 = vpack.c.bf16 %v2002_v44, %v2002_v44  ;;  %v12841_v34 = vld [vmem:[%s16018_s3 + $0x254] ss:$8 sps:$4 sm:$0xff]   ;;  %v12839_v35 = vld [vmem:[%s16018_s3 + $0x250] ss:$8 sps:$4 sm:$0xff]   ;;  %v12842_v36 = vld [vmem:[%s16018_s3 + $0x220] ss:$8 sps:$4 sm:$0xff]  }
 0x2bf   :  { %v2009_v47 = vpack.c.bf16 %v2003_v45, %v2003_v45  ;;  %v12844_v37 = vld [vmem:[%s16018_s3 + $0x224] ss:$8 sps:$4 sm:$0xff]   ;;  %v12845_v38 = vld [vmem:[%s16018_s3 + $0x260] ss:$8 sps:$4 sm:$0xff]   ;;  %v12850_v40 = vld [vmem:[%s16018_s3 + $0x234] ss:$8 sps:$4 sm:$0xff]  }
 0x2c0   :  { %2015 = vst [vmem:[#allocation3 + $0x18] sm:$0x3] %v2008_v46  ;;  %v2024_v49 = vld [vmem:[#allocation3 + $0x28] sm:$0x3]  ;;  %v12847_v39 = vld [vmem:[%s16018_s3 + $0x264] ss:$8 sps:$4 sm:$0xff]  }
 0x2c1   :  { %2016 = vst [vmem:[#allocation3 + $0x20] sm:$0x3] %v2009_v47  ;;  %v2044_v50 = vsel %vm2036_vm8, %v2024_v49, 0  ;;  %v12848_v41 = vld [vmem:[%s16018_s3 + $0x230] ss:$8 sps:$4 sm:$0xff]  }
 0x2c2   :  { %v12853_v42 = vld [vmem:[%s16018_s3 + $0x274] ss:$8 sps:$4 sm:$0xff]   ;;  %v12851_v43 = vld [vmem:[%s16018_s3 + $0x270] ss:$8 sps:$4 sm:$0xff]   ;;  %v12856_v44 = vld [vmem:[%s16018_s3 + $0x4] ss:$8 sps:$4 sm:$0xff]  }
 0x2c3   :  { %v2021_v48 = vld [vmem:[#allocation3 + $0x10] sm:$0xff] }
 0x2c4   :  { %12341 = vmatpush3.bf16.msra.mxu1 %v2021_v48 }
 0x2c5   :  { %12342 = vmatprep.subr.bf16.mxu1 %v13749_v16 }
 0x2c7   :  { %v2022_v51 = vld [vmem:[#allocation3 + $0x18] sm:$0x3] }
 0x2c8   :  { %12343 = vmatpush3.bf16.msra.mxu1 %v2044_v50  ;;  %v2023_v53 = vld [vmem:[#allocation3 + $0x20] sm:$0x3]  ;;  %v2038_v54 = vsel %vm2036_vm8, %v2022_v51, 0 }
 0x2c9   :  { %11162 = vmatprep.subr.msk.bf16.mxu0 %vm2036_vm8, %v2023_v53  ;;  %12348 = vmatprep.subr.bf16.mxu1 %v13749_v16 }
 0x2ca   :  { %2049 = vmatpush1.bf16.msra.mxu0 %v2038_v54 }
 0x2cb   :  { %2141 = vmatprep.subr.bf16.mxu0 %v2006_v32  ;;  %12345 = vmatmul.mubr.msk.bf16.vlgmr.msra.gmra.mrb[32].mxu1 %vm2032_vm9, %v12792_v52  ;;  %v12838_v32 = vld [vmem:[%s16018_s3 + $0x214] ss:$8 sps:$4 sm:$0xff]  }
 0x2cc   :  { %12349 = vmatpush3.bf16.msra.mxu1 %v2021_v48  ;;  %12352 = vmatprep.mubr.msk.bf16.mxu1 %vm13750_vm5, %v13749_v16 }
 0x2cd   :  { %11163 = vmatmul.mubr.msk.bf16.vlgmr.msra.gmra.mrb[32].mxu0 %vm2032_vm9, %v12792_v52  ;;  %12350 = vmatprep.subr.bf16.mxu1 %v13749_v16 }
 0x2ce   :  { %2142 = vmatpush1.bf16.msra.mxu0 %v2005_v29  ;;  %2173 = vmatprep.mubr.bf16.mxu0 %v13748_v21  ;;  %v12827_v29 = vld [vmem:[%s16018_s3 + $0x1f0] ss:$8 sps:$4 sm:$0xff]  }
 0x2cf   :  { %11168 = vmatprep.subr.msk.bf16.mxu0 %vm2036_vm8, %v2023_v53 }
 0x2d0   :  { %12351 = vmatpush3.bf16.msra.mxu1 %v2044_v50 }
 0x2d1   :  { %2558 = vmatprep.subr.bf16.mxu1 %v12835_v55 }
 0x2d2   :  { %2144 = vmatpush1.bf16.msra.mxu0 %v2038_v54 }
 0x2d3   :  { %12353 = vmatmul.mubr.msk.bf16.vlgmr.msra.gmra.mrb[36].mxu1 %vm2032_vm9, %v12793_v60  ;;  %2515 = vmatprep.subr.bf16.mxu0 %v12796_v56 }
 0x2d4   :  { %2559 = vmatpush1.bf16.msra.mxu1 %v12833_v57  ;;  %2590 = vmatprep.mubr.bf16.mxu1 %v13748_v21 }
 0x2d5   :  { %11169 = vmatmul.mubr.msk.bf16.vlgmr.msra.gmra.mrb[36].mxu0 %vm2032_vm9, %v12793_v60  ;;  %2560 = vmatprep.subr.bf16.mxu1 %v12841_v34  ;;  %v12886_v34 = vld [vmem:[%s16018_s3 + $0xa4] ss:$8 sps:$4 sm:$0xff]  }
 0x2d6   :  { %2516 = vmatpush1.bf16.msra.mxu0 %v12794_v4 }
 0x2d7   :  { %2517 = vmatprep.subr.bf16.mxu0 %v12799_v6 }
 0x2d8   :  { %2561 = vmatpush1.bf16.msra.mxu1 %v12839_v35  ;;  %v12884_v35 = vld [vmem:[%s16018_s3 + $0xa0] ss:$8 sps:$4 sm:$0xff]  }
 0x2d9   :  { %2562 = vmatprep.subr.bf16.mxu1 %v12847_v39  ;;  %v12890_v39 = vld [vmem:[%s16018_s3 + $0xc0] ss:$8 sps:$4 sm:$0xff]  }
 0x2da   :  { %2518 = vmatpush1.bf16.msra.mxu0 %v12797_v7 }
 0x2db   :  { %2519 = vmatprep.subr.bf16.mxu0 %v12802_v8 }
 0x2dc   :  { %2563 = vmatpush1.bf16.msra.mxu1 %v12845_v38  ;;  %v12892_v38 = vld [vmem:[%s16018_s3 + $0xc4] ss:$8 sps:$4 sm:$0xff]  }
 0x2dd   :  { %2564 = vmatprep.subr.bf16.mxu1 %v12853_v42  ;;  %v12898_v42 = vld [vmem:[%s16018_s3 + $0xe4] ss:$8 sps:$4 sm:$0xff]  }
 0x2de   :  { %2520 = vmatpush1.bf16.msra.mxu0 %v12800_v9 }
 0x2df   :  { %2521 = vmatprep.subr.bf16.mxu0 %v12805_v10 }
 0x2e0   :  { %2565 = vmatpush1.bf16.msra.mxu1 %v12851_v43  ;;  %v12896_v43 = vld [vmem:[%s16018_s3 + $0xe0] ss:$8 sps:$4 sm:$0xff]  }
 0x2e2   :  { %2522 = vmatpush1.bf16.msra.mxu0 %v12803_v11 }
 0x2e3   :  { %2523 = vmatprep.subr.bf16.mxu0 %v12808_v12 }
 0x2e6   :  { %2524 = vmatpush1.bf16.msra.mxu0 %v12806_v13  ;;  %v12854_v13 = vld [vmem:[%s16018_s3] ss:$8 sps:$4 sm:$0xff]  }
 0x2e7   :  { %2525 = vmatprep.subr.bf16.mxu0 %v12811_v14  ;;  %v12859_v14 = vld [vmem:[%s16018_s3 + $0x14] ss:$8 sps:$4 sm:$0xff]  }
 0x2ea   :  { %2526 = vmatpush1.bf16.msra.mxu0 %v12809_v15  ;;  %v12857_v15 = vld [vmem:[%s16018_s3 + $0x10] ss:$8 sps:$4 sm:$0xff]  }
 0x2eb   :  { %2527 = vmatprep.subr.bf16.mxu0 %v12814_v17  ;;  %v12862_v17 = vld [vmem:[%s16018_s3 + $0x24] ss:$8 sps:$4 sm:$0xff]  }
 0x2ee   :  { %2528 = vmatpush1.bf16.msra.mxu0 %v12812_v18  ;;  %v12860_v18 = vld [vmem:[%s16018_s3 + $0x20] ss:$8 sps:$4 sm:$0xff]  }
 0x2ef   :  { %2529 = vmatprep.subr.bf16.mxu0 %v12817_v19  ;;  %v12865_v19 = vld [vmem:[%s16018_s3 + $0x34] ss:$8 sps:$4 sm:$0xff]  }
 0x2f2   :  { %2530 = vmatpush1.bf16.msra.mxu0 %v12815_v20  ;;  %v12863_v20 = vld [vmem:[%s16018_s3 + $0x30] ss:$8 sps:$4 sm:$0xff]  }
 0x2f3   :  { %2531 = vmatprep.subr.bf16.mxu0 %v12820_v23  ;;  %v12868_v23 = vld [vmem:[%s16018_s3 + $0x44] ss:$8 sps:$4 sm:$0xff]  }
 0x2f6   :  { %2532 = vmatpush1.bf16.msra.mxu0 %v12818_v22  ;;  %v12866_v22 = vld [vmem:[%s16018_s3 + $0x40] ss:$8 sps:$4 sm:$0xff]  }
 0x2f7   :  { %2533 = vmatprep.subr.bf16.mxu0 %v12823_v24  ;;  %v12871_v24 = vld [vmem:[%s16018_s3 + $0x54] ss:$8 sps:$4 sm:$0xff]  }
 0x2fa   :  { %2534 = vmatpush1.bf16.msra.mxu0 %v12821_v25  ;;  %v12869_v25 = vld [vmem:[%s16018_s3 + $0x50] ss:$8 sps:$4 sm:$0xff]  }
 0x2fb   :  { %2535 = vmatprep.subr.bf16.mxu0 %v12826_v26  ;;  %v12874_v26 = vld [vmem:[%s16018_s3 + $0x64] ss:$8 sps:$4 sm:$0xff]  }
 0x2fe   :  { %2536 = vmatpush1.bf16.msra.mxu0 %v12824_v27  ;;  %v12872_v27 = vld [vmem:[%s16018_s3 + $0x60] ss:$8 sps:$4 sm:$0xff]  }
 0x2ff   :  { %2537 = vmatprep.subr.bf16.mxu0 %v12829_v28  ;;  %v12877_v28 = vld [vmem:[%s16018_s3 + $0x74] ss:$8 sps:$4 sm:$0xff]  }
 0x302   :  { %2538 = vmatpush1.bf16.msra.mxu0 %v12827_v29  ;;  %v12875_v29 = vld [vmem:[%s16018_s3 + $0x70] ss:$8 sps:$4 sm:$0xff]  }
 0x303   :  { %2539 = vmatprep.subr.bf16.mxu0 %v12832_v30  ;;  %v12880_v30 = vld [vmem:[%s16018_s3 + $0x84] ss:$8 sps:$4 sm:$0xff]  }
 0x306   :  { %2540 = vmatpush1.bf16.msra.mxu0 %v12830_v31  ;;  %v12878_v31 = vld [vmem:[%s16018_s3 + $0x80] ss:$8 sps:$4 sm:$0xff]  }
 0x307   :  { %2541 = vmatprep.subr.bf16.mxu0 %v12838_v32  ;;  %v12883_v32 = vld [vmem:[%s16018_s3 + $0x94] ss:$8 sps:$4 sm:$0xff]  }
 0x30a   :  { %2542 = vmatpush1.bf16.msra.mxu0 %v12836_v33  ;;  %v12881_v33 = vld [vmem:[%s16018_s3 + $0x90] ss:$8 sps:$4 sm:$0xff]  }
 0x30b   :  { %2543 = vmatprep.subr.bf16.mxu0 %v12844_v37  ;;  %v12887_v37 = vld [vmem:[%s16018_s3 + $0xb0] ss:$8 sps:$4 sm:$0xff]  }
 0x30e   :  { %2544 = vmatpush1.bf16.msra.mxu0 %v12842_v36  ;;  %v12889_v36 = vld [vmem:[%s16018_s3 + $0xb4] ss:$8 sps:$4 sm:$0xff]  }
 0x30f   :  { %2545 = vmatprep.subr.bf16.mxu0 %v12850_v40  ;;  %v12895_v40 = vld [vmem:[%s16018_s3 + $0xd4] ss:$8 sps:$4 sm:$0xff]  }
 0x312   :  { %2546 = vmatpush1.bf16.msra.mxu0 %v12848_v41  ;;  %v12893_v41 = vld [vmem:[%s16018_s3 + $0xd0] ss:$8 sps:$4 sm:$0xff]  }
 0x313   :  { %2804 = vmatprep.subr.bf16.mxu0 %v12856_v44  ;;  %v12901_v44 = vld [vmem:[%s16018_s3 + $0xf4] ss:$8 sps:$4 sm:$0xff]  }
 0x39e   :  { %v14515_v45 = vpop.f32.mrb[32].mxu1 }
 0x39f   :  { %v12346_v46 = vpop.f32.mrb[33].mxu1 }
 0x3a0   :  { %v14517_v47 = vpop.f32.mrb[32].mxu0  ;;  %v14519_v48 = vpop.f32.mrb[34].mxu1  ;;  %v12899_v46 = vld [vmem:[%s16018_s3 + $0xf0] ss:$8 sps:$4 sm:$0xff]  }
 0x3a1   :  { %v2082_v49 = vpop.f32.mrb[33].mxu0  ;;  %v2267_v50 = vpack.c.bf16 %v14519_v48, %v14515_v45  ;;  %v12347_v51 = vpop.f32.mrb[35].mxu1  ;;  %v12926_v45 = vld [vmem:[#allocation11 + $0x2c0] ss:$16 sps:$4 sm:$0xff]  }
 0x3a2   :  { %v14523_v52 = vpop.f32.mrb[34].mxu0  ;;  %v12902_v51 = vld [vmem:[%s16018_s3 + $0x100] ss:$8 sps:$4 sm:$0xff]  }
 0x3a3   :  { %v2265_v53 = vpack.c.bf16 %v14523_v52, %v14517_v47  ;;  %v2086_v54 = vpop.f32.mrb[35].mxu0  ;;  %v12913_v47 = vld [vmem:[%s16018_s3 + $0x134] ss:$8 sps:$4 sm:$0xff]   ;;  %v12911_v52 = vld [vmem:[%s16018_s3 + $0x130] ss:$8 sps:$4 sm:$0xff]  }
 0x3a4   :  { %v2266_v55 = vpack.c.bf16 %v2086_v54, %v2082_v49  ;;  %v12904_v49 = vld [vmem:[%s16018_s3 + $0x104] ss:$8 sps:$4 sm:$0xff]   ;;  %v12907_v54 = vld [vmem:[%s16018_s3 + $0x114] ss:$8 sps:$4 sm:$0xff]   ;;  %v12929_v48 = vld [vmem:[#allocation11 + $0x180] ss:$16 sps:$4 sm:$0xff]  }
 0x3a6   :  { %v2218_v56 = vpop.f32.mrb[36].mxu1 }
 0x3a7   :  { %v12354_v57 = vpop.f32.mrb[37].mxu1 }
 0x3a8   :  { %v2175_v60 = vpop.f32.mrb[36].mxu0  ;;  %v2221_v4 = vpop.f32.mrb[38].mxu1  ;;  %v12908_v57 = vld [vmem:[%s16018_s3 + $0x120] ss:$8 sps:$4 sm:$0xff]  }
 0x3a9   :  { %v2177_v6 = vpop.f32.mrb[37].mxu0  ;;  %v2311_v7 = vpack.c.bf16 %v2221_v4, %v2218_v56  ;;  %v12355_v8 = vpop.f32.mrb[39].mxu1  ;;  %v12910_v56 = vld [vmem:[%s16018_s3 + $0x124] ss:$8 sps:$4 sm:$0xff]   ;;  %v12917_v4 = vld [vmem:[#allocation11 + $0x140] ss:$16 sps:$4 sm:$0xff]  }
 0x3aa   :  { %v2179_v9 = vpop.f32.mrb[38].mxu0  ;;  %v12925_v8 = vld [vmem:[#allocation11 + $0x164] ss:$16 sps:$4 sm:$0xff]  }
 0x3ab   :  { %v2309_v10 = vpack.c.bf16 %v2179_v9, %v2175_v60  ;;  %v2181_v11 = vpop.f32.mrb[39].mxu0  ;;  %11251 = vmatmul.mubr.msk.bf16.vlgmr.msra.gmra.mrb[40].mxu1 %vm2013_vm7, %v2311_v7  ;;  %v12916_v60 = vld [vmem:[#allocation11 + $0x284] ss:$16 sps:$4 sm:$0xff]   ;;  %v12920_v9 = vld [vmem:[#allocation11 + $0x2a0] ss:$16 sps:$4 sm:$0xff]  }
 0x3ac   :  { %v2310_v12 = vpack.c.bf16 %v2181_v11, %v2177_v6  ;;  %v12919_v6 = vld [vmem:[#allocation11 + $0x144] ss:$16 sps:$4 sm:$0xff]  }
 0x3ad   :  { %v12922_v7 = vld [vmem:[#allocation11 + $0x2a4] ss:$16 sps:$4 sm:$0xff]   ;;  %3214 = vmatprep.subr.bf16.mxu1 %v12919_v6 }
 0x3ae   :  { %2547 = vmatprep.mubr.bf16.mxu0 %v2310_v12  ;;  %3215 = vmatpush1.bf16.msra.mxu1 %v12917_v4  ;;  %v12928_v11 = vld [vmem:[#allocation11 + $0x2c4] ss:$16 sps:$4 sm:$0xff]  }
 0x3af   :  { %2548 = vmatmul.mubr.bf16.vlgmr.msra.gmra.mrb[40].mxu0 %v2309_v10  ;;  %v12923_v10 = vld [vmem:[#allocation11 + $0x160] ss:$16 sps:$4 sm:$0xff]   ;;  %3216 = vmatprep.subr.bf16.mxu1 %v12925_v8  ;;  %v12931_v12 = vld [vmem:[#allocation11 + $0x184] ss:$16 sps:$4 sm:$0xff]  }
 0x3b0   :  { %2805 = vmatpush1.bf16.msra.mxu0 %v12854_v13  ;;  %2836 = vmatprep.mubr.bf16.mxu0 %v2266_v55  ;;  %v12905_v55 = vld [vmem:[%s16018_s3 + $0x110] ss:$8 sps:$4 sm:$0xff]   ;;  %v12937_v13 = vld [vmem:[#allocation11 + $0x1a4] ss:$16 sps:$4 sm:$0xff]  }
 0x3b1   :  { %2806 = vmatprep.subr.bf16.mxu0 %v12859_v14  ;;  %v12932_v14 = vld [vmem:[#allocation11 + $0x2e0] ss:$16 sps:$4 sm:$0xff]  }
 0x3b2   :  { %3217 = vmatpush1.bf16.msra.mxu1 %v12923_v10 }
 0x3b3   :  { %3218 = vmatprep.subr.bf16.mxu1 %v12931_v12 }
 0x3b4   :  { %2807 = vmatpush1.bf16.msra.mxu0 %v12857_v15  ;;  %v12935_v15 = vld [vmem:[#allocation11 + $0x1a0] ss:$16 sps:$4 sm:$0xff]  }
 0x3b5   :  { %2808 = vmatprep.subr.bf16.mxu0 %v12862_v17  ;;  %v12940_v17 = vld [vmem:[#allocation11 + $0x304] ss:$16 sps:$4 sm:$0xff]  }
 0x3b6   :  { %3219 = vmatpush1.bf16.msra.mxu1 %v12929_v48 }
 0x3b7   :  { %3220 = vmatprep.subr.bf16.mxu1 %v12937_v13 }
 0x3b8   :  { %2809 = vmatpush1.bf16.msra.mxu0 %v12860_v18  ;;  %v12938_v18 = vld [vmem:[#allocation11 + $0x300] ss:$16 sps:$4 sm:$0xff]  }
 0x3b9   :  { %2810 = vmatprep.subr.bf16.mxu0 %v12865_v19  ;;  %v12943_v19 = vld [vmem:[#allocation11 + $0x1c4] ss:$16 sps:$4 sm:$0xff]  }
 0x3ba   :  { %3221 = vmatpush1.bf16.msra.mxu1 %v12935_v15 }
 0x3bb   :  { %3222 = vmatprep.subr.bf16.mxu1 %v12943_v19 }
 0x3bc   :  { %2811 = vmatpush1.bf16.msra.mxu0 %v12863_v20  ;;  %v12941_v20 = vld [vmem:[#allocation11 + $0x1c0] ss:$16 sps:$4 sm:$0xff]  }
 0x3bd   :  { %2812 = vmatprep.subr.bf16.mxu0 %v12868_v23  ;;  %v12946_v23 = vld [vmem:[#allocation11 + $0x324] ss:$16 sps:$4 sm:$0xff]  }
 0x3be   :  { %3223 = vmatpush1.bf16.msra.mxu1 %v12941_v20 }
 0x3c0   :  { %2813 = vmatpush1.bf16.msra.mxu0 %v12866_v22  ;;  %v12944_v22 = vld [vmem:[#allocation11 + $0x320] ss:$16 sps:$4 sm:$0xff]  }
 0x3c1   :  { %2814 = vmatprep.subr.bf16.mxu0 %v12871_v24  ;;  %v12949_v24 = vld [vmem:[#allocation11 + $0x1e4] ss:$16 sps:$4 sm:$0xff]  }
 0x3c2   :  { %3224 = vmatprep.subr.bf16.mxu1 %v12949_v24 }
 0x3c4   :  { %2815 = vmatpush1.bf16.msra.mxu0 %v12869_v25  ;;  %v12947_v25 = vld [vmem:[#allocation11 + $0x1e0] ss:$16 sps:$4 sm:$0xff]  }
 0x3c5   :  { %2816 = vmatprep.subr.bf16.mxu0 %v12874_v26  ;;  %v12952_v26 = vld [vmem:[#allocation11 + $0x344] ss:$16 sps:$4 sm:$0xff]   ;;  %3225 = vmatpush1.bf16.msra.mxu1 %v12947_v25 }
 0x3c8   :  { %2817 = vmatpush1.bf16.msra.mxu0 %v12872_v27  ;;  %v12950_v27 = vld [vmem:[#allocation11 + $0x340] ss:$16 sps:$4 sm:$0xff]  }
 0x3c9   :  { %2818 = vmatprep.subr.bf16.mxu0 %v12877_v28  ;;  %v12955_v28 = vld [vmem:[#allocation11 + $0x204] ss:$16 sps:$4 sm:$0xff]  }
 0x3ca   :  { %3226 = vmatprep.subr.bf16.mxu1 %v12955_v28 }
 0x3cc   :  { %2819 = vmatpush1.bf16.msra.mxu0 %v12875_v29  ;;  %v12953_v29 = vld [vmem:[#allocation11 + $0x200] ss:$16 sps:$4 sm:$0xff]  }
 0x3cd   :  { %2820 = vmatprep.subr.bf16.mxu0 %v12880_v30  ;;  %v12958_v30 = vld [vmem:[#allocation11 + $0x364] ss:$16 sps:$4 sm:$0xff]   ;;  %3227 = vmatpush1.bf16.msra.mxu1 %v12953_v29 }
 0x3d0   :  { %2821 = vmatpush1.bf16.msra.mxu0 %v12878_v31  ;;  %v12956_v31 = vld [vmem:[#allocation11 + $0x360] ss:$16 sps:$4 sm:$0xff]  }
 0x3d1   :  { %2822 = vmatprep.subr.bf16.mxu0 %v12883_v32  ;;  %v12959_v32 = vld [vmem:[#allocation11 + $0x220] ss:$16 sps:$4 sm:$0xff]  }
 0x3d4   :  { %2823 = vmatpush1.bf16.msra.mxu0 %v12881_v33  ;;  %v12961_v33 = vld [vmem:[#allocation11 + $0x224] ss:$16 sps:$4 sm:$0xff]  }
 0x3d5   :  { %2824 = vmatprep.subr.bf16.mxu0 %v12886_v34  ;;  %v12962_v34 = vld [vmem:[#allocation11 + $0x380] ss:$16 sps:$4 sm:$0xff]   ;;  %3228 = vmatprep.subr.bf16.mxu1 %v12961_v33  ;;  %v12974_v33 = vld [vmem:[#allocation11 + $0x148] ss:$16 sps:$4 sm:$0xff]  }
 0x3d6   :  { %3229 = vmatpush1.bf16.msra.mxu1 %v12959_v32 }
 0x3d8   :  { %2825 = vmatpush1.bf16.msra.mxu0 %v12884_v35  ;;  %v12964_v35 = vld [vmem:[#allocation11 + $0x384] ss:$16 sps:$4 sm:$0xff]  }
 0x3d9   :  { %2826 = vmatprep.subr.bf16.mxu0 %v12889_v36  ;;  %v12967_v36 = vld [vmem:[#allocation11 + $0x244] ss:$16 sps:$4 sm:$0xff]  }
 0x3da   :  { %3230 = vmatprep.subr.bf16.mxu1 %v12967_v36  ;;  %v12977_v36 = vld [vmem:[#allocation11 + $0x168] ss:$16 sps:$4 sm:$0xff]  }
 0x3dc   :  { %2827 = vmatpush1.bf16.msra.mxu0 %v12887_v37  ;;  %v12970_v37 = vld [vmem:[#allocation11 + $0x3a4] ss:$16 sps:$4 sm:$0xff]  }
 0x3dd   :  { %2828 = vmatprep.subr.bf16.mxu0 %v12892_v38  ;;  %v12965_v38 = vld [vmem:[#allocation11 + $0x240] ss:$16 sps:$4 sm:$0xff]  }
 0x3de   :  { %3231 = vmatpush1.bf16.msra.mxu1 %v12965_v38  ;;  %v12980_v38 = vld [vmem:[#allocation11 + $0x188] ss:$16 sps:$4 sm:$0xff]  }
 0x3e0   :  { %2829 = vmatpush1.bf16.msra.mxu0 %v12890_v39  ;;  %v12968_v39 = vld [vmem:[#allocation11 + $0x3a0] ss:$16 sps:$4 sm:$0xff]  }
 0x3e1   :  { %2830 = vmatprep.subr.bf16.mxu0 %v12895_v40  ;;  %v12973_v40 = vld [vmem:[#allocation11 + $0x264] ss:$16 sps:$4 sm:$0xff]  }
 0x3e2   :  { %3232 = vmatprep.subr.bf16.mxu1 %v12973_v40  ;;  %v12983_v40 = vld [vmem:[#allocation11 + $0x1a8] ss:$16 sps:$4 sm:$0xff]  }
 0x3e4   :  { %2831 = vmatpush1.bf16.msra.mxu0 %v12893_v41  ;;  %v12971_v41 = vld [vmem:[#allocation11 + $0x260] ss:$16 sps:$4 sm:$0xff]  }
 0x3e5   :  { %2832 = vmatprep.subr.bf16.mxu0 %v12898_v42  ;;  %3233 = vmatpush1.bf16.msra.mxu1 %v12971_v41  ;;  %v12976_v42 = vld [vmem:[#allocation11 + $0x14c] ss:$16 sps:$4 sm:$0xff]  }
 0x3e6   :  { %3255 = vmatprep.subr.bf16.mxu1 %v12976_v42  ;;  %v12988_v41 = vld [vmem:[#allocation11 + $0x1cc] ss:$16 sps:$4 sm:$0xff]   ;;  %v12986_v42 = vld [vmem:[#allocation11 + $0x1c8] ss:$16 sps:$4 sm:$0xff]  }
 0x3e8   :  { %2833 = vmatpush1.bf16.msra.mxu0 %v12896_v43 }
 0x3e9   :  { %2834 = vmatprep.subr.bf16.mxu0 %v12901_v44 }
 0x3ec   :  { %2835 = vmatpush1.bf16.msra.mxu0 %v12899_v46 }
 0x3ed   :  { %2847 = vmatprep.subr.bf16.mxu0 %v12904_v49 }
 0x3ef   :  { %2837 = vmatmul.mubr.bf16.vlgmr.msra.gmra.mrb[44].mxu0 %v2265_v53  ;;  %v12914_v53 = vld [vmem:[#allocation11 + $0x280] ss:$16 sps:$4 sm:$0xff]  }
 0x3f0   :  { %2848 = vmatpush1.bf16.msra.mxu0 %v12902_v51  ;;  %2879 = vmatprep.mubr.bf16.mxu0 %v13748_v21 }
 0x3f1   :  { %2849 = vmatprep.subr.bf16.mxu0 %v12907_v54 }
 0x3f4   :  { %2850 = vmatpush1.bf16.msra.mxu0 %v12905_v55 }
 0x3f5   :  { %2851 = vmatprep.subr.bf16.mxu0 %v12910_v56 }
 0x3f8   :  { %2852 = vmatpush1.bf16.msra.mxu0 %v12908_v57 }
 0x3f9   :  { %2853 = vmatprep.subr.bf16.mxu0 %v12913_v47 }
 0x3fc   :  { %2854 = vmatpush1.bf16.msra.mxu0 %v12911_v52 }
 0x3fd   :  { %3832 = vmatprep.subr.bf16.mxu0 %v12916_v60  ;;  %v125_v60 = vld [vmem:[#allocation14 + $0x4] sm:$0x3] }
 0x3fe   :  { %v14657_v10 = vrot.slane %v125_v60, %v14346_v61 }
 0x3ff   :  { %11292 = vmatmul.mubr.msk.bf16.vlgmr.msra.gmra.mrb[44].mxu0 %vm2013_vm7, %v2267_v50  ;;  %v12934_v50 = vld [vmem:[#allocation11 + $0x2e4] ss:$16 sps:$4 sm:$0xff]  }
 0x400   :  { %3833 = vmatpush1.bf16.msra.mxu0 %v12914_v53 }
 0x401   :  { %3834 = vmatprep.subr.bf16.mxu0 %v12922_v7  ;;  %v14654_v7 = vrot.slane %v125_v60, %v14343_v59 }
 0x404   :  { %3835 = vmatpush1.bf16.msra.mxu0 %v12920_v9 }
 0x405   :  { %3836 = vmatprep.subr.bf16.mxu0 %v12928_v11 }
 0x408   :  { %3837 = vmatpush1.bf16.msra.mxu0 %v12926_v45 }
 0x409   :  { %3838 = vmatprep.subr.bf16.mxu0 %v12934_v50 }
 0x40c   :  { %3839 = vmatpush1.bf16.msra.mxu0 %v12932_v14 }
 0x40d   :  { %3840 = vmatprep.subr.bf16.mxu0 %v12940_v17 }
 0x410   :  { %3841 = vmatpush1.bf16.msra.mxu0 %v12938_v18 }
 0x411   :  { %3842 = vmatprep.subr.bf16.mxu0 %v12946_v23 }
 0x414   :  { %3843 = vmatpush1.bf16.msra.mxu0 %v12944_v22 }
 0x415   :  { %3844 = vmatprep.subr.bf16.mxu0 %v12952_v26 }
 0x418   :  { %3845 = vmatpush1.bf16.msra.mxu0 %v12950_v27 }
 0x419   :  { %3846 = vmatprep.subr.bf16.mxu0 %v12958_v30 }
 0x41c   :  { %3847 = vmatpush1.bf16.msra.mxu0 %v12956_v31 }
 0x41d   :  { %3848 = vmatprep.subr.bf16.mxu0 %v12964_v35  ;;  %v12979_v35 = vld [vmem:[#allocation11 + $0x16c] ss:$16 sps:$4 sm:$0xff]  }
 0x420   :  { %3849 = vmatpush1.bf16.msra.mxu0 %v12962_v34 }
 0x421   :  { %3850 = vmatprep.subr.bf16.mxu0 %v12970_v37  ;;  %v12982_v37 = vld [vmem:[#allocation11 + $0x18c] ss:$16 sps:$4 sm:$0xff]  }
 0x424   :  { %3851 = vmatpush1.bf16.msra.mxu0 %v12968_v39  ;;  %v12985_v39 = vld [vmem:[#allocation11 + $0x1ac] ss:$16 sps:$4 sm:$0xff]  }
 0x47e   :  { %v2592_v43 = vpop.f32.mrb[40].mxu1 }
 0x47f   :  { %v2594_v44 = vpop.f32.mrb[41].mxu1 }
 0x480   :  { %v2596_v46 = vpop.f32.mrb[42].mxu1 }
 0x481   :  { %v2598_v49 = vpop.f32.mrb[43].mxu1 }
 0x482   :  { %v2549_v51 = vpop.f32.mrb[40].mxu0 }
 0x483   :  { %v2593_v54 = vadd.f32 %v2592_v43, %v2549_v51  ;;  %v2551_v55 = vpop.f32.mrb[41].mxu0  ;;  %v12991_v43 = vld [vmem:[#allocation11 + $0x1ec] ss:$16 sps:$4 sm:$0xff]   ;;  %v14686_v51 = vld [vmem:[%s16015_s0 + $0x10] sm:$0xf] }
 0x484   :  { %v2595_v56 = vadd.f32 %v2594_v44, %v2551_v55  ;;  %v2553_v57 = vpop.f32.mrb[42].mxu0  ;;  %v12989_v44 = vld [vmem:[#allocation11 + $0x1e8] ss:$16 sps:$4 sm:$0xff]  }
 0x485   :  { %v2597_v47 = vadd.f32 %v2596_v46, %v2553_v57  ;;  %v2555_v52 = vpop.f32.mrb[43].mxu0  ;;  %v12994_v46 = vld [vmem:[#allocation11 + $0x20c] ss:$16 sps:$4 sm:$0xff]   ;;  %v12992_v55 = vld [vmem:[#allocation11 + $0x208] ss:$16 sps:$4 sm:$0xff]  }
 0x486   :  { %v2599_v53 = vadd.f32 %v2598_v49, %v2555_v52  ;;  %v3955_v49 = vld [vmem:[%s16015_s0 + $0xc] sm:$0xc]  ;;  %v3963_v52 = vld [vmem:[%s16015_s0 + $0x18] sm:$0x7] }
 0x487   :  { %v11419_v57 = vcombine.low %v3955_v49, %v14686_v51 }
 0x489   :  { %v3980_v60 = vshrl.u32 %v11419_v57, 16 }
 0x4d2   :  { %v2881_v4 = vpop.f32.mrb[44].mxu0 }
 0x4d3   :  { %v12533_v6 = vadd.f32 %v2881_v4, %v2593_v54  ;;  %v2883_v8 = vpop.f32.mrb[45].mxu0  ;;  %v14691_v54 = vld [vmem:[%s16015_s0 + $0x14] sm:$0xf]  ;;  %v3983_v4 = vshll.u32 %v11419_v57, 16 }
 0x4d4   :  { %v12535_v9 = vadd.f32 %v2883_v8, %v2595_v56  ;;  %v2885_v11 = vpop.f32.mrb[46].mxu0  ;;  %v13088_v56 = vld [vmem:[#allocation8 + $0x10] sm:$0xff]   ;;  %v13092_v8 = vld [vmem:[#allocation8 + $0x18] sm:$0x3f]  }
 0x4d5   :  { %v12537_v12 = vadd.f32 %v2885_v11, %v2597_v47  ;;  %v2887_v45 = vpop.f32.mrb[47].mxu0  ;;  %v2901_v50 = vadd.f32 %v12533_v6, %v14654_v7  ;;  %v12997_v47 = vld [vmem:[#allocation11 + $0x22c] ss:$16 sps:$4 sm:$0xff]   ;;  %12356 = vmatprep.subr.bf16.mxu0 %v13088_v56  ;;  %v12995_v6 = vld [vmem:[#allocation11 + $0x228] ss:$16 sps:$4 sm:$0xff]   ;;  %v3982_v11 = vrot.slane %v3980_v60, 2 }
 0x4d6   :  { %v12539_v48 = vadd.f32 %v2887_v45, %v2599_v53  ;;  %v2902_v14 = vadd.f32 %v12535_v9, %v14657_v10  ;;  %v14698_v53 = vcombine.low %v14691_v54, %v3963_v52  ;;  %v13000_v9 = vld [vmem:[#allocation11 + $0x24c] ss:$16 sps:$4 sm:$0xff]  }
 0x4d7   :  { %v2903_v13 = vadd.f32 %v12537_v12, %v14654_v7  ;;  %v3985_v12 = vrot.slane %v3983_v4, 3  ;;  %v13106_v60 = vld [vmem:[#allocation8 + $0x48] sm:$0x3f]   ;;  %v13012_v4 = vld [vmem:[#allocation11 + $0x44] ss:$16 sps:$4 sm:$0xff]  }
 0x4d8   :  { %v2904_v15 = vadd.f32 %v12539_v48, %v14657_v10  ;;  %v3988_v45 = vshrl.u32 %v14698_v53, 16  ;;  %v3991_v48 = vshll.u32 %v14698_v53, 16 }
 0x4d9   :  { %v2905_v17 = vpack.c.bf16 %v2903_v13, %v2901_v50  ;;  %v4014_v50 = vsel %vm187_vm0, %v13092_v8, 0  ;;  %v3986_v13 = vor.u32 %v3985_v12, %v3982_v11  ;;  %v4342_v11 = vsel %vm187_vm0, %v13106_v60, 0 }
 0x4da   :  { %v2906_v18 = vpack.c.bf16 %v2904_v15, %v2902_v14  ;;  %v3990_v14 = vrot.slane %v3988_v45, 2  ;;  %v3993_v15 = vrot.slane %v3991_v48, 3  ;;  %v11440_v12 = vcombine.low %v14686_v51, %v14691_v54 }
 0x4db   :  { %2907 = vst [vmem:[#allocation4] sm:$0x1f] %v2905_v17  ;;  %v12998_v17 = vld [vmem:[#allocation11 + $0x248] ss:$16 sps:$4 sm:$0xff]  }
 0x4dc   :  { %2909 = vst.msk [vmem:[#allocation4 + $0x8] sm:$0x1f] %vm2908_vm10, %v2906_v18  ;;  %v13098_v18 = vld [vmem:[#allocation8 + $0x20] sm:$0xff]  }
 0x4e2   :  { %v14664_v19 = vld [vmem:[#allocation4] sm:$0x1e] }
 0x4e3   :  { %v2952_v20 = vld [vmem:[#allocation4] sm:$0x1f]  ;;  %v14666_v23 = vld [vmem:[#allocation4 + $0x8] sm:$0x1e]  ;;  %v3626_v27 = vrot.slane %v14664_v19, 1 }
 0x4e4   :  { %v2953_v22 = vld [vmem:[#allocation4 + $0x8] sm:$0x1f]  ;;  %v3627_v24 = vrot.slane %v14666_v23, 1  ;;  %v2998_v26 = vshll.u32 %v2952_v20, 16  ;;  %v2996_v31 = vshrl.u32 %v2952_v20, 16 }
 0x4e5   :  { %v3005_v25 = vshll.u32 %v2953_v22, 16  ;;  %v3003_v28 = vshrl.u32 %v2953_v22, 16  ;;  %v13003_v20 = vld [vmem:[#allocation11 + $0x26c] ss:$16 sps:$4 sm:$0xff]   ;;  %v3994_v22 = vor.u32 %v3993_v15, %v3990_v14 }
 0x4e6   :  { %11417 = vmatprep.mubr.msk.bf16.mxu0 %vm3210_vm11, %v3627_v24  ;;  %v3000_v30 = vrot.slane %v2998_v26, 1  ;;  %v4138_v26 = vld [vmem:[%s16015_s0 + $0xc] sm:$0x8] }
 0x4e7   :  { %v3007_v29 = vrot.slane %v3005_v25, 1  ;;  %3865 = vmatmul.mubr.bf16.vlgmr.msra.gmra.mrb[48].mxu0 %v3626_v27  ;;  %v3995_v25 = vsel %vm3978_vm12, %v3986_v13, %v3994_v22  ;;  %v13015_v13 = vld [vmem:[#allocation11 + $0x64] ss:$16 sps:$4 sm:$0xff]   ;;  %v13084_v23 = vld [vmem:[#allocation11 + $0x34c] ss:$16 sps:$4 sm:$0xff]  }
 0x4e8   :  { %v14675_v34 = vor.u32 %v3000_v30, %v2996_v31  ;;  %12357 = vmatpush3.bf16.msra.mxu0 %v13088_v56  ;;  %12360 = vmatprep.mubr.msk.bf16.mxu0 %vm180_vm1, %v3995_v25  ;;  %v11430_v30 = vcombine.low %v4138_v26, %v14686_v51  ;;  %v3958_v31 = vld [vmem:[%s16015_s0 + $0x18] sm:$0x3]  ;;  %v13016_v51 = vld [vmem:[#allocation11 + $0x80] ss:$16 sps:$4 sm:$0xff]   ;;  %v13027_v26 = vld [vmem:[#allocation11 + $0xe4] ss:$16 sps:$4 sm:$0xff]  }
 0x4e9   :  { %v3008_v32 = vor.u32 %v3007_v29, %v3003_v28  ;;  %12593 = vmatprep.subr.msk.bf16.mxu0 %vm187_vm0, %v13092_v8  ;;  %v13001_v28 = vld [vmem:[#allocation11 + $0x268] ss:$16 sps:$4 sm:$0xff]   ;;  %v13022_v25 = vld [vmem:[#allocation11 + $0xc0] ss:$16 sps:$4 sm:$0xff]  }
 0x4ea   :  { %v13100_v29 = vld [vmem:[#allocation8 + $0x28] sm:$0x3f]   ;;  %v4231_v56 = vshrl.u32 %v11430_v30, 16 }
 0x4eb   :  { %11333 = vmatprep.mubr.msk.bf16.mxu1 %vm3210_vm11, %v3008_v32 }
 0x4ec   :  { %3247 = vmatmul.mubr.bf16.vlgmr.msra.gmra.mrb[44].mxu1 %v14675_v34  ;;  %12359 = vmatpush3.bf16.msra.mxu0 %v4014_v50  ;;  %v13010_v50 = vld [vmem:[#allocation11 + $0x40] ss:$16 sps:$4 sm:$0xff]  }
 0x4ed   :  { %3256 = vmatpush1.bf16.msra.mxu1 %v12974_v33  ;;  %11334 = vmatprep.mubr.msk.bf16.mxu1 %vm3210_vm11, %v3008_v32  ;;  %v13006_v32 = vld [vmem:[#allocation11 + $0x4] ss:$16 sps:$4 sm:$0xff]   ;;  %v11425_v33 = vcombine.low %v14691_v54, %v3958_v31 }
 0x4ee   :  { %3257 = vmatprep.subr.bf16.mxu1 %v12979_v35  ;;  %12372 = vmatprep.subr.bf16.mxu0 %v13098_v18  ;;  %v4147_v35 = vrot.slane %v11430_v30, 3  ;;  %v13033_v31 = vld [vmem:[#allocation11 + $0x124] ss:$16 sps:$4 sm:$0xff]  }
 0x4ef   :  { %12361 = vmatmul.mubr.msk.bf16.vlgmr.msra.gmra.mrb[52].mxu0 %vm180_vm1, %v3994_v22  ;;  %v13024_v22 = vld [vmem:[#allocation11 + $0xc4] ss:$16 sps:$4 sm:$0xff]  }
 0x4f0   :  { %12373 = vmatpush3.bf16.msra.mxu0 %v13098_v18  ;;  %v13018_v18 = vld [vmem:[#allocation11 + $0x84] ss:$16 sps:$4 sm:$0xff]  }
 0x4f1   :  { %3258 = vmatpush1.bf16.msra.mxu1 %v12977_v36  ;;  %v4148_v36 = vrot.slane %v14698_v53, 3  ;;  %12595 = vmatprep.subr.msk.bf16.mxu0 %vm187_vm0, %v13100_v29  ;;  %v13007_v53 = vld [vmem:[#allocation11 + $0x20] ss:$16 sps:$4 sm:$0xff]  }
 0x4f2   :  { %3259 = vmatprep.subr.bf16.mxu1 %v12982_v37  ;;  %v4168_v37 = vsel %vm187_vm0, %v13100_v29, 0  ;;  %v13030_v29 = vld [vmem:[#allocation11 + $0x104] ss:$16 sps:$4 sm:$0xff]  }
 0x4f4   :  { %12375 = vmatpush3.bf16.msra.mxu0 %v4168_v37  ;;  %v2910_v37 = vld [vmem:[#allocation4] sm:$0xf] }
 0x4f5   :  { %3260 = vmatpush1.bf16.msra.mxu1 %v12980_v38  ;;  %v4067_v38 = vrot.slane %v11419_v57, 2  ;;  %v4234_v57 = vshll.u32 %v11430_v30, 16  ;;  %v13028_v30 = vld [vmem:[#allocation11 + $0x100] ss:$16 sps:$4 sm:$0xff]  }
 0x4f6   :  { %3261 = vmatprep.subr.bf16.mxu1 %v12985_v39  ;;  %v14717_v39 = vrot.slane %v11425_v33, 2  ;;  %v13036_v33 = vld [vmem:[#allocation11 + $0xc] ss:$16 sps:$4 sm:$0xff]  }
 0x4f7   :  { %v4236_v8 = vrot.slane %v4234_v57, 4  ;;  %v13049_v57 = vld [vmem:[#allocation11 + $0xa8] ss:$16 sps:$4 sm:$0xff]  }
 0x4f9   :  { %3262 = vmatpush1.bf16.msra.mxu1 %v12983_v40  ;;  %v13004_v40 = vld [vmem:[#allocation11] ss:$16 sps:$4 sm:$0xff]  }
 0x4fa   :  { %3263 = vmatprep.subr.bf16.mxu1 %v12988_v41  ;;  %v4149_v41 = vsel %vm4146_vm13, %v4147_v35, %v4148_v36  ;;  %v13034_v35 = vld [vmem:[#allocation11 + $0x8] ss:$16 sps:$4 sm:$0xff]  }
 0x4fb   :  { %12376 = vmatprep.mubr.msk.bf16.mxu0 %vm180_vm1, %v4149_v41  ;;  %v13040_v41 = vld [vmem:[#allocation11 + $0x48] ss:$16 sps:$4 sm:$0xff]  }
 0x4fc   :  { %12377 = vmatmul.mubr.msk.bf16.vlgmr.msra.gmra.mrb[56].mxu0 %vm180_vm1, %v4148_v36  ;;  %v13039_v36 = vld [vmem:[#allocation11 + $0x2c] ss:$16 sps:$4 sm:$0xff]  }
 0x4fd   :  { %3264 = vmatpush1.bf16.msra.mxu1 %v12986_v42  ;;  %v13104_v42 = vld [vmem:[#allocation8 + $0x40] sm:$0xff]   ;;  %12392 = vmatprep.mubr.msk.bf16.mxu0 %vm180_vm1, %v11440_v12  ;;  %v13067_v12 = vld [vmem:[#allocation11 + $0x2a8] ss:$16 sps:$4 sm:$0xff]  }
 0x4fe   :  { %3265 = vmatprep.subr.bf16.mxu1 %v12991_v43  ;;  %v4221_v43 = vld [vmem:[%s16015_s0 + $0x18] sm:$0xf]  ;;  %12388 = vmatprep.subr.bf16.mxu0 %v13104_v42 }
 0x4ff   :  { %v11435_v49 = vcombine.low %v14691_v54, %v4221_v43  ;;  %12389 = vmatpush3.bf16.msra.mxu0 %v13104_v42  ;;  %v11441_v15 = vcombine.low %v4221_v43, %v4221_v43  ;;  %v13021_v54 = vld [vmem:[#allocation11 + $0xa4] ss:$16 sps:$4 sm:$0xff]   ;;  %v13045_v42 = vld [vmem:[#allocation11 + $0x6c] ss:$16 sps:$4 sm:$0xff]   ;;  %v13043_v43 = vld [vmem:[#allocation11 + $0x68] ss:$16 sps:$4 sm:$0xff]  }
 0x500   :  { %12597 = vmatprep.subr.msk.bf16.mxu0 %vm187_vm0, %v13106_v60  ;;  %v13060_v60 = vld [vmem:[#allocation11 + $0x10c] ss:$16 sps:$4 sm:$0xff]  }
 0x501   :  { %3266 = vmatpush1.bf16.msra.mxu1 %v12989_v44  ;;  %v13009_v44 = vld [vmem:[#allocation11 + $0x24] ss:$16 sps:$4 sm:$0xff]   ;;  %v4242_v52 = vshll.u32 %v11435_v49, 16 }
 0x502   :  { %3267 = vmatprep.subr.bf16.mxu1 %v12994_v46  ;;  %v14725_v46 = vsel %vm187_vm0, %v4067_v38, %v14717_v39  ;;  %v13037_v38 = vld [vmem:[#allocation11 + $0x28] ss:$16 sps:$4 sm:$0xff]  }
 0x503   :  { %12391 = vmatpush3.bf16.msra.mxu0 %v4342_v11  ;;  %v13069_v11 = vld [vmem:[#allocation11 + $0x2ac] ss:$16 sps:$4 sm:$0xff]  }
 0x505   :  { %3268 = vmatpush1.bf16.msra.mxu1 %v12992_v55  ;;  %v14729_v55 = vld [vmem:[#allocation4 + $0x8] sm:$0xf] }
 0x506   :  { %3269 = vmatprep.subr.bf16.mxu1 %v12997_v47  ;;  %v4239_v47 = vshrl.u32 %v11435_v49, 16  ;;  %12393 = vmatmul.mubr.msk.bf16.vlgmr.msra.gmra.mrb[60].mxu0 %vm180_vm1, %v11441_v15  ;;  %v13046_v49 = vld [vmem:[#allocation11 + $0x88] ss:$16 sps:$4 sm:$0xff]  }
 0x507   :  { %v13073_v15 = vld [vmem:[#allocation11 + $0x2e8] ss:$16 sps:$4 sm:$0xff]  }
 0x509   :  { %3270 = vmatpush1.bf16.msra.mxu1 %v12995_v6  ;;  %v4233_v6 = vrot.slane %v4231_v56, 3  ;;  %v13051_v56 = vld [vmem:[#allocation11 + $0xac] ss:$16 sps:$4 sm:$0xff]  }
 0x50a   :  { %3271 = vmatprep.subr.bf16.mxu1 %v13000_v9  ;;  %v4244_v9 = vrot.slane %v4242_v52, 4  ;;  %v13057_v52 = vld [vmem:[#allocation11 + $0xec] ss:$16 sps:$4 sm:$0xff]  }
 0x50b   :  { %v4237_v45 = vor.u32 %v4236_v8, %v4233_v6  ;;  %v13063_v6 = vld [vmem:[#allocation11 + $0x12c] ss:$16 sps:$4 sm:$0xff]   ;;  %v13061_v8 = vld [vmem:[#allocation11 + $0x128] ss:$16 sps:$4 sm:$0xff]  }
 0x50d   :  { %3272 = vmatpush1.bf16.msra.mxu1 %v12998_v17  ;;  %v13013_v17 = vld [vmem:[#allocation11 + $0x60] ss:$16 sps:$4 sm:$0xff]  }
 0x50e   :  { %3273 = vmatprep.subr.bf16.mxu1 %v13003_v20  ;;  %v13019_v20 = vld [vmem:[#allocation11 + $0xa0] ss:$16 sps:$4 sm:$0xff]  }
 0x511   :  { %3274 = vmatpush1.bf16.msra.mxu1 %v13001_v28  ;;  %v13025_v28 = vld [vmem:[#allocation11 + $0xe0] ss:$16 sps:$4 sm:$0xff]  }
 0x512   :  { %3499 = vmatprep.subr.bf16.mxu1 %v13006_v32  ;;  %v13031_v32 = vld [vmem:[#allocation11 + $0x120] ss:$16 sps:$4 sm:$0xff]  }
 0x514   :  { %3288 = vmatmul.mubr.bf16.vlgmr.msra.gmra.mrb[48].mxu1 %v14675_v34  ;;  %v4241_v34 = vrot.slane %v4239_v47, 3  ;;  %v13054_v47 = vld [vmem:[#allocation11 + $0xcc] ss:$16 sps:$4 sm:$0xff]  }
 0x515   :  { %3500 = vmatpush1.bf16.msra.mxu1 %v13004_v40  ;;  %11375 = vmatprep.mubr.msk.bf16.mxu1 %vm3210_vm11, %v14729_v55  ;;  %v13042_v40 = vld [vmem:[#allocation11 + $0x4c] ss:$16 sps:$4 sm:$0xff]  }
 0x516   :  { %3501 = vmatprep.subr.bf16.mxu1 %v13009_v44  ;;  %v14738_v48 = vor.u32 %v4244_v9, %v4241_v34  ;;  %v13048_v44 = vld [vmem:[#allocation11 + $0x8c] ss:$16 sps:$4 sm:$0xff]   ;;  %v13064_v9 = vld [vmem:[#allocation11 + $0x288] ss:$16 sps:$4 sm:$0xff]  }
 0x517   :  { %v13066_v34 = vld [vmem:[#allocation11 + $0x28c] ss:$16 sps:$4 sm:$0xff]  }
 0x518   :  { %v14742_v14 = vsel %vm4229_vm14, %v4237_v45, %v14738_v48  ;;  %v13072_v45 = vld [vmem:[#allocation11 + $0x2cc] ss:$16 sps:$4 sm:$0xff]  }
 0x519   :  { %3502 = vmatpush1.bf16.msra.mxu1 %v13007_v53  ;;  %v13055_v53 = vld [vmem:[#allocation11 + $0xe8] ss:$16 sps:$4 sm:$0xff]  }
 0x51a   :  { %3503 = vmatprep.subr.bf16.mxu1 %v13012_v4  ;;  %v13058_v4 = vld [vmem:[#allocation11 + $0x108] ss:$16 sps:$4 sm:$0xff]  }
 0x51d   :  { %3504 = vmatpush1.bf16.msra.mxu1 %v13010_v50  ;;  %v13070_v50 = vld [vmem:[#allocation11 + $0x2c8] ss:$16 sps:$4 sm:$0xff]  }
 0x51e   :  { %3505 = vmatprep.subr.bf16.mxu1 %v13015_v13  ;;  %v13075_v13 = vld [vmem:[#allocation11 + $0x2ec] ss:$16 sps:$4 sm:$0xff]  }
 0x521   :  { %3506 = vmatpush1.bf16.msra.mxu1 %v13013_v17  ;;  %v13078_v17 = vld [vmem:[#allocation11 + $0x30c] ss:$16 sps:$4 sm:$0xff]  }
 0x522   :  { %3507 = vmatprep.subr.bf16.mxu1 %v13018_v18  ;;  %v13076_v18 = vld [vmem:[#allocation11 + $0x308] ss:$16 sps:$4 sm:$0xff]  }
 0x525   :  { %3508 = vmatpush1.bf16.msra.mxu1 %v13016_v51  ;;  %v13081_v51 = vld [vmem:[#allocation11 + $0x32c] ss:$16 sps:$4 sm:$0xff]  }
 0x526   :  { %3509 = vmatprep.subr.bf16.mxu1 %v13021_v54  ;;  %v13079_v54 = vld [vmem:[#allocation11 + $0x328] ss:$16 sps:$4 sm:$0xff]  }
 0x529   :  { %3510 = vmatpush1.bf16.msra.mxu1 %v13019_v20  ;;  %v13087_v20 = vld [vmem:[#allocation11 + $0x36c] ss:$16 sps:$4 sm:$0xff]  }
 0x52a   :  { %3511 = vmatprep.subr.bf16.mxu1 %v13024_v22  ;;  %v13085_v22 = vld [vmem:[#allocation11 + $0x368] ss:$16 sps:$4 sm:$0xff]  }
 0x52d   :  { %3512 = vmatpush1.bf16.msra.mxu1 %v13022_v25  ;;  %v13091_v25 = vld [vmem:[#allocation11 + $0x38c] ss:$16 sps:$4 sm:$0xff]  }
 0x52e   :  { %3513 = vmatprep.subr.bf16.mxu1 %v13027_v26  ;;  %v13089_v26 = vld [vmem:[#allocation11 + $0x388] ss:$16 sps:$4 sm:$0xff]  }
 0x531   :  { %3514 = vmatpush1.bf16.msra.mxu1 %v13025_v28  ;;  %v13095_v28 = vld [vmem:[#allocation11 + $0x3ac] ss:$16 sps:$4 sm:$0xff]  }
 0x532   :  { %3515 = vmatprep.subr.bf16.mxu1 %v13030_v29  ;;  %v13093_v29 = vld [vmem:[#allocation11 + $0x3a8] ss:$16 sps:$4 sm:$0xff]  }
 0x535   :  { %3516 = vmatpush1.bf16.msra.mxu1 %v13028_v30  ;;  %v13099_v30 = vld [vmem:[#allocation8] sm:$0xff]  }
 0x536   :  { %3517 = vmatprep.subr.bf16.mxu1 %v13033_v31  ;;  %v13101_v31 = vld [vmem:[#allocation8 + $0x8] sm:$0x3f]  }
 0x539   :  { %3518 = vmatpush1.bf16.msra.mxu1 %v13031_v32  ;;  %v4088_v32 = vsel %vm187_vm0, %v13101_v31, 0 }
 0x53a   :  { %3540 = vmatprep.subr.bf16.mxu1 %v13036_v33  ;;  %v13105_v33 = vld [vmem:[#allocation8 + $0x30] sm:$0xff]  }
 0x53c   :  { %3532 = vmatmul.mubr.bf16.vlgmr.msra.gmra.mrb[52].mxu1 %v2910_v37 }
 0x53d   :  { %3541 = vmatpush1.bf16.msra.mxu1 %v13034_v35  ;;  %11376 = vmatprep.mubr.msk.bf16.mxu1 %vm3210_vm11, %v14729_v55  ;;  %v13052_v55 = vld [vmem:[#allocation11 + $0xc8] ss:$16 sps:$4 sm:$0xff]  }
 0x53e   :  { %3542 = vmatprep.subr.bf16.mxu1 %v13039_v36  ;;  %v13107_v35 = vld [vmem:[#allocation8 + $0x38] sm:$0x3f]  }
 0x53f   :  { %v4265_v19 = vsel %vm187_vm0, %v13107_v35, 0 }
 0x541   :  { %3543 = vmatpush1.bf16.msra.mxu1 %v13037_v38 }
 0x542   :  { %3544 = vmatprep.subr.bf16.mxu1 %v13042_v40 }
 0x545   :  { %3545 = vmatpush1.bf16.msra.mxu1 %v13040_v41 }
 0x546   :  { %3546 = vmatprep.subr.bf16.mxu1 %v13045_v42 }
 0x549   :  { %3547 = vmatpush1.bf16.msra.mxu1 %v13043_v43 }
 0x54a   :  { %3548 = vmatprep.subr.bf16.mxu1 %v13048_v44  ;;  %v13113_v44 = vld [vmem:[%s16017_s2 + $0xc4] ss:$12 sps:$4 sm:$0xff]  }
 0x54d   :  { %3549 = vmatpush1.bf16.msra.mxu1 %v13046_v49  ;;  %v13111_v49 = vld [vmem:[%s16017_s2 + $0xc0] ss:$12 sps:$4 sm:$0xff]  }
 0x54e   :  { %3550 = vmatprep.subr.bf16.mxu1 %v13051_v56  ;;  %v13114_v56 = vld [vmem:[%s16017_s2 + $0xc8] ss:$12 sps:$4 sm:$0xff]  }
 0x54f   :  { %12396 = vmatprep.subr.bf16.mxu0 %v13114_v56 }
 0x550   :  { %12397 = vmatpush3.bf16.msra.mxu0 %v13114_v56 }
 0x551   :  { %3551 = vmatpush1.bf16.msra.mxu1 %v13049_v57 }
 0x552   :  { %3552 = vmatprep.subr.bf16.mxu1 %v13054_v47 }
 0x555   :  { %3553 = vmatpush1.bf16.msra.mxu1 %v13052_v55  ;;  %v13117_v55 = vld [vmem:[%s16017_s2 + $0xdc] ss:$12 sps:$4 sm:$0xff]  }
 0x556   :  { %3554 = vmatprep.subr.bf16.mxu1 %v13057_v52 }
 0x559   :  { %3555 = vmatpush1.bf16.msra.mxu1 %v13055_v53 }
 0x55a   :  { %3556 = vmatprep.subr.bf16.mxu1 %v13060_v60  ;;  %v13115_v60 = vld [vmem:[%s16017_s2 + $0xd8] ss:$12 sps:$4 sm:$0xff]  }
 0x55d   :  { %3557 = vmatpush1.bf16.msra.mxu1 %v13058_v4  ;;  %v13118_v4 = vld [vmem:[%s16017_s2 + $0xe0] ss:$12 sps:$4 sm:$0xff]  }
 0x55e   :  { %3558 = vmatprep.subr.bf16.mxu1 %v13063_v6  ;;  %12398 = vmatprep.subr.bf16.mxu0 %v13118_v4 }
 0x55f   :  { %12399 = vmatpush3.bf16.msra.mxu0 %v13118_v4 }
 0x561   :  { %3559 = vmatpush1.bf16.msra.mxu1 %v13061_v8 }
 0x562   :  { %3873 = vmatprep.subr.bf16.mxu1 %v13066_v34 }
 0x564   :  { %3573 = vmatmul.mubr.bf16.vlgmr.msra.gmra.mrb[56].mxu1 %v2910_v37 }
 0x565   :  { %3874 = vmatpush1.bf16.msra.mxu1 %v13064_v9  ;;  %11418 = vmatprep.mubr.msk.bf16.mxu1 %vm3210_vm11, %v3627_v24  ;;  %v13082_v24 = vld [vmem:[#allocation11 + $0x348] ss:$16 sps:$4 sm:$0xff]  }
 0x566   :  { %3875 = vmatprep.subr.bf16.mxu1 %v13069_v11  ;;  %v13121_v11 = vld [vmem:[%s16017_s2 + $0xf4] ss:$12 sps:$4 sm:$0xff]  }
 0x569   :  { %3876 = vmatpush1.bf16.msra.mxu1 %v13067_v12  ;;  %v13119_v12 = vld [vmem:[%s16017_s2 + $0xf0] ss:$12 sps:$4 sm:$0xff]  }
 0x56a   :  { %3877 = vmatprep.subr.bf16.mxu1 %v13072_v45  ;;  %v13122_v45 = vld [vmem:[%s16017_s2 + $0xf8] ss:$12 sps:$4 sm:$0xff]  }
 0x56b   :  { %12400 = vmatprep.subr.bf16.mxu0 %v13122_v45 }
 0x56c   :  { %12401 = vmatpush3.bf16.msra.mxu0 %v13122_v45 }
 0x56d   :  { %3878 = vmatpush1.bf16.msra.mxu1 %v13070_v50  ;;  %v13125_v50 = vld [vmem:[%s16017_s2 + $0x10c] ss:$12 sps:$4 sm:$0xff]  }
 0x56e   :  { %3879 = vmatprep.subr.bf16.mxu1 %v13075_v13 }
 0x571   :  { %3880 = vmatpush1.bf16.msra.mxu1 %v13073_v15  ;;  %v13123_v15 = vld [vmem:[%s16017_s2 + $0x108] ss:$12 sps:$4 sm:$0xff]  }
 0x572   :  { %3881 = vmatprep.subr.bf16.mxu1 %v13078_v17  ;;  %v13126_v17 = vld [vmem:[%s16017_s2 + $0x110] ss:$12 sps:$4 sm:$0xff]  }
 0x573   :  { %12402 = vmatprep.subr.bf16.mxu0 %v13126_v17 }
 0x574   :  { %12403 = vmatpush3.bf16.msra.mxu0 %v13126_v17 }
 0x575   :  { %3882 = vmatpush1.bf16.msra.mxu1 %v13076_v18 }
 0x576   :  { %3883 = vmatprep.subr.bf16.mxu1 %v13081_v51 }
 0x579   :  { %3884 = vmatpush1.bf16.msra.mxu1 %v13079_v54 }
 0x57a   :  { %3885 = vmatprep.subr.bf16.mxu1 %v13084_v23  ;;  %v13129_v23 = vld [vmem:[%s16017_s2 + $0x124] ss:$12 sps:$4 sm:$0xff]  }
 0x57d   :  { %3886 = vmatpush1.bf16.msra.mxu1 %v13082_v24  ;;  %v13127_v24 = vld [vmem:[%s16017_s2 + $0x120] ss:$12 sps:$4 sm:$0xff]  }
 0x57e   :  { %3887 = vmatprep.subr.bf16.mxu1 %v13087_v20  ;;  %v13130_v20 = vld [vmem:[%s16017_s2 + $0x128] ss:$12 sps:$4 sm:$0xff]  }
 0x57f   :  { %12404 = vmatprep.subr.bf16.mxu0 %v13130_v20 }
 0x580   :  { %12405 = vmatpush3.bf16.msra.mxu0 %v13130_v20 }
 0x581   :  { %3888 = vmatpush1.bf16.msra.mxu1 %v13085_v22  ;;  %v13133_v22 = vld [vmem:[%s16017_s2 + $0x13c] ss:$12 sps:$4 sm:$0xff]  }
 0x582   :  { %3889 = vmatprep.subr.bf16.mxu1 %v13091_v25  ;;  %v13131_v25 = vld [vmem:[%s16017_s2 + $0x138] ss:$12 sps:$4 sm:$0xff]  }
 0x585   :  { %3890 = vmatpush1.bf16.msra.mxu1 %v13089_v26  ;;  %v13134_v26 = vld [vmem:[%s16017_s2 + $0x140] ss:$12 sps:$4 sm:$0xff]  }
 0x586   :  { %3891 = vmatprep.subr.bf16.mxu1 %v13095_v28  ;;  %12406 = vmatprep.subr.bf16.mxu0 %v13134_v26  ;;  %v13137_v28 = vld [vmem:[%s16017_s2 + $0x154] ss:$12 sps:$4 sm:$0xff]  }
 0x587   :  { %12407 = vmatpush3.bf16.msra.mxu0 %v13134_v26 }
 0x589   :  { %3892 = vmatpush1.bf16.msra.mxu1 %v13093_v29  ;;  %v13135_v29 = vld [vmem:[%s16017_s2 + $0x150] ss:$12 sps:$4 sm:$0xff]  }
 0x58a   :  { %12364 = vmatprep.subr.bf16.mxu1 %v13099_v30 }
 0x58c   :  { %3906 = vmatmul.mubr.bf16.vlgmr.msra.gmra.mrb[60].mxu1 %v3626_v27 }
 0x58d   :  { %12365 = vmatpush3.bf16.msra.mxu1 %v13099_v30  ;;  %12368 = vmatprep.mubr.msk.bf16.mxu1 %vm180_vm1, %v14725_v46  ;;  %v13138_v30 = vld [vmem:[%s16017_s2 + $0x158] ss:$12 sps:$4 sm:$0xff]  }
 0x58e   :  { %12594 = vmatprep.subr.msk.bf16.mxu1 %vm187_vm0, %v13101_v31  ;;  %v13141_v31 = vld [vmem:[%s16017_s2 + $0x16c] ss:$12 sps:$4 sm:$0xff]   ;;  %12408 = vmatprep.subr.bf16.mxu0 %v13138_v30 }
 0x58f   :  { %12409 = vmatpush3.bf16.msra.mxu0 %v13138_v30 }
 0x591   :  { %12367 = vmatpush3.bf16.msra.mxu1 %v4088_v32  ;;  %v13142_v32 = vld [vmem:[%s16017_s2 + $0x170] ss:$12 sps:$4 sm:$0xff]  }
 0x592   :  { %12380 = vmatprep.subr.bf16.mxu1 %v13105_v33  ;;  %12410 = vmatprep.subr.bf16.mxu0 %v13142_v32 }
 0x593   :  { %12411 = vmatpush3.bf16.msra.mxu0 %v13142_v32 }
 0x594   :  { %12369 = vmatmul.mubr.msk.bf16.vlgmr.msra.gmra.mrb[64].mxu1 %vm180_vm1, %v14717_v39 }
 0x595   :  { %12381 = vmatpush3.bf16.msra.mxu1 %v13105_v33  ;;  %12384 = vmatprep.mubr.msk.bf16.mxu1 %vm180_vm1, %v14742_v14  ;;  %v13139_v33 = vld [vmem:[%s16017_s2 + $0x168] ss:$12 sps:$4 sm:$0xff]  }
 0x596   :  { %12596 = vmatprep.subr.msk.bf16.mxu1 %vm187_vm0, %v13107_v35  ;;  %v13145_v35 = vld [vmem:[%s16017_s2 + $0x4] ss:$12 sps:$4 sm:$0xff]  }
 0x599   :  { %12383 = vmatpush3.bf16.msra.mxu1 %v4265_v19  ;;  %v14873_v19 = vld [vmem:[%s16017_s2 + $0x8] ss:$12 sps:$4 sm:$0xff]  }
 0x59a   :  { %4617 = vmatprep.subr.bf16.mxu1 %v13113_v44  ;;  %12416 = vmatprep.subr.bf16.mxu0 %v14873_v19 }
 0x59c   :  { %12385 = vmatmul.mubr.msk.bf16.vlgmr.msra.gmra.mrb[68].mxu1 %vm180_vm1, %v14738_v48 }
 0x59d   :  { %4649 = vmatprep.mubr.bf16.mxu1 %v13748_v21  ;;  %4618 = vmatpush1.bf16.msra.mxu1 %v13111_v49 }
 0x59e   :  { %4619 = vmatprep.subr.bf16.mxu1 %v13117_v55 }
 0x5a1   :  { %4620 = vmatpush1.bf16.msra.mxu1 %v13115_v60 }
 0x5a2   :  { %4621 = vmatprep.subr.bf16.mxu1 %v13121_v11 }
 0x5a5   :  { %4622 = vmatpush1.bf16.msra.mxu1 %v13119_v12 }
 0x5a6   :  { %4623 = vmatprep.subr.bf16.mxu1 %v13125_v50 }
 0x5a9   :  { %4624 = vmatpush1.bf16.msra.mxu1 %v13123_v15 }
 0x5aa   :  { %4625 = vmatprep.subr.bf16.mxu1 %v13129_v23 }
 0x5ad   :  { %4626 = vmatpush1.bf16.msra.mxu1 %v13127_v24 }
 0x5ae   :  { %4627 = vmatprep.subr.bf16.mxu1 %v13133_v22 }
 0x5b1   :  { %4628 = vmatpush1.bf16.msra.mxu1 %v13131_v25 }
 0x5b2   :  { %4629 = vmatprep.subr.bf16.mxu1 %v13137_v28 }
 0x5b5   :  { %4630 = vmatpush1.bf16.msra.mxu1 %v13135_v29 }
 0x5b6   :  { %4631 = vmatprep.subr.bf16.mxu1 %v13141_v31 }
 0x5b9   :  { %4632 = vmatpush1.bf16.msra.mxu1 %v13139_v33 }
 0x5ba   :  { %v14765_v27 = vpop.f32.mrb[48].mxu0  ;;  %4844 = vmatprep.subr.bf16.mxu1 %v13145_v35 }
 0x5bb   :  { %v14767_v46 = vpop.f32.mrb[49].mxu0 }
 0x5bc   :  { %v3870_v36 = vpop.f32.mrb[50].mxu0 }
 0x5bd   :  { %v3871_v39 = vpop.f32.mrb[51].mxu0  ;;  %v126_v36 = vld [vmem:[#allocation14 + $0x6] sm:$0xf] }
 0x5be   :  { %v14882_v49 = vrot.slane %v126_v36, %v14346_v61 }
 0x5bf   :  { %v14769_v37 = vpop.f32.mrb[44].mxu1 }
 0x5c0   :  { %v14771_v38 = vpop.f32.mrb[45].mxu1 }
 0x5c1   :  { %v3252_v14 = vpop.f32.mrb[46].mxu1 }
 0x5c2   :  { %v3253_v40 = vpop.f32.mrb[47].mxu1  ;;  %v14773_v41 = vpop.f32.mrb[52].mxu0 }
 0x5c3   :  { %v14775_v42 = vpop.f32.mrb[53].mxu0  ;;  %v14878_v40 = vrot.slane %v126_v36, %v14343_v59 }
 0x5c4   :  { %v12363_v43 = vpop.f32.mrb[54].mxu0 }
 0x5c5   :  { %v14777_v48 = vpop.f32.mrb[55].mxu0 }
 0x5cf   :  { %v14795_v53 = vpop.f32.mrb[56].mxu0 }
 0x5d0   :  { %v14803_v8 = vpop.f32.mrb[57].mxu0 }
 0x5d1   :  { %v12379_v34 = vpop.f32.mrb[58].mxu0 }
 0x5d2   :  { %v14805_v9 = vpop.f32.mrb[59].mxu0 }
 0x5d9   :  { %v14819_v13 = vpop.f32.mrb[60].mxu0 }
 0x5da   :  { %v14827_v18 = vpop.f32.mrb[61].mxu0 }
 0x5db   :  { %v12395_v51 = vpop.f32.mrb[62].mxu0 }
 0x5dc   :  { %v14829_v54 = vpop.f32.mrb[63].mxu0  ;;  %v14892_v51 = vrot.slane %v126_v36, %v14349_v62 }
 0x5e7   :  { %v14788_v57 = vpop.f32.mrb[48].mxu1 }
 0x5e8   :  { %v14790_v47 = vpop.f32.mrb[49].mxu1 }
 0x5e9   :  { %v3293_v52 = vpop.f32.mrb[50].mxu1 }
 0x5ea   :  { %v3294_v6 = vpop.f32.mrb[51].mxu1 }
 0x60f   :  { %v3533_v39 = vpop.f32.mrb[52].mxu1 }
 0x610   :  { %v3534_v14 = vadd.f32 %v3533_v39, %v14769_v37  ;;  %v3535_v43 = vpop.f32.mrb[53].mxu1 }
 0x611   :  { %v3536_v44 = vadd.f32 %v3535_v43, %v14771_v38  ;;  %v3537_v56 = vpop.f32.mrb[54].mxu1 }
 0x612   :  { %v3914_v55 = vadd.f32 %v14765_v27, %v3534_v14  ;;  %v3538_v52 = vpop.f32.mrb[55].mxu1 }
 0x613   :  { %v3915_v60 = vadd.f32 %v14767_v46, %v3536_v44  ;;  %v3933_v46 = vsub.s32 3, %v14340_v58 }
 0x614   :  { %v3939_v4 = vadd.f32 %v14878_v40, %v3914_v55 }
 0x615   :  { %v3940_v6 = vadd.f32 %v14882_v49, %v3915_v60  ;;  %v14896_v24 = vrot.slane %v126_v36, %v3933_v46 }
 0x616   :  { %v3943_v37 = vmax.f32 %v3939_v4, 0.0 }
 0x617   :  { %v3944_v34 = vmax.f32 %v3940_v6, 0.0 }
 0x618   :  { %v3947_v11 = vpack.c.bf16 %v3943_v37, %v3943_v37 }
 0x619   :  { %v3948_v12 = vpack.c.bf16 %v3944_v34, %v3944_v34 }
 0x61a   :  { %3951 = vst [vmem:[#allocation5] sm:$0xf] %v3947_v11 }
 0x61b   :  { %3952 = vst [vmem:[#allocation5 + $0x8] sm:$0xf] %v3948_v12 }
 0x637   :  { %v3574_v38 = vpop.f32.mrb[56].mxu1 }
 0x638   :  { %v3575_v45 = vadd.f32 %v3574_v38, %v14788_v57  ;;  %v3576_v50 = vpop.f32.mrb[57].mxu1  ;;  %v13573_v38 = vld [vmem:[#allocation14] ss:$0 sm:$0xff] }
 0x639   :  { %v3577_v15 = vadd.f32 %v3576_v50, %v14790_v47  ;;  %v3578_v27 = vpop.f32.mrb[58].mxu1 }
 0x63a   :  { %v3579_v17 = vpop.f32.mrb[59].mxu1 }
 0x65f   :  { %v3907_v23 = vpop.f32.mrb[60].mxu1 }
 0x660   :  { %v3916_v20 = vadd.f32 %v3907_v23, %v3575_v45  ;;  %v3909_v22 = vpop.f32.mrb[61].mxu1 }
 0x661   :  { %v3917_v25 = vadd.f32 %v3909_v22, %v3577_v15  ;;  %v3911_v26 = vpop.f32.mrb[62].mxu1 }
 0x662   :  { %v3941_v57 = vadd.f32 %v14892_v51, %v3916_v20  ;;  %v3912_v28 = vpop.f32.mrb[63].mxu1 }
 0x663   :  { %v3942_v47 = vadd.f32 %v14896_v24, %v3917_v25 }
 0x664   :  { %v3945_v29 = vmax.f32 %v3941_v57, 0.0 }
 0x665   :  { %v3946_v30 = vmax.f32 %v3942_v47, 0.0 }
 0x666   :  { %v3949_v31 = vpack.c.bf16 %v3945_v29, %v3945_v29  ;;  %v13149_v29 = vld [vmem:[%s16017_s2 + $0x1c] ss:$12 sps:$4 sm:$0xff]  }
 0x667   :  { %v3950_v32 = vpack.c.bf16 %v3946_v30, %v3946_v30  ;;  %v12370_v33 = vpop.f32.mrb[64].mxu1  ;;  %v13150_v30 = vld [vmem:[%s16017_s2 + $0x20] ss:$12 sps:$4 sm:$0xff]  }
 0x668   :  { %3953 = vst [vmem:[#allocation5 + $0x10] sm:$0xf] %v3949_v31  ;;  %v4133_v35 = vadd.f32 %v12370_v33, %v14773_v41  ;;  %v4124_v39 = vpop.f32.mrb[65].mxu1  ;;  %v13147_v31 = vld [vmem:[%s16017_s2 + $0x18] ss:$12 sps:$4 sm:$0xff]  }
 0x669   :  { %3954 = vst [vmem:[#allocation5 + $0x18] sm:$0xf] %v3950_v32  ;;  %v4125_v36 = vadd.f32 %v4124_v39, %v14775_v42  ;;  %v12371_v14 = vpop.f32.mrb[66].mxu1  ;;  %v13153_v32 = vld [vmem:[%s16017_s2 + $0x34] ss:$12 sps:$4 sm:$0xff]  }
 0x66a   :  { %v4127_v43 = vpop.f32.mrb[67].mxu1  ;;  %v4220_v44 = vadd.f32 %v14795_v53, %v4133_v35  ;;  %v13154_v33 = vld [vmem:[%s16017_s2 + $0x38] ss:$12 sps:$4 sm:$0xff]   ;;  %v13151_v35 = vld [vmem:[%s16017_s2 + $0x30] ss:$12 sps:$4 sm:$0xff]  }
 0x66b   :  { %v4128_v56 = vadd.f32 %v4127_v43, %v14777_v48  ;;  %v4218_v55 = vadd.f32 %v14803_v8, %v4125_v36  ;;  %v13158_v39 = vld [vmem:[%s16017_s2 + $0x50] ss:$12 sps:$4 sm:$0xff]   ;;  %v13155_v36 = vld [vmem:[%s16017_s2 + $0x48] ss:$12 sps:$4 sm:$0xff]  }
 0x66c   :  { %v13161_v14 = vld [vmem:[%s16017_s2 + $0x64] ss:$12 sps:$4 sm:$0xff]   ;;  %v13162_v43 = vld [vmem:[%s16017_s2 + $0x68] ss:$12 sps:$4 sm:$0xff]  }
 0x66d   :  { %v4219_v52 = vadd.f32 %v14805_v9, %v4128_v56  ;;  %v13165_v56 = vld [vmem:[%s16017_s2 + $0x7c] ss:$12 sps:$4 sm:$0xff]  }
 0x66f   :  { %v12386_v60 = vpop.f32.mrb[68].mxu1 }
 0x670   :  { %v4317_v4 = vadd.f32 %v12386_v60, %v4220_v44  ;;  %v4301_v6 = vpop.f32.mrb[69].mxu1  ;;  %v13159_v44 = vld [vmem:[%s16017_s2 + $0x60] ss:$12 sps:$4 sm:$0xff]  }
 0x671   :  { %v4315_v37 = vadd.f32 %v4301_v6, %v4218_v55  ;;  %v12387_v34 = vpop.f32.mrb[70].mxu1  ;;  %v13166_v55 = vld [vmem:[%s16017_s2 + $0x80] ss:$12 sps:$4 sm:$0xff]   ;;  %v13167_v6 = vld [vmem:[%s16017_s2 + $0x90] ss:$12 sps:$4 sm:$0xff]  }
 0x672   :  { %v4394_v41 = vadd.f32 %v14819_v13, %v4317_v4  ;;  %v4304_v11 = vpop.f32.mrb[71].mxu1  ;;  %v13169_v60 = vld [vmem:[%s16017_s2 + $0x94] ss:$12 sps:$4 sm:$0xff]   ;;  %v13170_v4 = vld [vmem:[%s16017_s2 + $0x98] ss:$12 sps:$4 sm:$0xff]  }
 0x673   :  { %v4392_v42 = vadd.f32 %v14827_v18, %v4315_v37  ;;  %v4316_v12 = vadd.f32 %v4304_v11, %v4219_v52  ;;  %v13163_v52 = vld [vmem:[%s16017_s2 + $0x78] ss:$12 sps:$4 sm:$0xff]   ;;  %v13174_v34 = vld [vmem:[%s16017_s2 + $0xb0] ss:$12 sps:$4 sm:$0xff]  }
 0x674   :  { %v4397_v45 = vadd.f32 %v13573_v38, %v4394_v41  ;;  %v13173_v37 = vld [vmem:[%s16017_s2 + $0xac] ss:$12 sps:$4 sm:$0xff]   ;;  %v13171_v41 = vld [vmem:[%s16017_s2 + $0xa8] ss:$12 sps:$4 sm:$0xff]   ;;  %v13177_v11 = vld [vmem:[%s16017_s2 + $0x184] ss:$12 sps:$4 sm:$0xff]  }
 0x675   :  { %v4395_v53 = vadd.f32 %v13573_v38, %v4392_v42  ;;  %v4393_v48 = vadd.f32 %v14829_v54, %v4316_v12  ;;  %v13143_v54 = vld [vmem:[%s16017_s2] ss:$12 sps:$4 sm:$0xff]   ;;  %v13178_v12 = vld [vmem:[%s16017_s2 + $0x188] ss:$12 sps:$4 sm:$0xff]  }
 0x676   :  { %v4400_v50 = vmax.f32 %v4397_v45, 0.0 }
 0x677   :  { %v4396_v8 = vadd.f32 %v13573_v38, %v4393_v48  ;;  %v4398_v9 = vmax.f32 %v4395_v53, 0.0  ;;  %v13175_v38 = vld [vmem:[%s16017_s2 + $0x180] ss:$12 sps:$4 sm:$0xff]   ;;  %v13181_v48 = vld [vmem:[%s16017_s2 + $0x19c] ss:$12 sps:$4 sm:$0xff]  }
 0x678   :  { %v4402_v15 = vpack.c.bf16 %v4400_v50, %v4400_v50  ;;  %v13182_v50 = vld [vmem:[%s16017_s2 + $0x1a0] ss:$12 sps:$4 sm:$0xff]  }
 0x679   :  { %v4399_v27 = vmax.f32 %v4396_v8, 0.0 }
 0x67a   :  { %4404 = vst [vmem:[#allocation2 + $0x18] sm:$0xf] %v4402_v15 }
 0x67b   :  { %v14909_v17 = vpack.c.bf16 %v4399_v27, %v4398_v9  ;;  %v13179_v9 = vld [vmem:[%s16017_s2 + $0x198] ss:$12 sps:$4 sm:$0xff]   ;;  %v13185_v27 = vld [vmem:[%s16017_s2 + $0x1b4] ss:$12 sps:$4 sm:$0xff]  }
 0x67d   :  { %4403 = vst [vmem:[#allocation2 + $0x10] sm:$0xff] %v14909_v17  ;;  %v4475_v13 = vshll.u32 %v14909_v17, 16  ;;  %v4473_v20 = vshrl.u32 %v14909_v17, 16 }
 0x67f   :  { %v4477_v23 = vrot.slane %v4475_v13, 1  ;;  %v13183_v13 = vld [vmem:[%s16017_s2 + $0x1b0] ss:$12 sps:$4 sm:$0xff]  }
 0x681   :  { %v14913_v18 = vld [vmem:[#allocation2 + $0x18] sm:$0x7]  ;;  %v4478_v25 = vor.u32 %v4477_v23, %v4473_v20  ;;  %v13187_v20 = vld [vmem:[%s16017_s2 + $0x1c8] ss:$12 sps:$4 sm:$0xff]  }
 0x682   :  { %v4480_v22 = vshll.u32 %v14913_v18, 16  ;;  %v4484_v57 = vshrl.u32 %v14913_v18, 16  ;;  %v15002_v53 = vrot.slane %v14913_v18, 1  ;;  %v4406_v8 = vld [vmem:[#allocation2 + $0x18] sm:$0x3] }
 0x683   :  { %v13189_v23 = vld [vmem:[%s16017_s2 + $0x1cc] ss:$12 sps:$4 sm:$0xff]   ;;  %v13190_v18 = vld [vmem:[%s16017_s2 + $0x1d0] ss:$12 sps:$4 sm:$0xff]  }
 0x684   :  { %v4482_v26 = vrot.slane %v4480_v22, 1  ;;  %v14992_v42 = vld [vmem:[#allocation2 + $0x10] sm:$0xfe] }
 0x685   :  { %v4978_v45 = vrot.slane %v14992_v42, 1  ;;  %v13193_v22 = vld [vmem:[%s16017_s2 + $0x1e4] ss:$12 sps:$4 sm:$0xff]  }
 0x686   :  { %v4483_v28 = vsel %vm153_vm2, %v4478_v25, %v4482_v26  ;;  %v4486_v47 = vor.u32 %v4484_v57, %v4482_v26  ;;  %v13191_v25 = vld [vmem:[%s16017_s2 + $0x1e0] ss:$12 sps:$4 sm:$0xff]   ;;  %v13197_v26 = vld [vmem:[%s16017_s2 + $0x1fc] ss:$12 sps:$4 sm:$0xff]  }
 0x687   :  { %4650 = vmatmul.mubr.bf16.vlgmr.msra.gmra.mrb[72].mxu1 %v4483_v28  ;;  %12412 = vmatprep.mubr.bf16.mxu0 %v4483_v28  ;;  %v15013_v15 = vsel %vm316_vm3, %v4978_v45, %v15002_v53  ;;  %v13198_v57 = vld [vmem:[%s16017_s2 + $0x200] ss:$12 sps:$4 sm:$0xff]   ;;  %v13195_v28 = vld [vmem:[%s16017_s2 + $0x1f8] ss:$12 sps:$4 sm:$0xff]   ;;  %v13215_v45 = vld [vmem:[%s16017_s2 + $0x270] ss:$12 sps:$4 sm:$0xff]  }
 0x688   :  { %4845 = vmatpush1.bf16.msra.mxu1 %v13143_v54  ;;  %12413 = vmatmul.mubr.bf16.vlgmr.msra.gmra.mrb[64].mxu0 %v4486_v47  ;;  %v13194_v54 = vld [vmem:[%s16017_s2 + $0x1e8] ss:$12 sps:$4 sm:$0xff]  }
 0x689   :  { %12417 = vmatpush3.bf16.msra.mxu0 %v14873_v19  ;;  %12432 = vmatprep.mubr.bf16.mxu0 %v14909_v17  ;;  %v13157_v19 = vld [vmem:[%s16017_s2 + $0x4c] ss:$12 sps:$4 sm:$0xff]  }
 0x68a   :  { %4846 = vmatprep.subr.bf16.mxu1 %v13149_v29  ;;  %12418 = vmatprep.subr.bf16.mxu0 %v13150_v30  ;;  %v13202_v29 = vld [vmem:[%s16017_s2 + $0x218] ss:$12 sps:$4 sm:$0xff]  }
 0x68b   :  { %4659 = vmatprep.mubr.bf16.mxu1 %v13748_v21 }
 0x68c   :  { %4847 = vmatpush1.bf16.msra.mxu1 %v13147_v31  ;;  %v13199_v31 = vld [vmem:[%s16017_s2 + $0x210] ss:$12 sps:$4 sm:$0xff]  }
 0x68d   :  { %12419 = vmatpush3.bf16.msra.mxu0 %v13150_v30  ;;  %4848 = vmatprep.subr.bf16.mxu1 %v13153_v32  ;;  %v15063_v30 = vld [vmem:[#allocation2 + $0x18] sm:$0xf]  ;;  %v5253_v32 = vshrl.u32 %v14992_v42, 16 }
 0x68e   :  { %12420 = vmatprep.subr.bf16.mxu0 %v13154_v33 }
 0x68f   :  { %4660 = vmatmul.mubr.bf16.gmra.mrb[76].mxu1 %v4486_v47  ;;  %v13201_v47 = vld [vmem:[%s16017_s2 + $0x214] ss:$12 sps:$4 sm:$0xff]  }
 0x690   :  { %4849 = vmatpush1.bf16.msra.mxu1 %v13151_v35  ;;  %4876 = vmatprep.mubr.bf16.mxu1 %v13748_v21  ;;  %v13205_v35 = vld [vmem:[%s16017_s2 + $0x22c] ss:$12 sps:$4 sm:$0xff]  }
 0x691   :  { %12421 = vmatpush3.bf16.msra.mxu0 %v13154_v33  ;;  %4850 = vmatprep.subr.bf16.mxu1 %v13157_v19  ;;  %v5256_v33 = vshll.u32 %v14992_v42, 16  ;;  %v13206_v19 = vld [vmem:[%s16017_s2 + $0x230] ss:$12 sps:$4 sm:$0xff]   ;;  %v13211_v42 = vld [vmem:[%s16017_s2 + $0x258] ss:$12 sps:$4 sm:$0xff]  }
 0x692   :  { %12422 = vmatprep.subr.bf16.mxu0 %v13158_v39 }
 0x694   :  { %4851 = vmatpush1.bf16.msra.mxu1 %v13155_v36  ;;  %v5264_v36 = vshll.u32 %v15063_v30, 16 }
 0x695   :  { %12423 = vmatpush3.bf16.msra.mxu0 %v13158_v39  ;;  %4852 = vmatprep.subr.bf16.mxu1 %v13161_v14  ;;  %v5261_v39 = vshrl.u32 %v15063_v30, 16  ;;  %v13203_v14 = vld [vmem:[%s16017_s2 + $0x228] ss:$12 sps:$4 sm:$0xff]  }
 0x696   :  { %12424 = vmatprep.subr.bf16.mxu0 %v13162_v43 }
 0x698   :  { %4853 = vmatpush1.bf16.msra.mxu1 %v13159_v44  ;;  %v5258_v44 = vrot.slane %v5256_v33, 2  ;;  %v13246_v33 = vld [vmem:[%s16017_s2 + $0x320] ss:$12 sps:$4 sm:$0xff]  }
 0x699   :  { %12425 = vmatpush3.bf16.msra.mxu0 %v13162_v43  ;;  %4854 = vmatprep.subr.bf16.mxu1 %v13165_v56  ;;  %v5255_v43 = vrot.slane %v5253_v32, 1  ;;  %v13209_v56 = vld [vmem:[%s16017_s2 + $0x244] ss:$12 sps:$4 sm:$0xff]   ;;  %v13245_v32 = vld [vmem:[%s16017_s2 + $0x31c] ss:$12 sps:$4 sm:$0xff]  }
 0x69a   :  { %12426 = vmatprep.subr.bf16.mxu0 %v13166_v55 }
 0x69c   :  { %4855 = vmatpush1.bf16.msra.mxu1 %v13163_v52  ;;  %v5263_v52 = vrot.slane %v5261_v39, 1  ;;  %v13250_v39 = vld [vmem:[%s16017_s2 + $0x338] ss:$12 sps:$4 sm:$0xff]  }
 0x69d   :  { %12427 = vmatpush3.bf16.msra.mxu0 %v13166_v55  ;;  %4856 = vmatprep.subr.bf16.mxu1 %v13169_v60  ;;  %v13210_v55 = vld [vmem:[%s16017_s2 + $0x248] ss:$12 sps:$4 sm:$0xff]   ;;  %v5266_v60 = vrot.slane %v5264_v36, 2  ;;  %v13247_v36 = vld [vmem:[%s16017_s2 + $0x330] ss:$12 sps:$4 sm:$0xff]  }
 0x69e   :  { %12428 = vmatprep.subr.bf16.mxu0 %v13170_v4 }
 0x6a0   :  { %4857 = vmatpush1.bf16.msra.mxu1 %v13167_v6  ;;  %v5259_v6 = vor.u32 %v5258_v44, %v5255_v43  ;;  %v13254_v43 = vld [vmem:[%s16017_s2 + $0x350] ss:$12 sps:$4 sm:$0xff]   ;;  %v13251_v44 = vld [vmem:[%s16017_s2 + $0x348] ss:$12 sps:$4 sm:$0xff]  }
 0x6a1   :  { %12429 = vmatpush3.bf16.msra.mxu0 %v13170_v4  ;;  %4858 = vmatprep.subr.bf16.mxu1 %v13173_v37  ;;  %v13207_v4 = vld [vmem:[%s16017_s2 + $0x240] ss:$12 sps:$4 sm:$0xff]   ;;  %v15090_v37 = vor.u32 %v5266_v60, %v5263_v52  ;;  %v13261_v60 = vld [vmem:[%s16017_s2 + $0x37c] ss:$12 sps:$4 sm:$0xff]  }
 0x6a2   :  { %12430 = vmatprep.subr.bf16.mxu0 %v13174_v34  ;;  %v13255_v52 = vld [vmem:[%s16017_s2 + $0x360] ss:$12 sps:$4 sm:$0xff]  }
 0x6a4   :  { %4859 = vmatpush1.bf16.msra.mxu1 %v13171_v41  ;;  %v13214_v41 = vld [vmem:[%s16017_s2 + $0x260] ss:$12 sps:$4 sm:$0xff]  }
 0x6a5   :  { %12431 = vmatpush3.bf16.msra.mxu0 %v13174_v34  ;;  %5111 = vmatprep.subr.bf16.mxu1 %v13177_v11  ;;  %v13213_v34 = vld [vmem:[%s16017_s2 + $0x25c] ss:$12 sps:$4 sm:$0xff]   ;;  %v5268_v11 = vsel %vm400_vm4, %v5259_v6, %v15090_v37  ;;  %v13259_v6 = vld [vmem:[%s16017_s2 + $0x378] ss:$12 sps:$4 sm:$0xff]  }
 0x6a6   :  { %12436 = vmatprep.subr.bf16.mxu0 %v13178_v12 }
 0x6a7   :  { %4877 = vmatmul.mubr.bf16.vlgmr.msra.gmra.mrb[72].mxu1 %v14909_v17  ;;  %v13186_v17 = vld [vmem:[%s16017_s2 + $0x1b8] ss:$12 sps:$4 sm:$0xff]  }
 0x6a8   :  { %12433 = vmatmul.mubr.bf16.vlgmr.msra.gmra.mrb[68].mxu0 %v4406_v8  ;;  %5112 = vmatpush1.bf16.msra.mxu1 %v13175_v38  ;;  %v13218_v38 = vld [vmem:[%s16017_s2 + $0x278] ss:$12 sps:$4 sm:$0xff]  }
 0x6a9   :  { %12437 = vmatpush3.bf16.msra.mxu0 %v13178_v12  ;;  %12452 = vmatprep.mubr.bf16.mxu0 %v15013_v15  ;;  %v13217_v12 = vld [vmem:[%s16017_s2 + $0x274] ss:$12 sps:$4 sm:$0xff]  }
 0x6aa   :  { %5113 = vmatprep.subr.bf16.mxu1 %v13181_v48  ;;  %12438 = vmatprep.subr.bf16.mxu0 %v13182_v50  ;;  %v13221_v48 = vld [vmem:[%s16017_s2 + $0x28c] ss:$12 sps:$4 sm:$0xff]  }
 0x6ab   :  { %4886 = vmatprep.mubr.bf16.mxu1 %v13748_v21 }
 0x6ac   :  { %5114 = vmatpush1.bf16.msra.mxu1 %v13179_v9  ;;  %v13226_v9 = vld [vmem:[%s16017_s2 + $0x2a8] ss:$12 sps:$4 sm:$0xff]  }
 0x6ad   :  { %12439 = vmatpush3.bf16.msra.mxu0 %v13182_v50  ;;  %5115 = vmatprep.subr.bf16.mxu1 %v13185_v27  ;;  %v13222_v50 = vld [vmem:[%s16017_s2 + $0x290] ss:$12 sps:$4 sm:$0xff]  }
 0x6ae   :  { %12440 = vmatprep.subr.bf16.mxu0 %v13186_v17  ;;  %v13229_v27 = vld [vmem:[%s16017_s2 + $0x2bc] ss:$12 sps:$4 sm:$0xff]  }
 0x6af   :  { %4887 = vmatmul.mubr.bf16.gmra.mrb[80].mxu1 %v4406_v8  ;;  %v13219_v8 = vld [vmem:[%s16017_s2 + $0x288] ss:$12 sps:$4 sm:$0xff]  }
 0x6b0   :  { %5116 = vmatpush1.bf16.msra.mxu1 %v13183_v13  ;;  %5143 = vmatprep.mubr.bf16.mxu1 %v13748_v21  ;;  %v13227_v13 = vld [vmem:[%s16017_s2 + $0x2b8] ss:$12 sps:$4 sm:$0xff]  }
 0x6b1   :  { %12441 = vmatpush3.bf16.msra.mxu0 %v13186_v17  ;;  %5117 = vmatprep.subr.bf16.mxu1 %v13189_v23  ;;  %v13230_v17 = vld [vmem:[%s16017_s2 + $0x2c0] ss:$12 sps:$4 sm:$0xff]  }
 0x6b2   :  { %12442 = vmatprep.subr.bf16.mxu0 %v13190_v18  ;;  %v13233_v23 = vld [vmem:[%s16017_s2 + $0x2d4] ss:$12 sps:$4 sm:$0xff]  }
 0x6b4   :  { %5118 = vmatpush1.bf16.msra.mxu1 %v13187_v20  ;;  %v13231_v20 = vld [vmem:[%s16017_s2 + $0x2d0] ss:$12 sps:$4 sm:$0xff]  }
 0x6b5   :  { %12443 = vmatpush3.bf16.msra.mxu0 %v13190_v18  ;;  %5119 = vmatprep.subr.bf16.mxu1 %v13193_v22  ;;  %v13234_v18 = vld [vmem:[%s16017_s2 + $0x2d8] ss:$12 sps:$4 sm:$0xff]  }
 0x6b6   :  { %12444 = vmatprep.subr.bf16.mxu0 %v13194_v54  ;;  %v13237_v22 = vld [vmem:[%s16017_s2 + $0x2ec] ss:$12 sps:$4 sm:$0xff]  }
 0x6b8   :  { %5120 = vmatpush1.bf16.msra.mxu1 %v13191_v25  ;;  %v13235_v25 = vld [vmem:[%s16017_s2 + $0x2e8] ss:$12 sps:$4 sm:$0xff]  }
 0x6b9   :  { %12445 = vmatpush3.bf16.msra.mxu0 %v13194_v54  ;;  %5121 = vmatprep.subr.bf16.mxu1 %v13197_v26  ;;  %v13238_v54 = vld [vmem:[%s16017_s2 + $0x2f0] ss:$12 sps:$4 sm:$0xff]  }
 0x6ba   :  { %12446 = vmatprep.subr.bf16.mxu0 %v13198_v57  ;;  %v13241_v26 = vld [vmem:[%s16017_s2 + $0x304] ss:$12 sps:$4 sm:$0xff]  }
 0x6bc   :  { %5122 = vmatpush1.bf16.msra.mxu1 %v13195_v28  ;;  %v13242_v28 = vld [vmem:[%s16017_s2 + $0x308] ss:$12 sps:$4 sm:$0xff]  }
 0x6bd   :  { %12447 = vmatpush3.bf16.msra.mxu0 %v13198_v57  ;;  %5123 = vmatprep.subr.bf16.mxu1 %v13201_v47  ;;  %v5507_v57 = vld [vmem:[#allocation2 + $0x10] sm:$0xfc]  ;;  %v13239_v47 = vld [vmem:[%s16017_s2 + $0x300] ss:$12 sps:$4 sm:$0xff]  }
 0x6be   :  { %12448 = vmatprep.subr.bf16.mxu0 %v13202_v29 }
 0x6c0   :  { %5124 = vmatpush1.bf16.msra.mxu1 %v13199_v31  ;;  %v15172_v31 = vrot.slane %v15063_v30, 2  ;;  %v13243_v30 = vld [vmem:[%s16017_s2 + $0x318] ss:$12 sps:$4 sm:$0xff]  }
 0x6c1   :  { %12449 = vmatpush3.bf16.msra.mxu0 %v13202_v29  ;;  %5125 = vmatprep.subr.bf16.mxu1 %v13205_v35  ;;  %v5542_v29 = vrot.slane %v5507_v57, 2 }
 0x6c2   :  { %12450 = vmatprep.subr.bf16.mxu0 %v13206_v19 }
 0x6c3   :  { %v5544_v35 = vsel %vm187_vm0, %v5542_v29, %v15172_v31 }
 0x6c4   :  { %5126 = vmatpush1.bf16.msra.mxu1 %v13203_v14  ;;  %v13253_v14 = vld [vmem:[%s16017_s2 + $0x34c] ss:$12 sps:$4 sm:$0xff]  }
 0x6c5   :  { %12451 = vmatpush3.bf16.msra.mxu0 %v13206_v19  ;;  %5399 = vmatprep.subr.bf16.mxu1 %v13209_v56  ;;  %v13249_v19 = vld [vmem:[%s16017_s2 + $0x334] ss:$12 sps:$4 sm:$0xff]   ;;  %v13257_v56 = vld [vmem:[%s16017_s2 + $0x364] ss:$12 sps:$4 sm:$0xff]  }
 0x6c6   :  { %12456 = vmatprep.subr.bf16.mxu0 %v13210_v55 }
 0x6c7   :  { %5144 = vmatmul.mubr.bf16.vlgmr.msra.gmra.mrb[72].mxu1 %v15013_v15  ;;  %v13225_v15 = vld [vmem:[%s16017_s2 + $0x2a4] ss:$12 sps:$4 sm:$0xff]  }
 0x6c8   :  { %12453 = vmatmul.mubr.bf16.vlgmr.msra.gmra.mrb[72].mxu0 %v15002_v53  ;;  %5400 = vmatpush1.bf16.msra.mxu1 %v13207_v4  ;;  %v13262_v4 = vld [vmem:[%s16017_s2 + $0x380] ss:$12 sps:$4 sm:$0xff]  }
 0x6c9   :  { %12457 = vmatpush3.bf16.msra.mxu0 %v13210_v55  ;;  %12472 = vmatprep.mubr.bf16.mxu0 %v5268_v11  ;;  %v13258_v55 = vld [vmem:[%s16017_s2 + $0x368] ss:$12 sps:$4 sm:$0xff]  }
 0x6ca   :  { %5401 = vmatprep.subr.bf16.mxu1 %v13213_v34  ;;  %12458 = vmatprep.subr.bf16.mxu0 %v13214_v41  ;;  %v13266_v34 = vld [vmem:[%s16017_s2 + $0x398] ss:$12 sps:$4 sm:$0xff]  }
 0x6cb   :  { %5153 = vmatprep.mubr.bf16.mxu1 %v13748_v21 }
 0x6cc   :  { %5402 = vmatpush1.bf16.msra.mxu1 %v13211_v42  ;;  %v13270_v42 = vld [vmem:[%s16017_s2 + $0x3b0] ss:$12 sps:$4 sm:$0xff]  }
 0x6cd   :  { %12459 = vmatpush3.bf16.msra.mxu0 %v13214_v41  ;;  %5403 = vmatprep.subr.bf16.mxu1 %v13217_v12  ;;  %v13263_v41 = vld [vmem:[%s16017_s2 + $0x390] ss:$12 sps:$4 sm:$0xff]   ;;  %v13267_v12 = vld [vmem:[%s16017_s2 + $0x3a8] ss:$12 sps:$4 sm:$0xff]  }
 0x6ce   :  { %12460 = vmatprep.subr.bf16.mxu0 %v13218_v38 }
 0x6cf   :  { %5154 = vmatmul.mubr.bf16.gmra.mrb[84].mxu1 %v15002_v53  ;;  %v13223_v53 = vld [vmem:[%s16017_s2 + $0x2a0] ss:$12 sps:$4 sm:$0xff]  }
 0x6d0   :  { %5404 = vmatpush1.bf16.msra.mxu1 %v13215_v45  ;;  %5431 = vmatprep.mubr.bf16.mxu1 %v13748_v21 }
 0x6d1   :  { %12461 = vmatpush3.bf16.msra.mxu0 %v13218_v38  ;;  %5405 = vmatprep.subr.bf16.mxu1 %v13221_v48 }
 0x6d2   :  { %12462 = vmatprep.subr.bf16.mxu0 %v13222_v50 }
 0x6d4   :  { %5406 = vmatpush1.bf16.msra.mxu1 %v13219_v8 }
 0x6d5   :  { %12463 = vmatpush3.bf16.msra.mxu0 %v13222_v50  ;;  %5407 = vmatprep.subr.bf16.mxu1 %v13225_v15 }
 0x6d6   :  { %12464 = vmatprep.subr.bf16.mxu0 %v13226_v9 }
 0x6d8   :  { %5408 = vmatpush1.bf16.msra.mxu1 %v13223_v53 }
 0x6d9   :  { %12465 = vmatpush3.bf16.msra.mxu0 %v13226_v9  ;;  %5409 = vmatprep.subr.bf16.mxu1 %v13229_v27 }
 0x6da   :  { %12466 = vmatprep.subr.bf16.mxu0 %v13230_v17 }
 0x6dc   :  { %5410 = vmatpush1.bf16.msra.mxu1 %v13227_v13 }
 0x6dd   :  { %12467 = vmatpush3.bf16.msra.mxu0 %v13230_v17  ;;  %5411 = vmatprep.subr.bf16.mxu1 %v13233_v23 }
 0x6de   :  { %12468 = vmatprep.subr.bf16.mxu0 %v13234_v18 }
 0x6e0   :  { %5412 = vmatpush1.bf16.msra.mxu1 %v13231_v20 }
 0x6e1   :  { %12469 = vmatpush3.bf16.msra.mxu0 %v13234_v18  ;;  %5413 = vmatprep.subr.bf16.mxu1 %v13237_v22 }
 0x6e2   :  { %12470 = vmatprep.subr.bf16.mxu0 %v13238_v54 }
 0x6e4   :  { %5414 = vmatpush1.bf16.msra.mxu1 %v13235_v25 }
 0x6e5   :  { %12471 = vmatpush3.bf16.msra.mxu0 %v13238_v54  ;;  %5675 = vmatprep.subr.bf16.mxu1 %v13241_v26 }
 0x6e6   :  { %12476 = vmatprep.subr.bf16.mxu0 %v13242_v28 }
 0x6e7   :  { %5432 = vmatmul.mubr.bf16.vlgmr.msra.gmra.mrb[72].mxu1 %v5268_v11  ;;  %v13269_v11 = vld [vmem:[%s16017_s2 + $0x3ac] ss:$12 sps:$4 sm:$0xff]  }
 0x6e8   :  { %12473 = vmatmul.mubr.bf16.vlgmr.msra.gmra.mrb[76].mxu0 %v15090_v37  ;;  %5676 = vmatpush1.bf16.msra.mxu1 %v13239_v47 }
 0x6e9   :  { %12477 = vmatpush3.bf16.msra.mxu0 %v13242_v28  ;;  %12492 = vmatprep.mubr.bf16.mxu0 %v5544_v35 }
 0x6ea   :  { %5677 = vmatprep.subr.bf16.mxu1 %v13245_v32  ;;  %12478 = vmatprep.subr.bf16.mxu0 %v13246_v33 }
 0x6eb   :  { %5441 = vmatprep.mubr.bf16.mxu1 %v13748_v21 }
 0x6ec   :  { %5678 = vmatpush1.bf16.msra.mxu1 %v13243_v30 }
 0x6ed   :  { %12479 = vmatpush3.bf16.msra.mxu0 %v13246_v33  ;;  %5679 = vmatprep.subr.bf16.mxu1 %v13249_v19 }
 0x6ee   :  { %12480 = vmatprep.subr.bf16.mxu0 %v13250_v39 }
 0x6ef   :  { %5442 = vmatmul.mubr.bf16.gmra.mrb[88].mxu1 %v15090_v37  ;;  %v13265_v37 = vld [vmem:[%s16017_s2 + $0x394] ss:$12 sps:$4 sm:$0xff]  }
 0x6f0   :  { %5680 = vmatpush1.bf16.msra.mxu1 %v13247_v36  ;;  %5707 = vmatprep.mubr.bf16.mxu1 %v13748_v21 }
 0x6f1   :  { %12481 = vmatpush3.bf16.msra.mxu0 %v13250_v39  ;;  %5681 = vmatprep.subr.bf16.mxu1 %v13253_v14 }
 0x6f2   :  { %12482 = vmatprep.subr.bf16.mxu0 %v13254_v43 }
 0x6f4   :  { %5682 = vmatpush1.bf16.msra.mxu1 %v13251_v44 }
 0x6f5   :  { %12483 = vmatpush3.bf16.msra.mxu0 %v13254_v43  ;;  %5683 = vmatprep.subr.bf16.mxu1 %v13257_v56 }
 0x6f6   :  { %12484 = vmatprep.subr.bf16.mxu0 %v13258_v55 }
 0x6f8   :  { %5684 = vmatpush1.bf16.msra.mxu1 %v13255_v52 }
 0x6f9   :  { %12485 = vmatpush3.bf16.msra.mxu0 %v13258_v55  ;;  %5685 = vmatprep.subr.bf16.mxu1 %v13261_v60 }
 0x6fa   :  { %12486 = vmatprep.subr.bf16.mxu0 %v13262_v4 }
 0x6fc   :  { %5686 = vmatpush1.bf16.msra.mxu1 %v13259_v6 }
 0x6fd   :  { %12487 = vmatpush3.bf16.msra.mxu0 %v13262_v4  ;;  %5687 = vmatprep.subr.bf16.mxu1 %v13265_v37 }
 0x6fe   :  { %12488 = vmatprep.subr.bf16.mxu0 %v13266_v34 }
 0x700   :  { %5688 = vmatpush1.bf16.msra.mxu1 %v13263_v41 }
 0x701   :  { %12489 = vmatpush3.bf16.msra.mxu0 %v13266_v34  ;;  %5689 = vmatprep.subr.bf16.mxu1 %v13269_v11 }
 0x702   :  { %12490 = vmatprep.subr.bf16.mxu0 %v13270_v42 }
 0x704   :  { %5690 = vmatpush1.bf16.msra.mxu1 %v13267_v12 }
 0x705   :  { %12491 = vmatpush3.bf16.msra.mxu0 %v13270_v42  ;;  %12496 = vmatprep.subr.bf16.mxu1 %v13749_v16 }
 0x707   :  { %5708 = vmatmul.mubr.bf16.vlgmr.msra.gmra.mrb[72].mxu1 %v5544_v35 }
 0x708   :  { %12493 = vmatmul.mubr.bf16.vlgmr.msra.gmra.mrb[80].mxu0 %v15172_v31  ;;  %5717 = vmatprep.mubr.bf16.mxu1 %v13748_v21 }
 0x709   :  { %5870 = vmatprep.mubr.bf16.mxu0 %v13748_v21 }
 0x70f   :  { %5718 = vmatmul.mubr.bf16.gmra.mrb[92].mxu1 %v15172_v31 }
 0x710   :  { %12500 = vmatprep.mubr.msk.bf16.mxu1 %vm13750_vm5, %v13749_v16 }
 0x75b   :  { %v12414_v38 = vpop.f32.mrb[64].mxu0 }
 0x75c   :  { %v4702_v45 = vpop.f32.mrb[65].mxu0 }
 0x75d   :  { %v12415_v48 = vpop.f32.mrb[66].mxu0 }
 0x75e   :  { %v4705_v50 = vpop.f32.mrb[67].mxu0 }
 0x762   :  { %v4661_v8 = vpop.f32.mrb[76].mxu1 }
 0x763   :  { %v4663_v15 = vpop.f32.mrb[77].mxu1 }
 0x764   :  { %v4665_v9 = vpop.f32.mrb[78].mxu1 }
 0x765   :  { %v4666_v53 = vpop.f32.mrb[79].mxu1 }
 0x77b   :  { %v12434_v27 = vpop.f32.mrb[68].mxu0 }
 0x77c   :  { %v4938_v17 = vadd.f32 %v12434_v27, %v12414_v38  ;;  %v4929_v13 = vpop.f32.mrb[69].mxu0 }
 0x77d   :  { %v4930_v23 = vadd.f32 %v4929_v13, %v4702_v45  ;;  %v12435_v18 = vpop.f32.mrb[70].mxu0 }
 0x77e   :  { %v4932_v20 = vpop.f32.mrb[71].mxu0 }
 0x77f   :  { %v4933_v22 = vadd.f32 %v4932_v20, %v4705_v50 }
 0x782   :  { %v4888_v54 = vpop.f32.mrb[80].mxu1 }
 0x783   :  { %v4889_v25 = vadd.f32 %v4888_v54, %v4661_v8  ;;  %v4890_v26 = vpop.f32.mrb[81].mxu1 }
 0x784   :  { %v4891_v57 = vadd.f32 %v4890_v26, %v4663_v15  ;;  %v4892_v28 = vpop.f32.mrb[82].mxu1 }
 0x785   :  { %v4893_v47 = vpop.f32.mrb[83].mxu1 }
 0x79b   :  { %v12454_v29 = vpop.f32.mrb[72].mxu0 }
 0x79c   :  { %v5218_v31 = vadd.f32 %v12454_v29, %v4938_v17  ;;  %v5196_v32 = vpop.f32.mrb[73].mxu0 }
 0x79d   :  { %v5212_v33 = vadd.f32 %v5196_v32, %v4930_v23  ;;  %v12455_v35 = vpop.f32.mrb[74].mxu0 }
 0x79e   :  { %v5199_v30 = vpop.f32.mrb[75].mxu0 }
 0x79f   :  { %v5215_v19 = vadd.f32 %v5199_v30, %v4933_v22 }
 0x7a2   :  { %v5155_v39 = vpop.f32.mrb[84].mxu1 }
 0x7a3   :  { %v5216_v36 = vadd.f32 %v5155_v39, %v4889_v25  ;;  %v5157_v14 = vpop.f32.mrb[85].mxu1 }
 0x7a4   :  { %v5217_v43 = vadd.f32 %v5157_v14, %v4891_v57  ;;  %v5159_v44 = vpop.f32.mrb[86].mxu1 }
 0x7a5   :  { %v5160_v56 = vpop.f32.mrb[87].mxu1 }
 0x7bb   :  { %v12474_v55 = vpop.f32.mrb[76].mxu0 }
 0x7bc   :  { %v5506_v52 = vadd.f32 %v12474_v55, %v5218_v31  ;;  %v5484_v60 = vpop.f32.mrb[77].mxu0 }
 0x7bd   :  { %v5500_v4 = vadd.f32 %v5484_v60, %v5212_v33  ;;  %v12475_v6 = vpop.f32.mrb[78].mxu0 }
 0x7be   :  { %v5487_v37 = vpop.f32.mrb[79].mxu0 }
 0x7bf   :  { %v5503_v34 = vadd.f32 %v5487_v37, %v5215_v19 }
 0x7c2   :  { %v5443_v41 = vpop.f32.mrb[88].mxu1 }
 0x7c3   :  { %v5504_v11 = vadd.f32 %v5443_v41, %v5216_v36  ;;  %v5445_v42 = vpop.f32.mrb[89].mxu1 }
 0x7c4   :  { %v5505_v12 = vadd.f32 %v5445_v42, %v5217_v43  ;;  %v5447_v38 = vpop.f32.mrb[90].mxu1 }
 0x7c5   :  { %v5448_v45 = vpop.f32.mrb[91].mxu1 }
 0x7da   :  { %v5709_v48 = vpop.f32.mrb[72].mxu1 }
 0x7db   :  { %v5783_v50 = vadd.f32 %v5709_v48, %v14352_v63  ;;  %v5711_v8 = vpop.f32.mrb[73].mxu1  ;;  %v12494_v15 = vpop.f32.mrb[80].mxu0  ;;  %v13275_v48 = vld [vmem:[%s16018_s3 + $0x144] ss:$8 sps:$4 sm:$0xff]  }
 0x7dc   :  { %v5784_v9 = vadd.f32 %v5711_v8, %v14355_v3  ;;  %v5782_v53 = vadd.f32 %v12494_v15, %v5506_v52  ;;  %v5713_v27 = vpop.f32.mrb[74].mxu1  ;;  %v5760_v17 = vpop.f32.mrb[81].mxu0  ;;  %v13273_v8 = vld [vmem:[%s16018_s3 + $0x140] ss:$8 sps:$4 sm:$0xff]   ;;  %v13278_v15 = vld [vmem:[%s16018_s3 + $0x154] ss:$8 sps:$4 sm:$0xff]  }
 0x7dd   :  { %v5786_v13 = vadd.f32 %v5713_v27, %v14352_v63  ;;  %v5776_v23 = vadd.f32 %v5760_v17, %v5500_v4  ;;  %v5715_v18 = vpop.f32.mrb[75].mxu1  ;;  %v12495_v20 = vpop.f32.mrb[82].mxu0  ;;  %v5792_v26 = vmax.f32 %v5783_v50, 0.0  ;;  %v13272_v50 = vld [vmem:[%s16019_s4 + $0x8] sm:$0x1f]  }
 0x7de   :  { %v5791_v22 = vadd.f32 %v5782_v53, %v14358_v5  ;;  %v5787_v54 = vadd.f32 %v5715_v18, %v14355_v3  ;;  %v5763_v25 = vpop.f32.mrb[83].mxu0  ;;  %v5793_v29 = vmax.f32 %v5784_v9, 0.0  ;;  %v13276_v9 = vld [vmem:[%s16018_s3 + $0x150] ss:$8 sps:$4 sm:$0xff]   ;;  %v13281_v53 = vld [vmem:[%s16018_s3 + $0x164] ss:$8 sps:$4 sm:$0xff]  }
 0x7df   :  { %v5795_v57 = vmax.f32 %v5786_v13, 0.0  ;;  %v5785_v28 = vadd.f32 %v5776_v23, %v14358_v5  ;;  %v5779_v47 = vadd.f32 %v5763_v25, %v5503_v34  ;;  %v13279_v27 = vld [vmem:[%s16018_s3 + $0x160] ss:$8 sps:$4 sm:$0xff]   ;;  %v13284_v17 = vld [vmem:[%s16018_s3 + $0x174] ss:$8 sps:$4 sm:$0xff]  }
 0x7e0   :  { %v5800_v31 = vmax.f32 %v5791_v22, 0.0  ;;  %v5796_v32 = vmax.f32 %v5787_v54, 0.0  ;;  %v13282_v13 = vld [vmem:[%s16018_s3 + $0x170] ss:$8 sps:$4 sm:$0xff]   ;;  %v13287_v23 = vld [vmem:[%s16018_s3 + $0x184] ss:$8 sps:$4 sm:$0xff]  }
 0x7e1   :  { %v5801_v33 = vpack.c.bf16 %v5795_v57, %v5792_v26  ;;  %v5788_v35 = vadd.f32 %v5779_v47, %v14358_v5  ;;  %v5794_v36 = vmax.f32 %v5785_v28, 0.0  ;;  %v13285_v18 = vld [vmem:[%s16018_s3 + $0x180] ss:$8 sps:$4 sm:$0xff]   ;;  %v13290_v20 = vld [vmem:[%s16018_s3 + $0x194] ss:$8 sps:$4 sm:$0xff]  }
 0x7e2   :  { %v5806_v30 = vpack.c.bf16 %v5800_v31, %v5800_v31  ;;  %v5802_v19 = vpack.c.bf16 %v5796_v32, %v5793_v29  ;;  %v5719_v39 = vpop.f32.mrb[92].mxu1  ;;  %v13288_v22 = vld [vmem:[%s16018_s3 + $0x190] ss:$8 sps:$4 sm:$0xff]   ;;  %v13293_v54 = vld [vmem:[%s16018_s3 + $0x1a4] ss:$8 sps:$4 sm:$0xff]  }
 0x7e3   :  { %v5797_v14 = vmax.f32 %v5788_v35, 0.0  ;;  %v5780_v43 = vadd.f32 %v5719_v39, %v5504_v11  ;;  %v5721_v44 = vpop.f32.mrb[93].mxu1  ;;  %v13291_v25 = vld [vmem:[%s16018_s3 + $0x1a0] ss:$8 sps:$4 sm:$0xff]   ;;  %v13296_v26 = vld [vmem:[%s16018_s3 + $0x1b4] ss:$8 sps:$4 sm:$0xff]  }
 0x7e4   :  { %5812 = vst.msk [vmem:[#allocation3 + $0x58] sm:$0x3] %vm2017_vm6, %v5806_v30  ;;  %v5781_v56 = vadd.f32 %v5721_v44, %v5505_v12  ;;  %v5723_v55 = vpop.f32.mrb[94].mxu1  ;;  %5838 = vmatprep.subr.bf16.mxu0 %v5802_v19  ;;  %v13294_v57 = vld [vmem:[%s16018_s3 + $0x1b0] ss:$8 sps:$4 sm:$0xff]  }
 0x7e5   :  { %v5803_v52 = vpack.c.bf16 %v5797_v14, %v5794_v36  ;;  %v5789_v60 = vadd.f32 %v5780_v43, %v14352_v63  ;;  %v5724_v4 = vpop.f32.mrb[95].mxu1  ;;  %5839 = vmatpush1.bf16.msra.mxu0 %v5801_v33  ;;  %v13299_v28 = vld [vmem:[%s16018_s3 + $0x1c4] ss:$8 sps:$4 sm:$0xff]   ;;  %v13297_v47 = vld [vmem:[%s16018_s3 + $0x1c0] ss:$8 sps:$4 sm:$0xff]  }
 0x7e6   :  { %v5790_v6 = vadd.f32 %v5781_v56, %v14355_v3  ;;  %v13271_v3 = vld [vmem:[%s16019_s4] sm:$0x1f]   ;;  %v13302_v29 = vld [vmem:[%s16018_s3 + $0x1d4] ss:$8 sps:$4 sm:$0xff]   ;;  %v13300_v31 = vld [vmem:[%s16018_s3 + $0x1d0] ss:$8 sps:$4 sm:$0xff]  }
 0x7e7   :  { %5809 = vst.msk [vmem:[#allocation3 + $0x40] sm:$0xff] %vm2013_vm7, %v5803_v52  ;;  %v5798_v5 = vmax.f32 %v5789_v60, 0.0  ;;  %v13305_v32 = vld [vmem:[%s16018_s3 + $0x1e4] ss:$8 sps:$4 sm:$0xff]   ;;  %v13308_v35 = vld [vmem:[%s16018_s3 + $0x1f4] ss:$8 sps:$4 sm:$0xff]  }
 0x7e8   :  { %v5799_v37 = vmax.f32 %v5790_v6, 0.0  ;;  %v13306_v30 = vld [vmem:[%s16018_s3 + $0x1f0] ss:$8 sps:$4 sm:$0xff]   ;;  %v13309_v39 = vld [vmem:[%s16018_s3 + $0x200] ss:$8 sps:$4 sm:$0xff]  }
 0x7e9   :  { %v5804_v34 = vpack.c.bf16 %v5798_v5, %v5798_v5  ;;  %v13314_v36 = vld [vmem:[%s16018_s3 + $0x214] ss:$8 sps:$4 sm:$0xff]   ;;  %v13312_v14 = vld [vmem:[%s16018_s3 + $0x210] ss:$8 sps:$4 sm:$0xff]   ;;  %v13315_v43 = vld [vmem:[%s16018_s3 + $0x220] ss:$8 sps:$4 sm:$0xff]  }
 0x7ea   :  { %v5805_v41 = vpack.c.bf16 %v5799_v37, %v5799_v37  ;;  %v13317_v44 = vld [vmem:[%s16018_s3 + $0x224] ss:$8 sps:$4 sm:$0xff]   ;;  %v13320_v56 = vld [vmem:[%s16018_s3 + $0x234] ss:$8 sps:$4 sm:$0xff]   ;;  %v13318_v55 = vld [vmem:[%s16018_s3 + $0x230] ss:$8 sps:$4 sm:$0xff]  }
 0x7eb   :  { %5810 = vst [vmem:[#allocation3 + $0x48] sm:$0x3] %v5804_v34  ;;  %v5818_v42 = vld [vmem:[#allocation3 + $0x58] sm:$0x3]  ;;  %v13323_v52 = vld [vmem:[%s16018_s3 + $0x244] ss:$8 sps:$4 sm:$0xff]  }
 0x7ec   :  { %5811 = vst [vmem:[#allocation3 + $0x50] sm:$0x3] %v5805_v41  ;;  %v5836_v12 = vsel %vm2036_vm8, %v5818_v42, 0  ;;  %v13396_v60 = vld [vmem:[#allocation11 + $0x140] ss:$16 sps:$4 sm:$0xff]  }
 0x7ed   :  { %v13398_v4 = vld [vmem:[#allocation11 + $0x144] ss:$16 sps:$4 sm:$0xff]   ;;  %v13402_v6 = vld [vmem:[#allocation11 + $0x160] ss:$16 sps:$4 sm:$0xff]  }
 0x7ee   :  { %v5815_v11 = vld [vmem:[#allocation3 + $0x40] sm:$0xff] }
 0x7ef   :  { %12497 = vmatpush3.bf16.msra.mxu1 %v5815_v11  ;;  %v13404_v5 = vld [vmem:[#allocation11 + $0x164] ss:$16 sps:$4 sm:$0xff]   ;;  %v13408_v37 = vld [vmem:[#allocation11 + $0x180] ss:$16 sps:$4 sm:$0xff]  }
 0x7f0   :  { %12498 = vmatprep.subr.bf16.mxu1 %v13749_v16  ;;  %v13410_v34 = vld [vmem:[#allocation11 + $0x184] ss:$16 sps:$4 sm:$0xff]   ;;  %v13414_v41 = vld [vmem:[#allocation11 + $0x1a0] ss:$16 sps:$4 sm:$0xff]  }
 0x7f2   :  { %v5816_v63 = vld [vmem:[#allocation3 + $0x48] sm:$0x3] }
 0x7f3   :  { %12499 = vmatpush3.bf16.msra.mxu1 %v5836_v12  ;;  %v5817_v38 = vld [vmem:[#allocation3 + $0x50] sm:$0x3]  ;;  %v5830_v45 = vsel %vm2036_vm8, %v5816_v63, 0 }
 0x7f4   :  { %11695 = vmatprep.subr.msk.bf16.mxu0 %vm2036_vm8, %v5817_v38  ;;  %12504 = vmatprep.subr.bf16.mxu1 %v13749_v16 }
 0x7f5   :  { %5841 = vmatpush1.bf16.msra.mxu0 %v5830_v45 }
 0x7f6   :  { %5932 = vmatprep.subr.bf16.mxu0 %v5802_v19  ;;  %12501 = vmatmul.mubr.msk.bf16.vlgmr.msra.gmra.mrb[96].mxu1 %vm2032_vm9, %v13271_v3  ;;  %v13311_v19 = vld [vmem:[%s16018_s3 + $0x204] ss:$8 sps:$4 sm:$0xff]  }
 0x7f7   :  { %12505 = vmatpush3.bf16.msra.mxu1 %v5815_v11  ;;  %12508 = vmatprep.mubr.msk.bf16.mxu1 %vm13750_vm5, %v13749_v16  ;;  %v13416_v11 = vld [vmem:[#allocation11 + $0x1a4] ss:$16 sps:$4 sm:$0xff]  }
 0x7f8   :  { %11696 = vmatmul.mubr.msk.bf16.vlgmr.msra.gmra.mrb[84].mxu0 %vm2032_vm9, %v13271_v3  ;;  %12506 = vmatprep.subr.bf16.mxu1 %v13749_v16 }
 0x7f9   :  { %5933 = vmatpush1.bf16.msra.mxu0 %v5801_v33  ;;  %5964 = vmatprep.mubr.bf16.mxu0 %v13748_v21  ;;  %v13303_v33 = vld [vmem:[%s16018_s3 + $0x1e0] ss:$8 sps:$4 sm:$0xff]  }
 0x7fa   :  { %11701 = vmatprep.subr.msk.bf16.mxu0 %vm2036_vm8, %v5817_v38  ;;  %v13420_v38 = vld [vmem:[#allocation11 + $0x1c0] ss:$16 sps:$4 sm:$0xff]  }
 0x7fb   :  { %12507 = vmatpush3.bf16.msra.mxu1 %v5836_v12 }
 0x7fc   :  { %6990 = vmatprep.subr.bf16.mxu1 %v13398_v4  ;;  %v13350_v4 = vld [vmem:[%s16018_s3 + $0x54] ss:$8 sps:$4 sm:$0xff]  }
 0x7fd   :  { %5935 = vmatpush1.bf16.msra.mxu0 %v5830_v45  ;;  %v13422_v45 = vld [vmem:[#allocation11 + $0x1c4] ss:$16 sps:$4 sm:$0xff]  }
 0x7fe   :  { %12509 = vmatmul.mubr.msk.bf16.vlgmr.msra.gmra.mrb[100].mxu1 %vm2032_vm9, %v13272_v50  ;;  %6305 = vmatprep.subr.bf16.mxu0 %v13275_v48 }
 0x7ff   :  { %6991 = vmatpush1.bf16.msra.mxu1 %v13396_v60  ;;  %v13345_v60 = vld [vmem:[%s16018_s3 + $0x40] ss:$8 sps:$4 sm:$0xff]  }
 0x800   :  { %11702 = vmatmul.mubr.msk.bf16.vlgmr.msra.gmra.mrb[88].mxu0 %vm2032_vm9, %v13272_v50  ;;  %6992 = vmatprep.subr.bf16.mxu1 %v13404_v5  ;;  %v13353_v5 = vld [vmem:[%s16018_s3 + $0x64] ss:$8 sps:$4 sm:$0xff]  }
 0x801   :  { %6306 = vmatpush1.bf16.msra.mxu0 %v13273_v8 }
 0x802   :  { %6307 = vmatprep.subr.bf16.mxu0 %v13278_v15 }
 0x803   :  { %6993 = vmatpush1.bf16.msra.mxu1 %v13402_v6  ;;  %v13348_v6 = vld [vmem:[%s16018_s3 + $0x50] ss:$8 sps:$4 sm:$0xff]  }
 0x804   :  { %6994 = vmatprep.subr.bf16.mxu1 %v13410_v34  ;;  %v13356_v34 = vld [vmem:[%s16018_s3 + $0x74] ss:$8 sps:$4 sm:$0xff]  }
 0x805   :  { %6308 = vmatpush1.bf16.msra.mxu0 %v13276_v9 }
 0x806   :  { %6309 = vmatprep.subr.bf16.mxu0 %v13281_v53 }
 0x807   :  { %6995 = vmatpush1.bf16.msra.mxu1 %v13408_v37  ;;  %v13351_v37 = vld [vmem:[%s16018_s3 + $0x60] ss:$8 sps:$4 sm:$0xff]  }
 0x808   :  { %6996 = vmatprep.subr.bf16.mxu1 %v13416_v11  ;;  %v13359_v11 = vld [vmem:[%s16018_s3 + $0x84] ss:$8 sps:$4 sm:$0xff]  }
 0x809   :  { %6310 = vmatpush1.bf16.msra.mxu0 %v13279_v27 }
 0x80a   :  { %6311 = vmatprep.subr.bf16.mxu0 %v13284_v17 }
 0x80b   :  { %6997 = vmatpush1.bf16.msra.mxu1 %v13414_v41  ;;  %v13354_v41 = vld [vmem:[%s16018_s3 + $0x70] ss:$8 sps:$4 sm:$0xff]  }
 0x80c   :  { %6998 = vmatprep.subr.bf16.mxu1 %v13422_v45  ;;  %v13360_v45 = vld [vmem:[%s16018_s3 + $0x90] ss:$8 sps:$4 sm:$0xff]  }
 0x80d   :  { %6312 = vmatpush1.bf16.msra.mxu0 %v13282_v13 }
 0x80e   :  { %6313 = vmatprep.subr.bf16.mxu0 %v13287_v23 }
 0x80f   :  { %6999 = vmatpush1.bf16.msra.mxu1 %v13420_v38  ;;  %v13362_v38 = vld [vmem:[%s16018_s3 + $0x94] ss:$8 sps:$4 sm:$0xff]  }
 0x811   :  { %6314 = vmatpush1.bf16.msra.mxu0 %v13285_v18 }
 0x812   :  { %6315 = vmatprep.subr.bf16.mxu0 %v13290_v20 }
 0x815   :  { %6316 = vmatpush1.bf16.msra.mxu0 %v13288_v22 }
 0x816   :  { %6317 = vmatprep.subr.bf16.mxu0 %v13293_v54 }
 0x819   :  { %6318 = vmatpush1.bf16.msra.mxu0 %v13291_v25 }
 0x81a   :  { %6319 = vmatprep.subr.bf16.mxu0 %v13296_v26 }
 0x81d   :  { %6320 = vmatpush1.bf16.msra.mxu0 %v13294_v57 }
 0x81e   :  { %6321 = vmatprep.subr.bf16.mxu0 %v13299_v28 }
 0x821   :  { %6322 = vmatpush1.bf16.msra.mxu0 %v13297_v47  ;;  %v13321_v47 = vld [vmem:[%s16018_s3 + $0x240] ss:$8 sps:$4 sm:$0xff]  }
 0x822   :  { %6323 = vmatprep.subr.bf16.mxu0 %v13302_v29  ;;  %v13326_v29 = vld [vmem:[%s16018_s3 + $0x254] ss:$8 sps:$4 sm:$0xff]  }
 0x825   :  { %6324 = vmatpush1.bf16.msra.mxu0 %v13300_v31  ;;  %v13324_v31 = vld [vmem:[%s16018_s3 + $0x250] ss:$8 sps:$4 sm:$0xff]  }
 0x826   :  { %6325 = vmatprep.subr.bf16.mxu0 %v13305_v32  ;;  %v13329_v32 = vld [vmem:[%s16018_s3 + $0x264] ss:$8 sps:$4 sm:$0xff]  }
 0x829   :  { %6326 = vmatpush1.bf16.msra.mxu0 %v13303_v33  ;;  %v13327_v33 = vld [vmem:[%s16018_s3 + $0x260] ss:$8 sps:$4 sm:$0xff]  }
 0x82a   :  { %6327 = vmatprep.subr.bf16.mxu0 %v13308_v35  ;;  %v13332_v35 = vld [vmem:[%s16018_s3 + $0x274] ss:$8 sps:$4 sm:$0xff]  }
 0x82d   :  { %6328 = vmatpush1.bf16.msra.mxu0 %v13306_v30  ;;  %v13330_v30 = vld [vmem:[%s16018_s3 + $0x270] ss:$8 sps:$4 sm:$0xff]  }
 0x82e   :  { %6329 = vmatprep.subr.bf16.mxu0 %v13311_v19  ;;  %v13335_v19 = vld [vmem:[%s16018_s3 + $0x4] ss:$8 sps:$4 sm:$0xff]  }
 0x831   :  { %6330 = vmatpush1.bf16.msra.mxu0 %v13309_v39  ;;  %v13333_v39 = vld [vmem:[%s16018_s3] ss:$8 sps:$4 sm:$0xff]  }
 0x832   :  { %6331 = vmatprep.subr.bf16.mxu0 %v13314_v36  ;;  %v13338_v36 = vld [vmem:[%s16018_s3 + $0x14] ss:$8 sps:$4 sm:$0xff]  }
 0x835   :  { %6332 = vmatpush1.bf16.msra.mxu0 %v13312_v14  ;;  %v13336_v14 = vld [vmem:[%s16018_s3 + $0x10] ss:$8 sps:$4 sm:$0xff]  }
 0x836   :  { %6333 = vmatprep.subr.bf16.mxu0 %v13317_v44  ;;  %v13339_v44 = vld [vmem:[%s16018_s3 + $0x20] ss:$8 sps:$4 sm:$0xff]  }
 0x839   :  { %6334 = vmatpush1.bf16.msra.mxu0 %v13315_v43  ;;  %v13341_v43 = vld [vmem:[%s16018_s3 + $0x24] ss:$8 sps:$4 sm:$0xff]  }
 0x83a   :  { %6335 = vmatprep.subr.bf16.mxu0 %v13320_v56  ;;  %v13344_v56 = vld [vmem:[%s16018_s3 + $0x34] ss:$8 sps:$4 sm:$0xff]  }
 0x83d   :  { %6336 = vmatpush1.bf16.msra.mxu0 %v13318_v55  ;;  %v13342_v55 = vld [vmem:[%s16018_s3 + $0x30] ss:$8 sps:$4 sm:$0xff]  }
 0x83e   :  { %6348 = vmatprep.subr.bf16.mxu0 %v13323_v52  ;;  %v13347_v52 = vld [vmem:[%s16018_s3 + $0x44] ss:$8 sps:$4 sm:$0xff]  }
 0x8c9   :  { %v15380_v42 = vpop.f32.mrb[96].mxu1 }
 0x8ca   :  { %v12502_v12 = vpop.f32.mrb[97].mxu1 }
 0x8cb   :  { %v15382_v63 = vpop.f32.mrb[84].mxu0  ;;  %v15384_v3 = vpop.f32.mrb[98].mxu1  ;;  %v13357_v12 = vld [vmem:[%s16018_s3 + $0x80] ss:$8 sps:$4 sm:$0xff]  }
 0x8cc   :  { %v5874_v48 = vpop.f32.mrb[85].mxu0  ;;  %v6058_v50 = vpack.c.bf16 %v15384_v3, %v15380_v42  ;;  %v12503_v8 = vpop.f32.mrb[99].mxu1  ;;  %v13423_v42 = vld [vmem:[#allocation11 + $0x320] ss:$16 sps:$4 sm:$0xff]   ;;  %v13428_v3 = vld [vmem:[#allocation11 + $0x1e4] ss:$16 sps:$4 sm:$0xff]  }
 0x8cd   :  { %v15388_v15 = vpop.f32.mrb[86].mxu0  ;;  %v13363_v8 = vld [vmem:[%s16018_s3 + $0xa0] ss:$8 sps:$4 sm:$0xff]   ;;  %7000 = vmatprep.subr.bf16.mxu1 %v13428_v3 }
 0x8ce   :  { %v6056_v9 = vpack.c.bf16 %v15388_v15, %v15382_v63  ;;  %v5878_v53 = vpop.f32.mrb[87].mxu0  ;;  %v13392_v63 = vld [vmem:[%s16018_s3 + $0x134] ss:$8 sps:$4 sm:$0xff]   ;;  %v13465_v3 = vld [vmem:[#allocation11 + $0x1c8] ss:$16 sps:$4 sm:$0xff]  }
 0x8cf   :  { %v6057_v27 = vpack.c.bf16 %v5878_v53, %v5874_v48  ;;  %v13365_v48 = vld [vmem:[%s16018_s3 + $0xa4] ss:$8 sps:$4 sm:$0xff]   ;;  %v13368_v53 = vld [vmem:[%s16018_s3 + $0xb4] ss:$8 sps:$4 sm:$0xff]  }
 0x8d0   :  { %v13395_v15 = vld [vmem:[#allocation11 + $0x284] ss:$16 sps:$4 sm:$0xff]  }
 0x8d1   :  { %v6009_v17 = vpop.f32.mrb[100].mxu1 }
 0x8d2   :  { %v12510_v13 = vpop.f32.mrb[101].mxu1 }
 0x8d3   :  { %v5966_v23 = vpop.f32.mrb[88].mxu0  ;;  %v6012_v18 = vpop.f32.mrb[102].mxu1  ;;  %v13369_v13 = vld [vmem:[%s16018_s3 + $0xc0] ss:$8 sps:$4 sm:$0xff]  }
 0x8d4   :  { %v5968_v20 = vpop.f32.mrb[89].mxu0  ;;  %v6101_v22 = vpack.c.bf16 %v6012_v18, %v6009_v17  ;;  %v12511_v54 = vpop.f32.mrb[103].mxu1  ;;  %v13371_v17 = vld [vmem:[%s16018_s3 + $0xc4] ss:$8 sps:$4 sm:$0xff]   ;;  %v13372_v18 = vld [vmem:[%s16018_s3 + $0xd0] ss:$8 sps:$4 sm:$0xff]  }
 0x8d5   :  { %v5970_v25 = vpop.f32.mrb[90].mxu0  ;;  %v13380_v54 = vld [vmem:[%s16018_s3 + $0xf4] ss:$8 sps:$4 sm:$0xff]  }
 0x8d6   :  { %v6099_v26 = vpack.c.bf16 %v5970_v25, %v5966_v23  ;;  %v5972_v57 = vpop.f32.mrb[91].mxu0  ;;  %v13374_v23 = vld [vmem:[%s16018_s3 + $0xd4] ss:$8 sps:$4 sm:$0xff]   ;;  %v13378_v25 = vld [vmem:[%s16018_s3 + $0xf0] ss:$8 sps:$4 sm:$0xff]  }
 0x8d7   :  { %v6100_v28 = vpack.c.bf16 %v5972_v57, %v5968_v20  ;;  %v13377_v20 = vld [vmem:[%s16018_s3 + $0xe4] ss:$8 sps:$4 sm:$0xff]   ;;  %v13381_v57 = vld [vmem:[%s16018_s3 + $0x100] ss:$8 sps:$4 sm:$0xff]  }
 0x8d9   :  { %6337 = vmatprep.mubr.bf16.mxu0 %v6100_v28  ;;  %v13386_v28 = vld [vmem:[%s16018_s3 + $0x114] ss:$8 sps:$4 sm:$0xff]  }
 0x8da   :  { %6338 = vmatmul.mubr.bf16.vlgmr.msra.gmra.mrb[92].mxu0 %v6099_v26  ;;  %v13383_v26 = vld [vmem:[%s16018_s3 + $0x104] ss:$8 sps:$4 sm:$0xff]  }
 0x8db   :  { %6349 = vmatpush1.bf16.msra.mxu0 %v13321_v47  ;;  %6380 = vmatprep.mubr.bf16.mxu0 %v13748_v21  ;;  %v13384_v47 = vld [vmem:[%s16018_s3 + $0x110] ss:$8 sps:$4 sm:$0xff]  }
 0x8dc   :  { %6350 = vmatprep.subr.bf16.mxu0 %v13326_v29  ;;  %v13389_v29 = vld [vmem:[%s16018_s3 + $0x124] ss:$8 sps:$4 sm:$0xff]  }
 0x8df   :  { %6351 = vmatpush1.bf16.msra.mxu0 %v13324_v31  ;;  %v13387_v31 = vld [vmem:[%s16018_s3 + $0x120] ss:$8 sps:$4 sm:$0xff]  }
 0x8e0   :  { %6352 = vmatprep.subr.bf16.mxu0 %v13329_v32  ;;  %v13401_v32 = vld [vmem:[#allocation11 + $0x2a4] ss:$16 sps:$4 sm:$0xff]  }
 0x8e3   :  { %6353 = vmatpush1.bf16.msra.mxu0 %v13327_v33  ;;  %v13399_v33 = vld [vmem:[#allocation11 + $0x2a0] ss:$16 sps:$4 sm:$0xff]  }
 0x8e4   :  { %6354 = vmatprep.subr.bf16.mxu0 %v13332_v35  ;;  %v13407_v35 = vld [vmem:[#allocation11 + $0x2c4] ss:$16 sps:$4 sm:$0xff]  }
 0x8e7   :  { %6355 = vmatpush1.bf16.msra.mxu0 %v13330_v30  ;;  %v13405_v30 = vld [vmem:[#allocation11 + $0x2c0] ss:$16 sps:$4 sm:$0xff]  }
 0x8e8   :  { %6594 = vmatprep.subr.bf16.mxu0 %v13335_v19  ;;  %v13413_v19 = vld [vmem:[#allocation11 + $0x2e4] ss:$16 sps:$4 sm:$0xff]  }
 0x8ea   :  { %11784 = vmatmul.mubr.msk.bf16.vlgmr.msra.gmra.mrb[92].mxu0 %vm2013_vm7, %v6101_v22  ;;  %v13375_v22 = vld [vmem:[%s16018_s3 + $0xe0] ss:$8 sps:$4 sm:$0xff]  }
 0x8eb   :  { %6595 = vmatpush1.bf16.msra.mxu0 %v13333_v39  ;;  %6626 = vmatprep.mubr.bf16.mxu0 %v6057_v27  ;;  %v13366_v27 = vld [vmem:[%s16018_s3 + $0xb0] ss:$8 sps:$4 sm:$0xff]  }
 0x8ec   :  { %6596 = vmatprep.subr.bf16.mxu0 %v13338_v36  ;;  %v13411_v39 = vld [vmem:[#allocation11 + $0x2e0] ss:$16 sps:$4 sm:$0xff]   ;;  %v13419_v36 = vld [vmem:[#allocation11 + $0x304] ss:$16 sps:$4 sm:$0xff]  }
 0x8ef   :  { %6597 = vmatpush1.bf16.msra.mxu0 %v13336_v14  ;;  %v13417_v14 = vld [vmem:[#allocation11 + $0x300] ss:$16 sps:$4 sm:$0xff]  }
 0x8f0   :  { %6598 = vmatprep.subr.bf16.mxu0 %v13341_v43  ;;  %v13425_v43 = vld [vmem:[#allocation11 + $0x324] ss:$16 sps:$4 sm:$0xff]  }
 0x8f3   :  { %6599 = vmatpush1.bf16.msra.mxu0 %v13339_v44  ;;  %v13431_v44 = vld [vmem:[#allocation11 + $0x344] ss:$16 sps:$4 sm:$0xff]  }
 0x8f4   :  { %6600 = vmatprep.subr.bf16.mxu0 %v13344_v56  ;;  %v13429_v56 = vld [vmem:[#allocation11 + $0x340] ss:$16 sps:$4 sm:$0xff]  }
 0x8f7   :  { %6601 = vmatpush1.bf16.msra.mxu0 %v13342_v55  ;;  %v13434_v55 = vld [vmem:[#allocation11 + $0x204] ss:$16 sps:$4 sm:$0xff]  }
 0x8f8   :  { %6602 = vmatprep.subr.bf16.mxu0 %v13347_v52  ;;  %v13432_v52 = vld [vmem:[#allocation11 + $0x200] ss:$16 sps:$4 sm:$0xff]  }
 0x8fb   :  { %6603 = vmatpush1.bf16.msra.mxu0 %v13345_v60  ;;  %v13437_v60 = vld [vmem:[#allocation11 + $0x364] ss:$16 sps:$4 sm:$0xff]  }
 0x8fc   :  { %6604 = vmatprep.subr.bf16.mxu0 %v13350_v4  ;;  %v13435_v4 = vld [vmem:[#allocation11 + $0x360] ss:$16 sps:$4 sm:$0xff]  }
 0x8ff   :  { %6605 = vmatpush1.bf16.msra.mxu0 %v13348_v6  ;;  %v13438_v6 = vld [vmem:[#allocation11 + $0x220] ss:$16 sps:$4 sm:$0xff]  }
 0x900   :  { %6606 = vmatprep.subr.bf16.mxu0 %v13353_v5  ;;  %v13440_v5 = vld [vmem:[#allocation11 + $0x224] ss:$16 sps:$4 sm:$0xff]  }
 0x903   :  { %6607 = vmatpush1.bf16.msra.mxu0 %v13351_v37  ;;  %v13441_v37 = vld [vmem:[#allocation11 + $0x380] ss:$16 sps:$4 sm:$0xff]  }
 0x904   :  { %6608 = vmatprep.subr.bf16.mxu0 %v13356_v34  ;;  %v13443_v34 = vld [vmem:[#allocation11 + $0x384] ss:$16 sps:$4 sm:$0xff]  }
 0x907   :  { %6609 = vmatpush1.bf16.msra.mxu0 %v13354_v41  ;;  %v13446_v41 = vld [vmem:[#allocation11 + $0x244] ss:$16 sps:$4 sm:$0xff]  }
 0x908   :  { %6610 = vmatprep.subr.bf16.mxu0 %v13359_v11  ;;  %v13449_v11 = vld [vmem:[#allocation11 + $0x3a4] ss:$16 sps:$4 sm:$0xff]  }
 0x90b   :  { %6611 = vmatpush1.bf16.msra.mxu0 %v13357_v12  ;;  %v13444_v12 = vld [vmem:[#allocation11 + $0x240] ss:$16 sps:$4 sm:$0xff]  }
 0x90c   :  { %6612 = vmatprep.subr.bf16.mxu0 %v13362_v38  ;;  %v13447_v38 = vld [vmem:[#allocation11 + $0x3a0] ss:$16 sps:$4 sm:$0xff]  }
 0x90f   :  { %6613 = vmatpush1.bf16.msra.mxu0 %v13360_v45  ;;  %v13452_v45 = vld [vmem:[#allocation11 + $0x264] ss:$16 sps:$4 sm:$0xff]  }
 0x910   :  { %6614 = vmatprep.subr.bf16.mxu0 %v13365_v48  ;;  %v13450_v48 = vld [vmem:[#allocation11 + $0x260] ss:$16 sps:$4 sm:$0xff]  }
 0x913   :  { %6615 = vmatpush1.bf16.msra.mxu0 %v13363_v8  ;;  %v13455_v8 = vld [vmem:[#allocation11 + $0x14c] ss:$16 sps:$4 sm:$0xff]  }
 0x914   :  { %6616 = vmatprep.subr.bf16.mxu0 %v13368_v53 }
 0x917   :  { %6617 = vmatpush1.bf16.msra.mxu0 %v13366_v27 }
 0x918   :  { %6618 = vmatprep.subr.bf16.mxu0 %v13371_v17 }
 0x91b   :  { %6619 = vmatpush1.bf16.msra.mxu0 %v13369_v13 }
 0x91c   :  { %6620 = vmatprep.subr.bf16.mxu0 %v13374_v23 }
 0x91f   :  { %6621 = vmatpush1.bf16.msra.mxu0 %v13372_v18 }
 0x920   :  { %6622 = vmatprep.subr.bf16.mxu0 %v13377_v20 }
 0x923   :  { %6623 = vmatpush1.bf16.msra.mxu0 %v13375_v22 }
 0x924   :  { %6624 = vmatprep.subr.bf16.mxu0 %v13380_v54 }
 0x927   :  { %6625 = vmatpush1.bf16.msra.mxu0 %v13378_v25 }
 0x928   :  { %6637 = vmatprep.subr.bf16.mxu0 %v13383_v26 }
 0x92a   :  { %6627 = vmatmul.mubr.bf16.vlgmr.msra.gmra.mrb[92].mxu0 %v6056_v9  ;;  %v13393_v9 = vld [vmem:[#allocation11 + $0x280] ss:$16 sps:$4 sm:$0xff]  }
 0x92b   :  { %6638 = vmatpush1.bf16.msra.mxu0 %v13381_v57  ;;  %6669 = vmatprep.mubr.bf16.mxu0 %v13748_v21  ;;  %v13390_v21 = vld [vmem:[%s16018_s3 + $0x130] ss:$8 sps:$4 sm:$0xff]  }
 0x92c   :  { %6639 = vmatprep.subr.bf16.mxu0 %v13386_v28 }
 0x92f   :  { %6640 = vmatpush1.bf16.msra.mxu0 %v13384_v47 }
 0x930   :  { %6641 = vmatprep.subr.bf16.mxu0 %v13389_v29 }
 0x933   :  { %6642 = vmatpush1.bf16.msra.mxu0 %v13387_v31 }
 0x934   :  { %6643 = vmatprep.subr.bf16.mxu0 %v13392_v63 }
 0x937   :  { %6644 = vmatpush1.bf16.msra.mxu0 %v13390_v21 }
 0x938   :  { %7607 = vmatprep.subr.bf16.mxu0 %v13395_v15 }
 0x93a   :  { %11825 = vmatmul.mubr.msk.bf16.vlgmr.msra.gmra.mrb[92].mxu0 %vm2013_vm7, %v6058_v50  ;;  %v13426_v50 = vld [vmem:[#allocation11 + $0x1e0] ss:$16 sps:$4 sm:$0xff]  }
 0x93b   :  { %7608 = vmatpush1.bf16.msra.mxu0 %v13393_v9  ;;  %7001 = vmatpush1.bf16.msra.mxu1 %v13426_v50  ;;  %v13470_v50 = vld [vmem:[#allocation11 + $0x1ec] ss:$16 sps:$4 sm:$0xff]  }
 0x93c   :  { %7609 = vmatprep.subr.bf16.mxu0 %v13401_v32  ;;  %7002 = vmatprep.subr.bf16.mxu1 %v13434_v55  ;;  %v13471_v55 = vld [vmem:[#allocation11 + $0x208] ss:$16 sps:$4 sm:$0xff]  }
 0x93f   :  { %7610 = vmatpush1.bf16.msra.mxu0 %v13399_v33  ;;  %7003 = vmatpush1.bf16.msra.mxu1 %v13432_v52  ;;  %v13453_v33 = vld [vmem:[#allocation11 + $0x148] ss:$16 sps:$4 sm:$0xff]   ;;  %v13476_v52 = vld [vmem:[#allocation11 + $0x22c] ss:$16 sps:$4 sm:$0xff]  }
 0x940   :  { %7611 = vmatprep.subr.bf16.mxu0 %v13407_v35  ;;  %7004 = vmatprep.subr.bf16.mxu1 %v13440_v5  ;;  %v13482_v5 = vld [vmem:[#allocation11 + $0x26c] ss:$16 sps:$4 sm:$0xff]  }
 0x943   :  { %7612 = vmatpush1.bf16.msra.mxu0 %v13405_v30  ;;  %7005 = vmatpush1.bf16.msra.mxu1 %v13438_v6  ;;  %v13458_v30 = vld [vmem:[#allocation11 + $0x16c] ss:$16 sps:$4 sm:$0xff]   ;;  %v13477_v6 = vld [vmem:[#allocation11 + $0x248] ss:$16 sps:$4 sm:$0xff]  }
 0x944   :  { %7613 = vmatprep.subr.bf16.mxu0 %v13413_v19  ;;  %7006 = vmatprep.subr.bf16.mxu1 %v13446_v41  ;;  %v13456_v19 = vld [vmem:[#allocation11 + $0x168] ss:$16 sps:$4 sm:$0xff]   ;;  %v13483_v41 = vld [vmem:[#allocation11] ss:$16 sps:$4 sm:$0xff]  }
 0x947   :  { %7614 = vmatpush1.bf16.msra.mxu0 %v13411_v39  ;;  %7007 = vmatpush1.bf16.msra.mxu1 %v13444_v12  ;;  %v13461_v39 = vld [vmem:[#allocation11 + $0x18c] ss:$16 sps:$4 sm:$0xff]  }
 0x948   :  { %7615 = vmatprep.subr.bf16.mxu0 %v13419_v36  ;;  %7008 = vmatprep.subr.bf16.mxu1 %v13452_v45  ;;  %v13459_v36 = vld [vmem:[#allocation11 + $0x188] ss:$16 sps:$4 sm:$0xff]   ;;  %v13491_v45 = vld [vmem:[#allocation11 + $0x44] ss:$16 sps:$4 sm:$0xff]  }
 0x94b   :  { %7616 = vmatpush1.bf16.msra.mxu0 %v13417_v14  ;;  %7009 = vmatpush1.bf16.msra.mxu1 %v13450_v48  ;;  %v13464_v14 = vld [vmem:[#allocation11 + $0x1ac] ss:$16 sps:$4 sm:$0xff]   ;;  %v13489_v48 = vld [vmem:[#allocation11 + $0x40] ss:$16 sps:$4 sm:$0xff]  }
 0x94c   :  { %7617 = vmatprep.subr.bf16.mxu0 %v13425_v43  ;;  %7031 = vmatprep.subr.bf16.mxu1 %v13455_v8  ;;  %v13462_v43 = vld [vmem:[#allocation11 + $0x1a8] ss:$16 sps:$4 sm:$0xff]   ;;  %v13494_v8 = vld [vmem:[#allocation11 + $0x64] ss:$16 sps:$4 sm:$0xff]  }
 0x94f   :  { %7618 = vmatpush1.bf16.msra.mxu0 %v13423_v42  ;;  %v13467_v42 = vld [vmem:[#allocation11 + $0x1cc] ss:$16 sps:$4 sm:$0xff]  }
 0x950   :  { %7619 = vmatprep.subr.bf16.mxu0 %v13431_v44  ;;  %v13468_v44 = vld [vmem:[#allocation11 + $0x1e8] ss:$16 sps:$4 sm:$0xff]  }
 0x953   :  { %7620 = vmatpush1.bf16.msra.mxu0 %v13429_v56  ;;  %v13473_v56 = vld [vmem:[#allocation11 + $0x20c] ss:$16 sps:$4 sm:$0xff]  }
 0x954   :  { %7621 = vmatprep.subr.bf16.mxu0 %v13437_v60  ;;  %v13474_v60 = vld [vmem:[#allocation11 + $0x228] ss:$16 sps:$4 sm:$0xff]  }
 0x957   :  { %7622 = vmatpush1.bf16.msra.mxu0 %v13435_v4  ;;  %v13479_v4 = vld [vmem:[#allocation11 + $0x24c] ss:$16 sps:$4 sm:$0xff]  }
 0x958   :  { %7623 = vmatprep.subr.bf16.mxu0 %v13443_v34  ;;  %v13485_v34 = vld [vmem:[#allocation11 + $0x4] ss:$16 sps:$4 sm:$0xff]  }
 0x95b   :  { %7624 = vmatpush1.bf16.msra.mxu0 %v13441_v37  ;;  %v13480_v37 = vld [vmem:[#allocation11 + $0x268] ss:$16 sps:$4 sm:$0xff]  }
 0x95c   :  { %7625 = vmatprep.subr.bf16.mxu0 %v13449_v11  ;;  %v13488_v11 = vld [vmem:[#allocation11 + $0x24] ss:$16 sps:$4 sm:$0xff]  }
 0x95f   :  { %7626 = vmatpush1.bf16.msra.mxu0 %v13447_v38  ;;  %v13486_v38 = vld [vmem:[#allocation11 + $0x20] ss:$16 sps:$4 sm:$0xff]  }
 0xa0d   :  { %v6671_v53 = vpop.f32.mrb[92].mxu0 }
 0xa0e   :  { %v6673_v27 = vpop.f32.mrb[93].mxu0  ;;  %v6680_v13 = vadd.f32 %v6671_v53, %v14654_v7  ;;  %v13492_v53 = vld [vmem:[#allocation11 + $0x60] ss:$16 sps:$4 sm:$0xff]  }
 0xa0f   :  { %v6675_v17 = vpop.f32.mrb[94].mxu0  ;;  %v6681_v20 = vadd.f32 %v6673_v27, %v14657_v10  ;;  %v13497_v27 = vld [vmem:[#allocation11 + $0x84] ss:$16 sps:$4 sm:$0xff]  }
 0xa10   :  { %v6682_v23 = vadd.f32 %v6675_v17, %v14654_v7  ;;  %v6677_v18 = vpop.f32.mrb[95].mxu0  ;;  %v13495_v17 = vld [vmem:[#allocation11 + $0x80] ss:$16 sps:$4 sm:$0xff]  }
 0xa11   :  { %v6683_v22 = vadd.f32 %v6677_v18, %v14657_v10  ;;  %v13503_v18 = vld [vmem:[#allocation11 + $0xc4] ss:$16 sps:$4 sm:$0xff]  }
 0xa12   :  { %v6684_v54 = vpack.c.bf16 %v6682_v23, %v6680_v13  ;;  %v13500_v13 = vld [vmem:[#allocation11 + $0xa4] ss:$16 sps:$4 sm:$0xff]   ;;  %v13498_v23 = vld [vmem:[#allocation11 + $0xa0] ss:$16 sps:$4 sm:$0xff]  }
 0xa13   :  { %v6685_v25 = vpack.c.bf16 %v6683_v22, %v6681_v20  ;;  %v13501_v20 = vld [vmem:[#allocation11 + $0xc0] ss:$16 sps:$4 sm:$0xff]   ;;  %v13506_v22 = vld [vmem:[#allocation11 + $0xe4] ss:$16 sps:$4 sm:$0xff]  }
 0xa14   :  { %6686 = vst [vmem:[#allocation4 + $0x10] sm:$0x1f] %v6684_v54  ;;  %v13504_v54 = vld [vmem:[#allocation11 + $0xe0] ss:$16 sps:$4 sm:$0xff]  }
 0xa15   :  { %6687 = vst.msk [vmem:[#allocation4 + $0x18] sm:$0x1f] %vm2908_vm10, %v6685_v25  ;;  %v13509_v25 = vld [vmem:[#allocation11 + $0x104] ss:$16 sps:$4 sm:$0xff]  }
 0xa1b   :  { %v15548_v26 = vld [vmem:[#allocation4 + $0x10] sm:$0x1e] }
 0xa1c   :  { %v6730_v57 = vld [vmem:[#allocation4 + $0x10] sm:$0x1f]  ;;  %v15550_v28 = vld [vmem:[#allocation4 + $0x18] sm:$0x1e]  ;;  %v7401_v63 = vrot.slane %v15548_v26, 1 }
 0xa1d   :  { %v6731_v47 = vld [vmem:[#allocation4 + $0x18] sm:$0x1f]  ;;  %v7402_v29 = vrot.slane %v15550_v28, 1  ;;  %v6775_v7 = vshll.u32 %v6730_v57, 16  ;;  %v6773_v9 = vshrl.u32 %v6730_v57, 16 }
 0xa1e   :  { %v6782_v31 = vshll.u32 %v6731_v47, 16  ;;  %v6780_v10 = vshrl.u32 %v6731_v47, 16  ;;  %v6689_v12 = vld [vmem:[#allocation4 + $0x18] sm:$0xf]  ;;  %v13507_v57 = vld [vmem:[#allocation11 + $0x100] ss:$16 sps:$4 sm:$0xff]  }
 0xa1f   :  { %11950 = vmatprep.mubr.msk.bf16.mxu0 %vm3210_vm11, %v7402_v29  ;;  %v6777_v15 = vrot.slane %v6775_v7, 1  ;;  %v13512_v47 = vld [vmem:[#allocation11 + $0x124] ss:$16 sps:$4 sm:$0xff]   ;;  %v13515_v7 = vld [vmem:[#allocation11 + $0xc] ss:$16 sps:$4 sm:$0xff]  }
 0xa20   :  { %v6784_v21 = vrot.slane %v6782_v31, 1  ;;  %7640 = vmatmul.mubr.bf16.vlgmr.msra.gmra.mrb[96].mxu0 %v7401_v63  ;;  %v13510_v31 = vld [vmem:[#allocation11 + $0x120] ss:$16 sps:$4 sm:$0xff]   ;;  %v13563_v28 = vld [vmem:[#allocation11 + $0x34c] ss:$16 sps:$4 sm:$0xff]  }
 0xa21   :  { %v6778_v35 = vor.u32 %v6777_v15, %v6773_v9  ;;  %v6688_v15 = vld [vmem:[#allocation4 + $0x10] sm:$0xf]  ;;  %v13516_v9 = vld [vmem:[#allocation11 + $0x28] ss:$16 sps:$4 sm:$0xff]  }
 0xa22   :  { %v6785_v32 = vor.u32 %v6784_v21, %v6780_v10  ;;  %v13513_v10 = vld [vmem:[#allocation11 + $0x8] ss:$16 sps:$4 sm:$0xff]   ;;  %v13518_v21 = vld [vmem:[#allocation11 + $0x2c] ss:$16 sps:$4 sm:$0xff]  }
 0xa24   :  { %11866 = vmatprep.mubr.msk.bf16.mxu1 %vm3210_vm11, %v6785_v32 }
 0xa25   :  { %7023 = vmatmul.mubr.bf16.vlgmr.msra.gmra.mrb[104].mxu1 %v6778_v35 }
 0xa26   :  { %7032 = vmatpush1.bf16.msra.mxu1 %v13453_v33  ;;  %11867 = vmatprep.mubr.msk.bf16.mxu1 %vm3210_vm11, %v6785_v32  ;;  %v13521_v32 = vld [vmem:[#allocation11 + $0x4c] ss:$16 sps:$4 sm:$0xff]   ;;  %v13519_v33 = vld [vmem:[#allocation11 + $0x48] ss:$16 sps:$4 sm:$0xff]  }
 0xa27   :  { %7033 = vmatprep.subr.bf16.mxu1 %v13458_v30  ;;  %v13522_v30 = vld [vmem:[#allocation11 + $0x68] ss:$16 sps:$4 sm:$0xff]  }
 0xa2a   :  { %7034 = vmatpush1.bf16.msra.mxu1 %v13456_v19  ;;  %v13527_v19 = vld [vmem:[#allocation11 + $0x8c] ss:$16 sps:$4 sm:$0xff]  }
 0xa2b   :  { %7035 = vmatprep.subr.bf16.mxu1 %v13461_v39  ;;  %v13525_v39 = vld [vmem:[#allocation11 + $0x88] ss:$16 sps:$4 sm:$0xff]  }
 0xa2e   :  { %7036 = vmatpush1.bf16.msra.mxu1 %v13459_v36  ;;  %v13530_v36 = vld [vmem:[#allocation11 + $0xac] ss:$16 sps:$4 sm:$0xff]  }
 0xa2f   :  { %7037 = vmatprep.subr.bf16.mxu1 %v13464_v14  ;;  %v13528_v14 = vld [vmem:[#allocation11 + $0xa8] ss:$16 sps:$4 sm:$0xff]  }
 0xa32   :  { %7038 = vmatpush1.bf16.msra.mxu1 %v13462_v43  ;;  %v13533_v43 = vld [vmem:[#allocation11 + $0xcc] ss:$16 sps:$4 sm:$0xff]  }
 0xa33   :  { %7039 = vmatprep.subr.bf16.mxu1 %v13467_v42  ;;  %v13531_v42 = vld [vmem:[#allocation11 + $0xc8] ss:$16 sps:$4 sm:$0xff]  }
 0xa36   :  { %7040 = vmatpush1.bf16.msra.mxu1 %v13465_v3  ;;  %v13536_v3 = vld [vmem:[#allocation11 + $0xec] ss:$16 sps:$4 sm:$0xff]  }
 0xa37   :  { %7041 = vmatprep.subr.bf16.mxu1 %v13470_v50  ;;  %v13534_v50 = vld [vmem:[#allocation11 + $0xe8] ss:$16 sps:$4 sm:$0xff]  }
 0xa3a   :  { %7042 = vmatpush1.bf16.msra.mxu1 %v13468_v44  ;;  %v13539_v44 = vld [vmem:[#allocation11 + $0x10c] ss:$16 sps:$4 sm:$0xff]  }
 0xa3b   :  { %7043 = vmatprep.subr.bf16.mxu1 %v13473_v56  ;;  %v13537_v56 = vld [vmem:[#allocation11 + $0x108] ss:$16 sps:$4 sm:$0xff]  }
 0xa3e   :  { %7044 = vmatpush1.bf16.msra.mxu1 %v13471_v55  ;;  %v13542_v55 = vld [vmem:[#allocation11 + $0x12c] ss:$16 sps:$4 sm:$0xff]  }
 0xa3f   :  { %7045 = vmatprep.subr.bf16.mxu1 %v13476_v52  ;;  %v13540_v52 = vld [vmem:[#allocation11 + $0x128] ss:$16 sps:$4 sm:$0xff]  }
 0xa42   :  { %7046 = vmatpush1.bf16.msra.mxu1 %v13474_v60  ;;  %v13545_v60 = vld [vmem:[#allocation11 + $0x28c] ss:$16 sps:$4 sm:$0xff]  }
 0xa43   :  { %7047 = vmatprep.subr.bf16.mxu1 %v13479_v4  ;;  %v13543_v4 = vld [vmem:[#allocation11 + $0x288] ss:$16 sps:$4 sm:$0xff]  }
 0xa46   :  { %7048 = vmatpush1.bf16.msra.mxu1 %v13477_v6  ;;  %v13548_v6 = vld [vmem:[#allocation11 + $0x2ac] ss:$16 sps:$4 sm:$0xff]  }
 0xa47   :  { %7049 = vmatprep.subr.bf16.mxu1 %v13482_v5  ;;  %v13546_v5 = vld [vmem:[#allocation11 + $0x2a8] ss:$16 sps:$4 sm:$0xff]  }
 0xa4a   :  { %7050 = vmatpush1.bf16.msra.mxu1 %v13480_v37  ;;  %v13551_v37 = vld [vmem:[#allocation11 + $0x2cc] ss:$16 sps:$4 sm:$0xff]  }
 0xa4b   :  { %7275 = vmatprep.subr.bf16.mxu1 %v13485_v34  ;;  %v13549_v34 = vld [vmem:[#allocation11 + $0x2c8] ss:$16 sps:$4 sm:$0xff]  }
 0xa4d   :  { %7064 = vmatmul.mubr.bf16.vlgmr.msra.gmra.mrb[108].mxu1 %v6778_v35  ;;  %v13524_v35 = vld [vmem:[#allocation11 + $0x6c] ss:$16 sps:$4 sm:$0xff]  }
 0xa4e   :  { %7276 = vmatpush1.bf16.msra.mxu1 %v13483_v41  ;;  %11908 = vmatprep.mubr.msk.bf16.mxu1 %vm3210_vm11, %v6689_v12  ;;  %v13554_v41 = vld [vmem:[#allocation11 + $0x2ec] ss:$16 sps:$4 sm:$0xff]  }
 0xa4f   :  { %7277 = vmatprep.subr.bf16.mxu1 %v13488_v11  ;;  %v13552_v11 = vld [vmem:[#allocation11 + $0x2e8] ss:$16 sps:$4 sm:$0xff]  }
 0xa52   :  { %7278 = vmatpush1.bf16.msra.mxu1 %v13486_v38  ;;  %v13555_v38 = vld [vmem:[#allocation11 + $0x308] ss:$16 sps:$4 sm:$0xff]  }
 0xa53   :  { %7279 = vmatprep.subr.bf16.mxu1 %v13491_v45  ;;  %v13560_v45 = vld [vmem:[#allocation11 + $0x32c] ss:$16 sps:$4 sm:$0xff]  }
 0xa56   :  { %7280 = vmatpush1.bf16.msra.mxu1 %v13489_v48  ;;  %v13558_v48 = vld [vmem:[#allocation11 + $0x328] ss:$16 sps:$4 sm:$0xff]  }
 0xa57   :  { %7281 = vmatprep.subr.bf16.mxu1 %v13494_v8  ;;  %v13566_v8 = vld [vmem:[#allocation11 + $0x36c] ss:$16 sps:$4 sm:$0xff]  }
 0xa5a   :  { %7282 = vmatpush1.bf16.msra.mxu1 %v13492_v53  ;;  %v13564_v53 = vld [vmem:[#allocation11 + $0x368] ss:$16 sps:$4 sm:$0xff]  }
 0xa5b   :  { %7283 = vmatprep.subr.bf16.mxu1 %v13497_v27  ;;  %v13569_v27 = vld [vmem:[#allocation11 + $0x38c] ss:$16 sps:$4 sm:$0xff]  }
 0xa5e   :  { %7284 = vmatpush1.bf16.msra.mxu1 %v13495_v17  ;;  %v13567_v17 = vld [vmem:[#allocation11 + $0x388] ss:$16 sps:$4 sm:$0xff]  }
 0xa5f   :  { %7285 = vmatprep.subr.bf16.mxu1 %v13500_v13  ;;  %v13572_v13 = vld [vmem:[#allocation11 + $0x3ac] ss:$16 sps:$4 sm:$0xff]  }
 0xa62   :  { %7286 = vmatpush1.bf16.msra.mxu1 %v13498_v23  ;;  %v13570_v23 = vld [vmem:[#allocation11 + $0x3a8] ss:$16 sps:$4 sm:$0xff]  }
 0xa63   :  { %7287 = vmatprep.subr.bf16.mxu1 %v13503_v18 }
 0xa66   :  { %7288 = vmatpush1.bf16.msra.mxu1 %v13501_v20 }
 0xa67   :  { %7289 = vmatprep.subr.bf16.mxu1 %v13506_v22 }
 0xa6a   :  { %7290 = vmatpush1.bf16.msra.mxu1 %v13504_v54 }
 0xa6b   :  { %7291 = vmatprep.subr.bf16.mxu1 %v13509_v25 }
 0xa6e   :  { %7292 = vmatpush1.bf16.msra.mxu1 %v13507_v57 }
 0xa6f   :  { %7293 = vmatprep.subr.bf16.mxu1 %v13512_v47 }
 0xa72   :  { %7294 = vmatpush1.bf16.msra.mxu1 %v13510_v31 }
 0xa73   :  { %7316 = vmatprep.subr.bf16.mxu1 %v13515_v7 }
 0xa75   :  { %7308 = vmatmul.mubr.bf16.vlgmr.msra.gmra.mrb[112].mxu1 %v6688_v15 }
 0xa76   :  { %7317 = vmatpush1.bf16.msra.mxu1 %v13513_v10  ;;  %11909 = vmatprep.mubr.msk.bf16.mxu1 %vm3210_vm11, %v6689_v12  ;;  %v13557_v12 = vld [vmem:[#allocation11 + $0x30c] ss:$16 sps:$4 sm:$0xff]  }
 0xa77   :  { %7318 = vmatprep.subr.bf16.mxu1 %v13518_v21 }
 0xa7a   :  { %7319 = vmatpush1.bf16.msra.mxu1 %v13516_v9 }
 0xa7b   :  { %7320 = vmatprep.subr.bf16.mxu1 %v13521_v32 }
 0xa7e   :  { %7321 = vmatpush1.bf16.msra.mxu1 %v13519_v33 }
 0xa7f   :  { %7322 = vmatprep.subr.bf16.mxu1 %v13524_v35 }
 0xa82   :  { %7323 = vmatpush1.bf16.msra.mxu1 %v13522_v30 }
 0xa83   :  { %7324 = vmatprep.subr.bf16.mxu1 %v13527_v19 }
 0xa86   :  { %7325 = vmatpush1.bf16.msra.mxu1 %v13525_v39 }
 0xa87   :  { %7326 = vmatprep.subr.bf16.mxu1 %v13530_v36 }
 0xa8a   :  { %7327 = vmatpush1.bf16.msra.mxu1 %v13528_v14 }
 0xa8b   :  { %7328 = vmatprep.subr.bf16.mxu1 %v13533_v43 }
 0xa8e   :  { %7329 = vmatpush1.bf16.msra.mxu1 %v13531_v42 }
 0xa8f   :  { %7330 = vmatprep.subr.bf16.mxu1 %v13536_v3 }
 0xa92   :  { %7331 = vmatpush1.bf16.msra.mxu1 %v13534_v50 }
 0xa93   :  { %7332 = vmatprep.subr.bf16.mxu1 %v13539_v44 }
 0xa96   :  { %7333 = vmatpush1.bf16.msra.mxu1 %v13537_v56 }
 0xa97   :  { %7334 = vmatprep.subr.bf16.mxu1 %v13542_v55 }
 0xa9a   :  { %7335 = vmatpush1.bf16.msra.mxu1 %v13540_v52 }
 0xa9b   :  { %7648 = vmatprep.subr.bf16.mxu1 %v13545_v60 }
 0xa9d   :  { %7349 = vmatmul.mubr.bf16.vlgmr.msra.gmra.mrb[116].mxu1 %v6688_v15 }
 0xa9e   :  { %7649 = vmatpush1.bf16.msra.mxu1 %v13543_v4  ;;  %11951 = vmatprep.mubr.msk.bf16.mxu1 %vm3210_vm11, %v7402_v29  ;;  %v13561_v29 = vld [vmem:[#allocation11 + $0x348] ss:$16 sps:$4 sm:$0xff]  }
 0xa9f   :  { %7650 = vmatprep.subr.bf16.mxu1 %v13548_v6 }
 0xaa2   :  { %7651 = vmatpush1.bf16.msra.mxu1 %v13546_v5 }
 0xaa3   :  { %7652 = vmatprep.subr.bf16.mxu1 %v13551_v37 }
 0xaa6   :  { %7653 = vmatpush1.bf16.msra.mxu1 %v13549_v34 }
 0xaa7   :  { %7654 = vmatprep.subr.bf16.mxu1 %v13554_v41 }
 0xaaa   :  { %7655 = vmatpush1.bf16.msra.mxu1 %v13552_v11 }
 0xaab   :  { %7656 = vmatprep.subr.bf16.mxu1 %v13557_v12 }
 0xaae   :  { %7657 = vmatpush1.bf16.msra.mxu1 %v13555_v38 }
 0xaaf   :  { %7658 = vmatprep.subr.bf16.mxu1 %v13560_v45 }
 0xab2   :  { %7659 = vmatpush1.bf16.msra.mxu1 %v13558_v48 }
 0xab3   :  { %7660 = vmatprep.subr.bf16.mxu1 %v13563_v28 }
 0xab6   :  { %7661 = vmatpush1.bf16.msra.mxu1 %v13561_v29 }
 0xab7   :  { %7662 = vmatprep.subr.bf16.mxu1 %v13566_v8 }
 0xaba   :  { %7663 = vmatpush1.bf16.msra.mxu1 %v13564_v53 }
 0xabb   :  { %7664 = vmatprep.subr.bf16.mxu1 %v13569_v27 }
 0xabe   :  { %7665 = vmatpush1.bf16.msra.mxu1 %v13567_v17 }
 0xabf   :  { %7666 = vmatprep.subr.bf16.mxu1 %v13572_v13 }
 0xac2   :  { %7667 = vmatpush1.bf16.msra.mxu1 %v13570_v23 }
 0xac5   :  { %7681 = vmatmul.mubr.bf16.vlgmr.msra.gmra.mrb[120].mxu1 %v7401_v63 }
 0xaf3   :  { %v7641_v18 = vpop.f32.mrb[96].mxu0 }
 0xaf4   :  { %v7643_v20 = vpop.f32.mrb[97].mxu0 }
 0xaf5   :  { %v7645_v22 = vpop.f32.mrb[98].mxu0 }
 0xaf6   :  { %v7646_v54 = vpop.f32.mrb[99].mxu0 }
 0xaf8   :  { %v7024_v25 = vpop.f32.mrb[104].mxu1 }
 0xaf9   :  { %v7026_v57 = vpop.f32.mrb[105].mxu1 }
 0xafa   :  { %v7028_v47 = vpop.f32.mrb[106].mxu1 }
 0xafb   :  { %v7029_v31 = vpop.f32.mrb[107].mxu1 }
 0xb20   :  { %v7065_v7 = vpop.f32.mrb[108].mxu1 }
 0xb21   :  { %v7067_v10 = vpop.f32.mrb[109].mxu1 }
 0xb22   :  { %v7069_v21 = vpop.f32.mrb[110].mxu1 }
 0xb23   :  { %v7070_v15 = vpop.f32.mrb[111].mxu1 }
 0xb48   :  { %v7309_v9 = vpop.f32.mrb[112].mxu1 }
 0xb49   :  { %v7310_v32 = vadd.f32 %v7309_v9, %v7024_v25  ;;  %v7311_v33 = vpop.f32.mrb[113].mxu1 }
 0xb4a   :  { %v7312_v35 = vadd.f32 %v7311_v33, %v7026_v57  ;;  %v7313_v30 = vpop.f32.mrb[114].mxu1 }
 0xb4b   :  { %v7689_v19 = vadd.f32 %v7641_v18, %v7310_v32  ;;  %v7314_v26 = vpop.f32.mrb[115].mxu1 }
 0xb4c   :  { %v7690_v63 = vadd.f32 %v7643_v20, %v7312_v35 }
 0xb4d   :  { %v7693_v39 = vadd.f32 %v7689_v19, %v14878_v40 }
 0xb4e   :  { %v7694_v36 = vadd.f32 %v7690_v63, %v14882_v49 }
 0xb4f   :  { %v7697_v14 = vmax.f32 %v7693_v39, 0.0 }
 0xb50   :  { %v7698_v43 = vmax.f32 %v7694_v36, 0.0 }
 0xb51   :  { %v7701_v42 = vpack.c.bf16 %v7697_v14, %v7697_v14 }
 0xb52   :  { %v7702_v3 = vpack.c.bf16 %v7698_v43, %v7698_v43 }
 0xb53   :  { %7705 = vst [vmem:[#allocation5 + $0x20] sm:$0xf] %v7701_v42 }
 0xb54   :  { %7706 = vst [vmem:[#allocation5 + $0x28] sm:$0xf] %v7702_v3 }
 0xb70   :  { %v7350_v50 = vpop.f32.mrb[116].mxu1 }
 0xb71   :  { %v7351_v44 = vadd.f32 %v7350_v50, %v7065_v7  ;;  %v7352_v56 = vpop.f32.mrb[117].mxu1 }
 0xb72   :  { %v7353_v55 = vadd.f32 %v7352_v56, %v7067_v10  ;;  %v7354_v52 = vpop.f32.mrb[118].mxu1 }
 0xb73   :  { %v7355_v60 = vpop.f32.mrb[119].mxu1 }
 0xb98   :  { %v7682_v4 = vpop.f32.mrb[120].mxu1 }
 0xb99   :  { %v7691_v6 = vadd.f32 %v7682_v4, %v7351_v44  ;;  %v7684_v5 = vpop.f32.mrb[121].mxu1 }
 0xb9a   :  { %v7692_v37 = vadd.f32 %v7684_v5, %v7353_v55  ;;  %v7686_v34 = vpop.f32.mrb[122].mxu1 }
 0xb9b   :  { %v7695_v40 = vadd.f32 %v7691_v6, %v14892_v51  ;;  %v7687_v49 = vpop.f32.mrb[123].mxu1 }
 0xb9c   :  { %v7696_v41 = vadd.f32 %v7692_v37, %v14896_v24 }
 0xb9d   :  { %v7699_v11 = vmax.f32 %v7695_v40, 0.0 }
 0xb9e   :  { %v7700_v12 = vmax.f32 %v7696_v41, 0.0 }
 0xb9f   :  { %v7703_v38 = vpack.c.bf16 %v7699_v11, %v7699_v11 }
 0xba0   :  { %v7704_v45 = vpack.c.bf16 %v7700_v12, %v7700_v12 }
 0xba1   :  { %7707 = vst [vmem:[#allocation5 + $0x30] sm:$0xf] %v7703_v38 }
 0xba2   :  { %7708 = vst [vmem:[#allocation5 + $0x38] sm:$0xf] %v7704_v45 }
 0xba3   :  { %13730 = dma.done.wait [#allocation7], 131072 }
 0xba4   :  { %13731 = vsyncadd [#allocation7], 4294836224  ;;  %v7895_v48 = vld [vmem:[#allocation6 + $0x408] sm:$0xff]  ;;  %v7894_v29 = vld [vmem:[#allocation6 + $0x400] sm:$0xff]  ;;  %vm7738_vm15 = vcmask 1040384   ;;  %s13751_s28 = smov [#allocation16]  }
 0xba5   :  { %v7959_v28 = vld [vmem:[#allocation6 + $0x608] sm:$0xff]  ;;  %8022 = vmatprep.subr.bf16.mxu0 %v7895_v48  ;;  %v7958_v8 = vld [vmem:[#allocation6 + $0x600] sm:$0xff]  ;;  %vm7739_vm0 = vsmask.f32 256  ;;  %v15581_v63 = vld [vmem:[#allocation5 + $0x18] sm:$0x1] }
 0xba6   :  { %8063 = vmatprep.subr.bf16.mxu1 %v7959_v28  ;;  %v7899_v53 = vld [vmem:[#allocation6 + $0x428] sm:$0xff]  ;;  %8023 = vmatpush1.bf16.msra.mxu0 %v7894_v29  ;;  %v7898_v51 = vld [vmem:[#allocation6 + $0x420] sm:$0xff]  ;;  %vm15576_vm1 = vmand %vm7738_vm15, %vm7739_vm0  ;;  %v7883_v43 = vshrl.u32 %v15581_v63, 16  ;;  %s10867_s4 = sshll.u32 %s13751_s28, 4  ;;  %vm10859_vm2 = vcmask 74752   ;;  %s10868_s4 = int_to_ptr.vmem [resolvable:$true] %s10867_s4 }
 0xba7   :  { %v7963_v27 = vld [vmem:[#allocation6 + $0x628] sm:$0xff]  ;;  %8064 = vmatpush1.bf16.msra.mxu1 %v7958_v8  ;;  %8024 = vmatprep.subr.bf16.mxu0 %v7899_v53  ;;  %v7962_v24 = vld [vmem:[#allocation6 + $0x620] sm:$0xff]  ;;  %v10151_v19 = vld [vmem:[#allocation6 + $0x1e58] sm:$0xff]  ;;  %p13707_p5 = scmp.lt.s32.totalorder %s10868_s4, %s10868_s4 }
 0xba8   :  { %8065 = vmatprep.subr.bf16.mxu1 %v7963_v27  ;;  %v7903_v17 = vld [vmem:[#allocation6 + $0x448] sm:$0xff]  ;;  %v7902_v23 = vld [vmem:[#allocation6 + $0x440] sm:$0xff] }
 0xba9   :  { %v7967_v13 = vld [vmem:[#allocation6 + $0x648] sm:$0xff]  ;;  %v7966_v18 = vld [vmem:[#allocation6 + $0x640] sm:$0xff]  ;;  %v15583_v39 = vld [vmem:[#allocation5 + $0x38] sm:$0x1] }
 0xbaa   :  { %8025 = vmatpush1.bf16.msra.mxu0 %v7898_v51  ;;  %v7907_v20 = vld [vmem:[#allocation6 + $0x468] sm:$0xff]  ;;  %v7906_v54 = vld [vmem:[#allocation6 + $0x460] sm:$0xff]  ;;  %v15595_v44 = vsel %vm15576_vm1, %v7883_v43, %v15583_v39  ;;  %v7961_v43 = vld [vmem:[#allocation6 + $0x618] sm:$0xff] }
 0xbab   :  { %8066 = vmatpush1.bf16.msra.mxu1 %v7962_v24  ;;  %8026 = vmatprep.subr.bf16.mxu0 %v7903_v17  ;;  %v7971_v22 = vld [vmem:[#allocation6 + $0x668] sm:$0xff]  ;;  %v7970_v25 = vld [vmem:[#allocation6 + $0x660] sm:$0xff] }
 0xbac   :  { %8067 = vmatprep.subr.bf16.mxu1 %v7967_v13  ;;  %v7911_v57 = vld [vmem:[#allocation6 + $0x488] sm:$0xff]  ;;  %v7910_v31 = vld [vmem:[#allocation6 + $0x480] sm:$0xff]  ;;  %8095 = vmatprep.mubr.bf16.mxu1 %v15595_v44 }
 0xbad   :  { %v7975_v47 = vld [vmem:[#allocation6 + $0x688] sm:$0xff]  ;;  %v7974_v7 = vld [vmem:[#allocation6 + $0x680] sm:$0xff] }
 0xbae   :  { %8027 = vmatpush1.bf16.msra.mxu0 %v7902_v23  ;;  %v7915_v10 = vld [vmem:[#allocation6 + $0x4a8] sm:$0xff]  ;;  %v7914_v15 = vld [vmem:[#allocation6 + $0x4a0] sm:$0xff] }
 0xbaf   :  { %8068 = vmatpush1.bf16.msra.mxu1 %v7966_v18  ;;  %8028 = vmatprep.subr.bf16.mxu0 %v7907_v20  ;;  %v7979_v21 = vld [vmem:[#allocation6 + $0x6a8] sm:$0xff]  ;;  %v7978_v9 = vld [vmem:[#allocation6 + $0x6a0] sm:$0xff] }
 0xbb0   :  { %8069 = vmatprep.subr.bf16.mxu1 %v7971_v22  ;;  %v7919_v32 = vld [vmem:[#allocation6 + $0x4c8] sm:$0xff]  ;;  %v7918_v36 = vld [vmem:[#allocation6 + $0x4c0] sm:$0xff]  ;;  %v7716_v22 = vld [vmem:[#allocation5 + $0x10] sm:$0x1] }
 0xbb1   :  { %v7983_v33 = vld [vmem:[#allocation6 + $0x6c8] sm:$0xff]  ;;  %v7982_v14 = vld [vmem:[#allocation6 + $0x6c0] sm:$0xff] }
 0xbb2   :  { %8029 = vmatpush1.bf16.msra.mxu0 %v7906_v54  ;;  %v15572_v35 = vld [vmem:[#allocation5 + $0x8] sm:$0x1]  ;;  %v7922_v56 = vld [vmem:[#allocation6 + $0x4e0] sm:$0xff] }
 0xbb3   :  { %8070 = vmatpush1.bf16.msra.mxu1 %v7970_v25  ;;  %8030 = vmatprep.subr.bf16.mxu0 %v7911_v57  ;;  %v15574_v30 = vld [vmem:[#allocation5 + $0x28] sm:$0x1]  ;;  %v7877_v26 = vshrl.u32 %v15572_v35, 16  ;;  %v7986_v55 = vld [vmem:[#allocation6 + $0x6e0] sm:$0xff] }
 0xbb4   :  { %8071 = vmatprep.subr.bf16.mxu1 %v7975_v47  ;;  %v7923_v42 = vld [vmem:[#allocation6 + $0x4e8] sm:$0xff]  ;;  %v7926_v4 = vld [vmem:[#allocation6 + $0x500] sm:$0xff] }
 0xbb5   :  { %v7987_v3 = vld [vmem:[#allocation6 + $0x6e8] sm:$0xff]  ;;  %v15589_v50 = vsel %vm15576_vm1, %v7877_v26, %v15574_v30  ;;  %v7990_v6 = vld [vmem:[#allocation6 + $0x700] sm:$0xff] }
 0xbb6   :  { %8031 = vmatpush1.bf16.msra.mxu0 %v7910_v31  ;;  %8054 = vmatprep.mubr.bf16.mxu0 %v15589_v50  ;;  %v7927_v52 = vld [vmem:[#allocation6 + $0x508] sm:$0xff]  ;;  %v7930_v34 = vld [vmem:[#allocation6 + $0x520] sm:$0xff] }
 0xbb7   :  { %8072 = vmatpush1.bf16.msra.mxu1 %v7974_v7  ;;  %8032 = vmatprep.subr.bf16.mxu0 %v7915_v10  ;;  %v7991_v60 = vld [vmem:[#allocation6 + $0x708] sm:$0xff]  ;;  %v7994_v40 = vld [vmem:[#allocation6 + $0x720] sm:$0xff]  ;;  %v7880_v10 = vshrl.u32 %v7716_v22, 16 }
 0xbb8   :  { %8073 = vmatprep.subr.bf16.mxu1 %v7979_v21  ;;  %v7931_v5 = vld [vmem:[#allocation6 + $0x528] sm:$0xff]  ;;  %v7934_v11 = vld [vmem:[#allocation6 + $0x540] sm:$0xff]  ;;  %v7726_v21 = vshll.u32 %v15574_v30, 16 }
 0xbb9   :  { %v7995_v37 = vld [vmem:[#allocation6 + $0x728] sm:$0xff]  ;;  %v7998_v12 = vld [vmem:[#allocation6 + $0x740] sm:$0xff] }
 0xbba   :  { %8033 = vmatpush1.bf16.msra.mxu0 %v7914_v15  ;;  %v7935_v49 = vld [vmem:[#allocation6 + $0x548] sm:$0xff]  ;;  %v7938_v48 = vld [vmem:[#allocation6 + $0x560] sm:$0xff]  ;;  %v7732_v15 = vshll.u32 %v15583_v39, 16  ;;  %v15611_v30 = vsel %vm15576_vm1, %v15572_v35, %v7726_v21  ;;  %v7900_v35 = vld [vmem:[#allocation6 + $0x430] sm:$0xff] }
 0xbbb   :  { %8074 = vmatpush1.bf16.msra.mxu1 %v7978_v9  ;;  %8034 = vmatprep.subr.bf16.mxu0 %v7919_v32  ;;  %v7999_v41 = vld [vmem:[#allocation6 + $0x748] sm:$0xff]  ;;  %v8002_v28 = vld [vmem:[#allocation6 + $0x760] sm:$0xff]  ;;  %v7720_v32 = vld [vmem:[#allocation5 + $0x30] sm:$0x1] }
 0xbbc   :  { %8075 = vmatprep.subr.bf16.mxu1 %v7983_v33  ;;  %v7939_v38 = vld [vmem:[#allocation6 + $0x568] sm:$0xff]  ;;  %v7942_v53 = vld [vmem:[#allocation6 + $0x580] sm:$0xff]  ;;  %v15616_v39 = vsel %vm15576_vm1, %v15581_v63, %v7732_v15  ;;  %v7964_v63 = vld [vmem:[#allocation6 + $0x630] sm:$0xff] }
 0xbbd   :  { %v8003_v45 = vld [vmem:[#allocation6 + $0x768] sm:$0xff]  ;;  %v8006_v27 = vld [vmem:[#allocation6 + $0x780] sm:$0xff]  ;;  %v8001_v21 = vld [vmem:[#allocation6 + $0x758] sm:$0xff] }
 0xbbe   :  { %8035 = vmatpush1.bf16.msra.mxu0 %v7918_v36  ;;  %v7943_v29 = vld [vmem:[#allocation6 + $0x588] sm:$0xff]  ;;  %v7946_v17 = vld [vmem:[#allocation6 + $0x5a0] sm:$0xff]  ;;  %v7729_v36 = vshll.u32 %v7720_v32, 16  ;;  %v7936_v15 = vld [vmem:[#allocation6 + $0x550] sm:$0xff] }
 0xbbf   :  { %8076 = vmatpush1.bf16.msra.mxu1 %v7982_v14  ;;  %8036 = vmatprep.subr.bf16.mxu0 %v7923_v42  ;;  %v8007_v8 = vld [vmem:[#allocation6 + $0x788] sm:$0xff]  ;;  %v8010_v13 = vld [vmem:[#allocation6 + $0x7a0] sm:$0xff]  ;;  %v7897_v14 = vld [vmem:[#allocation6 + $0x418] sm:$0xff] }
 0xbc0   :  { %8077 = vmatprep.subr.bf16.mxu1 %v7987_v3  ;;  %v7947_v51 = vld [vmem:[#allocation6 + $0x5a8] sm:$0xff]  ;;  %v7714_v20 = vld [vmem:[#allocation5] sm:$0x1]  ;;  %v15606_v3 = vsel %vm15576_vm1, %v7880_v10, %v7720_v32  ;;  %v7937_v10 = vld [vmem:[#allocation6 + $0x558] sm:$0xff] }
 0xbc1   :  { %v8011_v24 = vld [vmem:[#allocation6 + $0x7a8] sm:$0xff]  ;;  %v7950_v54 = vld [vmem:[#allocation6 + $0x5c0] sm:$0xff]  ;;  %v7874_v7 = vshrl.u32 %v7714_v20, 16  ;;  %v7941_v32 = vld [vmem:[#allocation6 + $0x578] sm:$0xff] }
 0xbc2   :  { %8037 = vmatpush1.bf16.msra.mxu0 %v7922_v56  ;;  %v7951_v23 = vld [vmem:[#allocation6 + $0x5c8] sm:$0xff]  ;;  %v8014_v25 = vld [vmem:[#allocation6 + $0x7c0] sm:$0xff] }
 0xbc3   :  { %8078 = vmatpush1.bf16.msra.mxu1 %v7986_v55  ;;  %8038 = vmatprep.subr.bf16.mxu0 %v7927_v52  ;;  %v8015_v18 = vld [vmem:[#allocation6 + $0x7c8] sm:$0xff]  ;;  %v7718_v31 = vld [vmem:[#allocation5 + $0x20] sm:$0x1]  ;;  %v7896_v55 = vld [vmem:[#allocation6 + $0x410] sm:$0xff] }
 0xbc4   :  { %8079 = vmatprep.subr.bf16.mxu1 %v7991_v60  ;;  %v7955_v57 = vld [vmem:[#allocation6 + $0x5e8] sm:$0xff]  ;;  %v7723_v9 = vshll.u32 %v7718_v31, 16  ;;  %v7954_v33 = vld [vmem:[#allocation6 + $0x5e0] sm:$0xff]  ;;  %v15602_v42 = vsel %vm15576_vm1, %v7874_v7, %v7718_v31  ;;  %v7960_v52 = vld [vmem:[#allocation6 + $0x610] sm:$0xff] }
 0xbc5   :  { %v8019_v47 = vld [vmem:[#allocation6 + $0x7e8] sm:$0xff]  ;;  %v8018_v26 = vld [vmem:[#allocation6 + $0x7e0] sm:$0xff]  ;;  %v7901_v60 = vld [vmem:[#allocation6 + $0x438] sm:$0xff] }
 0xbc6   :  { %8039 = vmatpush1.bf16.msra.mxu0 %v7926_v4  ;;  %v15620_v56 = vsel %vm15576_vm1, %v7714_v20, %v7723_v9  ;;  %v7965_v4 = vld [vmem:[#allocation6 + $0x638] sm:$0xff]  ;;  %v7932_v31 = vld [vmem:[#allocation6 + $0x530] sm:$0xff]  ;;  %v13606_v58 = vld [vmem:[%s16023_s8] sm:$0xff]  }
 0xbc7   :  { %8080 = vmatpush1.bf16.msra.mxu1 %v7990_v6  ;;  %8040 = vmatprep.subr.bf16.mxu0 %v7931_v5  ;;  %v15624_v6 = vsel %vm15576_vm1, %v7716_v22, %v7729_v36  ;;  %v7905_v5 = vld [vmem:[#allocation6 + $0x458] sm:$0xff]  ;;  %v7996_v7 = vld [vmem:[#allocation6 + $0x730] sm:$0xff] }
 0xbc8   :  { %8081 = vmatprep.subr.bf16.mxu1 %v7995_v37  ;;  %v7969_v37 = vld [vmem:[#allocation6 + $0x658] sm:$0xff]  ;;  %v8000_v9 = vld [vmem:[#allocation6 + $0x750] sm:$0xff] }
 0xbc9   :  { %v7929_v20 = vld [vmem:[#allocation6 + $0x518] sm:$0xff]  ;;  %v8004_v36 = vld [vmem:[#allocation6 + $0x770] sm:$0xff] }
 0xbca   :  { %8041 = vmatpush1.bf16.msra.mxu0 %v7930_v34  ;;  %v7904_v34 = vld [vmem:[#allocation6 + $0x450] sm:$0xff]  ;;  %v7993_v22 = vld [vmem:[#allocation6 + $0x718] sm:$0xff] }
 0xbcb   :  { %8082 = vmatpush1.bf16.msra.mxu1 %v7994_v40  ;;  %8042 = vmatprep.subr.bf16.mxu0 %v7935_v49  ;;  %v7968_v40 = vld [vmem:[#allocation6 + $0x650] sm:$0xff]  ;;  %v7909_v49 = vld [vmem:[#allocation6 + $0x478] sm:$0xff] }
 0xbcc   :  { %8083 = vmatprep.subr.bf16.mxu1 %v7999_v41  ;;  %v7973_v41 = vld [vmem:[#allocation6 + $0x678] sm:$0xff] }
 0xbce   :  { %8043 = vmatpush1.bf16.msra.mxu0 %v7934_v11  ;;  %v7908_v11 = vld [vmem:[#allocation6 + $0x470] sm:$0xff] }
 0xbcf   :  { %8084 = vmatpush1.bf16.msra.mxu1 %v7998_v12  ;;  %8044 = vmatprep.subr.bf16.mxu0 %v7939_v38  ;;  %v7972_v12 = vld [vmem:[#allocation6 + $0x670] sm:$0xff]  ;;  %v7913_v38 = vld [vmem:[#allocation6 + $0x498] sm:$0xff] }
 0xbd0   :  { %8085 = vmatprep.subr.bf16.mxu1 %v8003_v45  ;;  %v7977_v45 = vld [vmem:[#allocation6 + $0x698] sm:$0xff] }
 0xbd2   :  { %8045 = vmatpush1.bf16.msra.mxu0 %v7938_v48  ;;  %v7912_v48 = vld [vmem:[#allocation6 + $0x490] sm:$0xff] }
 0xbd3   :  { %8086 = vmatpush1.bf16.msra.mxu1 %v8002_v28  ;;  %8046 = vmatprep.subr.bf16.mxu0 %v7943_v29  ;;  %v7981_v28 = vld [vmem:[#allocation6 + $0x6b8] sm:$0xff]  ;;  %v7916_v29 = vld [vmem:[#allocation6 + $0x4b0] sm:$0xff] }
 0xbd4   :  { %8087 = vmatprep.subr.bf16.mxu1 %v8007_v8  ;;  %v7980_v8 = vld [vmem:[#allocation6 + $0x6b0] sm:$0xff] }
 0xbd6   :  { %8047 = vmatpush1.bf16.msra.mxu0 %v7942_v53  ;;  %v7921_v53 = vld [vmem:[#allocation6 + $0x4d8] sm:$0xff] }
 0xbd7   :  { %8088 = vmatpush1.bf16.msra.mxu1 %v8006_v27  ;;  %8048 = vmatprep.subr.bf16.mxu0 %v7947_v51  ;;  %v7985_v27 = vld [vmem:[#allocation6 + $0x6d8] sm:$0xff]  ;;  %v7920_v51 = vld [vmem:[#allocation6 + $0x4d0] sm:$0xff] }
 0xbd8   :  { %8089 = vmatprep.subr.bf16.mxu1 %v8011_v24  ;;  %v7984_v24 = vld [vmem:[#allocation6 + $0x6d0] sm:$0xff] }
 0xbda   :  { %8049 = vmatpush1.bf16.msra.mxu0 %v7946_v17  ;;  %v7925_v17 = vld [vmem:[#allocation6 + $0x4f8] sm:$0xff] }
 0xbdb   :  { %8090 = vmatpush1.bf16.msra.mxu1 %v8010_v13  ;;  %8050 = vmatprep.subr.bf16.mxu0 %v7951_v23  ;;  %v7989_v13 = vld [vmem:[#allocation6 + $0x6f8] sm:$0xff]  ;;  %v7924_v23 = vld [vmem:[#allocation6 + $0x4f0] sm:$0xff] }
 0xbdc   :  { %8091 = vmatprep.subr.bf16.mxu1 %v8015_v18  ;;  %v7988_v18 = vld [vmem:[#allocation6 + $0x6f0] sm:$0xff] }
 0xbde   :  { %8051 = vmatpush1.bf16.msra.mxu0 %v7950_v54  ;;  %v7928_v54 = vld [vmem:[#allocation6 + $0x510] sm:$0xff] }
 0xbdf   :  { %8092 = vmatpush1.bf16.msra.mxu1 %v8014_v25  ;;  %8052 = vmatprep.subr.bf16.mxu0 %v7955_v57  ;;  %v7992_v25 = vld [vmem:[#allocation6 + $0x710] sm:$0xff]  ;;  %v7933_v57 = vld [vmem:[#allocation6 + $0x538] sm:$0xff] }
 0xbe0   :  { %8093 = vmatprep.subr.bf16.mxu1 %v8019_v47  ;;  %v7997_v47 = vld [vmem:[#allocation6 + $0x738] sm:$0xff] }
 0xbe2   :  { %8053 = vmatpush1.bf16.msra.mxu0 %v7954_v33  ;;  %v8005_v33 = vld [vmem:[#allocation6 + $0x778] sm:$0xff] }
 0xbe3   :  { %8094 = vmatpush1.bf16.msra.mxu1 %v8018_v26  ;;  %8104 = vmatprep.subr.bf16.mxu0 %v7897_v14  ;;  %v7940_v26 = vld [vmem:[#allocation6 + $0x570] sm:$0xff]  ;;  %v7945_v14 = vld [vmem:[#allocation6 + $0x598] sm:$0xff] }
 0xbe4   :  { %8145 = vmatprep.subr.bf16.mxu1 %v7961_v43  ;;  %v8009_v43 = vld [vmem:[#allocation6 + $0x798] sm:$0xff] }
 0xbe5   :  { %8055 = vmatmul.mubr.bf16.vlgmr.msra.gmra.mrb[100].mxu0 %v15602_v42 }
 0xbe6   :  { %8096 = vmatmul.mubr.bf16.vlgmr.msra.gmra.mrb[124].mxu1 %v15606_v3  ;;  %8105 = vmatpush1.bf16.msra.mxu0 %v7896_v55  ;;  %v7944_v55 = vld [vmem:[#allocation6 + $0x590] sm:$0xff] }
 0xbe7   :  { %8146 = vmatpush1.bf16.msra.mxu1 %v7960_v52  ;;  %8106 = vmatprep.subr.bf16.mxu0 %v7901_v60  ;;  %v8008_v52 = vld [vmem:[#allocation6 + $0x790] sm:$0xff]  ;;  %v7949_v60 = vld [vmem:[#allocation6 + $0x5b8] sm:$0xff] }
 0xbe8   :  { %8147 = vmatprep.subr.bf16.mxu1 %v7965_v4  ;;  %8136 = vmatprep.mubr.bf16.mxu0 %v15589_v50  ;;  %v7976_v50 = vld [vmem:[#allocation6 + $0x690] sm:$0xff]  ;;  %v8013_v4 = vld [vmem:[#allocation6 + $0x7b8] sm:$0xff] }
 0xbe9   :  { %8177 = vmatprep.mubr.bf16.mxu1 %v15595_v44  ;;  %v7917_v44 = vld [vmem:[#allocation6 + $0x4b8] sm:$0xff] }
 0xbea   :  { %8107 = vmatpush1.bf16.msra.mxu0 %v7900_v35  ;;  %v7948_v35 = vld [vmem:[#allocation6 + $0x5b0] sm:$0xff] }
 0xbeb   :  { %8148 = vmatpush1.bf16.msra.mxu1 %v7964_v63  ;;  %8108 = vmatprep.subr.bf16.mxu0 %v7905_v5  ;;  %v8012_v63 = vld [vmem:[#allocation6 + $0x7b0] sm:$0xff]  ;;  %v7953_v5 = vld [vmem:[#allocation6 + $0x5d8] sm:$0xff] }
 0xbec   :  { %8149 = vmatprep.subr.bf16.mxu1 %v7969_v37  ;;  %v8017_v37 = vld [vmem:[#allocation6 + $0x7d8] sm:$0xff] }
 0xbee   :  { %8109 = vmatpush1.bf16.msra.mxu0 %v7904_v34  ;;  %v7952_v34 = vld [vmem:[#allocation6 + $0x5d0] sm:$0xff] }
 0xbef   :  { %8150 = vmatpush1.bf16.msra.mxu1 %v7968_v40  ;;  %8110 = vmatprep.subr.bf16.mxu0 %v7909_v49  ;;  %v8016_v40 = vld [vmem:[#allocation6 + $0x7d0] sm:$0xff]  ;;  %v7957_v49 = vld [vmem:[#allocation6 + $0x5f8] sm:$0xff] }
 0xbf0   :  { %8151 = vmatprep.subr.bf16.mxu1 %v7973_v41  ;;  %v8021_v41 = vld [vmem:[#allocation6 + $0x7f8] sm:$0xff] }
 0xbf2   :  { %8111 = vmatpush1.bf16.msra.mxu0 %v7908_v11  ;;  %v7956_v11 = vld [vmem:[#allocation6 + $0x5f0] sm:$0xff] }
 0xbf3   :  { %8152 = vmatpush1.bf16.msra.mxu1 %v7972_v12  ;;  %8112 = vmatprep.subr.bf16.mxu0 %v7913_v38  ;;  %v8020_v12 = vld [vmem:[#allocation6 + $0x7f0] sm:$0xff]  ;;  %v7746_v38 = vld [vmem:[#allocation6 + $0x8] sm:$0xff] }
 0xbf4   :  { %8153 = vmatprep.subr.bf16.mxu1 %v7977_v45  ;;  %v7810_v45 = vld [vmem:[#allocation6 + $0x208] sm:$0xff] }
 0xbf6   :  { %8113 = vmatpush1.bf16.msra.mxu0 %v7912_v48  ;;  %v7745_v48 = vld [vmem:[#allocation6] sm:$0xff] }
 0xbf7   :  { %8154 = vmatpush1.bf16.msra.mxu1 %v7976_v50  ;;  %8114 = vmatprep.subr.bf16.mxu0 %v7917_v44  ;;  %v7809_v50 = vld [vmem:[#allocation6 + $0x200] sm:$0xff]  ;;  %v7750_v44 = vld [vmem:[#allocation6 + $0x28] sm:$0xff] }
 0xbf8   :  { %8155 = vmatprep.subr.bf16.mxu1 %v7981_v28  ;;  %v7814_v28 = vld [vmem:[#allocation6 + $0x228] sm:$0xff] }
 0xbfa   :  { %8115 = vmatpush1.bf16.msra.mxu0 %v7916_v29  ;;  %v7749_v29 = vld [vmem:[#allocation6 + $0x20] sm:$0xff] }
 0xbfb   :  { %8156 = vmatpush1.bf16.msra.mxu1 %v7980_v8  ;;  %8116 = vmatprep.subr.bf16.mxu0 %v7921_v53  ;;  %v7813_v8 = vld [vmem:[#allocation6 + $0x220] sm:$0xff]  ;;  %v7754_v53 = vld [vmem:[#allocation6 + $0x48] sm:$0xff] }
 0xbfc   :  { %8157 = vmatprep.subr.bf16.mxu1 %v7985_v27  ;;  %v7818_v27 = vld [vmem:[#allocation6 + $0x248] sm:$0xff] }
 0xbfe   :  { %8117 = vmatpush1.bf16.msra.mxu0 %v7920_v51  ;;  %v7753_v51 = vld [vmem:[#allocation6 + $0x40] sm:$0xff] }
 0xbff   :  { %8158 = vmatpush1.bf16.msra.mxu1 %v7984_v24  ;;  %8118 = vmatprep.subr.bf16.mxu0 %v7925_v17  ;;  %v7758_v24 = vld [vmem:[#allocation6 + $0x68] sm:$0xff]  ;;  %v7757_v17 = vld [vmem:[#allocation6 + $0x60] sm:$0xff] }
 0xc00   :  { %8159 = vmatprep.subr.bf16.mxu1 %v7989_v13  ;;  %v7821_v13 = vld [vmem:[#allocation6 + $0x260] sm:$0xff] }
 0xc02   :  { %8119 = vmatpush1.bf16.msra.mxu0 %v7924_v23  ;;  %v7762_v23 = vld [vmem:[#allocation6 + $0x88] sm:$0xff] }
 0xc03   :  { %8160 = vmatpush1.bf16.msra.mxu1 %v7988_v18  ;;  %8120 = vmatprep.subr.bf16.mxu0 %v7929_v20  ;;  %v7826_v18 = vld [vmem:[#allocation6 + $0x288] sm:$0xff]  ;;  %v7761_v20 = vld [vmem:[#allocation6 + $0x80] sm:$0xff] }
 0xc04   :  { %8161 = vmatprep.subr.bf16.mxu1 %v7993_v22  ;;  %v7825_v22 = vld [vmem:[#allocation6 + $0x280] sm:$0xff] }
 0xc06   :  { %8121 = vmatpush1.bf16.msra.mxu0 %v7928_v54  ;;  %v7766_v54 = vld [vmem:[#allocation6 + $0xa8] sm:$0xff] }
 0xc07   :  { %8162 = vmatpush1.bf16.msra.mxu1 %v7992_v25  ;;  %8122 = vmatprep.subr.bf16.mxu0 %v7933_v57  ;;  %v7830_v25 = vld [vmem:[#allocation6 + $0x2a8] sm:$0xff]  ;;  %v7765_v57 = vld [vmem:[#allocation6 + $0xa0] sm:$0xff] }
 0xc08   :  { %8163 = vmatprep.subr.bf16.mxu1 %v7997_v47  ;;  %v7829_v47 = vld [vmem:[#allocation6 + $0x2a0] sm:$0xff] }
 0xc0a   :  { %8123 = vmatpush1.bf16.msra.mxu0 %v7932_v31  ;;  %v7770_v31 = vld [vmem:[#allocation6 + $0xc8] sm:$0xff] }
 0xc0b   :  { %8164 = vmatpush1.bf16.msra.mxu1 %v7996_v7  ;;  %8124 = vmatprep.subr.bf16.mxu0 %v7937_v10  ;;  %v7834_v7 = vld [vmem:[#allocation6 + $0x2c8] sm:$0xff]  ;;  %v7769_v10 = vld [vmem:[#allocation6 + $0xc0] sm:$0xff] }
 0xc0c   :  { %8165 = vmatprep.subr.bf16.mxu1 %v8001_v21  ;;  %v7833_v21 = vld [vmem:[#allocation6 + $0x2c0] sm:$0xff] }
 0xc0e   :  { %8125 = vmatpush1.bf16.msra.mxu0 %v7936_v15  ;;  %v7774_v15 = vld [vmem:[#allocation6 + $0xe8] sm:$0xff] }
 0xc0f   :  { %8166 = vmatpush1.bf16.msra.mxu1 %v8000_v9  ;;  %8126 = vmatprep.subr.bf16.mxu0 %v7941_v32  ;;  %v7838_v9 = vld [vmem:[#allocation6 + $0x2e8] sm:$0xff]  ;;  %v7773_v32 = vld [vmem:[#allocation6 + $0xe0] sm:$0xff] }
 0xc10   :  { %8167 = vmatprep.subr.bf16.mxu1 %v8005_v33  ;;  %v7837_v33 = vld [vmem:[#allocation6 + $0x2e0] sm:$0xff] }
 0xc12   :  { %8127 = vmatpush1.bf16.msra.mxu0 %v7940_v26  ;;  %v7778_v26 = vld [vmem:[#allocation6 + $0x108] sm:$0xff] }
 0xc13   :  { %8168 = vmatpush1.bf16.msra.mxu1 %v8004_v36  ;;  %8128 = vmatprep.subr.bf16.mxu0 %v7945_v14  ;;  %v7842_v36 = vld [vmem:[#allocation6 + $0x308] sm:$0xff]  ;;  %v7777_v14 = vld [vmem:[#allocation6 + $0x100] sm:$0xff] }
 0xc14   :  { %8169 = vmatprep.subr.bf16.mxu1 %v8009_v43  ;;  %v7841_v43 = vld [vmem:[#allocation6 + $0x300] sm:$0xff] }
 0xc16   :  { %8129 = vmatpush1.bf16.msra.mxu0 %v7944_v55  ;;  %v7782_v55 = vld [vmem:[#allocation6 + $0x128] sm:$0xff] }
 0xc17   :  { %8170 = vmatpush1.bf16.msra.mxu1 %v8008_v52  ;;  %8130 = vmatprep.subr.bf16.mxu0 %v7949_v60  ;;  %v7846_v52 = vld [vmem:[#allocation6 + $0x328] sm:$0xff]  ;;  %v7781_v60 = vld [vmem:[#allocation6 + $0x120] sm:$0xff] }
 0xc18   :  { %8171 = vmatprep.subr.bf16.mxu1 %v8013_v4  ;;  %v7845_v4 = vld [vmem:[#allocation6 + $0x320] sm:$0xff] }
 0xc1a   :  { %8131 = vmatpush1.bf16.msra.mxu0 %v7948_v35  ;;  %v7786_v35 = vld [vmem:[#allocation6 + $0x148] sm:$0xff] }
 0xc1b   :  { %8172 = vmatpush1.bf16.msra.mxu1 %v8012_v63  ;;  %8132 = vmatprep.subr.bf16.mxu0 %v7953_v5  ;;  %v7850_v63 = vld [vmem:[#allocation6 + $0x348] sm:$0xff]  ;;  %v7785_v5 = vld [vmem:[#allocation6 + $0x140] sm:$0xff] }
 0xc1c   :  { %8173 = vmatprep.subr.bf16.mxu1 %v8017_v37  ;;  %v7849_v37 = vld [vmem:[#allocation6 + $0x340] sm:$0xff] }
 0xc1e   :  { %8133 = vmatpush1.bf16.msra.mxu0 %v7952_v34  ;;  %v7790_v34 = vld [vmem:[#allocation6 + $0x168] sm:$0xff] }
 0xc1f   :  { %8174 = vmatpush1.bf16.msra.mxu1 %v8016_v40  ;;  %8134 = vmatprep.subr.bf16.mxu0 %v7957_v49  ;;  %v7854_v40 = vld [vmem:[#allocation6 + $0x368] sm:$0xff]  ;;  %v7789_v49 = vld [vmem:[#allocation6 + $0x160] sm:$0xff] }
 0xc20   :  { %8175 = vmatprep.subr.bf16.mxu1 %v8021_v41  ;;  %v7853_v41 = vld [vmem:[#allocation6 + $0x360] sm:$0xff] }
 0xc22   :  { %8135 = vmatpush1.bf16.msra.mxu0 %v7956_v11  ;;  %v7794_v11 = vld [vmem:[#allocation6 + $0x188] sm:$0xff] }
 0xc23   :  { %8176 = vmatpush1.bf16.msra.mxu1 %v8020_v12  ;;  %8186 = vmatprep.subr.bf16.mxu0 %v7746_v38  ;;  %v7858_v12 = vld [vmem:[#allocation6 + $0x388] sm:$0xff]  ;;  %v7793_v38 = vld [vmem:[#allocation6 + $0x180] sm:$0xff] }
 0xc24   :  { %8227 = vmatprep.subr.bf16.mxu1 %v7810_v45  ;;  %v7857_v45 = vld [vmem:[#allocation6 + $0x380] sm:$0xff] }
 0xc25   :  { %8137 = vmatmul.mubr.bf16.vlgmr.msra.gmra.mrb[104].mxu0 %v15602_v42  ;;  %v7817_v42 = vld [vmem:[#allocation6 + $0x240] sm:$0xff] }
 0xc26   :  { %8178 = vmatmul.mubr.bf16.vlgmr.msra.gmra.mrb[128].mxu1 %v15606_v3  ;;  %8187 = vmatpush1.bf16.msra.mxu0 %v7745_v48  ;;  %v7822_v3 = vld [vmem:[#allocation6 + $0x268] sm:$0xff] }
 0xc27   :  { %8228 = vmatpush1.bf16.msra.mxu1 %v7809_v50  ;;  %8188 = vmatprep.subr.bf16.mxu0 %v7750_v44  ;;  %v7798_v48 = vld [vmem:[#allocation6 + $0x1a8] sm:$0xff]  ;;  %v7797_v44 = vld [vmem:[#allocation6 + $0x1a0] sm:$0xff] }
 0xc28   :  { %8229 = vmatprep.subr.bf16.mxu1 %v7814_v28  ;;  %8218 = vmatprep.mubr.bf16.mxu0 %v15611_v30  ;;  %v7862_v50 = vld [vmem:[#allocation6 + $0x3a8] sm:$0xff]  ;;  %v7861_v28 = vld [vmem:[#allocation6 + $0x3a0] sm:$0xff] }
 0xc29   :  { %8259 = vmatprep.mubr.bf16.mxu1 %v15616_v39 }
 0xc2a   :  { %8189 = vmatpush1.bf16.msra.mxu0 %v7749_v29  ;;  %v7802_v29 = vld [vmem:[#allocation6 + $0x1c8] sm:$0xff] }
 0xc2b   :  { %8230 = vmatpush1.bf16.msra.mxu1 %v7813_v8  ;;  %8190 = vmatprep.subr.bf16.mxu0 %v7754_v53  ;;  %v7866_v8 = vld [vmem:[#allocation6 + $0x3c8] sm:$0xff]  ;;  %v7801_v53 = vld [vmem:[#allocation6 + $0x1c0] sm:$0xff] }
 0xc2c   :  { %8231 = vmatprep.subr.bf16.mxu1 %v7818_v27  ;;  %v7865_v27 = vld [vmem:[#allocation6 + $0x3c0] sm:$0xff] }
 0xc2e   :  { %8191 = vmatpush1.bf16.msra.mxu0 %v7753_v51  ;;  %v7806_v51 = vld [vmem:[#allocation6 + $0x1e8] sm:$0xff] }
 0xc2f   :  { %8232 = vmatpush1.bf16.msra.mxu1 %v7817_v42  ;;  %8192 = vmatprep.subr.bf16.mxu0 %v7758_v24  ;;  %v7870_v42 = vld [vmem:[#allocation6 + $0x3e8] sm:$0xff]  ;;  %v7805_v24 = vld [vmem:[#allocation6 + $0x1e0] sm:$0xff] }
 0xc30   :  { %8233 = vmatprep.subr.bf16.mxu1 %v7822_v3  ;;  %v7869_v3 = vld [vmem:[#allocation6 + $0x3e0] sm:$0xff] }
 0xc32   :  { %8193 = vmatpush1.bf16.msra.mxu0 %v7757_v17  ;;  %v7748_v17 = vld [vmem:[#allocation6 + $0x18] sm:$0xff] }
 0xc33   :  { %8234 = vmatpush1.bf16.msra.mxu1 %v7821_v13  ;;  %8194 = vmatprep.subr.bf16.mxu0 %v7762_v23  ;;  %v7812_v13 = vld [vmem:[#allocation6 + $0x218] sm:$0xff]  ;;  %v7747_v23 = vld [vmem:[#allocation6 + $0x10] sm:$0xff] }
 0xc34   :  { %8235 = vmatprep.subr.bf16.mxu1 %v7826_v18  ;;  %v7811_v18 = vld [vmem:[#allocation6 + $0x210] sm:$0xff] }
 0xc36   :  { %8195 = vmatpush1.bf16.msra.mxu0 %v7761_v20  ;;  %v7752_v20 = vld [vmem:[#allocation6 + $0x38] sm:$0xff] }
 0xc37   :  { %8236 = vmatpush1.bf16.msra.mxu1 %v7825_v22  ;;  %8196 = vmatprep.subr.bf16.mxu0 %v7766_v54  ;;  %v7816_v22 = vld [vmem:[#allocation6 + $0x238] sm:$0xff]  ;;  %v7751_v54 = vld [vmem:[#allocation6 + $0x30] sm:$0xff] }
 0xc38   :  { %8237 = vmatprep.subr.bf16.mxu1 %v7830_v25  ;;  %v7815_v25 = vld [vmem:[#allocation6 + $0x230] sm:$0xff] }
 0xc3a   :  { %8197 = vmatpush1.bf16.msra.mxu0 %v7765_v57  ;;  %v7756_v57 = vld [vmem:[#allocation6 + $0x58] sm:$0xff] }
 0xc3b   :  { %8238 = vmatpush1.bf16.msra.mxu1 %v7829_v47  ;;  %8198 = vmatprep.subr.bf16.mxu0 %v7770_v31  ;;  %v7820_v47 = vld [vmem:[#allocation6 + $0x258] sm:$0xff]  ;;  %v7755_v31 = vld [vmem:[#allocation6 + $0x50] sm:$0xff] }
 0xc3c   :  { %8239 = vmatprep.subr.bf16.mxu1 %v7834_v7  ;;  %v7819_v7 = vld [vmem:[#allocation6 + $0x250] sm:$0xff] }
 0xc3e   :  { %8199 = vmatpush1.bf16.msra.mxu0 %v7769_v10  ;;  %v7760_v10 = vld [vmem:[#allocation6 + $0x78] sm:$0xff] }
 0xc3f   :  { %8240 = vmatpush1.bf16.msra.mxu1 %v7833_v21  ;;  %8200 = vmatprep.subr.bf16.mxu0 %v7774_v15  ;;  %v7824_v21 = vld [vmem:[#allocation6 + $0x278] sm:$0xff]  ;;  %v7759_v15 = vld [vmem:[#allocation6 + $0x70] sm:$0xff] }
 0xc40   :  { %8241 = vmatprep.subr.bf16.mxu1 %v7838_v9  ;;  %v7823_v9 = vld [vmem:[#allocation6 + $0x270] sm:$0xff] }
 0xc42   :  { %8201 = vmatpush1.bf16.msra.mxu0 %v7773_v32  ;;  %v7764_v32 = vld [vmem:[#allocation6 + $0x98] sm:$0xff] }
 0xc43   :  { %8242 = vmatpush1.bf16.msra.mxu1 %v7837_v33  ;;  %8202 = vmatprep.subr.bf16.mxu0 %v7778_v26  ;;  %v7828_v33 = vld [vmem:[#allocation6 + $0x298] sm:$0xff] }
 0xc44   :  { %8243 = vmatprep.subr.bf16.mxu1 %v7842_v36  ;;  %v7768_v26 = vld [vmem:[#allocation6 + $0xb8] sm:$0xff] }
 0xc45   :  { %v7832_v36 = vld [vmem:[#allocation6 + $0x2b8] sm:$0xff] }
 0xc46   :  { %8203 = vmatpush1.bf16.msra.mxu0 %v7777_v14  ;;  %v7767_v14 = vld [vmem:[#allocation6 + $0xb0] sm:$0xff] }
 0xc47   :  { %8244 = vmatpush1.bf16.msra.mxu1 %v7841_v43  ;;  %8204 = vmatprep.subr.bf16.mxu0 %v7782_v55  ;;  %v7831_v43 = vld [vmem:[#allocation6 + $0x2b0] sm:$0xff]  ;;  %v7772_v55 = vld [vmem:[#allocation6 + $0xd8] sm:$0xff] }
 0xc48   :  { %8245 = vmatprep.subr.bf16.mxu1 %v7846_v52  ;;  %v7836_v52 = vld [vmem:[#allocation6 + $0x2d8] sm:$0xff] }
 0xc4a   :  { %8205 = vmatpush1.bf16.msra.mxu0 %v7781_v60  ;;  %v7771_v60 = vld [vmem:[#allocation6 + $0xd0] sm:$0xff] }
 0xc4b   :  { %8246 = vmatpush1.bf16.msra.mxu1 %v7845_v4  ;;  %8206 = vmatprep.subr.bf16.mxu0 %v7786_v35  ;;  %v7835_v4 = vld [vmem:[#allocation6 + $0x2d0] sm:$0xff]  ;;  %v7776_v35 = vld [vmem:[#allocation6 + $0xf8] sm:$0xff] }
 0xc4c   :  { %8247 = vmatprep.subr.bf16.mxu1 %v7850_v63  ;;  %v7840_v63 = vld [vmem:[#allocation6 + $0x2f8] sm:$0xff] }
 0xc4e   :  { %8207 = vmatpush1.bf16.msra.mxu0 %v7785_v5  ;;  %v7775_v5 = vld [vmem:[#allocation6 + $0xf0] sm:$0xff] }
 0xc4f   :  { %8248 = vmatpush1.bf16.msra.mxu1 %v7849_v37  ;;  %8208 = vmatprep.subr.bf16.mxu0 %v7790_v34  ;;  %v7839_v37 = vld [vmem:[#allocation6 + $0x2f0] sm:$0xff]  ;;  %v7780_v34 = vld [vmem:[#allocation6 + $0x118] sm:$0xff] }
 0xc50   :  { %8249 = vmatprep.subr.bf16.mxu1 %v7854_v40  ;;  %v7844_v40 = vld [vmem:[#allocation6 + $0x318] sm:$0xff] }
 0xc52   :  { %8209 = vmatpush1.bf16.msra.mxu0 %v7789_v49  ;;  %v7779_v49 = vld [vmem:[#allocation6 + $0x110] sm:$0xff] }
 0xc53   :  { %8250 = vmatpush1.bf16.msra.mxu1 %v7853_v41  ;;  %8210 = vmatprep.subr.bf16.mxu0 %v7794_v11  ;;  %v7843_v41 = vld [vmem:[#allocation6 + $0x310] sm:$0xff]  ;;  %v7784_v11 = vld [vmem:[#allocation6 + $0x138] sm:$0xff] }
 0xc54   :  { %8251 = vmatprep.subr.bf16.mxu1 %v7858_v12  ;;  %v7848_v12 = vld [vmem:[#allocation6 + $0x338] sm:$0xff] }
 0xc56   :  { %8211 = vmatpush1.bf16.msra.mxu0 %v7793_v38  ;;  %v7783_v38 = vld [vmem:[#allocation6 + $0x130] sm:$0xff] }
 0xc57   :  { %8252 = vmatpush1.bf16.msra.mxu1 %v7857_v45  ;;  %8212 = vmatprep.subr.bf16.mxu0 %v7798_v48  ;;  %v7847_v45 = vld [vmem:[#allocation6 + $0x330] sm:$0xff]  ;;  %v7788_v48 = vld [vmem:[#allocation6 + $0x158] sm:$0xff] }
 0xc58   :  { %8253 = vmatprep.subr.bf16.mxu1 %v7862_v50  ;;  %v7852_v50 = vld [vmem:[#allocation6 + $0x358] sm:$0xff] }
 0xc5a   :  { %8213 = vmatpush1.bf16.msra.mxu0 %v7797_v44  ;;  %v7787_v44 = vld [vmem:[#allocation6 + $0x150] sm:$0xff] }
 0xc5b   :  { %8254 = vmatpush1.bf16.msra.mxu1 %v7861_v28  ;;  %8214 = vmatprep.subr.bf16.mxu0 %v7802_v29  ;;  %v7851_v28 = vld [vmem:[#allocation6 + $0x350] sm:$0xff]  ;;  %v7792_v29 = vld [vmem:[#allocation6 + $0x178] sm:$0xff] }
 0xc5c   :  { %8255 = vmatprep.subr.bf16.mxu1 %v7866_v8  ;;  %v7856_v8 = vld [vmem:[#allocation6 + $0x378] sm:$0xff] }
 0xc5e   :  { %8215 = vmatpush1.bf16.msra.mxu0 %v7801_v53  ;;  %v7791_v53 = vld [vmem:[#allocation6 + $0x170] sm:$0xff] }
 0xc5f   :  { %8256 = vmatpush1.bf16.msra.mxu1 %v7865_v27  ;;  %8216 = vmatprep.subr.bf16.mxu0 %v7806_v51  ;;  %v7855_v27 = vld [vmem:[#allocation6 + $0x370] sm:$0xff]  ;;  %v7796_v51 = vld [vmem:[#allocation6 + $0x198] sm:$0xff] }
 0xc60   :  { %8257 = vmatprep.subr.bf16.mxu1 %v7870_v42  ;;  %v7860_v42 = vld [vmem:[#allocation6 + $0x398] sm:$0xff] }
 0xc62   :  { %8217 = vmatpush1.bf16.msra.mxu0 %v7805_v24  ;;  %v7795_v24 = vld [vmem:[#allocation6 + $0x190] sm:$0xff] }
 0xc63   :  { %8258 = vmatpush1.bf16.msra.mxu1 %v7869_v3  ;;  %8268 = vmatprep.subr.bf16.mxu0 %v7748_v17  ;;  %v7859_v3 = vld [vmem:[#allocation6 + $0x390] sm:$0xff]  ;;  %v7800_v17 = vld [vmem:[#allocation6 + $0x1b8] sm:$0xff] }
 0xc64   :  { %8309 = vmatprep.subr.bf16.mxu1 %v7812_v13  ;;  %v7864_v13 = vld [vmem:[#allocation6 + $0x3b8] sm:$0xff] }
 0xc65   :  { %8219 = vmatmul.mubr.bf16.vlgmr.msra.gmra.mrb[108].mxu0 %v15620_v56 }
 0xc66   :  { %8260 = vmatmul.mubr.bf16.vlgmr.msra.gmra.mrb[132].mxu1 %v15624_v6  ;;  %8269 = vmatpush1.bf16.msra.mxu0 %v7747_v23  ;;  %v7799_v23 = vld [vmem:[#allocation6 + $0x1b0] sm:$0xff] }
 0xc67   :  { %8310 = vmatpush1.bf16.msra.mxu1 %v7811_v18  ;;  %8270 = vmatprep.subr.bf16.mxu0 %v7752_v20  ;;  %v7863_v18 = vld [vmem:[#allocation6 + $0x3b0] sm:$0xff]  ;;  %v7804_v20 = vld [vmem:[#allocation6 + $0x1d8] sm:$0xff] }
 0xc68   :  { %8311 = vmatprep.subr.bf16.mxu1 %v7816_v22  ;;  %8300 = vmatprep.mubr.bf16.mxu0 %v15611_v30  ;;  %v7763_v30 = vld [vmem:[#allocation6 + $0x90] sm:$0xff]  ;;  %v7868_v22 = vld [vmem:[#allocation6 + $0x3d8] sm:$0xff] }
 0xc69   :  { %8341 = vmatprep.mubr.bf16.mxu1 %v15616_v39  ;;  %v7827_v39 = vld [vmem:[#allocation6 + $0x290] sm:$0xff] }
 0xc6a   :  { %8271 = vmatpush1.bf16.msra.mxu0 %v7751_v54  ;;  %v15638_v54 = vld [vmem:[#allocation5 + $0x28] sm:$0x2] }
 0xc6b   :  { %8312 = vmatpush1.bf16.msra.mxu1 %v7815_v25  ;;  %8272 = vmatprep.subr.bf16.mxu0 %v7756_v57  ;;  %v15640_v25 = vld [vmem:[#allocation5 + $0x38] sm:$0x2]  ;;  %v7803_v57 = vld [vmem:[#allocation6 + $0x1d0] sm:$0xff] }
 0xc6c   :  { %8313 = vmatprep.subr.bf16.mxu1 %v7820_v47  ;;  %v7867_v47 = vld [vmem:[#allocation6 + $0x3d0] sm:$0xff] }
 0xc6e   :  { %8273 = vmatpush1.bf16.msra.mxu0 %v7755_v31  ;;  %v7808_v31 = vld [vmem:[#allocation6 + $0x1f8] sm:$0xff] }
 0xc6f   :  { %8314 = vmatpush1.bf16.msra.mxu1 %v7819_v7  ;;  %8274 = vmatprep.subr.bf16.mxu0 %v7760_v10  ;;  %v7872_v7 = vld [vmem:[#allocation6 + $0x3f8] sm:$0xff]  ;;  %v8375_v10 = vshll.u32 %v15638_v54, 16 }
 0xc70   :  { %8315 = vmatprep.subr.bf16.mxu1 %v7824_v21  ;;  %v8383_v21 = vshll.u32 %v15640_v25, 16 }
 0xc72   :  { %8275 = vmatpush1.bf16.msra.mxu0 %v7759_v15  ;;  %v15644_v15 = vld [vmem:[#allocation5 + $0x8] sm:$0x2] }
 0xc73   :  { %8316 = vmatpush1.bf16.msra.mxu1 %v7823_v9  ;;  %8276 = vmatprep.subr.bf16.mxu0 %v7764_v32  ;;  %v15646_v9 = vld [vmem:[#allocation5 + $0x18] sm:$0x2]  ;;  %v7807_v32 = vld [vmem:[#allocation6 + $0x1f0] sm:$0xff] }
 0xc74   :  { %8317 = vmatprep.subr.bf16.mxu1 %v7828_v33  ;;  %v7871_v33 = vld [vmem:[#allocation6 + $0x3f0] sm:$0xff] }
 0xc76   :  { %8277 = vmatpush1.bf16.msra.mxu0 %v7763_v30  ;;  %v8396_v30 = vld [vmem:[#allocation6 + $0x808] sm:$0xff] }
 0xc77   :  { %8318 = vmatpush1.bf16.msra.mxu1 %v7827_v39  ;;  %8278 = vmatprep.subr.bf16.mxu0 %v7768_v26  ;;  %v8460_v39 = vld [vmem:[#allocation6 + $0xa08] sm:$0xff]  ;;  %v8363_v26 = vrot.slane %v15644_v15, 1 }
 0xc78   :  { %8319 = vmatprep.subr.bf16.mxu1 %v7832_v36  ;;  %v8377_v36 = vrot.slane %v8375_v10, 1  ;;  %v8423_v10 = vld [vmem:[#allocation6 + $0x8e0] sm:$0xff] }
 0xc7a   :  { %8279 = vmatpush1.bf16.msra.mxu0 %v7767_v14  ;;  %v8365_v14 = vrot.slane %v15646_v9, 1 }
 0xc7b   :  { %8320 = vmatpush1.bf16.msra.mxu1 %v7831_v43  ;;  %8280 = vmatprep.subr.bf16.mxu0 %v7772_v55  ;;  %v8385_v43 = vrot.slane %v8383_v21, 1  ;;  %v8395_v55 = vld [vmem:[#allocation6 + $0x800] sm:$0xff] }
 0xc7c   :  { %8321 = vmatprep.subr.bf16.mxu1 %v7836_v52  ;;  %v8459_v52 = vld [vmem:[#allocation6 + $0xa00] sm:$0xff] }
 0xc7d   :  { %v8487_v21 = vld [vmem:[#allocation6 + $0xae0] sm:$0xff] }
 0xc7e   :  { %8281 = vmatpush1.bf16.msra.mxu0 %v7771_v60  ;;  %v8400_v60 = vld [vmem:[#allocation6 + $0x828] sm:$0xff] }
 0xc7f   :  { %8322 = vmatpush1.bf16.msra.mxu1 %v7835_v4  ;;  %8282 = vmatprep.subr.bf16.mxu0 %v7776_v35  ;;  %v8464_v4 = vld [vmem:[#allocation6 + $0xa28] sm:$0xff]  ;;  %v15654_v35 = vsel %vm15576_vm1, %v8363_v26, %v8377_v36 }
 0xc80   :  { %8323 = vmatprep.subr.bf16.mxu1 %v7840_v63  ;;  %v15658_v63 = vsel %vm15576_vm1, %v8365_v14, %v8385_v43  ;;  %v8432_v26 = vld [vmem:[#allocation6 + $0x928] sm:$0xff]  ;;  %v8431_v14 = vld [vmem:[#allocation6 + $0x920] sm:$0xff] }
 0xc81   :  { %v8496_v36 = vld [vmem:[#allocation6 + $0xb28] sm:$0xff]  ;;  %v8495_v43 = vld [vmem:[#allocation6 + $0xb20] sm:$0xff] }
 0xc82   :  { %8283 = vmatpush1.bf16.msra.mxu0 %v7775_v5  ;;  %v8399_v5 = vld [vmem:[#allocation6 + $0x820] sm:$0xff] }
 0xc83   :  { %8324 = vmatpush1.bf16.msra.mxu1 %v7839_v37  ;;  %8284 = vmatprep.subr.bf16.mxu0 %v7780_v34  ;;  %v8463_v37 = vld [vmem:[#allocation6 + $0xa20] sm:$0xff]  ;;  %v8404_v34 = vld [vmem:[#allocation6 + $0x848] sm:$0xff] }
 0xc84   :  { %8325 = vmatprep.subr.bf16.mxu1 %v7844_v40  ;;  %v8468_v40 = vld [vmem:[#allocation6 + $0xa48] sm:$0xff] }
 0xc86   :  { %8285 = vmatpush1.bf16.msra.mxu0 %v7779_v49  ;;  %v8408_v49 = vld [vmem:[#allocation6 + $0x868] sm:$0xff] }
 0xc87   :  { %8326 = vmatpush1.bf16.msra.mxu1 %v7843_v41  ;;  %8286 = vmatprep.subr.bf16.mxu0 %v7784_v11  ;;  %v8472_v41 = vld [vmem:[#allocation6 + $0xa68] sm:$0xff]  ;;  %v8407_v11 = vld [vmem:[#allocation6 + $0x860] sm:$0xff] }
 0xc88   :  { %8327 = vmatprep.subr.bf16.mxu1 %v7848_v12  ;;  %v8471_v12 = vld [vmem:[#allocation6 + $0xa60] sm:$0xff] }
 0xc8a   :  { %8287 = vmatpush1.bf16.msra.mxu0 %v7783_v38  ;;  %v8412_v38 = vld [vmem:[#allocation6 + $0x888] sm:$0xff] }
 0xc8b   :  { %8328 = vmatpush1.bf16.msra.mxu1 %v7847_v45  ;;  %8288 = vmatprep.subr.bf16.mxu0 %v7788_v48  ;;  %v8476_v45 = vld [vmem:[#allocation6 + $0xa88] sm:$0xff]  ;;  %v8411_v48 = vld [vmem:[#allocation6 + $0x880] sm:$0xff] }
 0xc8c   :  { %8329 = vmatprep.subr.bf16.mxu1 %v7852_v50  ;;  %v8475_v50 = vld [vmem:[#allocation6 + $0xa80] sm:$0xff] }
 0xc8e   :  { %8289 = vmatpush1.bf16.msra.mxu0 %v7787_v44  ;;  %v8416_v44 = vld [vmem:[#allocation6 + $0x8a8] sm:$0xff] }
 0xc8f   :  { %8330 = vmatpush1.bf16.msra.mxu1 %v7851_v28  ;;  %8290 = vmatprep.subr.bf16.mxu0 %v7792_v29  ;;  %v8480_v28 = vld [vmem:[#allocation6 + $0xaa8] sm:$0xff]  ;;  %v8415_v29 = vld [vmem:[#allocation6 + $0x8a0] sm:$0xff] }
 0xc90   :  { %8331 = vmatprep.subr.bf16.mxu1 %v7856_v8  ;;  %v8479_v8 = vld [vmem:[#allocation6 + $0xaa0] sm:$0xff] }
 0xc92   :  { %8291 = vmatpush1.bf16.msra.mxu0 %v7791_v53 }
 0xc93   :  { %8332 = vmatpush1.bf16.msra.mxu1 %v7855_v27  ;;  %8292 = vmatprep.subr.bf16.mxu0 %v7796_v51  ;;  %v8420_v51 = vld [vmem:[#allocation6 + $0x8c8] sm:$0xff] }
 0xc94   :  { %8333 = vmatprep.subr.bf16.mxu1 %v7860_v42  ;;  %v8484_v42 = vld [vmem:[#allocation6 + $0xac8] sm:$0xff] }
 0xc96   :  { %8293 = vmatpush1.bf16.msra.mxu0 %v7795_v24 }
 0xc97   :  { %8334 = vmatpush1.bf16.msra.mxu1 %v7859_v3  ;;  %8294 = vmatprep.subr.bf16.mxu0 %v7800_v17 }
 0xc98   :  { %8335 = vmatprep.subr.bf16.mxu1 %v7864_v13 }
 0xc9a   :  { %8295 = vmatpush1.bf16.msra.mxu0 %v7799_v23 }
 0xc9b   :  { %8336 = vmatpush1.bf16.msra.mxu1 %v7863_v18  ;;  %8296 = vmatprep.subr.bf16.mxu0 %v7804_v20 }
 0xc9c   :  { %8337 = vmatprep.subr.bf16.mxu1 %v7868_v22 }
 0xc9e   :  { %8297 = vmatpush1.bf16.msra.mxu0 %v7803_v57  ;;  %v8419_v57 = vld [vmem:[#allocation6 + $0x8c0] sm:$0xff] }
 0xc9f   :  { %8338 = vmatpush1.bf16.msra.mxu1 %v7867_v47  ;;  %8298 = vmatprep.subr.bf16.mxu0 %v7808_v31  ;;  %v8483_v47 = vld [vmem:[#allocation6 + $0xac0] sm:$0xff]  ;;  %v8424_v31 = vld [vmem:[#allocation6 + $0x8e8] sm:$0xff] }
 0xca0   :  { %8339 = vmatprep.subr.bf16.mxu1 %v7872_v7  ;;  %v8488_v7 = vld [vmem:[#allocation6 + $0xae8] sm:$0xff] }
 0xca2   :  { %8299 = vmatpush1.bf16.msra.mxu0 %v7807_v32  ;;  %v8428_v32 = vld [vmem:[#allocation6 + $0x908] sm:$0xff] }
 0xca3   :  { %8340 = vmatpush1.bf16.msra.mxu1 %v7871_v33  ;;  %8523 = vmatprep.subr.bf16.mxu0 %v8396_v30  ;;  %v8492_v33 = vld [vmem:[#allocation6 + $0xb08] sm:$0xff]  ;;  %v8427_v30 = vld [vmem:[#allocation6 + $0x900] sm:$0xff] }
 0xca4   :  { %8564 = vmatprep.subr.bf16.mxu1 %v8460_v39  ;;  %v8491_v39 = vld [vmem:[#allocation6 + $0xb00] sm:$0xff] }
 0xca5   :  { %8301 = vmatmul.mubr.bf16.vlgmr.msra.gmra.mrb[112].mxu0 %v15620_v56  ;;  %v8403_v56 = vld [vmem:[#allocation6 + $0x840] sm:$0xff] }
 0xca6   :  { %8342 = vmatmul.mubr.bf16.vlgmr.msra.gmra.mrb[136].mxu1 %v15624_v6  ;;  %8524 = vmatpush1.bf16.msra.mxu0 %v8395_v55  ;;  %v8467_v6 = vld [vmem:[#allocation6 + $0xa40] sm:$0xff]  ;;  %v8436_v55 = vld [vmem:[#allocation6 + $0x948] sm:$0xff] }
 0xca7   :  { %8565 = vmatpush1.bf16.msra.mxu1 %v8459_v52  ;;  %8525 = vmatprep.subr.bf16.mxu0 %v8400_v60  ;;  %v8500_v52 = vld [vmem:[#allocation6 + $0xb48] sm:$0xff]  ;;  %v8435_v60 = vld [vmem:[#allocation6 + $0x940] sm:$0xff] }
 0xca8   :  { %8566 = vmatprep.subr.bf16.mxu1 %v8464_v4  ;;  %8555 = vmatprep.mubr.bf16.mxu0 %v15654_v35  ;;  %v8499_v4 = vld [vmem:[#allocation6 + $0xb40] sm:$0xff] }
 0xca9   :  { %8596 = vmatprep.mubr.bf16.mxu1 %v15658_v63 }
 0xcaa   :  { %8526 = vmatpush1.bf16.msra.mxu0 %v8399_v5  ;;  %v8440_v5 = vld [vmem:[#allocation6 + $0x968] sm:$0xff] }
 0xcab   :  { %8567 = vmatpush1.bf16.msra.mxu1 %v8463_v37  ;;  %8527 = vmatprep.subr.bf16.mxu0 %v8404_v34  ;;  %v8504_v37 = vld [vmem:[#allocation6 + $0xb68] sm:$0xff]  ;;  %v8439_v34 = vld [vmem:[#allocation6 + $0x960] sm:$0xff] }
 0xcac   :  { %8568 = vmatprep.subr.bf16.mxu1 %v8468_v40  ;;  %v8503_v40 = vld [vmem:[#allocation6 + $0xb60] sm:$0xff] }
 0xcae   :  { %8528 = vmatpush1.bf16.msra.mxu0 %v8403_v56  ;;  %v8444_v56 = vld [vmem:[#allocation6 + $0x988] sm:$0xff] }
 0xcaf   :  { %8569 = vmatpush1.bf16.msra.mxu1 %v8467_v6  ;;  %8529 = vmatprep.subr.bf16.mxu0 %v8408_v49  ;;  %v8508_v6 = vld [vmem:[#allocation6 + $0xb88] sm:$0xff]  ;;  %v8443_v49 = vld [vmem:[#allocation6 + $0x980] sm:$0xff] }
 0xcb0   :  { %8570 = vmatprep.subr.bf16.mxu1 %v8472_v41  ;;  %v8507_v41 = vld [vmem:[#allocation6 + $0xb80] sm:$0xff] }
 0xcb2   :  { %8530 = vmatpush1.bf16.msra.mxu0 %v8407_v11  ;;  %v8448_v11 = vld [vmem:[#allocation6 + $0x9a8] sm:$0xff] }
 0xcb3   :  { %8571 = vmatpush1.bf16.msra.mxu1 %v8471_v12  ;;  %8531 = vmatprep.subr.bf16.mxu0 %v8412_v38  ;;  %v8512_v12 = vld [vmem:[#allocation6 + $0xba8] sm:$0xff]  ;;  %v8447_v38 = vld [vmem:[#allocation6 + $0x9a0] sm:$0xff] }
 0xcb4   :  { %8572 = vmatprep.subr.bf16.mxu1 %v8476_v45  ;;  %v8511_v45 = vld [vmem:[#allocation6 + $0xba0] sm:$0xff] }
 0xcb6   :  { %8532 = vmatpush1.bf16.msra.mxu0 %v8411_v48  ;;  %v15666_v48 = vld [vmem:[#allocation5 + $0x20] sm:$0x2] }
 0xcb7   :  { %8573 = vmatpush1.bf16.msra.mxu1 %v8475_v50  ;;  %8533 = vmatprep.subr.bf16.mxu0 %v8416_v44  ;;  %v15668_v50 = vld [vmem:[#allocation5 + $0x30] sm:$0x2]  ;;  %v8452_v44 = vld [vmem:[#allocation6 + $0x9c8] sm:$0xff] }
 0xcb8   :  { %8574 = vmatprep.subr.bf16.mxu1 %v8480_v28  ;;  %v8056_v53 = vpop.f32.mrb[100].mxu0  ;;  %v8516_v28 = vld [vmem:[#allocation6 + $0xbc8] sm:$0xff] }
 0xcb9   :  { %v8097_v27 = vpop.f32.mrb[124].mxu1  ;;  %v8058_v3 = vpop.f32.mrb[101].mxu0 }
 0xcba   :  { %v15662_v24 = vadd.f32 %v8097_v27, %v8056_v53  ;;  %v8099_v17 = vpop.f32.mrb[125].mxu1  ;;  %v8060_v23 = vpop.f32.mrb[102].mxu0  ;;  %8534 = vmatpush1.bf16.msra.mxu0 %v8415_v29  ;;  %v8451_v29 = vld [vmem:[#allocation6 + $0x9c0] sm:$0xff]  ;;  %v8379_v53 = vshll.u32 %v15668_v50, 16 }
 0xcbb   :  { %v15664_v13 = vadd.f32 %v8099_v17, %v8058_v3  ;;  %v8101_v18 = vpop.f32.mrb[126].mxu1  ;;  %8575 = vmatpush1.bf16.msra.mxu1 %v8479_v8  ;;  %v8061_v20 = vpop.f32.mrb[103].mxu0  ;;  %8535 = vmatprep.subr.bf16.mxu0 %v8420_v51  ;;  %v8371_v8 = vshll.u32 %v15666_v48, 16  ;;  %v8515_v27 = vld [vmem:[#allocation6 + $0xbc0] sm:$0xff]  ;;  %v8456_v3 = vld [vmem:[#allocation6 + $0x9e8] sm:$0xff] }
 0xcbc   :  { %v8102_v22 = vpop.f32.mrb[127].mxu1  ;;  %8576 = vmatprep.subr.bf16.mxu1 %v8484_v42  ;;  %v15672_v51 = vld [vmem:[#allocation5] sm:$0x2]  ;;  %v15674_v42 = vld [vmem:[#allocation5 + $0x10] sm:$0x2]  ;;  %v8520_v17 = vld [vmem:[#allocation6 + $0xbe8] sm:$0xff] }
 0xcbd   :  { %v8362_v23 = vrot.slane %v15672_v51, 1  ;;  %v8373_v18 = vrot.slane %v8371_v8, 1  ;;  %v8364_v20 = vrot.slane %v15674_v42, 1  ;;  %v8381_v22 = vrot.slane %v8379_v53, 1 }
 0xcbe   :  { %8536 = vmatpush1.bf16.msra.mxu0 %v8419_v57  ;;  %v8455_v57 = vld [vmem:[#allocation6 + $0x9e0] sm:$0xff] }
 0xcbf   :  { %8577 = vmatpush1.bf16.msra.mxu1 %v8483_v47  ;;  %8537 = vmatprep.subr.bf16.mxu0 %v8424_v31  ;;  %v8519_v47 = vld [vmem:[#allocation6 + $0xbe0] sm:$0xff]  ;;  %v8398_v31 = vld [vmem:[#allocation6 + $0x818] sm:$0xff] }
 0xcc0   :  { %8578 = vmatprep.subr.bf16.mxu1 %v8488_v7  ;;  %v8462_v7 = vld [vmem:[#allocation6 + $0xa18] sm:$0xff] }
 0xcc2   :  { %8538 = vmatpush1.bf16.msra.mxu0 %v8423_v10  ;;  %v15680_v10 = vsel %vm15576_vm1, %v8362_v23, %v8373_v18  ;;  %v8421_v23 = vld [vmem:[#allocation6 + $0x8d0] sm:$0xff] }
 0xcc3   :  { %8579 = vmatpush1.bf16.msra.mxu1 %v8487_v21  ;;  %8539 = vmatprep.subr.bf16.mxu0 %v8428_v32  ;;  %v15684_v21 = vsel %vm15576_vm1, %v8364_v20, %v8381_v22  ;;  %v8397_v32 = vld [vmem:[#allocation6 + $0x810] sm:$0xff]  ;;  %v8426_v20 = vld [vmem:[#allocation6 + $0x8f8] sm:$0xff] }
 0xcc4   :  { %8580 = vmatprep.subr.bf16.mxu1 %v8492_v33  ;;  %v8461_v33 = vld [vmem:[#allocation6 + $0xa10] sm:$0xff]  ;;  %v8490_v22 = vld [vmem:[#allocation6 + $0xaf8] sm:$0xff] }
 0xcc5   :  { %v8485_v18 = vld [vmem:[#allocation6 + $0xad0] sm:$0xff] }
 0xcc6   :  { %8540 = vmatpush1.bf16.msra.mxu0 %v8427_v30  ;;  %v8402_v30 = vld [vmem:[#allocation6 + $0x838] sm:$0xff] }
 0xcc7   :  { %8581 = vmatpush1.bf16.msra.mxu1 %v8491_v39  ;;  %8541 = vmatprep.subr.bf16.mxu0 %v8432_v26  ;;  %v8466_v39 = vld [vmem:[#allocation6 + $0xa38] sm:$0xff]  ;;  %v8401_v26 = vld [vmem:[#allocation6 + $0x830] sm:$0xff] }
 0xcc8   :  { %8582 = vmatprep.subr.bf16.mxu1 %v8496_v36  ;;  %v8465_v36 = vld [vmem:[#allocation6 + $0xa30] sm:$0xff] }
 0xcca   :  { %8542 = vmatpush1.bf16.msra.mxu0 %v8431_v14  ;;  %v8406_v14 = vld [vmem:[#allocation6 + $0x858] sm:$0xff] }
 0xccb   :  { %8583 = vmatpush1.bf16.msra.mxu1 %v8495_v43  ;;  %8543 = vmatprep.subr.bf16.mxu0 %v8436_v55  ;;  %v8470_v43 = vld [vmem:[#allocation6 + $0xa58] sm:$0xff]  ;;  %v8405_v55 = vld [vmem:[#allocation6 + $0x850] sm:$0xff] }
 0xccc   :  { %8584 = vmatprep.subr.bf16.mxu1 %v8500_v52  ;;  %v8469_v52 = vld [vmem:[#allocation6 + $0xa50] sm:$0xff] }
 0xcce   :  { %8544 = vmatpush1.bf16.msra.mxu0 %v8435_v60  ;;  %v8410_v60 = vld [vmem:[#allocation6 + $0x878] sm:$0xff] }
 0xccf   :  { %8585 = vmatpush1.bf16.msra.mxu1 %v8499_v4  ;;  %8545 = vmatprep.subr.bf16.mxu0 %v8440_v5  ;;  %v8474_v4 = vld [vmem:[#allocation6 + $0xa78] sm:$0xff]  ;;  %v8409_v5 = vld [vmem:[#allocation6 + $0x870] sm:$0xff] }
 0xcd0   :  { %8586 = vmatprep.subr.bf16.mxu1 %v8504_v37  ;;  %v8473_v37 = vld [vmem:[#allocation6 + $0xa70] sm:$0xff] }
 0xcd2   :  { %8546 = vmatpush1.bf16.msra.mxu0 %v8439_v34  ;;  %v8414_v34 = vld [vmem:[#allocation6 + $0x898] sm:$0xff] }
 0xcd3   :  { %8587 = vmatpush1.bf16.msra.mxu1 %v8503_v40  ;;  %8547 = vmatprep.subr.bf16.mxu0 %v8444_v56  ;;  %v8478_v40 = vld [vmem:[#allocation6 + $0xa98] sm:$0xff] }
 0xcd4   :  { %8588 = vmatprep.subr.bf16.mxu1 %v8508_v6  ;;  %v8418_v56 = vld [vmem:[#allocation6 + $0x8b8] sm:$0xff] }
 0xcd5   :  { %v8482_v6 = vld [vmem:[#allocation6 + $0xab8] sm:$0xff] }
 0xcd6   :  { %8548 = vmatpush1.bf16.msra.mxu0 %v8443_v49  ;;  %v8417_v49 = vld [vmem:[#allocation6 + $0x8b0] sm:$0xff] }
 0xcd7   :  { %8589 = vmatpush1.bf16.msra.mxu1 %v8507_v41  ;;  %8549 = vmatprep.subr.bf16.mxu0 %v8448_v11  ;;  %v8481_v41 = vld [vmem:[#allocation6 + $0xab0] sm:$0xff] }
 0xcd8   :  { %8590 = vmatprep.subr.bf16.mxu1 %v8512_v12 }
 0xcda   :  { %8550 = vmatpush1.bf16.msra.mxu0 %v8447_v38  ;;  %v8422_v38 = vld [vmem:[#allocation6 + $0x8d8] sm:$0xff] }
 0xcdb   :  { %8591 = vmatpush1.bf16.msra.mxu1 %v8511_v45  ;;  %8551 = vmatprep.subr.bf16.mxu0 %v8452_v44  ;;  %v8486_v45 = vld [vmem:[#allocation6 + $0xad8] sm:$0xff] }
 0xcdc   :  { %8592 = vmatprep.subr.bf16.mxu1 %v8516_v28 }
 0xcde   :  { %8552 = vmatpush1.bf16.msra.mxu0 %v8451_v29 }
 0xcdf   :  { %8593 = vmatpush1.bf16.msra.mxu1 %v8515_v27  ;;  %8553 = vmatprep.subr.bf16.mxu0 %v8456_v3 }
 0xce0   :  { %8594 = vmatprep.subr.bf16.mxu1 %v8520_v17 }
 0xce2   :  { %8554 = vmatpush1.bf16.msra.mxu0 %v8455_v57  ;;  %v8425_v57 = vld [vmem:[#allocation6 + $0x8f0] sm:$0xff] }
 0xce3   :  { %8595 = vmatpush1.bf16.msra.mxu1 %v8519_v47  ;;  %8605 = vmatprep.subr.bf16.mxu0 %v8398_v31  ;;  %v8489_v47 = vld [vmem:[#allocation6 + $0xaf0] sm:$0xff]  ;;  %v8430_v31 = vld [vmem:[#allocation6 + $0x918] sm:$0xff] }
 0xce4   :  { %8646 = vmatprep.subr.bf16.mxu1 %v8462_v7  ;;  %v8494_v7 = vld [vmem:[#allocation6 + $0xb18] sm:$0xff] }
 0xce5   :  { %8556 = vmatmul.mubr.bf16.vlgmr.msra.gmra.mrb[116].mxu0 %v15680_v10 }
 0xce6   :  { %8597 = vmatmul.mubr.bf16.vlgmr.msra.gmra.mrb[140].mxu1 %v15684_v21  ;;  %8606 = vmatpush1.bf16.msra.mxu0 %v8397_v32  ;;  %v8429_v32 = vld [vmem:[#allocation6 + $0x910] sm:$0xff] }
 0xce7   :  { %8647 = vmatpush1.bf16.msra.mxu1 %v8461_v33  ;;  %8607 = vmatprep.subr.bf16.mxu0 %v8402_v30  ;;  %v8493_v33 = vld [vmem:[#allocation6 + $0xb10] sm:$0xff]  ;;  %v8434_v30 = vld [vmem:[#allocation6 + $0x938] sm:$0xff] }
 0xce8   :  { %8648 = vmatprep.subr.bf16.mxu1 %v8466_v39  ;;  %8637 = vmatprep.mubr.bf16.mxu0 %v15654_v35  ;;  %v8413_v35 = vld [vmem:[#allocation6 + $0x890] sm:$0xff]  ;;  %v8498_v39 = vld [vmem:[#allocation6 + $0xb38] sm:$0xff] }
 0xce9   :  { %8678 = vmatprep.mubr.bf16.mxu1 %v15658_v63  ;;  %v8477_v63 = vld [vmem:[#allocation6 + $0xa90] sm:$0xff] }
 0xcea   :  { %8608 = vmatpush1.bf16.msra.mxu0 %v8401_v26  ;;  %v8433_v26 = vld [vmem:[#allocation6 + $0x930] sm:$0xff] }
 0xceb   :  { %8649 = vmatpush1.bf16.msra.mxu1 %v8465_v36  ;;  %8609 = vmatprep.subr.bf16.mxu0 %v8406_v14  ;;  %v8497_v36 = vld [vmem:[#allocation6 + $0xb30] sm:$0xff]  ;;  %v8438_v14 = vld [vmem:[#allocation6 + $0x958] sm:$0xff] }
 0xcec   :  { %8650 = vmatprep.subr.bf16.mxu1 %v8470_v43  ;;  %v8502_v43 = vld [vmem:[#allocation6 + $0xb58] sm:$0xff] }
 0xcee   :  { %8610 = vmatpush1.bf16.msra.mxu0 %v8405_v55  ;;  %v8437_v55 = vld [vmem:[#allocation6 + $0x950] sm:$0xff] }
 0xcef   :  { %8651 = vmatpush1.bf16.msra.mxu1 %v8469_v52  ;;  %8611 = vmatprep.subr.bf16.mxu0 %v8410_v60  ;;  %v8501_v52 = vld [vmem:[#allocation6 + $0xb50] sm:$0xff]  ;;  %v8442_v60 = vld [vmem:[#allocation6 + $0x978] sm:$0xff] }
 0xcf0   :  { %8652 = vmatprep.subr.bf16.mxu1 %v8474_v4  ;;  %v8506_v4 = vld [vmem:[#allocation6 + $0xb78] sm:$0xff] }
 0xcf2   :  { %8612 = vmatpush1.bf16.msra.mxu0 %v8409_v5  ;;  %v8441_v5 = vld [vmem:[#allocation6 + $0x970] sm:$0xff] }
 0xcf3   :  { %8653 = vmatpush1.bf16.msra.mxu1 %v8473_v37  ;;  %8613 = vmatprep.subr.bf16.mxu0 %v8414_v34  ;;  %v8505_v37 = vld [vmem:[#allocation6 + $0xb70] sm:$0xff]  ;;  %v8446_v34 = vld [vmem:[#allocation6 + $0x998] sm:$0xff] }
 0xcf4   :  { %8654 = vmatprep.subr.bf16.mxu1 %v8478_v40  ;;  %v8510_v40 = vld [vmem:[#allocation6 + $0xb98] sm:$0xff] }
 0xcf6   :  { %8614 = vmatpush1.bf16.msra.mxu0 %v8413_v35  ;;  %v8445_v35 = vld [vmem:[#allocation6 + $0x990] sm:$0xff] }
 0xcf7   :  { %8655 = vmatpush1.bf16.msra.mxu1 %v8477_v63  ;;  %8615 = vmatprep.subr.bf16.mxu0 %v8418_v56  ;;  %v8509_v63 = vld [vmem:[#allocation6 + $0xb90] sm:$0xff]  ;;  %v8450_v56 = vld [vmem:[#allocation6 + $0x9b8] sm:$0xff] }
 0xcf8   :  { %8656 = vmatprep.subr.bf16.mxu1 %v8482_v6  ;;  %v8138_v11 = vpop.f32.mrb[104].mxu0  ;;  %v8514_v6 = vld [vmem:[#allocation6 + $0xbb8] sm:$0xff] }
 0xcf9   :  { %v8179_v12 = vpop.f32.mrb[128].mxu1  ;;  %v8140_v28 = vpop.f32.mrb[105].mxu0 }
 0xcfa   :  { %v15690_v44 = vadd.f32 %v8179_v12, %v8138_v11  ;;  %v8181_v29 = vpop.f32.mrb[129].mxu1  ;;  %v8142_v53 = vpop.f32.mrb[106].mxu0  ;;  %8616 = vmatpush1.bf16.msra.mxu0 %v8417_v49  ;;  %v8449_v49 = vld [vmem:[#allocation6 + $0x9b0] sm:$0xff]  ;;  %v8454_v11 = vld [vmem:[#allocation6 + $0x9d8] sm:$0xff] }
 0xcfb   :  { %v15692_v8 = vadd.f32 %v8181_v29, %v8140_v28  ;;  %v8183_v27 = vpop.f32.mrb[130].mxu1  ;;  %8657 = vmatpush1.bf16.msra.mxu1 %v8481_v41  ;;  %v8143_v3 = vpop.f32.mrb[107].mxu0  ;;  %8617 = vmatprep.subr.bf16.mxu0 %v8422_v38  ;;  %v8513_v41 = vld [vmem:[#allocation6 + $0xbb0] sm:$0xff]  ;;  %v8518_v12 = vld [vmem:[#allocation6 + $0xbd8] sm:$0xff]  ;;  %v8696_v53 = vshrl.u32 %v15644_v15, 16  ;;  %v8728_v15 = vld [vmem:[#allocation6 + $0xc00] sm:$0xff] }
 0xcfc   :  { %v8184_v17 = vpop.f32.mrb[131].mxu1  ;;  %8658 = vmatprep.subr.bf16.mxu1 %v8486_v45  ;;  %v8453_v38 = vld [vmem:[#allocation6 + $0x9d0] sm:$0xff]  ;;  %v8458_v28 = vld [vmem:[#allocation6 + $0x9f8] sm:$0xff]  ;;  %v8704_v27 = vshrl.u32 %v15646_v9, 16  ;;  %v8792_v9 = vld [vmem:[#allocation6 + $0xe00] sm:$0xff] }
 0xcfd   :  { %v8517_v45 = vld [vmem:[#allocation6 + $0xbd0] sm:$0xff]  ;;  %v8522_v29 = vld [vmem:[#allocation6 + $0xbf8] sm:$0xff] }
 0xcfe   :  { %8618 = vmatpush1.bf16.msra.mxu0 %v8421_v23  ;;  %v8457_v3 = vld [vmem:[#allocation6 + $0x9f0] sm:$0xff]  ;;  %v8729_v23 = vld [vmem:[#allocation6 + $0xc08] sm:$0xff] }
 0xcff   :  { %8659 = vmatpush1.bf16.msra.mxu1 %v8485_v18  ;;  %8619 = vmatprep.subr.bf16.mxu0 %v8426_v20  ;;  %v8521_v17 = vld [vmem:[#allocation6 + $0xbf0] sm:$0xff]  ;;  %v8793_v18 = vld [vmem:[#allocation6 + $0xe08] sm:$0xff]  ;;  %v8698_v20 = vrot.slane %v8696_v53, 1 }
 0xd00   :  { %8660 = vmatprep.subr.bf16.mxu1 %v8490_v22  ;;  %v8716_v22 = vrot.slane %v15638_v54, 1 }
 0xd02   :  { %8620 = vmatpush1.bf16.msra.mxu0 %v8425_v57  ;;  %v8706_v57 = vrot.slane %v8704_v27, 1  ;;  %v8752_v27 = vld [vmem:[#allocation6 + $0xcc0] sm:$0xff] }
 0xd03   :  { %8661 = vmatpush1.bf16.msra.mxu1 %v8489_v47  ;;  %8621 = vmatprep.subr.bf16.mxu0 %v8430_v31  ;;  %v8718_v47 = vrot.slane %v15640_v25, 1  ;;  %v8733_v31 = vld [vmem:[#allocation6 + $0xc28] sm:$0xff]  ;;  %v8732_v25 = vld [vmem:[#allocation6 + $0xc20] sm:$0xff] }
 0xd04   :  { %8662 = vmatprep.subr.bf16.mxu1 %v8494_v7  ;;  %v8797_v7 = vld [vmem:[#allocation6 + $0xe28] sm:$0xff] }
 0xd05   :  { %v15706_v54 = vsel %vm15576_vm1, %v8706_v57, %v8718_v47  ;;  %v8760_v57 = vld [vmem:[#allocation6 + $0xd00] sm:$0xff] }
 0xd06   :  { %8622 = vmatpush1.bf16.msra.mxu0 %v8429_v32  ;;  %v15702_v32 = vsel %vm15576_vm1, %v8698_v20, %v8716_v22  ;;  %v8761_v20 = vld [vmem:[#allocation6 + $0xd08] sm:$0xff]  ;;  %v8824_v47 = vld [vmem:[#allocation6 + $0xf00] sm:$0xff] }
 0xd07   :  { %8663 = vmatpush1.bf16.msra.mxu1 %v8493_v33  ;;  %8623 = vmatprep.subr.bf16.mxu0 %v8434_v30  ;;  %v8796_v33 = vld [vmem:[#allocation6 + $0xe20] sm:$0xff]  ;;  %v8737_v30 = vld [vmem:[#allocation6 + $0xc48] sm:$0xff] }
 0xd08   :  { %8664 = vmatprep.subr.bf16.mxu1 %v8498_v39  ;;  %v8801_v39 = vld [vmem:[#allocation6 + $0xe48] sm:$0xff] }
 0xd09   :  { %v8825_v22 = vld [vmem:[#allocation6 + $0xf08] sm:$0xff] }
 0xd0a   :  { %8624 = vmatpush1.bf16.msra.mxu0 %v8433_v26  ;;  %v8741_v26 = vld [vmem:[#allocation6 + $0xc68] sm:$0xff] }
 0xd0b   :  { %8665 = vmatpush1.bf16.msra.mxu1 %v8497_v36  ;;  %8625 = vmatprep.subr.bf16.mxu0 %v8438_v14  ;;  %v8805_v36 = vld [vmem:[#allocation6 + $0xe68] sm:$0xff]  ;;  %v8740_v14 = vld [vmem:[#allocation6 + $0xc60] sm:$0xff] }
 0xd0c   :  { %8666 = vmatprep.subr.bf16.mxu1 %v8502_v43  ;;  %v8804_v43 = vld [vmem:[#allocation6 + $0xe60] sm:$0xff] }
 0xd0e   :  { %8626 = vmatpush1.bf16.msra.mxu0 %v8437_v55  ;;  %v8745_v55 = vld [vmem:[#allocation6 + $0xc88] sm:$0xff] }
 0xd0f   :  { %8667 = vmatpush1.bf16.msra.mxu1 %v8501_v52  ;;  %8627 = vmatprep.subr.bf16.mxu0 %v8442_v60  ;;  %v8809_v52 = vld [vmem:[#allocation6 + $0xe88] sm:$0xff]  ;;  %v8744_v60 = vld [vmem:[#allocation6 + $0xc80] sm:$0xff] }
 0xd10   :  { %8668 = vmatprep.subr.bf16.mxu1 %v8506_v4  ;;  %v8808_v4 = vld [vmem:[#allocation6 + $0xe80] sm:$0xff] }
 0xd12   :  { %8628 = vmatpush1.bf16.msra.mxu0 %v8441_v5  ;;  %v8749_v5 = vld [vmem:[#allocation6 + $0xca8] sm:$0xff] }
 0xd13   :  { %8669 = vmatpush1.bf16.msra.mxu1 %v8505_v37  ;;  %8629 = vmatprep.subr.bf16.mxu0 %v8446_v34  ;;  %v8813_v37 = vld [vmem:[#allocation6 + $0xea8] sm:$0xff]  ;;  %v8748_v34 = vld [vmem:[#allocation6 + $0xca0] sm:$0xff] }
 0xd14   :  { %8670 = vmatprep.subr.bf16.mxu1 %v8510_v40  ;;  %v8812_v40 = vld [vmem:[#allocation6 + $0xea0] sm:$0xff] }
 0xd16   :  { %8630 = vmatpush1.bf16.msra.mxu0 %v8445_v35 }
 0xd17   :  { %8671 = vmatpush1.bf16.msra.mxu1 %v8509_v63  ;;  %8631 = vmatprep.subr.bf16.mxu0 %v8450_v56  ;;  %v8753_v56 = vld [vmem:[#allocation6 + $0xcc8] sm:$0xff] }
 0xd18   :  { %8672 = vmatprep.subr.bf16.mxu1 %v8514_v6  ;;  %v8817_v6 = vld [vmem:[#allocation6 + $0xec8] sm:$0xff] }
 0xd1a   :  { %8632 = vmatpush1.bf16.msra.mxu0 %v8449_v49 }
 0xd1b   :  { %8673 = vmatpush1.bf16.msra.mxu1 %v8513_v41  ;;  %8633 = vmatprep.subr.bf16.mxu0 %v8454_v11 }
 0xd1c   :  { %8674 = vmatprep.subr.bf16.mxu1 %v8518_v12 }
 0xd1e   :  { %8634 = vmatpush1.bf16.msra.mxu0 %v8453_v38 }
 0xd1f   :  { %8675 = vmatpush1.bf16.msra.mxu1 %v8517_v45  ;;  %8635 = vmatprep.subr.bf16.mxu0 %v8458_v28 }
 0xd20   :  { %8676 = vmatprep.subr.bf16.mxu1 %v8522_v29 }
 0xd22   :  { %8636 = vmatpush1.bf16.msra.mxu0 %v8457_v3  ;;  %v8816_v3 = vld [vmem:[#allocation6 + $0xec0] sm:$0xff] }
 0xd23   :  { %8677 = vmatpush1.bf16.msra.mxu1 %v8521_v17  ;;  %8856 = vmatprep.subr.bf16.mxu0 %v8729_v23  ;;  %v8757_v23 = vld [vmem:[#allocation6 + $0xce8] sm:$0xff] }
 0xd24   :  { %8897 = vmatprep.subr.bf16.mxu1 %v8793_v18  ;;  %v8820_v18 = vld [vmem:[#allocation6 + $0xee0] sm:$0xff] }
 0xd25   :  { %8638 = vmatmul.mubr.bf16.vlgmr.msra.gmra.mrb[120].mxu0 %v15680_v10  ;;  %v8736_v10 = vld [vmem:[#allocation6 + $0xc40] sm:$0xff] }
 0xd26   :  { %8679 = vmatmul.mubr.bf16.vlgmr.msra.gmra.mrb[144].mxu1 %v15684_v21  ;;  %8857 = vmatpush1.bf16.msra.mxu0 %v8728_v15  ;;  %v8800_v21 = vld [vmem:[#allocation6 + $0xe40] sm:$0xff]  ;;  %v8765_v15 = vld [vmem:[#allocation6 + $0xd28] sm:$0xff] }
 0xd27   :  { %8898 = vmatpush1.bf16.msra.mxu1 %v8792_v9  ;;  %8858 = vmatprep.subr.bf16.mxu0 %v8733_v31  ;;  %v8829_v9 = vld [vmem:[#allocation6 + $0xf28] sm:$0xff]  ;;  %v8764_v31 = vld [vmem:[#allocation6 + $0xd20] sm:$0xff] }
 0xd28   :  { %8899 = vmatprep.subr.bf16.mxu1 %v8797_v7  ;;  %8888 = vmatprep.mubr.bf16.mxu0 %v15702_v32  ;;  %v8828_v7 = vld [vmem:[#allocation6 + $0xf20] sm:$0xff] }
 0xd29   :  { %8929 = vmatprep.mubr.bf16.mxu1 %v15706_v54 }
 0xd2a   :  { %8859 = vmatpush1.bf16.msra.mxu0 %v8732_v25  ;;  %v8769_v25 = vld [vmem:[#allocation6 + $0xd48] sm:$0xff] }
 0xd2b   :  { %8900 = vmatpush1.bf16.msra.mxu1 %v8796_v33  ;;  %8860 = vmatprep.subr.bf16.mxu0 %v8737_v30  ;;  %v8833_v33 = vld [vmem:[#allocation6 + $0xf48] sm:$0xff]  ;;  %v8768_v30 = vld [vmem:[#allocation6 + $0xd40] sm:$0xff] }
 0xd2c   :  { %8901 = vmatprep.subr.bf16.mxu1 %v8801_v39  ;;  %v8832_v39 = vld [vmem:[#allocation6 + $0xf40] sm:$0xff] }
 0xd2e   :  { %8861 = vmatpush1.bf16.msra.mxu0 %v8736_v10  ;;  %v8773_v10 = vld [vmem:[#allocation6 + $0xd68] sm:$0xff] }
 0xd2f   :  { %8902 = vmatpush1.bf16.msra.mxu1 %v8800_v21  ;;  %8862 = vmatprep.subr.bf16.mxu0 %v8741_v26  ;;  %v8837_v21 = vld [vmem:[#allocation6 + $0xf68] sm:$0xff]  ;;  %v8772_v26 = vld [vmem:[#allocation6 + $0xd60] sm:$0xff] }
 0xd30   :  { %8903 = vmatprep.subr.bf16.mxu1 %v8805_v36  ;;  %v8836_v36 = vld [vmem:[#allocation6 + $0xf60] sm:$0xff] }
 0xd32   :  { %8863 = vmatpush1.bf16.msra.mxu0 %v8740_v14  ;;  %v8777_v14 = vld [vmem:[#allocation6 + $0xd88] sm:$0xff] }
 0xd33   :  { %8904 = vmatpush1.bf16.msra.mxu1 %v8804_v43  ;;  %8864 = vmatprep.subr.bf16.mxu0 %v8745_v55  ;;  %v8841_v43 = vld [vmem:[#allocation6 + $0xf88] sm:$0xff]  ;;  %v8776_v55 = vld [vmem:[#allocation6 + $0xd80] sm:$0xff] }
 0xd34   :  { %8905 = vmatprep.subr.bf16.mxu1 %v8809_v52  ;;  %v8840_v52 = vld [vmem:[#allocation6 + $0xf80] sm:$0xff] }
 0xd36   :  { %8865 = vmatpush1.bf16.msra.mxu0 %v8744_v60  ;;  %v8781_v60 = vld [vmem:[#allocation6 + $0xda8] sm:$0xff] }
 0xd37   :  { %8906 = vmatpush1.bf16.msra.mxu1 %v8808_v4  ;;  %8866 = vmatprep.subr.bf16.mxu0 %v8749_v5  ;;  %v8845_v4 = vld [vmem:[#allocation6 + $0xfa8] sm:$0xff]  ;;  %v8780_v5 = vld [vmem:[#allocation6 + $0xda0] sm:$0xff] }
 0xd38   :  { %8907 = vmatprep.subr.bf16.mxu1 %v8813_v37  ;;  %v8220_v35 = vpop.f32.mrb[108].mxu0  ;;  %v8844_v37 = vld [vmem:[#allocation6 + $0xfa0] sm:$0xff] }
 0xd39   :  { %v8261_v63 = vpop.f32.mrb[132].mxu1  ;;  %v8221_v49 = vadd.f32 %v8220_v35, %v15662_v24  ;;  %v8222_v41 = vpop.f32.mrb[109].mxu0  ;;  %v8821_v24 = vld [vmem:[#allocation6 + $0xee8] sm:$0xff]  ;;  %v8692_v35 = vshrl.u32 %v15672_v51, 16  ;;  %v8852_v51 = vld [vmem:[#allocation6 + $0xfe0] sm:$0xff] }
 0xd3a   :  { %v8263_v11 = vpop.f32.mrb[133].mxu1  ;;  %v8223_v12 = vadd.f32 %v8222_v41, %v15664_v13  ;;  %v8224_v38 = vpop.f32.mrb[110].mxu0  ;;  %8867 = vmatpush1.bf16.msra.mxu0 %v8748_v34  ;;  %v8756_v13 = vld [vmem:[#allocation6 + $0xce0] sm:$0xff]  ;;  %v8785_v34 = vld [vmem:[#allocation6 + $0xdc8] sm:$0xff] }
 0xd3b   :  { %v8265_v45 = vpop.f32.mrb[134].mxu1  ;;  %8908 = vmatpush1.bf16.msra.mxu1 %v8812_v40  ;;  %v15712_v28 = vadd.f32 %v8261_v63, %v8221_v49  ;;  %v8225_v29 = vpop.f32.mrb[111].mxu0  ;;  %8868 = vmatprep.subr.bf16.mxu0 %v8753_v56  ;;  %v8849_v40 = vld [vmem:[#allocation6 + $0xfc8] sm:$0xff]  ;;  %v8700_v63 = vshrl.u32 %v15674_v42, 16  ;;  %v8784_v56 = vld [vmem:[#allocation6 + $0xdc0] sm:$0xff]  ;;  %v8795_v42 = vld [vmem:[#allocation6 + $0xe18] sm:$0xff] }
 0xd3c   :  { %v8266_v53 = vpop.f32.mrb[135].mxu1  ;;  %8909 = vmatprep.subr.bf16.mxu1 %v8817_v6  ;;  %v15714_v17 = vadd.f32 %v8263_v11, %v8223_v12  ;;  %v8848_v6 = vld [vmem:[#allocation6 + $0xfc0] sm:$0xff]  ;;  %v8789_v49 = vld [vmem:[#allocation6 + $0xde8] sm:$0xff]  ;;  %v8694_v11 = vrot.slane %v8692_v35, 1  ;;  %v8715_v12 = vrot.slane %v15666_v48, 1  ;;  %v8717_v45 = vrot.slane %v15668_v50, 1 }
 0xd3d   :  { %v8853_v41 = vld [vmem:[#allocation6 + $0xfe8] sm:$0xff]  ;;  %v8702_v38 = vrot.slane %v8700_v63, 1  ;;  %v8788_v29 = vld [vmem:[#allocation6 + $0xde0] sm:$0xff]  ;;  %v8731_v53 = vld [vmem:[#allocation6 + $0xc18] sm:$0xff] }
 0xd3e   :  { %8869 = vmatpush1.bf16.msra.mxu0 %v8752_v27  ;;  %v15722_v27 = vsel %vm15576_vm1, %v8694_v11, %v8715_v12  ;;  %v8730_v48 = vld [vmem:[#allocation6 + $0xc10] sm:$0xff]  ;;  %v8763_v11 = vld [vmem:[#allocation6 + $0xd18] sm:$0xff] }
 0xd3f   :  { %8910 = vmatpush1.bf16.msra.mxu1 %v8816_v3  ;;  %8870 = vmatprep.subr.bf16.mxu0 %v8757_v23  ;;  %v15726_v3 = vsel %vm15576_vm1, %v8702_v38, %v8717_v45  ;;  %v8794_v50 = vld [vmem:[#allocation6 + $0xe10] sm:$0xff]  ;;  %v8735_v23 = vld [vmem:[#allocation6 + $0xc38] sm:$0xff] }
 0xd40   :  { %8911 = vmatprep.subr.bf16.mxu1 %v8821_v24  ;;  %v8799_v24 = vld [vmem:[#allocation6 + $0xe38] sm:$0xff]  ;;  %v8754_v63 = vld [vmem:[#allocation6 + $0xcd0] sm:$0xff] }
 0xd41   :  { %v8827_v12 = vld [vmem:[#allocation6 + $0xf18] sm:$0xff]  ;;  %v8762_v38 = vld [vmem:[#allocation6 + $0xd10] sm:$0xff] }
 0xd42   :  { %8871 = vmatpush1.bf16.msra.mxu0 %v8756_v13  ;;  %v8734_v13 = vld [vmem:[#allocation6 + $0xc30] sm:$0xff] }
 0xd43   :  { %8912 = vmatpush1.bf16.msra.mxu1 %v8820_v18  ;;  %8872 = vmatprep.subr.bf16.mxu0 %v8761_v20  ;;  %v8798_v18 = vld [vmem:[#allocation6 + $0xe30] sm:$0xff]  ;;  %v8739_v20 = vld [vmem:[#allocation6 + $0xc58] sm:$0xff] }
 0xd44   :  { %8913 = vmatprep.subr.bf16.mxu1 %v8825_v22  ;;  %v8803_v22 = vld [vmem:[#allocation6 + $0xe58] sm:$0xff]  ;;  %v8826_v45 = vld [vmem:[#allocation6 + $0xf10] sm:$0xff] }
 0xd46   :  { %8873 = vmatpush1.bf16.msra.mxu0 %v8760_v57  ;;  %v8738_v57 = vld [vmem:[#allocation6 + $0xc50] sm:$0xff] }
 0xd47   :  { %8914 = vmatpush1.bf16.msra.mxu1 %v8824_v47  ;;  %8874 = vmatprep.subr.bf16.mxu0 %v8765_v15  ;;  %v8802_v47 = vld [vmem:[#allocation6 + $0xe50] sm:$0xff]  ;;  %v8743_v15 = vld [vmem:[#allocation6 + $0xc78] sm:$0xff] }
 0xd48   :  { %8915 = vmatprep.subr.bf16.mxu1 %v8829_v9  ;;  %v8807_v9 = vld [vmem:[#allocation6 + $0xe78] sm:$0xff] }
 0xd4a   :  { %8875 = vmatpush1.bf16.msra.mxu0 %v8764_v31  ;;  %v8742_v31 = vld [vmem:[#allocation6 + $0xc70] sm:$0xff] }
 0xd4b   :  { %8916 = vmatpush1.bf16.msra.mxu1 %v8828_v7  ;;  %8876 = vmatprep.subr.bf16.mxu0 %v8769_v25  ;;  %v8806_v7 = vld [vmem:[#allocation6 + $0xe70] sm:$0xff]  ;;  %v8747_v25 = vld [vmem:[#allocation6 + $0xc98] sm:$0xff] }
 0xd4c   :  { %8917 = vmatprep.subr.bf16.mxu1 %v8833_v33  ;;  %v8811_v33 = vld [vmem:[#allocation6 + $0xe98] sm:$0xff] }
 0xd4e   :  { %8877 = vmatpush1.bf16.msra.mxu0 %v8768_v30  ;;  %v8751_v30 = vld [vmem:[#allocation6 + $0xcb8] sm:$0xff] }
 0xd4f   :  { %8918 = vmatpush1.bf16.msra.mxu1 %v8832_v39  ;;  %8878 = vmatprep.subr.bf16.mxu0 %v8773_v10  ;;  %v8815_v39 = vld [vmem:[#allocation6 + $0xeb8] sm:$0xff]  ;;  %v8750_v10 = vld [vmem:[#allocation6 + $0xcb0] sm:$0xff] }
 0xd50   :  { %8919 = vmatprep.subr.bf16.mxu1 %v8837_v21  ;;  %v8814_v21 = vld [vmem:[#allocation6 + $0xeb0] sm:$0xff] }
 0xd52   :  { %8879 = vmatpush1.bf16.msra.mxu0 %v8772_v26 }
 0xd53   :  { %8920 = vmatpush1.bf16.msra.mxu1 %v8836_v36  ;;  %8880 = vmatprep.subr.bf16.mxu0 %v8777_v14  ;;  %v8755_v14 = vld [vmem:[#allocation6 + $0xcd8] sm:$0xff] }
 0xd54   :  { %8921 = vmatprep.subr.bf16.mxu1 %v8841_v43  ;;  %v8819_v43 = vld [vmem:[#allocation6 + $0xed8] sm:$0xff] }
 0xd56   :  { %8881 = vmatpush1.bf16.msra.mxu0 %v8776_v55 }
 0xd57   :  { %8922 = vmatpush1.bf16.msra.mxu1 %v8840_v52  ;;  %8882 = vmatprep.subr.bf16.mxu0 %v8781_v60 }
 0xd58   :  { %8923 = vmatprep.subr.bf16.mxu1 %v8845_v4 }
 0xd5a   :  { %8883 = vmatpush1.bf16.msra.mxu0 %v8780_v5 }
 0xd5b   :  { %8924 = vmatpush1.bf16.msra.mxu1 %v8844_v37  ;;  %8884 = vmatprep.subr.bf16.mxu0 %v8785_v34 }
 0xd5c   :  { %8925 = vmatprep.subr.bf16.mxu1 %v8849_v40 }
 0xd5e   :  { %8885 = vmatpush1.bf16.msra.mxu0 %v8784_v56  ;;  %v8818_v56 = vld [vmem:[#allocation6 + $0xed0] sm:$0xff] }
 0xd5f   :  { %8926 = vmatpush1.bf16.msra.mxu1 %v8848_v6  ;;  %8886 = vmatprep.subr.bf16.mxu0 %v8789_v49  ;;  %v8759_v49 = vld [vmem:[#allocation6 + $0xcf8] sm:$0xff] }
 0xd60   :  { %8927 = vmatprep.subr.bf16.mxu1 %v8853_v41  ;;  %v8822_v41 = vld [vmem:[#allocation6 + $0xef0] sm:$0xff] }
 0xd62   :  { %8887 = vmatpush1.bf16.msra.mxu0 %v8788_v29  ;;  %v8767_v29 = vld [vmem:[#allocation6 + $0xd38] sm:$0xff] }
 0xd63   :  { %8928 = vmatpush1.bf16.msra.mxu1 %v8852_v51  ;;  %8938 = vmatprep.subr.bf16.mxu0 %v8731_v53  ;;  %v8831_v51 = vld [vmem:[#allocation6 + $0xf38] sm:$0xff]  ;;  %v8766_v53 = vld [vmem:[#allocation6 + $0xd30] sm:$0xff] }
 0xd64   :  { %8979 = vmatprep.subr.bf16.mxu1 %v8795_v42  ;;  %v8830_v42 = vld [vmem:[#allocation6 + $0xf30] sm:$0xff] }
 0xd65   :  { %8889 = vmatmul.mubr.bf16.vlgmr.msra.gmra.mrb[124].mxu0 %v15722_v27 }
 0xd66   :  { %8930 = vmatmul.mubr.bf16.vlgmr.msra.gmra.mrb[148].mxu1 %v15726_v3  ;;  %8939 = vmatpush1.bf16.msra.mxu0 %v8730_v48  ;;  %v8771_v48 = vld [vmem:[#allocation6 + $0xd58] sm:$0xff] }
 0xd67   :  { %8980 = vmatpush1.bf16.msra.mxu1 %v8794_v50  ;;  %8940 = vmatprep.subr.bf16.mxu0 %v8735_v23  ;;  %v8835_v50 = vld [vmem:[#allocation6 + $0xf58] sm:$0xff]  ;;  %v8770_v23 = vld [vmem:[#allocation6 + $0xd50] sm:$0xff] }
 0xd68   :  { %8981 = vmatprep.subr.bf16.mxu1 %v8799_v24  ;;  %8970 = vmatprep.mubr.bf16.mxu0 %v15702_v32  ;;  %v8746_v32 = vld [vmem:[#allocation6 + $0xc90] sm:$0xff] }
 0xd69   :  { %9011 = vmatprep.mubr.bf16.mxu1 %v15706_v54  ;;  %v8810_v54 = vld [vmem:[#allocation6 + $0xe90] sm:$0xff] }
 0xd6a   :  { %8941 = vmatpush1.bf16.msra.mxu0 %v8734_v13  ;;  %v8834_v24 = vld [vmem:[#allocation6 + $0xf50] sm:$0xff]  ;;  %v8775_v13 = vld [vmem:[#allocation6 + $0xd78] sm:$0xff] }
 0xd6b   :  { %8982 = vmatpush1.bf16.msra.mxu1 %v8798_v18  ;;  %8942 = vmatprep.subr.bf16.mxu0 %v8739_v20  ;;  %v8839_v18 = vld [vmem:[#allocation6 + $0xf78] sm:$0xff]  ;;  %v8774_v20 = vld [vmem:[#allocation6 + $0xd70] sm:$0xff] }
 0xd6c   :  { %8983 = vmatprep.subr.bf16.mxu1 %v8803_v22  ;;  %v8838_v22 = vld [vmem:[#allocation6 + $0xf70] sm:$0xff] }
 0xd6e   :  { %8943 = vmatpush1.bf16.msra.mxu0 %v8738_v57  ;;  %v8779_v57 = vld [vmem:[#allocation6 + $0xd98] sm:$0xff] }
 0xd6f   :  { %8984 = vmatpush1.bf16.msra.mxu1 %v8802_v47  ;;  %8944 = vmatprep.subr.bf16.mxu0 %v8743_v15  ;;  %v8843_v47 = vld [vmem:[#allocation6 + $0xf98] sm:$0xff]  ;;  %v8778_v15 = vld [vmem:[#allocation6 + $0xd90] sm:$0xff] }
 0xd70   :  { %8985 = vmatprep.subr.bf16.mxu1 %v8807_v9  ;;  %v8842_v9 = vld [vmem:[#allocation6 + $0xf90] sm:$0xff] }
 0xd72   :  { %8945 = vmatpush1.bf16.msra.mxu0 %v8742_v31  ;;  %v8783_v31 = vld [vmem:[#allocation6 + $0xdb8] sm:$0xff] }
 0xd73   :  { %8986 = vmatpush1.bf16.msra.mxu1 %v8806_v7  ;;  %8946 = vmatprep.subr.bf16.mxu0 %v8747_v25  ;;  %v8847_v7 = vld [vmem:[#allocation6 + $0xfb8] sm:$0xff]  ;;  %v8782_v25 = vld [vmem:[#allocation6 + $0xdb0] sm:$0xff] }
 0xd74   :  { %8987 = vmatprep.subr.bf16.mxu1 %v8811_v33  ;;  %v8846_v33 = vld [vmem:[#allocation6 + $0xfb0] sm:$0xff] }
 0xd76   :  { %8947 = vmatpush1.bf16.msra.mxu0 %v8746_v32  ;;  %v8787_v32 = vld [vmem:[#allocation6 + $0xdd8] sm:$0xff] }
 0xd77   :  { %8988 = vmatpush1.bf16.msra.mxu1 %v8810_v54  ;;  %8948 = vmatprep.subr.bf16.mxu0 %v8751_v30  ;;  %v8851_v54 = vld [vmem:[#allocation6 + $0xfd8] sm:$0xff]  ;;  %v15738_v30 = vld [vmem:[#allocation5 + $0x28] sm:$0x4] }
 0xd78   :  { %8989 = vmatprep.subr.bf16.mxu1 %v8815_v39  ;;  %v8302_v26 = vpop.f32.mrb[112].mxu0  ;;  %v15740_v39 = vld [vmem:[#allocation5 + $0x38] sm:$0x4] }
 0xd79   :  { %v8343_v36 = vpop.f32.mrb[136].mxu1  ;;  %v8303_v55 = vadd.f32 %v8302_v26, %v15690_v44  ;;  %v8304_v52 = vpop.f32.mrb[113].mxu0  ;;  %v8823_v44 = vld [vmem:[#allocation6 + $0xef8] sm:$0xff] }
 0xd7a   :  { %v8345_v60 = vpop.f32.mrb[137].mxu1  ;;  %v8305_v4 = vadd.f32 %v8304_v52, %v15692_v8  ;;  %v8306_v5 = vpop.f32.mrb[114].mxu0  ;;  %8949 = vmatpush1.bf16.msra.mxu0 %v8750_v10  ;;  %v8758_v8 = vld [vmem:[#allocation6 + $0xcf0] sm:$0xff]  ;;  %v8791_v26 = vld [vmem:[#allocation6 + $0xdf8] sm:$0xff] }
 0xd7b   :  { %v8347_v37 = vpop.f32.mrb[138].mxu1  ;;  %8990 = vmatpush1.bf16.msra.mxu1 %v8814_v21  ;;  %v15734_v34 = vadd.f32 %v8343_v36, %v8303_v55  ;;  %v8307_v40 = vpop.f32.mrb[115].mxu0  ;;  %8950 = vmatprep.subr.bf16.mxu0 %v8755_v14  ;;  %v8786_v10 = vld [vmem:[#allocation6 + $0xdd0] sm:$0xff]  ;;  %v8855_v36 = vld [vmem:[#allocation6 + $0xff8] sm:$0xff]  ;;  %v9049_v14 = vshll.u32 %v15738_v30, 16  ;;  %v9070_v5 = vld [vmem:[#allocation6 + $0x1008] sm:$0xff] }
 0xd7c   :  { %v8348_v35 = vpop.f32.mrb[139].mxu1  ;;  %8991 = vmatprep.subr.bf16.mxu1 %v8819_v43  ;;  %v15736_v6 = vadd.f32 %v8345_v60, %v8305_v4  ;;  %v8850_v21 = vld [vmem:[#allocation6 + $0xfd0] sm:$0xff]  ;;  %v9057_v43 = vshll.u32 %v15740_v39, 16  ;;  %v15744_v55 = vld [vmem:[#allocation5 + $0x8] sm:$0x4] }
 0xd7d   :  { %v15746_v52 = vld [vmem:[#allocation5 + $0x18] sm:$0x4]  ;;  %v8790_v60 = vld [vmem:[#allocation6 + $0xdf0] sm:$0xff]  ;;  %v9134_v37 = vld [vmem:[#allocation6 + $0x1208] sm:$0xff]  ;;  %v9037_v40 = vrot.slane %v15744_v55, 2  ;;  %v9051_v35 = vrot.slane %v9049_v14, 2 }
 0xd7e   :  { %8951 = vmatpush1.bf16.msra.mxu0 %v8754_v63  ;;  %v8854_v4 = vld [vmem:[#allocation6 + $0xff0] sm:$0xff]  ;;  %v9039_v63 = vrot.slane %v15746_v52, 2 }
 0xd7f   :  { %8992 = vmatpush1.bf16.msra.mxu1 %v8818_v56  ;;  %8952 = vmatprep.subr.bf16.mxu0 %v8759_v49  ;;  %v9059_v56 = vrot.slane %v9057_v43, 2  ;;  %v9069_v49 = vld [vmem:[#allocation6 + $0x1000] sm:$0xff] }
 0xd80   :  { %8993 = vmatprep.subr.bf16.mxu1 %v8823_v44  ;;  %v9133_v44 = vld [vmem:[#allocation6 + $0x1200] sm:$0xff] }
 0xd81   :  { %v9093_v43 = vld [vmem:[#allocation6 + $0x10c0] sm:$0xff] }
 0xd82   :  { %8953 = vmatpush1.bf16.msra.mxu0 %v8758_v8  ;;  %v9074_v8 = vld [vmem:[#allocation6 + $0x1028] sm:$0xff] }
 0xd83   :  { %8994 = vmatpush1.bf16.msra.mxu1 %v8822_v41  ;;  %8954 = vmatprep.subr.bf16.mxu0 %v8763_v11  ;;  %v9138_v41 = vld [vmem:[#allocation6 + $0x1228] sm:$0xff]  ;;  %v15754_v11 = vsel %vm15576_vm1, %v9037_v40, %v9051_v35  ;;  %v9097_v40 = vld [vmem:[#allocation6 + $0x10e0] sm:$0xff] }
 0xd84   :  { %8995 = vmatprep.subr.bf16.mxu1 %v8827_v12  ;;  %v15758_v12 = vsel %vm15576_vm1, %v9039_v63, %v9059_v56  ;;  %v9161_v35 = vld [vmem:[#allocation6 + $0x12e0] sm:$0xff]  ;;  %v9102_v63 = vld [vmem:[#allocation6 + $0x1108] sm:$0xff] }
 0xd85   :  { %v9101_v56 = vld [vmem:[#allocation6 + $0x1100] sm:$0xff] }
 0xd86   :  { %8955 = vmatpush1.bf16.msra.mxu0 %v8762_v38  ;;  %v9073_v38 = vld [vmem:[#allocation6 + $0x1020] sm:$0xff] }
 0xd87   :  { %8996 = vmatpush1.bf16.msra.mxu1 %v8826_v45  ;;  %8956 = vmatprep.subr.bf16.mxu0 %v8767_v29  ;;  %v9137_v45 = vld [vmem:[#allocation6 + $0x1220] sm:$0xff]  ;;  %v9078_v29 = vld [vmem:[#allocation6 + $0x1048] sm:$0xff] }
 0xd88   :  { %8997 = vmatprep.subr.bf16.mxu1 %v8831_v51  ;;  %v9142_v51 = vld [vmem:[#allocation6 + $0x1248] sm:$0xff] }
 0xd8a   :  { %8957 = vmatpush1.bf16.msra.mxu0 %v8766_v53  ;;  %v9082_v53 = vld [vmem:[#allocation6 + $0x1068] sm:$0xff] }
 0xd8b   :  { %8998 = vmatpush1.bf16.msra.mxu1 %v8830_v42  ;;  %8958 = vmatprep.subr.bf16.mxu0 %v8771_v48  ;;  %v9146_v42 = vld [vmem:[#allocation6 + $0x1268] sm:$0xff]  ;;  %v9081_v48 = vld [vmem:[#allocation6 + $0x1060] sm:$0xff] }
 0xd8c   :  { %8999 = vmatprep.subr.bf16.mxu1 %v8835_v50  ;;  %v9145_v50 = vld [vmem:[#allocation6 + $0x1260] sm:$0xff] }
 0xd8e   :  { %8959 = vmatpush1.bf16.msra.mxu0 %v8770_v23  ;;  %v9086_v23 = vld [vmem:[#allocation6 + $0x1088] sm:$0xff] }
 0xd8f   :  { %9000 = vmatpush1.bf16.msra.mxu1 %v8834_v24  ;;  %8960 = vmatprep.subr.bf16.mxu0 %v8775_v13  ;;  %v9150_v24 = vld [vmem:[#allocation6 + $0x1288] sm:$0xff]  ;;  %v9085_v13 = vld [vmem:[#allocation6 + $0x1080] sm:$0xff] }
 0xd90   :  { %9001 = vmatprep.subr.bf16.mxu1 %v8839_v18  ;;  %v9149_v18 = vld [vmem:[#allocation6 + $0x1280] sm:$0xff] }
 0xd92   :  { %8961 = vmatpush1.bf16.msra.mxu0 %v8774_v20  ;;  %v9090_v20 = vld [vmem:[#allocation6 + $0x10a8] sm:$0xff] }
 0xd93   :  { %9002 = vmatpush1.bf16.msra.mxu1 %v8838_v22  ;;  %8962 = vmatprep.subr.bf16.mxu0 %v8779_v57  ;;  %v9154_v22 = vld [vmem:[#allocation6 + $0x12a8] sm:$0xff]  ;;  %v9089_v57 = vld [vmem:[#allocation6 + $0x10a0] sm:$0xff] }
 0xd94   :  { %9003 = vmatprep.subr.bf16.mxu1 %v8843_v47  ;;  %v9153_v47 = vld [vmem:[#allocation6 + $0x12a0] sm:$0xff] }
 0xd96   :  { %8963 = vmatpush1.bf16.msra.mxu0 %v8778_v15 }
 0xd97   :  { %9004 = vmatpush1.bf16.msra.mxu1 %v8842_v9  ;;  %8964 = vmatprep.subr.bf16.mxu0 %v8783_v31  ;;  %v9094_v31 = vld [vmem:[#allocation6 + $0x10c8] sm:$0xff] }
 0xd98   :  { %9005 = vmatprep.subr.bf16.mxu1 %v8847_v7  ;;  %v9158_v7 = vld [vmem:[#allocation6 + $0x12c8] sm:$0xff] }
 0xd9a   :  { %8965 = vmatpush1.bf16.msra.mxu0 %v8782_v25 }
 0xd9b   :  { %9006 = vmatpush1.bf16.msra.mxu1 %v8846_v33  ;;  %8966 = vmatprep.subr.bf16.mxu0 %v8787_v32 }
 0xd9c   :  { %9007 = vmatprep.subr.bf16.mxu1 %v8851_v54 }
 0xd9e   :  { %8967 = vmatpush1.bf16.msra.mxu0 %v8786_v10 }
 0xd9f   :  { %9008 = vmatpush1.bf16.msra.mxu1 %v8850_v21  ;;  %8968 = vmatprep.subr.bf16.mxu0 %v8791_v26 }
 0xda0   :  { %9009 = vmatprep.subr.bf16.mxu1 %v8855_v36 }
 0xda2   :  { %8969 = vmatpush1.bf16.msra.mxu0 %v8790_v60  ;;  %v9157_v60 = vld [vmem:[#allocation6 + $0x12c0] sm:$0xff] }
 0xda3   :  { %9010 = vmatpush1.bf16.msra.mxu1 %v8854_v4  ;;  %9197 = vmatprep.subr.bf16.mxu0 %v9070_v5  ;;  %v9098_v5 = vld [vmem:[#allocation6 + $0x10e8] sm:$0xff] }
 0xda4   :  { %9238 = vmatprep.subr.bf16.mxu1 %v9134_v37  ;;  %v9162_v37 = vld [vmem:[#allocation6 + $0x12e8] sm:$0xff] }
 0xda5   :  { %8971 = vmatmul.mubr.bf16.vlgmr.msra.gmra.mrb[128].mxu0 %v15722_v27  ;;  %v9077_v27 = vld [vmem:[#allocation6 + $0x1040] sm:$0xff] }
 0xda6   :  { %9012 = vmatmul.mubr.bf16.vlgmr.msra.gmra.mrb[152].mxu1 %v15726_v3  ;;  %9198 = vmatpush1.bf16.msra.mxu0 %v9069_v49  ;;  %v9141_v3 = vld [vmem:[#allocation6 + $0x1240] sm:$0xff] }
 0xda7   :  { %9239 = vmatpush1.bf16.msra.mxu1 %v9133_v44  ;;  %9199 = vmatprep.subr.bf16.mxu0 %v9074_v8  ;;  %v9165_v49 = vld [vmem:[#allocation6 + $0x1300] sm:$0xff]  ;;  %v9106_v44 = vld [vmem:[#allocation6 + $0x1128] sm:$0xff] }
 0xda8   :  { %9240 = vmatprep.subr.bf16.mxu1 %v9138_v41  ;;  %9229 = vmatprep.mubr.bf16.mxu0 %v15754_v11  ;;  %v9170_v8 = vld [vmem:[#allocation6 + $0x1328] sm:$0xff]  ;;  %v9169_v41 = vld [vmem:[#allocation6 + $0x1320] sm:$0xff] }
 0xda9   :  { %9270 = vmatprep.mubr.bf16.mxu1 %v15758_v12 }
 0xdaa   :  { %9200 = vmatpush1.bf16.msra.mxu0 %v9073_v38  ;;  %v9110_v38 = vld [vmem:[#allocation6 + $0x1148] sm:$0xff] }
 0xdab   :  { %9241 = vmatpush1.bf16.msra.mxu1 %v9137_v45  ;;  %9201 = vmatprep.subr.bf16.mxu0 %v9078_v29  ;;  %v9174_v45 = vld [vmem:[#allocation6 + $0x1348] sm:$0xff]  ;;  %v9109_v29 = vld [vmem:[#allocation6 + $0x1140] sm:$0xff] }
 0xdac   :  { %9242 = vmatprep.subr.bf16.mxu1 %v9142_v51  ;;  %v9173_v51 = vld [vmem:[#allocation6 + $0x1340] sm:$0xff] }
 0xdae   :  { %9202 = vmatpush1.bf16.msra.mxu0 %v9077_v27  ;;  %v9114_v27 = vld [vmem:[#allocation6 + $0x1168] sm:$0xff] }
 0xdaf   :  { %9243 = vmatpush1.bf16.msra.mxu1 %v9141_v3  ;;  %9203 = vmatprep.subr.bf16.mxu0 %v9082_v53  ;;  %v9178_v3 = vld [vmem:[#allocation6 + $0x1368] sm:$0xff]  ;;  %v9113_v53 = vld [vmem:[#allocation6 + $0x1160] sm:$0xff] }
 0xdb0   :  { %9244 = vmatprep.subr.bf16.mxu1 %v9146_v42  ;;  %v9177_v42 = vld [vmem:[#allocation6 + $0x1360] sm:$0xff] }
 0xdb2   :  { %9204 = vmatpush1.bf16.msra.mxu0 %v9081_v48  ;;  %v9118_v48 = vld [vmem:[#allocation6 + $0x1188] sm:$0xff] }
 0xdb3   :  { %9245 = vmatpush1.bf16.msra.mxu1 %v9145_v50  ;;  %9205 = vmatprep.subr.bf16.mxu0 %v9086_v23  ;;  %v9182_v50 = vld [vmem:[#allocation6 + $0x1388] sm:$0xff]  ;;  %v9117_v23 = vld [vmem:[#allocation6 + $0x1180] sm:$0xff] }
 0xdb4   :  { %9246 = vmatprep.subr.bf16.mxu1 %v9150_v24  ;;  %v9181_v24 = vld [vmem:[#allocation6 + $0x1380] sm:$0xff] }
 0xdb6   :  { %9206 = vmatpush1.bf16.msra.mxu0 %v9085_v13  ;;  %v9122_v13 = vld [vmem:[#allocation6 + $0x11a8] sm:$0xff] }
 0xdb7   :  { %9247 = vmatpush1.bf16.msra.mxu1 %v9149_v18  ;;  %9207 = vmatprep.subr.bf16.mxu0 %v9090_v20  ;;  %v9186_v18 = vld [vmem:[#allocation6 + $0x13a8] sm:$0xff]  ;;  %v9121_v20 = vld [vmem:[#allocation6 + $0x11a0] sm:$0xff] }
 0xdb8   :  { %9248 = vmatprep.subr.bf16.mxu1 %v9154_v22  ;;  %v8557_v15 = vpop.f32.mrb[116].mxu0  ;;  %v9185_v22 = vld [vmem:[#allocation6 + $0x13a0] sm:$0xff] }
 0xdb9   :  { %v8598_v9 = vpop.f32.mrb[140].mxu1  ;;  %v8559_v33 = vpop.f32.mrb[117].mxu0 }
 0xdba   :  { %v8599_v25 = vadd.f32 %v8598_v9, %v8557_v15  ;;  %v8600_v32 = vpop.f32.mrb[141].mxu1  ;;  %v8561_v10 = vpop.f32.mrb[118].mxu0  ;;  %9208 = vmatpush1.bf16.msra.mxu0 %v9089_v57  ;;  %v15768_v57 = vld [vmem:[#allocation5 + $0x20] sm:$0x4]  ;;  %v9126_v15 = vld [vmem:[#allocation6 + $0x11c8] sm:$0xff] }
 0xdbb   :  { %v8601_v54 = vadd.f32 %v8600_v32, %v8559_v33  ;;  %v8602_v21 = vpop.f32.mrb[142].mxu1  ;;  %9249 = vmatpush1.bf16.msra.mxu1 %v9153_v47  ;;  %v8562_v36 = vpop.f32.mrb[119].mxu0  ;;  %9209 = vmatprep.subr.bf16.mxu0 %v9094_v31  ;;  %v15770_v47 = vld [vmem:[#allocation5 + $0x30] sm:$0x4]  ;;  %v9190_v9 = vld [vmem:[#allocation6 + $0x13c8] sm:$0xff]  ;;  %v9125_v31 = vld [vmem:[#allocation6 + $0x11c0] sm:$0xff] }
 0xdbc   :  { %v15763_v26 = vadd.f32 %v8599_v25, %v15712_v28  ;;  %v8603_v14 = vpop.f32.mrb[143].mxu1  ;;  %9250 = vmatprep.subr.bf16.mxu1 %v9158_v7  ;;  %v9166_v28 = vld [vmem:[#allocation6 + $0x1308] sm:$0xff]  ;;  %v9045_v7 = vshll.u32 %v15768_v57, 16  ;;  %v9053_v25 = vshll.u32 %v15770_v47, 16  ;;  %v9189_v33 = vld [vmem:[#allocation6 + $0x13c0] sm:$0xff] }
 0xdbd   :  { %v15766_v4 = vadd.f32 %v8601_v54, %v15714_v17  ;;  %v9105_v17 = vld [vmem:[#allocation6 + $0x1120] sm:$0xff]  ;;  %v15776_v54 = vld [vmem:[#allocation5 + $0x10] sm:$0x4]  ;;  %v9130_v10 = vld [vmem:[#allocation6 + $0x11e8] sm:$0xff] }
 0xdbe   :  { %9210 = vmatpush1.bf16.msra.mxu0 %v9093_v43  ;;  %v15774_v32 = vld [vmem:[#allocation5] sm:$0x4]  ;;  %v9194_v21 = vld [vmem:[#allocation6 + $0x13e8] sm:$0xff]  ;;  %v9047_v14 = vrot.slane %v9045_v7, 2  ;;  %v9038_v43 = vrot.slane %v15776_v54, 2 }
 0xdbf   :  { %9251 = vmatpush1.bf16.msra.mxu1 %v9157_v60  ;;  %9211 = vmatprep.subr.bf16.mxu0 %v9098_v5  ;;  %v9036_v36 = vrot.slane %v15774_v32, 2  ;;  %v9055_v60 = vrot.slane %v9053_v25, 2  ;;  %v9129_v5 = vld [vmem:[#allocation6 + $0x11e0] sm:$0xff] }
 0xdc0   :  { %9252 = vmatprep.subr.bf16.mxu1 %v9162_v37  ;;  %v9193_v37 = vld [vmem:[#allocation6 + $0x13e0] sm:$0xff] }
 0xdc2   :  { %9212 = vmatpush1.bf16.msra.mxu0 %v9097_v40  ;;  %v9072_v40 = vld [vmem:[#allocation6 + $0x1018] sm:$0xff] }
 0xdc3   :  { %9253 = vmatpush1.bf16.msra.mxu1 %v9161_v35  ;;  %9213 = vmatprep.subr.bf16.mxu0 %v9102_v63  ;;  %v9136_v35 = vld [vmem:[#allocation6 + $0x1218] sm:$0xff]  ;;  %v15782_v63 = vsel %vm15576_vm1, %v9036_v36, %v9047_v14 }
 0xdc4   :  { %9254 = vmatprep.subr.bf16.mxu1 %v9166_v28  ;;  %v15786_v28 = vsel %vm15576_vm1, %v9038_v43, %v9055_v60  ;;  %v9095_v60 = vld [vmem:[#allocation6 + $0x10d0] sm:$0xff] }
 0xdc6   :  { %9214 = vmatpush1.bf16.msra.mxu0 %v9101_v56  ;;  %v9071_v56 = vld [vmem:[#allocation6 + $0x1010] sm:$0xff] }
 0xdc7   :  { %9255 = vmatpush1.bf16.msra.mxu1 %v9165_v49  ;;  %9215 = vmatprep.subr.bf16.mxu0 %v9106_v44  ;;  %v9135_v49 = vld [vmem:[#allocation6 + $0x1210] sm:$0xff]  ;;  %v9076_v44 = vld [vmem:[#allocation6 + $0x1038] sm:$0xff] }
 0xdc8   :  { %9256 = vmatprep.subr.bf16.mxu1 %v9170_v8  ;;  %v9140_v8 = vld [vmem:[#allocation6 + $0x1238] sm:$0xff] }
 0xdca   :  { %9216 = vmatpush1.bf16.msra.mxu0 %v9105_v17  ;;  %v9075_v17 = vld [vmem:[#allocation6 + $0x1030] sm:$0xff] }
 0xdcb   :  { %9257 = vmatpush1.bf16.msra.mxu1 %v9169_v41  ;;  %9217 = vmatprep.subr.bf16.mxu0 %v9110_v38  ;;  %v9139_v41 = vld [vmem:[#allocation6 + $0x1230] sm:$0xff]  ;;  %v9080_v38 = vld [vmem:[#allocation6 + $0x1058] sm:$0xff] }
 0xdcc   :  { %9258 = vmatprep.subr.bf16.mxu1 %v9174_v45  ;;  %v9144_v45 = vld [vmem:[#allocation6 + $0x1258] sm:$0xff] }
 0xdce   :  { %9218 = vmatpush1.bf16.msra.mxu0 %v9109_v29  ;;  %v9079_v29 = vld [vmem:[#allocation6 + $0x1050] sm:$0xff] }
 0xdcf   :  { %9259 = vmatpush1.bf16.msra.mxu1 %v9173_v51  ;;  %9219 = vmatprep.subr.bf16.mxu0 %v9114_v27  ;;  %v9143_v51 = vld [vmem:[#allocation6 + $0x1250] sm:$0xff]  ;;  %v9084_v27 = vld [vmem:[#allocation6 + $0x1078] sm:$0xff] }
 0xdd0   :  { %9260 = vmatprep.subr.bf16.mxu1 %v9178_v3  ;;  %v9148_v3 = vld [vmem:[#allocation6 + $0x1278] sm:$0xff] }
 0xdd2   :  { %9220 = vmatpush1.bf16.msra.mxu0 %v9113_v53  ;;  %v9083_v53 = vld [vmem:[#allocation6 + $0x1070] sm:$0xff] }
 0xdd3   :  { %9261 = vmatpush1.bf16.msra.mxu1 %v9177_v42  ;;  %9221 = vmatprep.subr.bf16.mxu0 %v9118_v48  ;;  %v9147_v42 = vld [vmem:[#allocation6 + $0x1270] sm:$0xff]  ;;  %v9088_v48 = vld [vmem:[#allocation6 + $0x1098] sm:$0xff] }
 0xdd4   :  { %9262 = vmatprep.subr.bf16.mxu1 %v9182_v50  ;;  %v9152_v50 = vld [vmem:[#allocation6 + $0x1298] sm:$0xff] }
 0xdd6   :  { %9222 = vmatpush1.bf16.msra.mxu0 %v9117_v23  ;;  %v9092_v23 = vld [vmem:[#allocation6 + $0x10b8] sm:$0xff] }
 0xdd7   :  { %9263 = vmatpush1.bf16.msra.mxu1 %v9181_v24  ;;  %9223 = vmatprep.subr.bf16.mxu0 %v9122_v13  ;;  %v9156_v24 = vld [vmem:[#allocation6 + $0x12b8] sm:$0xff]  ;;  %v9091_v13 = vld [vmem:[#allocation6 + $0x10b0] sm:$0xff] }
 0xdd8   :  { %9264 = vmatprep.subr.bf16.mxu1 %v9186_v18  ;;  %v9155_v18 = vld [vmem:[#allocation6 + $0x12b0] sm:$0xff] }
 0xdda   :  { %9224 = vmatpush1.bf16.msra.mxu0 %v9121_v20 }
 0xddb   :  { %9265 = vmatpush1.bf16.msra.mxu1 %v9185_v22  ;;  %9225 = vmatprep.subr.bf16.mxu0 %v9126_v15  ;;  %v9096_v15 = vld [vmem:[#allocation6 + $0x10d8] sm:$0xff] }
 0xddc   :  { %9266 = vmatprep.subr.bf16.mxu1 %v9190_v9  ;;  %v9160_v9 = vld [vmem:[#allocation6 + $0x12d8] sm:$0xff] }
 0xdde   :  { %9226 = vmatpush1.bf16.msra.mxu0 %v9125_v31 }
 0xddf   :  { %9267 = vmatpush1.bf16.msra.mxu1 %v9189_v33  ;;  %9227 = vmatprep.subr.bf16.mxu0 %v9130_v10 }
 0xde0   :  { %9268 = vmatprep.subr.bf16.mxu1 %v9194_v21 }
 0xde2   :  { %9228 = vmatpush1.bf16.msra.mxu0 %v9129_v5  ;;  %v9159_v5 = vld [vmem:[#allocation6 + $0x12d0] sm:$0xff] }
 0xde3   :  { %9269 = vmatpush1.bf16.msra.mxu1 %v9193_v37  ;;  %9279 = vmatprep.subr.bf16.mxu0 %v9072_v40  ;;  %v9100_v40 = vld [vmem:[#allocation6 + $0x10f8] sm:$0xff] }
 0xde4   :  { %9320 = vmatprep.subr.bf16.mxu1 %v9136_v35  ;;  %v9164_v35 = vld [vmem:[#allocation6 + $0x12f8] sm:$0xff] }
 0xde5   :  { %9230 = vmatmul.mubr.bf16.vlgmr.msra.gmra.mrb[132].mxu0 %v15782_v63 }
 0xde6   :  { %9271 = vmatmul.mubr.bf16.vlgmr.msra.gmra.mrb[156].mxu1 %v15786_v28  ;;  %9280 = vmatpush1.bf16.msra.mxu0 %v9071_v56  ;;  %v9099_v56 = vld [vmem:[#allocation6 + $0x10f0] sm:$0xff] }
 0xde7   :  { %9321 = vmatpush1.bf16.msra.mxu1 %v9135_v49  ;;  %9281 = vmatprep.subr.bf16.mxu0 %v9076_v44  ;;  %v9163_v49 = vld [vmem:[#allocation6 + $0x12f0] sm:$0xff]  ;;  %v9104_v44 = vld [vmem:[#allocation6 + $0x1118] sm:$0xff] }
 0xde8   :  { %9322 = vmatprep.subr.bf16.mxu1 %v9140_v8  ;;  %9311 = vmatprep.mubr.bf16.mxu0 %v15754_v11  ;;  %v9087_v11 = vld [vmem:[#allocation6 + $0x1090] sm:$0xff] }
 0xde9   :  { %9352 = vmatprep.mubr.bf16.mxu1 %v15758_v12  ;;  %v9151_v12 = vld [vmem:[#allocation6 + $0x1290] sm:$0xff] }
 0xdea   :  { %9282 = vmatpush1.bf16.msra.mxu0 %v9075_v17  ;;  %v9103_v8 = vld [vmem:[#allocation6 + $0x1110] sm:$0xff] }
 0xdeb   :  { %9323 = vmatpush1.bf16.msra.mxu1 %v9139_v41  ;;  %9283 = vmatprep.subr.bf16.mxu0 %v9080_v38  ;;  %v9167_v17 = vld [vmem:[#allocation6 + $0x1310] sm:$0xff]  ;;  %v9108_v41 = vld [vmem:[#allocation6 + $0x1138] sm:$0xff] }
 0xdec   :  { %9324 = vmatprep.subr.bf16.mxu1 %v9144_v45  ;;  %v9172_v38 = vld [vmem:[#allocation6 + $0x1338] sm:$0xff]  ;;  %v9171_v45 = vld [vmem:[#allocation6 + $0x1330] sm:$0xff] }
 0xdee   :  { %9284 = vmatpush1.bf16.msra.mxu0 %v9079_v29  ;;  %v9112_v29 = vld [vmem:[#allocation6 + $0x1158] sm:$0xff] }
 0xdef   :  { %9325 = vmatpush1.bf16.msra.mxu1 %v9143_v51  ;;  %9285 = vmatprep.subr.bf16.mxu0 %v9084_v27  ;;  %v9176_v51 = vld [vmem:[#allocation6 + $0x1358] sm:$0xff]  ;;  %v9111_v27 = vld [vmem:[#allocation6 + $0x1150] sm:$0xff] }
 0xdf0   :  { %9326 = vmatprep.subr.bf16.mxu1 %v9148_v3  ;;  %v9175_v3 = vld [vmem:[#allocation6 + $0x1350] sm:$0xff] }
 0xdf2   :  { %9286 = vmatpush1.bf16.msra.mxu0 %v9083_v53  ;;  %v9116_v53 = vld [vmem:[#allocation6 + $0x1178] sm:$0xff] }
 0xdf3   :  { %9327 = vmatpush1.bf16.msra.mxu1 %v9147_v42  ;;  %9287 = vmatprep.subr.bf16.mxu0 %v9088_v48  ;;  %v9180_v42 = vld [vmem:[#allocation6 + $0x1378] sm:$0xff]  ;;  %v9115_v48 = vld [vmem:[#allocation6 + $0x1170] sm:$0xff] }
 0xdf4   :  { %9328 = vmatprep.subr.bf16.mxu1 %v9152_v50  ;;  %v9179_v50 = vld [vmem:[#allocation6 + $0x1370] sm:$0xff] }
 0xdf6   :  { %9288 = vmatpush1.bf16.msra.mxu0 %v9087_v11  ;;  %v9120_v11 = vld [vmem:[#allocation6 + $0x1198] sm:$0xff] }
 0xdf7   :  { %9329 = vmatpush1.bf16.msra.mxu1 %v9151_v12  ;;  %9289 = vmatprep.subr.bf16.mxu0 %v9092_v23  ;;  %v9184_v12 = vld [vmem:[#allocation6 + $0x1398] sm:$0xff]  ;;  %v9119_v23 = vld [vmem:[#allocation6 + $0x1190] sm:$0xff] }
 0xdf8   :  { %9330 = vmatprep.subr.bf16.mxu1 %v9156_v24  ;;  %v8639_v20 = vpop.f32.mrb[120].mxu0  ;;  %v9183_v24 = vld [vmem:[#allocation6 + $0x1390] sm:$0xff] }
 0xdf9   :  { %v8680_v22 = vpop.f32.mrb[144].mxu1  ;;  %v8641_v7 = vpop.f32.mrb[121].mxu0 }
 0xdfa   :  { %v8681_v31 = vadd.f32 %v8680_v22, %v8639_v20  ;;  %v8682_v25 = vpop.f32.mrb[145].mxu1  ;;  %v8643_v10 = vpop.f32.mrb[122].mxu0  ;;  %9290 = vmatpush1.bf16.msra.mxu0 %v9091_v13  ;;  %v9124_v13 = vld [vmem:[#allocation6 + $0x11b8] sm:$0xff]  ;;  %v9123_v20 = vld [vmem:[#allocation6 + $0x11b0] sm:$0xff] }
 0xdfb   :  { %v8683_v33 = vadd.f32 %v8682_v25, %v8641_v7  ;;  %v8684_v21 = vpop.f32.mrb[146].mxu1  ;;  %9331 = vmatpush1.bf16.msra.mxu1 %v9155_v18  ;;  %v8644_v14 = vpop.f32.mrb[123].mxu0  ;;  %9291 = vmatprep.subr.bf16.mxu0 %v9096_v15  ;;  %v9188_v18 = vld [vmem:[#allocation6 + $0x13b8] sm:$0xff]  ;;  %v9187_v22 = vld [vmem:[#allocation6 + $0x13b0] sm:$0xff]  ;;  %v9370_v10 = vshrl.u32 %v15744_v55, 16  ;;  %v9402_v55 = vld [vmem:[#allocation6 + $0x1400] sm:$0xff] }
 0xdfc   :  { %v15793_v36 = vadd.f32 %v8681_v31, %v15734_v34  ;;  %v8685_v43 = vpop.f32.mrb[147].mxu1  ;;  %9332 = vmatprep.subr.bf16.mxu1 %v9160_v9  ;;  %v9168_v34 = vld [vmem:[#allocation6 + $0x1318] sm:$0xff]  ;;  %v9127_v31 = vld [vmem:[#allocation6 + $0x11d0] sm:$0xff]  ;;  %v9378_v21 = vshrl.u32 %v15746_v52, 16  ;;  %v9466_v52 = vld [vmem:[#allocation6 + $0x1600] sm:$0xff] }
 0xdfd   :  { %v15796_v37 = vadd.f32 %v8683_v33, %v15736_v6  ;;  %v9107_v6 = vld [vmem:[#allocation6 + $0x1130] sm:$0xff]  ;;  %v9128_v15 = vld [vmem:[#allocation6 + $0x11d8] sm:$0xff] }
 0xdfe   :  { %9292 = vmatpush1.bf16.msra.mxu0 %v9095_v60  ;;  %v9192_v9 = vld [vmem:[#allocation6 + $0x13d8] sm:$0xff]  ;;  %v9191_v7 = vld [vmem:[#allocation6 + $0x13d0] sm:$0xff]  ;;  %v9403_v60 = vld [vmem:[#allocation6 + $0x1408] sm:$0xff] }
 0xdff   :  { %9333 = vmatpush1.bf16.msra.mxu1 %v9159_v5  ;;  %9293 = vmatprep.subr.bf16.mxu0 %v9100_v40  ;;  %v9132_v25 = vld [vmem:[#allocation6 + $0x11f8] sm:$0xff]  ;;  %v9131_v14 = vld [vmem:[#allocation6 + $0x11f0] sm:$0xff]  ;;  %v9467_v5 = vld [vmem:[#allocation6 + $0x1608] sm:$0xff]  ;;  %v9372_v40 = vrot.slane %v9370_v10, 2 }
 0xe00   :  { %9334 = vmatprep.subr.bf16.mxu1 %v9164_v35  ;;  %v9196_v33 = vld [vmem:[#allocation6 + $0x13f8] sm:$0xff]  ;;  %v9195_v43 = vld [vmem:[#allocation6 + $0x13f0] sm:$0xff]  ;;  %v9390_v35 = vrot.slane %v15738_v30, 2 }
 0xe02   :  { %9294 = vmatpush1.bf16.msra.mxu0 %v9099_v56  ;;  %v9380_v56 = vrot.slane %v9378_v21, 2  ;;  %v9426_v21 = vld [vmem:[#allocation6 + $0x14c0] sm:$0xff] }
 0xe03   :  { %9335 = vmatpush1.bf16.msra.mxu1 %v9163_v49  ;;  %9295 = vmatprep.subr.bf16.mxu0 %v9104_v44  ;;  %v9392_v49 = vrot.slane %v15740_v39, 2  ;;  %v9407_v44 = vld [vmem:[#allocation6 + $0x1428] sm:$0xff]  ;;  %v9406_v39 = vld [vmem:[#allocation6 + $0x1420] sm:$0xff] }
 0xe04   :  { %9336 = vmatprep.subr.bf16.mxu1 %v9168_v34  ;;  %v9471_v34 = vld [vmem:[#allocation6 + $0x1628] sm:$0xff] }
 0xe05   :  { %v15810_v30 = vsel %vm15576_vm1, %v9380_v56, %v9392_v49  ;;  %v9435_v56 = vld [vmem:[#allocation6 + $0x1508] sm:$0xff]  ;;  %v9434_v49 = vld [vmem:[#allocation6 + $0x1500] sm:$0xff] }
 0xe06   :  { %9296 = vmatpush1.bf16.msra.mxu0 %v9103_v8  ;;  %v15806_v8 = vsel %vm15576_vm1, %v9372_v40, %v9390_v35  ;;  %v9430_v40 = vld [vmem:[#allocation6 + $0x14e0] sm:$0xff] }
 0xe07   :  { %9337 = vmatpush1.bf16.msra.mxu1 %v9167_v17  ;;  %9297 = vmatprep.subr.bf16.mxu0 %v9108_v41  ;;  %v9470_v17 = vld [vmem:[#allocation6 + $0x1620] sm:$0xff]  ;;  %v9411_v41 = vld [vmem:[#allocation6 + $0x1448] sm:$0xff] }
 0xe08   :  { %9338 = vmatprep.subr.bf16.mxu1 %v9172_v38  ;;  %v9475_v38 = vld [vmem:[#allocation6 + $0x1648] sm:$0xff]  ;;  %v9494_v35 = vld [vmem:[#allocation6 + $0x16e0] sm:$0xff] }
 0xe0a   :  { %9298 = vmatpush1.bf16.msra.mxu0 %v9107_v6  ;;  %v9415_v6 = vld [vmem:[#allocation6 + $0x1468] sm:$0xff] }
 0xe0b   :  { %9339 = vmatpush1.bf16.msra.mxu1 %v9171_v45  ;;  %9299 = vmatprep.subr.bf16.mxu0 %v9112_v29  ;;  %v9479_v45 = vld [vmem:[#allocation6 + $0x1668] sm:$0xff]  ;;  %v9414_v29 = vld [vmem:[#allocation6 + $0x1460] sm:$0xff] }
 0xe0c   :  { %9340 = vmatprep.subr.bf16.mxu1 %v9176_v51  ;;  %v9478_v51 = vld [vmem:[#allocation6 + $0x1660] sm:$0xff] }
 0xe0e   :  { %9300 = vmatpush1.bf16.msra.mxu0 %v9111_v27  ;;  %v9419_v27 = vld [vmem:[#allocation6 + $0x1488] sm:$0xff] }
 0xe0f   :  { %9341 = vmatpush1.bf16.msra.mxu1 %v9175_v3  ;;  %9301 = vmatprep.subr.bf16.mxu0 %v9116_v53  ;;  %v9483_v3 = vld [vmem:[#allocation6 + $0x1688] sm:$0xff]  ;;  %v9418_v53 = vld [vmem:[#allocation6 + $0x1480] sm:$0xff] }
 0xe10   :  { %9342 = vmatprep.subr.bf16.mxu1 %v9180_v42  ;;  %v9482_v42 = vld [vmem:[#allocation6 + $0x1680] sm:$0xff] }
 0xe12   :  { %9302 = vmatpush1.bf16.msra.mxu0 %v9115_v48  ;;  %v9423_v48 = vld [vmem:[#allocation6 + $0x14a8] sm:$0xff] }
 0xe13   :  { %9343 = vmatpush1.bf16.msra.mxu1 %v9179_v50  ;;  %9303 = vmatprep.subr.bf16.mxu0 %v9120_v11  ;;  %v9487_v50 = vld [vmem:[#allocation6 + $0x16a8] sm:$0xff]  ;;  %v9422_v11 = vld [vmem:[#allocation6 + $0x14a0] sm:$0xff] }
 0xe14   :  { %9344 = vmatprep.subr.bf16.mxu1 %v9184_v12  ;;  %v9486_v12 = vld [vmem:[#allocation6 + $0x16a0] sm:$0xff] }
 0xe16   :  { %9304 = vmatpush1.bf16.msra.mxu0 %v9119_v23 }
 0xe17   :  { %9345 = vmatpush1.bf16.msra.mxu1 %v9183_v24  ;;  %9305 = vmatprep.subr.bf16.mxu0 %v9124_v13  ;;  %v9427_v13 = vld [vmem:[#allocation6 + $0x14c8] sm:$0xff] }
 0xe18   :  { %9346 = vmatprep.subr.bf16.mxu1 %v9188_v18  ;;  %v9491_v18 = vld [vmem:[#allocation6 + $0x16c8] sm:$0xff] }
 0xe1a   :  { %9306 = vmatpush1.bf16.msra.mxu0 %v9123_v20 }
 0xe1b   :  { %9347 = vmatpush1.bf16.msra.mxu1 %v9187_v22  ;;  %9307 = vmatprep.subr.bf16.mxu0 %v9128_v15 }
 0xe1c   :  { %9348 = vmatprep.subr.bf16.mxu1 %v9192_v9 }
 0xe1e   :  { %9308 = vmatpush1.bf16.msra.mxu0 %v9127_v31 }
 0xe1f   :  { %9349 = vmatpush1.bf16.msra.mxu1 %v9191_v7  ;;  %9309 = vmatprep.subr.bf16.mxu0 %v9132_v25 }
 0xe20   :  { %9350 = vmatprep.subr.bf16.mxu1 %v9196_v33 }
 0xe22   :  { %9310 = vmatpush1.bf16.msra.mxu0 %v9131_v14  ;;  %v9490_v14 = vld [vmem:[#allocation6 + $0x16c0] sm:$0xff] }
 0xe23   :  { %9351 = vmatpush1.bf16.msra.mxu1 %v9195_v43  ;;  %9530 = vmatprep.subr.bf16.mxu0 %v9403_v60  ;;  %v9431_v60 = vld [vmem:[#allocation6 + $0x14e8] sm:$0xff] }
 0xe24   :  { %9571 = vmatprep.subr.bf16.mxu1 %v9467_v5  ;;  %v9495_v5 = vld [vmem:[#allocation6 + $0x16e8] sm:$0xff] }
 0xe25   :  { %9312 = vmatmul.mubr.bf16.vlgmr.msra.gmra.mrb[136].mxu0 %v15782_v63  ;;  %v9410_v63 = vld [vmem:[#allocation6 + $0x1440] sm:$0xff] }
 0xe26   :  { %9353 = vmatmul.mubr.bf16.vlgmr.msra.gmra.mrb[160].mxu1 %v15786_v28  ;;  %9531 = vmatpush1.bf16.msra.mxu0 %v9402_v55  ;;  %v9474_v28 = vld [vmem:[#allocation6 + $0x1640] sm:$0xff] }
 0xe27   :  { %9572 = vmatpush1.bf16.msra.mxu1 %v9466_v52  ;;  %9532 = vmatprep.subr.bf16.mxu0 %v9407_v44  ;;  %v9498_v55 = vld [vmem:[#allocation6 + $0x1700] sm:$0xff]  ;;  %v9439_v52 = vld [vmem:[#allocation6 + $0x1528] sm:$0xff] }
 0xe28   :  { %9573 = vmatprep.subr.bf16.mxu1 %v9471_v34  ;;  %9562 = vmatprep.mubr.bf16.mxu0 %v15806_v8  ;;  %v9503_v44 = vld [vmem:[#allocation6 + $0x1728] sm:$0xff]  ;;  %v9502_v34 = vld [vmem:[#allocation6 + $0x1720] sm:$0xff] }
 0xe29   :  { %9603 = vmatprep.mubr.bf16.mxu1 %v15810_v30 }
 0xe2a   :  { %9533 = vmatpush1.bf16.msra.mxu0 %v9406_v39  ;;  %v9443_v39 = vld [vmem:[#allocation6 + $0x1548] sm:$0xff] }
 0xe2b   :  { %9574 = vmatpush1.bf16.msra.mxu1 %v9470_v17  ;;  %9534 = vmatprep.subr.bf16.mxu0 %v9411_v41  ;;  %v9507_v17 = vld [vmem:[#allocation6 + $0x1748] sm:$0xff]  ;;  %v9442_v41 = vld [vmem:[#allocation6 + $0x1540] sm:$0xff] }
 0xe2c   :  { %9575 = vmatprep.subr.bf16.mxu1 %v9475_v38  ;;  %v9506_v38 = vld [vmem:[#allocation6 + $0x1740] sm:$0xff] }
 0xe2e   :  { %9535 = vmatpush1.bf16.msra.mxu0 %v9410_v63  ;;  %v9447_v63 = vld [vmem:[#allocation6 + $0x1568] sm:$0xff] }
 0xe2f   :  { %9576 = vmatpush1.bf16.msra.mxu1 %v9474_v28  ;;  %9536 = vmatprep.subr.bf16.mxu0 %v9415_v6  ;;  %v9511_v28 = vld [vmem:[#allocation6 + $0x1768] sm:$0xff]  ;;  %v9446_v6 = vld [vmem:[#allocation6 + $0x1560] sm:$0xff] }
 0xe30   :  { %9577 = vmatprep.subr.bf16.mxu1 %v9479_v45  ;;  %v9510_v45 = vld [vmem:[#allocation6 + $0x1760] sm:$0xff] }
 0xe32   :  { %9537 = vmatpush1.bf16.msra.mxu0 %v9414_v29  ;;  %v9451_v29 = vld [vmem:[#allocation6 + $0x1588] sm:$0xff] }
 0xe33   :  { %9578 = vmatpush1.bf16.msra.mxu1 %v9478_v51  ;;  %9538 = vmatprep.subr.bf16.mxu0 %v9419_v27  ;;  %v9515_v51 = vld [vmem:[#allocation6 + $0x1788] sm:$0xff]  ;;  %v9450_v27 = vld [vmem:[#allocation6 + $0x1580] sm:$0xff] }
 0xe34   :  { %9579 = vmatprep.subr.bf16.mxu1 %v9483_v3  ;;  %v9514_v3 = vld [vmem:[#allocation6 + $0x1780] sm:$0xff] }
 0xe36   :  { %9539 = vmatpush1.bf16.msra.mxu0 %v9418_v53  ;;  %v9455_v53 = vld [vmem:[#allocation6 + $0x15a8] sm:$0xff] }
 0xe37   :  { %9580 = vmatpush1.bf16.msra.mxu1 %v9482_v42  ;;  %9540 = vmatprep.subr.bf16.mxu0 %v9423_v48  ;;  %v9519_v42 = vld [vmem:[#allocation6 + $0x17a8] sm:$0xff]  ;;  %v9454_v48 = vld [vmem:[#allocation6 + $0x15a0] sm:$0xff] }
 0xe38   :  { %9581 = vmatprep.subr.bf16.mxu1 %v9487_v50  ;;  %v8890_v23 = vpop.f32.mrb[124].mxu0  ;;  %v9518_v50 = vld [vmem:[#allocation6 + $0x17a0] sm:$0xff] }
 0xe39   :  { %v8931_v24 = vpop.f32.mrb[148].mxu1  ;;  %v8892_v22 = vpop.f32.mrb[125].mxu0 }
 0xe3a   :  { %v8932_v20 = vadd.f32 %v8931_v24, %v8890_v23  ;;  %v8933_v15 = vpop.f32.mrb[149].mxu1  ;;  %v8894_v31 = vpop.f32.mrb[126].mxu0  ;;  %9541 = vmatpush1.bf16.msra.mxu0 %v9422_v11  ;;  %v9459_v11 = vld [vmem:[#allocation6 + $0x15c8] sm:$0xff]  ;;  %v9366_v23 = vshrl.u32 %v15774_v32, 16  ;;  %v9374_v24 = vshrl.u32 %v15776_v54, 16  ;;  %v9526_v32 = vld [vmem:[#allocation6 + $0x17e0] sm:$0xff] }
 0xe3b   :  { %v8934_v9 = vadd.f32 %v8933_v15, %v8892_v22  ;;  %v8935_v7 = vpop.f32.mrb[150].mxu1  ;;  %9582 = vmatpush1.bf16.msra.mxu1 %v9486_v12  ;;  %v8895_v33 = vpop.f32.mrb[127].mxu0  ;;  %9542 = vmatprep.subr.bf16.mxu0 %v9427_v13  ;;  %v9523_v12 = vld [vmem:[#allocation6 + $0x17c8] sm:$0xff]  ;;  %v9458_v13 = vld [vmem:[#allocation6 + $0x15c0] sm:$0xff]  ;;  %v9469_v54 = vld [vmem:[#allocation6 + $0x1618] sm:$0xff] }
 0xe3c   :  { %v15815_v25 = vadd.f32 %v8932_v20, %v15763_v26  ;;  %v8936_v10 = vpop.f32.mrb[151].mxu1  ;;  %9583 = vmatprep.subr.bf16.mxu1 %v9491_v18  ;;  %v9499_v26 = vld [vmem:[#allocation6 + $0x1708] sm:$0xff]  ;;  %v9522_v18 = vld [vmem:[#allocation6 + $0x17c0] sm:$0xff]  ;;  %v9368_v15 = vrot.slane %v9366_v23, 2  ;;  %v9376_v31 = vrot.slane %v9374_v24, 2  ;;  %v9391_v7 = vrot.slane %v15770_v47, 2 }
 0xe3d   :  { %v15818_v43 = vadd.f32 %v8934_v9, %v15766_v4  ;;  %v9438_v4 = vld [vmem:[#allocation6 + $0x1520] sm:$0xff]  ;;  %v9463_v20 = vld [vmem:[#allocation6 + $0x15e8] sm:$0xff]  ;;  %v9389_v9 = vrot.slane %v15768_v57, 2  ;;  %v9405_v10 = vld [vmem:[#allocation6 + $0x1418] sm:$0xff] }
 0xe3e   :  { %9543 = vmatpush1.bf16.msra.mxu0 %v9426_v21  ;;  %v9527_v22 = vld [vmem:[#allocation6 + $0x17e8] sm:$0xff]  ;;  %v9462_v33 = vld [vmem:[#allocation6 + $0x15e0] sm:$0xff]  ;;  %v9404_v57 = vld [vmem:[#allocation6 + $0x1410] sm:$0xff] }
 0xe3f   :  { %9584 = vmatpush1.bf16.msra.mxu1 %v9490_v14  ;;  %9544 = vmatprep.subr.bf16.mxu0 %v9431_v60  ;;  %v15826_v21 = vsel %vm15576_vm1, %v9368_v15, %v9389_v9  ;;  %v15830_v14 = vsel %vm15576_vm1, %v9376_v31, %v9391_v7  ;;  %v9468_v47 = vld [vmem:[#allocation6 + $0x1610] sm:$0xff]  ;;  %v9409_v60 = vld [vmem:[#allocation6 + $0x1438] sm:$0xff] }
 0xe40   :  { %9585 = vmatprep.subr.bf16.mxu1 %v9495_v5  ;;  %v9473_v5 = vld [vmem:[#allocation6 + $0x1638] sm:$0xff]  ;;  %v9428_v24 = vld [vmem:[#allocation6 + $0x14d0] sm:$0xff] }
 0xe41   :  { %v9432_v15 = vld [vmem:[#allocation6 + $0x14f0] sm:$0xff]  ;;  %v9437_v31 = vld [vmem:[#allocation6 + $0x1518] sm:$0xff] }
 0xe42   :  { %9545 = vmatpush1.bf16.msra.mxu0 %v9430_v40  ;;  %v9408_v40 = vld [vmem:[#allocation6 + $0x1430] sm:$0xff] }
 0xe43   :  { %9586 = vmatpush1.bf16.msra.mxu1 %v9494_v35  ;;  %9546 = vmatprep.subr.bf16.mxu0 %v9435_v56  ;;  %v9472_v35 = vld [vmem:[#allocation6 + $0x1630] sm:$0xff]  ;;  %v9413_v56 = vld [vmem:[#allocation6 + $0x1458] sm:$0xff] }
 0xe44   :  { %9587 = vmatprep.subr.bf16.mxu1 %v9499_v26  ;;  %v9477_v26 = vld [vmem:[#allocation6 + $0x1658] sm:$0xff]  ;;  %v9496_v9 = vld [vmem:[#allocation6 + $0x16f0] sm:$0xff] }
 0xe45   :  { %v9436_v7 = vld [vmem:[#allocation6 + $0x1510] sm:$0xff] }
 0xe46   :  { %9547 = vmatpush1.bf16.msra.mxu0 %v9434_v49  ;;  %v9412_v49 = vld [vmem:[#allocation6 + $0x1450] sm:$0xff] }
 0xe47   :  { %9588 = vmatpush1.bf16.msra.mxu1 %v9498_v55  ;;  %9548 = vmatprep.subr.bf16.mxu0 %v9439_v52  ;;  %v9476_v55 = vld [vmem:[#allocation6 + $0x1650] sm:$0xff]  ;;  %v9417_v52 = vld [vmem:[#allocation6 + $0x1478] sm:$0xff] }
 0xe48   :  { %9589 = vmatprep.subr.bf16.mxu1 %v9503_v44  ;;  %v9481_v44 = vld [vmem:[#allocation6 + $0x1678] sm:$0xff] }
 0xe4a   :  { %9549 = vmatpush1.bf16.msra.mxu0 %v9438_v4  ;;  %v9416_v4 = vld [vmem:[#allocation6 + $0x1470] sm:$0xff] }
 0xe4b   :  { %9590 = vmatpush1.bf16.msra.mxu1 %v9502_v34  ;;  %9550 = vmatprep.subr.bf16.mxu0 %v9443_v39  ;;  %v9480_v34 = vld [vmem:[#allocation6 + $0x1670] sm:$0xff]  ;;  %v9421_v39 = vld [vmem:[#allocation6 + $0x1498] sm:$0xff] }
 0xe4c   :  { %9591 = vmatprep.subr.bf16.mxu1 %v9507_v17  ;;  %v9485_v17 = vld [vmem:[#allocation6 + $0x1698] sm:$0xff] }
 0xe4e   :  { %9551 = vmatpush1.bf16.msra.mxu0 %v9442_v41  ;;  %v9425_v41 = vld [vmem:[#allocation6 + $0x14b8] sm:$0xff] }
 0xe4f   :  { %9592 = vmatpush1.bf16.msra.mxu1 %v9506_v38  ;;  %9552 = vmatprep.subr.bf16.mxu0 %v9447_v63  ;;  %v9489_v38 = vld [vmem:[#allocation6 + $0x16b8] sm:$0xff]  ;;  %v9424_v63 = vld [vmem:[#allocation6 + $0x14b0] sm:$0xff] }
 0xe50   :  { %9593 = vmatprep.subr.bf16.mxu1 %v9511_v28  ;;  %v9488_v28 = vld [vmem:[#allocation6 + $0x16b0] sm:$0xff] }
 0xe52   :  { %9553 = vmatpush1.bf16.msra.mxu0 %v9446_v6 }
 0xe53   :  { %9594 = vmatpush1.bf16.msra.mxu1 %v9510_v45  ;;  %9554 = vmatprep.subr.bf16.mxu0 %v9451_v29  ;;  %v9429_v29 = vld [vmem:[#allocation6 + $0x14d8] sm:$0xff] }
 0xe54   :  { %9595 = vmatprep.subr.bf16.mxu1 %v9515_v51  ;;  %v9493_v51 = vld [vmem:[#allocation6 + $0x16d8] sm:$0xff] }
 0xe56   :  { %9555 = vmatpush1.bf16.msra.mxu0 %v9450_v27 }
 0xe57   :  { %9596 = vmatpush1.bf16.msra.mxu1 %v9514_v3  ;;  %9556 = vmatprep.subr.bf16.mxu0 %v9455_v53 }
 0xe58   :  { %9597 = vmatprep.subr.bf16.mxu1 %v9519_v42 }
 0xe5a   :  { %9557 = vmatpush1.bf16.msra.mxu0 %v9454_v48 }
 0xe5b   :  { %9598 = vmatpush1.bf16.msra.mxu1 %v9518_v50  ;;  %9558 = vmatprep.subr.bf16.mxu0 %v9459_v11 }
 0xe5c   :  { %9599 = vmatprep.subr.bf16.mxu1 %v9523_v12 }
 0xe5e   :  { %9559 = vmatpush1.bf16.msra.mxu0 %v9458_v13  ;;  %v9492_v13 = vld [vmem:[#allocation6 + $0x16d0] sm:$0xff] }
 0xe5f   :  { %9600 = vmatpush1.bf16.msra.mxu1 %v9522_v18  ;;  %9560 = vmatprep.subr.bf16.mxu0 %v9463_v20  ;;  %v9433_v20 = vld [vmem:[#allocation6 + $0x14f8] sm:$0xff] }
 0xe60   :  { %9601 = vmatprep.subr.bf16.mxu1 %v9527_v22  ;;  %v9497_v22 = vld [vmem:[#allocation6 + $0x16f8] sm:$0xff] }
 0xe62   :  { %9561 = vmatpush1.bf16.msra.mxu0 %v9462_v33  ;;  %v9500_v33 = vld [vmem:[#allocation6 + $0x1710] sm:$0xff] }
 0xe63   :  { %9602 = vmatpush1.bf16.msra.mxu1 %v9526_v32  ;;  %9612 = vmatprep.subr.bf16.mxu0 %v9405_v10  ;;  %v9441_v32 = vld [vmem:[#allocation6 + $0x1538] sm:$0xff] }
 0xe64   :  { %9653 = vmatprep.subr.bf16.mxu1 %v9469_v54  ;;  %v9505_v10 = vld [vmem:[#allocation6 + $0x1738] sm:$0xff]  ;;  %v9504_v54 = vld [vmem:[#allocation6 + $0x1730] sm:$0xff] }
 0xe65   :  { %9563 = vmatmul.mubr.bf16.vlgmr.msra.gmra.mrb[140].mxu0 %v15826_v21 }
 0xe66   :  { %9604 = vmatmul.mubr.bf16.vlgmr.msra.gmra.mrb[164].mxu1 %v15830_v14  ;;  %9613 = vmatpush1.bf16.msra.mxu0 %v9404_v57  ;;  %v9445_v57 = vld [vmem:[#allocation6 + $0x1558] sm:$0xff] }
 0xe67   :  { %9654 = vmatpush1.bf16.msra.mxu1 %v9468_v47  ;;  %9614 = vmatprep.subr.bf16.mxu0 %v9409_v60  ;;  %v9509_v47 = vld [vmem:[#allocation6 + $0x1758] sm:$0xff]  ;;  %v9444_v60 = vld [vmem:[#allocation6 + $0x1550] sm:$0xff] }
 0xe68   :  { %9655 = vmatprep.subr.bf16.mxu1 %v9473_v5  ;;  %9644 = vmatprep.mubr.bf16.mxu0 %v15806_v8  ;;  %v9420_v8 = vld [vmem:[#allocation6 + $0x1490] sm:$0xff] }
 0xe69   :  { %9685 = vmatprep.mubr.bf16.mxu1 %v15810_v30  ;;  %v9484_v30 = vld [vmem:[#allocation6 + $0x1690] sm:$0xff] }
 0xe6a   :  { %9615 = vmatpush1.bf16.msra.mxu0 %v9408_v40  ;;  %v9508_v5 = vld [vmem:[#allocation6 + $0x1750] sm:$0xff]  ;;  %v9449_v40 = vld [vmem:[#allocation6 + $0x1578] sm:$0xff] }
 0xe6b   :  { %9656 = vmatpush1.bf16.msra.mxu1 %v9472_v35  ;;  %9616 = vmatprep.subr.bf16.mxu0 %v9413_v56  ;;  %v9513_v35 = vld [vmem:[#allocation6 + $0x1778] sm:$0xff]  ;;  %v9448_v56 = vld [vmem:[#allocation6 + $0x1570] sm:$0xff] }
 0xe6c   :  { %9657 = vmatprep.subr.bf16.mxu1 %v9477_v26  ;;  %v9512_v26 = vld [vmem:[#allocation6 + $0x1770] sm:$0xff] }
 0xe6e   :  { %9617 = vmatpush1.bf16.msra.mxu0 %v9412_v49  ;;  %v9453_v49 = vld [vmem:[#allocation6 + $0x1598] sm:$0xff] }
 0xe6f   :  { %9658 = vmatpush1.bf16.msra.mxu1 %v9476_v55  ;;  %9618 = vmatprep.subr.bf16.mxu0 %v9417_v52  ;;  %v9517_v55 = vld [vmem:[#allocation6 + $0x1798] sm:$0xff]  ;;  %v9452_v52 = vld [vmem:[#allocation6 + $0x1590] sm:$0xff] }
 0xe70   :  { %9659 = vmatprep.subr.bf16.mxu1 %v9481_v44  ;;  %v9516_v44 = vld [vmem:[#allocation6 + $0x1790] sm:$0xff] }
 0xe72   :  { %9619 = vmatpush1.bf16.msra.mxu0 %v9416_v4  ;;  %v9457_v4 = vld [vmem:[#allocation6 + $0x15b8] sm:$0xff] }
 0xe73   :  { %9660 = vmatpush1.bf16.msra.mxu1 %v9480_v34  ;;  %9620 = vmatprep.subr.bf16.mxu0 %v9421_v39  ;;  %v9521_v34 = vld [vmem:[#allocation6 + $0x17b8] sm:$0xff]  ;;  %v9456_v39 = vld [vmem:[#allocation6 + $0x15b0] sm:$0xff] }
 0xe74   :  { %9661 = vmatprep.subr.bf16.mxu1 %v9485_v17  ;;  %v9520_v17 = vld [vmem:[#allocation6 + $0x17b0] sm:$0xff] }
 0xe76   :  { %9621 = vmatpush1.bf16.msra.mxu0 %v9420_v8  ;;  %v9461_v8 = vld [vmem:[#allocation6 + $0x15d8] sm:$0xff] }
 0xe77   :  { %9662 = vmatpush1.bf16.msra.mxu1 %v9484_v30  ;;  %9622 = vmatprep.subr.bf16.mxu0 %v9425_v41  ;;  %v9525_v30 = vld [vmem:[#allocation6 + $0x17d8] sm:$0xff]  ;;  %v15842_v41 = vld [vmem:[#allocation5 + $0x28] sm:$0x8] }
 0xe78   :  { %9663 = vmatprep.subr.bf16.mxu1 %v9489_v38  ;;  %v8972_v6 = vpop.f32.mrb[128].mxu0  ;;  %v15844_v38 = vld [vmem:[#allocation5 + $0x38] sm:$0x8] }
 0xe79   :  { %v9013_v45 = vpop.f32.mrb[152].mxu1  ;;  %v8974_v3 = vpop.f32.mrb[129].mxu0 }
 0xe7a   :  { %v9014_v27 = vadd.f32 %v9013_v45, %v8972_v6  ;;  %v9015_v53 = vpop.f32.mrb[153].mxu1  ;;  %v8976_v48 = vpop.f32.mrb[130].mxu0  ;;  %9623 = vmatpush1.bf16.msra.mxu0 %v9424_v63  ;;  %v9460_v63 = vld [vmem:[#allocation6 + $0x15d0] sm:$0xff]  ;;  %v9465_v6 = vld [vmem:[#allocation6 + $0x15f8] sm:$0xff] }
 0xe7b   :  { %v9016_v42 = vadd.f32 %v9015_v53, %v8974_v3  ;;  %v9017_v50 = vpop.f32.mrb[154].mxu1  ;;  %9664 = vmatpush1.bf16.msra.mxu1 %v9488_v28  ;;  %v8977_v12 = vpop.f32.mrb[131].mxu0  ;;  %9624 = vmatprep.subr.bf16.mxu0 %v9429_v29  ;;  %v9524_v28 = vld [vmem:[#allocation6 + $0x17d0] sm:$0xff]  ;;  %v9529_v45 = vld [vmem:[#allocation6 + $0x17f8] sm:$0xff]  ;;  %v9723_v29 = vshll.u32 %v15842_v41, 16  ;;  %v9744_v48 = vld [vmem:[#allocation6 + $0x1808] sm:$0xff] }
 0xe7c   :  { %v15837_v11 = vadd.f32 %v9014_v27, %v15793_v36  ;;  %v9018_v23 = vpop.f32.mrb[155].mxu1  ;;  %9665 = vmatprep.subr.bf16.mxu1 %v9493_v51  ;;  %v9501_v36 = vld [vmem:[#allocation6 + $0x1718] sm:$0xff]  ;;  %v9731_v51 = vshll.u32 %v15844_v38, 16  ;;  %v15848_v27 = vld [vmem:[#allocation5 + $0x8] sm:$0x8]  ;;  %v9464_v53 = vld [vmem:[#allocation6 + $0x15f0] sm:$0xff] }
 0xe7d   :  { %v15840_v18 = vadd.f32 %v9016_v42, %v15796_v37  ;;  %v9440_v37 = vld [vmem:[#allocation6 + $0x1530] sm:$0xff]  ;;  %v15850_v3 = vld [vmem:[#allocation5 + $0x18] sm:$0x8]  ;;  %v9808_v50 = vld [vmem:[#allocation6 + $0x1a08] sm:$0xff]  ;;  %v9711_v12 = vrot.slane %v15848_v27, 3  ;;  %v9725_v23 = vrot.slane %v9723_v29, 3 }
 0xe7e   :  { %9625 = vmatpush1.bf16.msra.mxu0 %v9428_v24  ;;  %v9528_v42 = vld [vmem:[#allocation6 + $0x17f0] sm:$0xff]  ;;  %v9713_v24 = vrot.slane %v15850_v3, 3 }
 0xe7f   :  { %9666 = vmatpush1.bf16.msra.mxu1 %v9492_v13  ;;  %9626 = vmatprep.subr.bf16.mxu0 %v9433_v20  ;;  %v9733_v13 = vrot.slane %v9731_v51, 3  ;;  %v9743_v20 = vld [vmem:[#allocation6 + $0x1800] sm:$0xff] }
 0xe80   :  { %9667 = vmatprep.subr.bf16.mxu1 %v9497_v22  ;;  %v9807_v22 = vld [vmem:[#allocation6 + $0x1a00] sm:$0xff] }
 0xe81   :  { %v9767_v51 = vld [vmem:[#allocation6 + $0x18c0] sm:$0xff] }
 0xe82   :  { %9627 = vmatpush1.bf16.msra.mxu0 %v9432_v15  ;;  %v9748_v15 = vld [vmem:[#allocation6 + $0x1828] sm:$0xff] }
 0xe83   :  { %9668 = vmatpush1.bf16.msra.mxu1 %v9496_v9  ;;  %9628 = vmatprep.subr.bf16.mxu0 %v9437_v31  ;;  %v9812_v9 = vld [vmem:[#allocation6 + $0x1a28] sm:$0xff]  ;;  %v15858_v31 = vsel %vm15576_vm1, %v9711_v12, %v9725_v23  ;;  %v9771_v12 = vld [vmem:[#allocation6 + $0x18e0] sm:$0xff] }
 0xe84   :  { %9669 = vmatprep.subr.bf16.mxu1 %v9501_v36  ;;  %v15862_v36 = vsel %vm15576_vm1, %v9713_v24, %v9733_v13  ;;  %v9835_v23 = vld [vmem:[#allocation6 + $0x1ae0] sm:$0xff]  ;;  %v9776_v24 = vld [vmem:[#allocation6 + $0x1908] sm:$0xff] }
 0xe85   :  { %v9775_v13 = vld [vmem:[#allocation6 + $0x1900] sm:$0xff] }
 0xe86   :  { %9629 = vmatpush1.bf16.msra.mxu0 %v9436_v7  ;;  %v9747_v7 = vld [vmem:[#allocation6 + $0x1820] sm:$0xff] }
 0xe87   :  { %9670 = vmatpush1.bf16.msra.mxu1 %v9500_v33  ;;  %9630 = vmatprep.subr.bf16.mxu0 %v9441_v32  ;;  %v9811_v33 = vld [vmem:[#allocation6 + $0x1a20] sm:$0xff]  ;;  %v9752_v32 = vld [vmem:[#allocation6 + $0x1848] sm:$0xff] }
 0xe88   :  { %9671 = vmatprep.subr.bf16.mxu1 %v9505_v10  ;;  %v9816_v10 = vld [vmem:[#allocation6 + $0x1a48] sm:$0xff] }
 0xe8a   :  { %9631 = vmatpush1.bf16.msra.mxu0 %v9440_v37  ;;  %v9756_v37 = vld [vmem:[#allocation6 + $0x1868] sm:$0xff] }
 0xe8b   :  { %9672 = vmatpush1.bf16.msra.mxu1 %v9504_v54  ;;  %9632 = vmatprep.subr.bf16.mxu0 %v9445_v57  ;;  %v9820_v54 = vld [vmem:[#allocation6 + $0x1a68] sm:$0xff]  ;;  %v9755_v57 = vld [vmem:[#allocation6 + $0x1860] sm:$0xff] }
 0xe8c   :  { %9673 = vmatprep.subr.bf16.mxu1 %v9509_v47  ;;  %v9819_v47 = vld [vmem:[#allocation6 + $0x1a60] sm:$0xff] }
 0xe8e   :  { %9633 = vmatpush1.bf16.msra.mxu0 %v9444_v60  ;;  %v9760_v60 = vld [vmem:[#allocation6 + $0x1888] sm:$0xff] }
 0xe8f   :  { %9674 = vmatpush1.bf16.msra.mxu1 %v9508_v5  ;;  %9634 = vmatprep.subr.bf16.mxu0 %v9449_v40  ;;  %v9824_v5 = vld [vmem:[#allocation6 + $0x1a88] sm:$0xff]  ;;  %v9759_v40 = vld [vmem:[#allocation6 + $0x1880] sm:$0xff] }
 0xe90   :  { %9675 = vmatprep.subr.bf16.mxu1 %v9513_v35  ;;  %v9823_v35 = vld [vmem:[#allocation6 + $0x1a80] sm:$0xff] }
 0xe92   :  { %9635 = vmatpush1.bf16.msra.mxu0 %v9448_v56  ;;  %v9764_v56 = vld [vmem:[#allocation6 + $0x18a8] sm:$0xff] }
 0xe93   :  { %9676 = vmatpush1.bf16.msra.mxu1 %v9512_v26  ;;  %9636 = vmatprep.subr.bf16.mxu0 %v9453_v49  ;;  %v9828_v26 = vld [vmem:[#allocation6 + $0x1aa8] sm:$0xff]  ;;  %v9763_v49 = vld [vmem:[#allocation6 + $0x18a0] sm:$0xff] }
 0xe94   :  { %9677 = vmatprep.subr.bf16.mxu1 %v9517_v55  ;;  %v9827_v55 = vld [vmem:[#allocation6 + $0x1aa0] sm:$0xff] }
 0xe96   :  { %9637 = vmatpush1.bf16.msra.mxu0 %v9452_v52 }
 0xe97   :  { %9678 = vmatpush1.bf16.msra.mxu1 %v9516_v44  ;;  %9638 = vmatprep.subr.bf16.mxu0 %v9457_v4  ;;  %v9768_v4 = vld [vmem:[#allocation6 + $0x18c8] sm:$0xff] }
 0xe98   :  { %9679 = vmatprep.subr.bf16.mxu1 %v9521_v34  ;;  %v9832_v34 = vld [vmem:[#allocation6 + $0x1ac8] sm:$0xff] }
 0xe9a   :  { %9639 = vmatpush1.bf16.msra.mxu0 %v9456_v39 }
 0xe9b   :  { %9680 = vmatpush1.bf16.msra.mxu1 %v9520_v17  ;;  %9640 = vmatprep.subr.bf16.mxu0 %v9461_v8 }
 0xe9c   :  { %9681 = vmatprep.subr.bf16.mxu1 %v9525_v30 }
 0xe9e   :  { %9641 = vmatpush1.bf16.msra.mxu0 %v9460_v63 }
 0xe9f   :  { %9682 = vmatpush1.bf16.msra.mxu1 %v9524_v28  ;;  %9642 = vmatprep.subr.bf16.mxu0 %v9465_v6 }
 0xea0   :  { %9683 = vmatprep.subr.bf16.mxu1 %v9529_v45 }
 0xea2   :  { %9643 = vmatpush1.bf16.msra.mxu0 %v9464_v53  ;;  %v9831_v53 = vld [vmem:[#allocation6 + $0x1ac0] sm:$0xff] }
 0xea3   :  { %9684 = vmatpush1.bf16.msra.mxu1 %v9528_v42  ;;  %9871 = vmatprep.subr.bf16.mxu0 %v9744_v48  ;;  %v9772_v48 = vld [vmem:[#allocation6 + $0x18e8] sm:$0xff] }
 0xea4   :  { %9912 = vmatprep.subr.bf16.mxu1 %v9808_v50  ;;  %v9836_v50 = vld [vmem:[#allocation6 + $0x1ae8] sm:$0xff] }
 0xea5   :  { %9645 = vmatmul.mubr.bf16.vlgmr.msra.gmra.mrb[144].mxu0 %v15826_v21  ;;  %v9751_v21 = vld [vmem:[#allocation6 + $0x1840] sm:$0xff] }
 0xea6   :  { %9686 = vmatmul.mubr.bf16.vlgmr.msra.gmra.mrb[168].mxu1 %v15830_v14  ;;  %9872 = vmatpush1.bf16.msra.mxu0 %v9743_v20  ;;  %v9815_v14 = vld [vmem:[#allocation6 + $0x1a40] sm:$0xff] }
 0xea7   :  { %9913 = vmatpush1.bf16.msra.mxu1 %v9807_v22  ;;  %9873 = vmatprep.subr.bf16.mxu0 %v9748_v15  ;;  %v9839_v20 = vld [vmem:[#allocation6 + $0x1b00] sm:$0xff]  ;;  %v9780_v22 = vld [vmem:[#allocation6 + $0x1928] sm:$0xff] }
 0xea8   :  { %9914 = vmatprep.subr.bf16.mxu1 %v9812_v9  ;;  %9903 = vmatprep.mubr.bf16.mxu0 %v15858_v31  ;;  %v9844_v15 = vld [vmem:[#allocation6 + $0x1b28] sm:$0xff]  ;;  %v9843_v9 = vld [vmem:[#allocation6 + $0x1b20] sm:$0xff] }
 0xea9   :  { %9944 = vmatprep.mubr.bf16.mxu1 %v15862_v36 }
 0xeaa   :  { %9874 = vmatpush1.bf16.msra.mxu0 %v9747_v7  ;;  %v9784_v7 = vld [vmem:[#allocation6 + $0x1948] sm:$0xff] }
 0xeab   :  { %9915 = vmatpush1.bf16.msra.mxu1 %v9811_v33  ;;  %9875 = vmatprep.subr.bf16.mxu0 %v9752_v32  ;;  %v9848_v33 = vld [vmem:[#allocation6 + $0x1b48] sm:$0xff]  ;;  %v9783_v32 = vld [vmem:[#allocation6 + $0x1940] sm:$0xff] }
 0xeac   :  { %9916 = vmatprep.subr.bf16.mxu1 %v9816_v10  ;;  %v9847_v10 = vld [vmem:[#allocation6 + $0x1b40] sm:$0xff] }
 0xeae   :  { %9876 = vmatpush1.bf16.msra.mxu0 %v9751_v21  ;;  %v9788_v21 = vld [vmem:[#allocation6 + $0x1968] sm:$0xff] }
 0xeaf   :  { %9917 = vmatpush1.bf16.msra.mxu1 %v9815_v14  ;;  %9877 = vmatprep.subr.bf16.mxu0 %v9756_v37  ;;  %v9852_v14 = vld [vmem:[#allocation6 + $0x1b68] sm:$0xff]  ;;  %v9787_v37 = vld [vmem:[#allocation6 + $0x1960] sm:$0xff] }
 0xeb0   :  { %9918 = vmatprep.subr.bf16.mxu1 %v9820_v54  ;;  %v9851_v54 = vld [vmem:[#allocation6 + $0x1b60] sm:$0xff] }
 0xeb2   :  { %9878 = vmatpush1.bf16.msra.mxu0 %v9755_v57  ;;  %v9792_v57 = vld [vmem:[#allocation6 + $0x1988] sm:$0xff] }
 0xeb3   :  { %9919 = vmatpush1.bf16.msra.mxu1 %v9819_v47  ;;  %9879 = vmatprep.subr.bf16.mxu0 %v9760_v60  ;;  %v9856_v47 = vld [vmem:[#allocation6 + $0x1b88] sm:$0xff]  ;;  %v9791_v60 = vld [vmem:[#allocation6 + $0x1980] sm:$0xff] }
 0xeb4   :  { %9920 = vmatprep.subr.bf16.mxu1 %v9824_v5  ;;  %v9855_v5 = vld [vmem:[#allocation6 + $0x1b80] sm:$0xff] }
 0xeb6   :  { %9880 = vmatpush1.bf16.msra.mxu0 %v9759_v40  ;;  %v9796_v40 = vld [vmem:[#allocation6 + $0x19a8] sm:$0xff] }
 0xeb7   :  { %9921 = vmatpush1.bf16.msra.mxu1 %v9823_v35  ;;  %9881 = vmatprep.subr.bf16.mxu0 %v9764_v56  ;;  %v9860_v35 = vld [vmem:[#allocation6 + $0x1ba8] sm:$0xff]  ;;  %v9795_v56 = vld [vmem:[#allocation6 + $0x19a0] sm:$0xff] }
 0xeb8   :  { %9922 = vmatprep.subr.bf16.mxu1 %v9828_v26  ;;  %v9231_v52 = vpop.f32.mrb[132].mxu0  ;;  %v9859_v26 = vld [vmem:[#allocation6 + $0x1ba0] sm:$0xff] }
 0xeb9   :  { %v9272_v44 = vpop.f32.mrb[156].mxu1  ;;  %v9233_v17 = vpop.f32.mrb[133].mxu0 }
 0xeba   :  { %v9273_v39 = vadd.f32 %v9272_v44, %v9231_v52  ;;  %v9274_v8 = vpop.f32.mrb[157].mxu1  ;;  %v9235_v63 = vpop.f32.mrb[134].mxu0  ;;  %9882 = vmatpush1.bf16.msra.mxu0 %v9763_v49  ;;  %v15872_v49 = vld [vmem:[#allocation5 + $0x20] sm:$0x8]  ;;  %v9800_v52 = vld [vmem:[#allocation6 + $0x19c8] sm:$0xff] }
 0xebb   :  { %v9275_v30 = vadd.f32 %v9274_v8, %v9233_v17  ;;  %v9276_v28 = vpop.f32.mrb[158].mxu1  ;;  %9923 = vmatpush1.bf16.msra.mxu1 %v9827_v55  ;;  %v9236_v45 = vpop.f32.mrb[135].mxu0  ;;  %9883 = vmatprep.subr.bf16.mxu0 %v9768_v4  ;;  %v15874_v55 = vld [vmem:[#allocation5 + $0x30] sm:$0x8]  ;;  %v9864_v44 = vld [vmem:[#allocation6 + $0x1bc8] sm:$0xff]  ;;  %v9799_v4 = vld [vmem:[#allocation6 + $0x19c0] sm:$0xff] }
 0xebc   :  { %v15867_v6 = vadd.f32 %v9273_v39, %v15815_v25  ;;  %v9277_v29 = vpop.f32.mrb[159].mxu1  ;;  %9924 = vmatprep.subr.bf16.mxu1 %v9832_v34  ;;  %v9840_v25 = vld [vmem:[#allocation6 + $0x1b08] sm:$0xff]  ;;  %v9719_v34 = vshll.u32 %v15872_v49, 16  ;;  %v9727_v39 = vshll.u32 %v15874_v55, 16  ;;  %v9863_v17 = vld [vmem:[#allocation6 + $0x1bc0] sm:$0xff] }
 0xebd   :  { %v15870_v42 = vadd.f32 %v9275_v30, %v15818_v43  ;;  %v9779_v43 = vld [vmem:[#allocation6 + $0x1920] sm:$0xff]  ;;  %v15880_v30 = vld [vmem:[#allocation5 + $0x10] sm:$0x8]  ;;  %v9804_v63 = vld [vmem:[#allocation6 + $0x19e8] sm:$0xff] }
 0xebe   :  { %9884 = vmatpush1.bf16.msra.mxu0 %v9767_v51  ;;  %v15878_v8 = vld [vmem:[#allocation5] sm:$0x8]  ;;  %v9868_v28 = vld [vmem:[#allocation6 + $0x1be8] sm:$0xff]  ;;  %v9721_v29 = vrot.slane %v9719_v34, 3  ;;  %v9712_v51 = vrot.slane %v15880_v30, 3 }
 0xebf   :  { %9925 = vmatpush1.bf16.msra.mxu1 %v9831_v53  ;;  %9885 = vmatprep.subr.bf16.mxu0 %v9772_v48  ;;  %v9710_v45 = vrot.slane %v15878_v8, 3  ;;  %v9729_v53 = vrot.slane %v9727_v39, 3  ;;  %v9803_v48 = vld [vmem:[#allocation6 + $0x19e0] sm:$0xff] }
 0xec0   :  { %9926 = vmatprep.subr.bf16.mxu1 %v9836_v50  ;;  %v9867_v50 = vld [vmem:[#allocation6 + $0x1be0] sm:$0xff] }
 0xec2   :  { %9886 = vmatpush1.bf16.msra.mxu0 %v9771_v12  ;;  %v9746_v12 = vld [vmem:[#allocation6 + $0x1818] sm:$0xff] }
 0xec3   :  { %9927 = vmatpush1.bf16.msra.mxu1 %v9835_v23  ;;  %9887 = vmatprep.subr.bf16.mxu0 %v9776_v24  ;;  %v9810_v23 = vld [vmem:[#allocation6 + $0x1a18] sm:$0xff]  ;;  %v15886_v24 = vsel %vm15576_vm1, %v9710_v45, %v9721_v29 }
 0xec4   :  { %9928 = vmatprep.subr.bf16.mxu1 %v9840_v25  ;;  %v15890_v25 = vsel %vm15576_vm1, %v9712_v51, %v9729_v53  ;;  %v9769_v53 = vld [vmem:[#allocation6 + $0x18d0] sm:$0xff] }
 0xec6   :  { %9888 = vmatpush1.bf16.msra.mxu0 %v9775_v13  ;;  %v9745_v13 = vld [vmem:[#allocation6 + $0x1810] sm:$0xff] }
 0xec7   :  { %9929 = vmatpush1.bf16.msra.mxu1 %v9839_v20  ;;  %9889 = vmatprep.subr.bf16.mxu0 %v9780_v22  ;;  %v9809_v20 = vld [vmem:[#allocation6 + $0x1a10] sm:$0xff]  ;;  %v9750_v22 = vld [vmem:[#allocation6 + $0x1838] sm:$0xff] }
 0xec8   :  { %9930 = vmatprep.subr.bf16.mxu1 %v9844_v15  ;;  %v9814_v15 = vld [vmem:[#allocation6 + $0x1a38] sm:$0xff] }
 0xeca   :  { %9890 = vmatpush1.bf16.msra.mxu0 %v9779_v43  ;;  %v9749_v43 = vld [vmem:[#allocation6 + $0x1830] sm:$0xff] }
 0xecb   :  { %9931 = vmatpush1.bf16.msra.mxu1 %v9843_v9  ;;  %9891 = vmatprep.subr.bf16.mxu0 %v9784_v7  ;;  %v9813_v9 = vld [vmem:[#allocation6 + $0x1a30] sm:$0xff]  ;;  %v9754_v7 = vld [vmem:[#allocation6 + $0x1858] sm:$0xff] }
 0xecc   :  { %9932 = vmatprep.subr.bf16.mxu1 %v9848_v33  ;;  %v9818_v33 = vld [vmem:[#allocation6 + $0x1a58] sm:$0xff] }
 0xece   :  { %9892 = vmatpush1.bf16.msra.mxu0 %v9783_v32  ;;  %v9753_v32 = vld [vmem:[#allocation6 + $0x1850] sm:$0xff] }
 0xecf   :  { %9933 = vmatpush1.bf16.msra.mxu1 %v9847_v10  ;;  %9893 = vmatprep.subr.bf16.mxu0 %v9788_v21  ;;  %v9817_v10 = vld [vmem:[#allocation6 + $0x1a50] sm:$0xff]  ;;  %v9758_v21 = vld [vmem:[#allocation6 + $0x1878] sm:$0xff] }
 0xed0   :  { %9934 = vmatprep.subr.bf16.mxu1 %v9852_v14  ;;  %v9822_v14 = vld [vmem:[#allocation6 + $0x1a78] sm:$0xff] }
 0xed2   :  { %9894 = vmatpush1.bf16.msra.mxu0 %v9787_v37  ;;  %v9757_v37 = vld [vmem:[#allocation6 + $0x1870] sm:$0xff] }
 0xed3   :  { %9935 = vmatpush1.bf16.msra.mxu1 %v9851_v54  ;;  %9895 = vmatprep.subr.bf16.mxu0 %v9792_v57  ;;  %v9821_v54 = vld [vmem:[#allocation6 + $0x1a70] sm:$0xff]  ;;  %v9762_v57 = vld [vmem:[#allocation6 + $0x1898] sm:$0xff] }
 0xed4   :  { %9936 = vmatprep.subr.bf16.mxu1 %v9856_v47  ;;  %v9826_v47 = vld [vmem:[#allocation6 + $0x1a98] sm:$0xff] }
 0xed6   :  { %9896 = vmatpush1.bf16.msra.mxu0 %v9791_v60  ;;  %v9766_v60 = vld [vmem:[#allocation6 + $0x18b8] sm:$0xff] }
 0xed7   :  { %9937 = vmatpush1.bf16.msra.mxu1 %v9855_v5  ;;  %9897 = vmatprep.subr.bf16.mxu0 %v9796_v40  ;;  %v9830_v5 = vld [vmem:[#allocation6 + $0x1ab8] sm:$0xff]  ;;  %v9765_v40 = vld [vmem:[#allocation6 + $0x18b0] sm:$0xff] }
 0xed8   :  { %9938 = vmatprep.subr.bf16.mxu1 %v9860_v35  ;;  %v9829_v35 = vld [vmem:[#allocation6 + $0x1ab0] sm:$0xff] }
 0xeda   :  { %9898 = vmatpush1.bf16.msra.mxu0 %v9795_v56 }
 0xedb   :  { %9939 = vmatpush1.bf16.msra.mxu1 %v9859_v26  ;;  %9899 = vmatprep.subr.bf16.mxu0 %v9800_v52  ;;  %v9770_v52 = vld [vmem:[#allocation6 + $0x18d8] sm:$0xff] }
 0xedc   :  { %9940 = vmatprep.subr.bf16.mxu1 %v9864_v44  ;;  %v9834_v44 = vld [vmem:[#allocation6 + $0x1ad8] sm:$0xff] }
 0xede   :  { %9900 = vmatpush1.bf16.msra.mxu0 %v9799_v4 }
 0xedf   :  { %9941 = vmatpush1.bf16.msra.mxu1 %v9863_v17  ;;  %9901 = vmatprep.subr.bf16.mxu0 %v9804_v63 }
 0xee0   :  { %9942 = vmatprep.subr.bf16.mxu1 %v9868_v28 }
 0xee2   :  { %9902 = vmatpush1.bf16.msra.mxu0 %v9803_v48  ;;  %v9833_v48 = vld [vmem:[#allocation6 + $0x1ad0] sm:$0xff] }
 0xee3   :  { %9943 = vmatpush1.bf16.msra.mxu1 %v9867_v50  ;;  %9953 = vmatprep.subr.bf16.mxu0 %v9746_v12  ;;  %v9774_v12 = vld [vmem:[#allocation6 + $0x18f8] sm:$0xff] }
 0xee4   :  { %9994 = vmatprep.subr.bf16.mxu1 %v9810_v23  ;;  %v9838_v23 = vld [vmem:[#allocation6 + $0x1af8] sm:$0xff] }
 0xee5   :  { %9904 = vmatmul.mubr.bf16.vlgmr.msra.gmra.mrb[148].mxu0 %v15886_v24 }
 0xee6   :  { %9945 = vmatmul.mubr.bf16.vlgmr.msra.gmra.mrb[172].mxu1 %v15890_v25  ;;  %9954 = vmatpush1.bf16.msra.mxu0 %v9745_v13  ;;  %v9773_v13 = vld [vmem:[#allocation6 + $0x18f0] sm:$0xff] }
 0xee7   :  { %9995 = vmatpush1.bf16.msra.mxu1 %v9809_v20  ;;  %9955 = vmatprep.subr.bf16.mxu0 %v9750_v22  ;;  %v9837_v20 = vld [vmem:[#allocation6 + $0x1af0] sm:$0xff]  ;;  %v9778_v22 = vld [vmem:[#allocation6 + $0x1918] sm:$0xff] }
 0xee8   :  { %9996 = vmatprep.subr.bf16.mxu1 %v9814_v15  ;;  %9985 = vmatprep.mubr.bf16.mxu0 %v15858_v31  ;;  %v9761_v31 = vld [vmem:[#allocation6 + $0x1890] sm:$0xff] }
 0xee9   :  { %10026 = vmatprep.mubr.bf16.mxu1 %v15862_v36  ;;  %v9825_v36 = vld [vmem:[#allocation6 + $0x1a90] sm:$0xff] }
 0xeea   :  { %9956 = vmatpush1.bf16.msra.mxu0 %v9749_v43  ;;  %v9777_v15 = vld [vmem:[#allocation6 + $0x1910] sm:$0xff] }
 0xeeb   :  { %9997 = vmatpush1.bf16.msra.mxu1 %v9813_v9  ;;  %9957 = vmatprep.subr.bf16.mxu0 %v9754_v7  ;;  %v9841_v43 = vld [vmem:[#allocation6 + $0x1b10] sm:$0xff]  ;;  %v9782_v9 = vld [vmem:[#allocation6 + $0x1938] sm:$0xff] }
 0xeec   :  { %9998 = vmatprep.subr.bf16.mxu1 %v9818_v33  ;;  %v9846_v7 = vld [vmem:[#allocation6 + $0x1b38] sm:$0xff]  ;;  %v9845_v33 = vld [vmem:[#allocation6 + $0x1b30] sm:$0xff] }
 0xeee   :  { %9958 = vmatpush1.bf16.msra.mxu0 %v9753_v32  ;;  %v9786_v32 = vld [vmem:[#allocation6 + $0x1958] sm:$0xff] }
 0xeef   :  { %9999 = vmatpush1.bf16.msra.mxu1 %v9817_v10  ;;  %9959 = vmatprep.subr.bf16.mxu0 %v9758_v21  ;;  %v9850_v10 = vld [vmem:[#allocation6 + $0x1b58] sm:$0xff]  ;;  %v9785_v21 = vld [vmem:[#allocation6 + $0x1950] sm:$0xff] }
 0xef0   :  { %10000 = vmatprep.subr.bf16.mxu1 %v9822_v14  ;;  %v9849_v14 = vld [vmem:[#allocation6 + $0x1b50] sm:$0xff] }
 0xef2   :  { %9960 = vmatpush1.bf16.msra.mxu0 %v9757_v37  ;;  %v9790_v37 = vld [vmem:[#allocation6 + $0x1978] sm:$0xff] }
 0xef3   :  { %10001 = vmatpush1.bf16.msra.mxu1 %v9821_v54  ;;  %9961 = vmatprep.subr.bf16.mxu0 %v9762_v57  ;;  %v9854_v54 = vld [vmem:[#allocation6 + $0x1b78] sm:$0xff]  ;;  %v9789_v57 = vld [vmem:[#allocation6 + $0x1970] sm:$0xff] }
 0xef4   :  { %10002 = vmatprep.subr.bf16.mxu1 %v9826_v47  ;;  %v9853_v47 = vld [vmem:[#allocation6 + $0x1b70] sm:$0xff] }
 0xef6   :  { %9962 = vmatpush1.bf16.msra.mxu0 %v9761_v31  ;;  %v9794_v31 = vld [vmem:[#allocation6 + $0x1998] sm:$0xff] }
 0xef7   :  { %10003 = vmatpush1.bf16.msra.mxu1 %v9825_v36  ;;  %9963 = vmatprep.subr.bf16.mxu0 %v9766_v60  ;;  %v9858_v36 = vld [vmem:[#allocation6 + $0x1b98] sm:$0xff]  ;;  %v9793_v60 = vld [vmem:[#allocation6 + $0x1990] sm:$0xff] }
 0xef8   :  { %10004 = vmatprep.subr.bf16.mxu1 %v9830_v5  ;;  %v9313_v56 = vpop.f32.mrb[136].mxu0  ;;  %v9857_v5 = vld [vmem:[#allocation6 + $0x1b90] sm:$0xff] }
 0xef9   :  { %v9354_v26 = vpop.f32.mrb[160].mxu1  ;;  %v9315_v34 = vpop.f32.mrb[137].mxu0 }
 0xefa   :  { %v9355_v4 = vadd.f32 %v9354_v26, %v9313_v56  ;;  %v9356_v39 = vpop.f32.mrb[161].mxu1  ;;  %v9317_v63 = vpop.f32.mrb[138].mxu0  ;;  %9964 = vmatpush1.bf16.msra.mxu0 %v9765_v40  ;;  %v9798_v40 = vld [vmem:[#allocation6 + $0x19b8] sm:$0xff]  ;;  %v9797_v56 = vld [vmem:[#allocation6 + $0x19b0] sm:$0xff] }
 0xefb   :  { %v9357_v17 = vadd.f32 %v9356_v39, %v9315_v34  ;;  %v9358_v28 = vpop.f32.mrb[162].mxu1  ;;  %10005 = vmatpush1.bf16.msra.mxu1 %v9829_v35  ;;  %v9318_v29 = vpop.f32.mrb[139].mxu0  ;;  %9965 = vmatprep.subr.bf16.mxu0 %v9770_v52  ;;  %v9862_v35 = vld [vmem:[#allocation6 + $0x1bb8] sm:$0xff]  ;;  %v9861_v26 = vld [vmem:[#allocation6 + $0x1bb0] sm:$0xff]  ;;  %v10044_v63 = vshrl.u32 %v15848_v27, 16  ;;  %v10076_v27 = vld [vmem:[#allocation6 + $0x1c00] sm:$0xff] }
 0xefc   :  { %v15897_v45 = vadd.f32 %v9355_v4, %v15837_v11  ;;  %v9359_v51 = vpop.f32.mrb[163].mxu1  ;;  %10006 = vmatprep.subr.bf16.mxu1 %v9834_v44  ;;  %v9842_v11 = vld [vmem:[#allocation6 + $0x1b18] sm:$0xff]  ;;  %v9801_v4 = vld [vmem:[#allocation6 + $0x19d0] sm:$0xff]  ;;  %v10052_v28 = vshrl.u32 %v15850_v3, 16  ;;  %v10140_v3 = vld [vmem:[#allocation6 + $0x1e00] sm:$0xff] }
 0xefd   :  { %v15900_v50 = vadd.f32 %v9357_v17, %v15840_v18  ;;  %v9781_v18 = vld [vmem:[#allocation6 + $0x1930] sm:$0xff]  ;;  %v9802_v52 = vld [vmem:[#allocation6 + $0x19d8] sm:$0xff] }
 0xefe   :  { %9966 = vmatpush1.bf16.msra.mxu0 %v9769_v53  ;;  %v9866_v44 = vld [vmem:[#allocation6 + $0x1bd8] sm:$0xff]  ;;  %v9865_v34 = vld [vmem:[#allocation6 + $0x1bd0] sm:$0xff]  ;;  %v10077_v53 = vld [vmem:[#allocation6 + $0x1c08] sm:$0xff] }
 0xeff   :  { %10007 = vmatpush1.bf16.msra.mxu1 %v9833_v48  ;;  %9967 = vmatprep.subr.bf16.mxu0 %v9774_v12  ;;  %v9806_v39 = vld [vmem:[#allocation6 + $0x19f8] sm:$0xff]  ;;  %v9805_v29 = vld [vmem:[#allocation6 + $0x19f0] sm:$0xff]  ;;  %v10141_v48 = vld [vmem:[#allocation6 + $0x1e08] sm:$0xff]  ;;  %v10046_v12 = vrot.slane %v10044_v63, 3 }
 0xf00   :  { %10008 = vmatprep.subr.bf16.mxu1 %v9838_v23  ;;  %v9870_v17 = vld [vmem:[#allocation6 + $0x1bf8] sm:$0xff]  ;;  %v9869_v51 = vld [vmem:[#allocation6 + $0x1bf0] sm:$0xff]  ;;  %v10064_v23 = vrot.slane %v15842_v41, 3 }
 0xf02   :  { %9968 = vmatpush1.bf16.msra.mxu0 %v9773_v13  ;;  %v10054_v13 = vrot.slane %v10052_v28, 3  ;;  %v10100_v28 = vld [vmem:[#allocation6 + $0x1cc0] sm:$0xff] }
 0xf03   :  { %10009 = vmatpush1.bf16.msra.mxu1 %v9837_v20  ;;  %9969 = vmatprep.subr.bf16.mxu0 %v9778_v22  ;;  %v10066_v20 = vrot.slane %v15844_v38, 3  ;;  %v10081_v22 = vld [vmem:[#allocation6 + $0x1c28] sm:$0xff]  ;;  %v10080_v38 = vld [vmem:[#allocation6 + $0x1c20] sm:$0xff] }
 0xf04   :  { %10010 = vmatprep.subr.bf16.mxu1 %v9842_v11  ;;  %v10145_v11 = vld [vmem:[#allocation6 + $0x1e28] sm:$0xff] }
 0xf05   :  { %v15914_v41 = vsel %vm15576_vm1, %v10054_v13, %v10066_v20  ;;  %v10109_v13 = vld [vmem:[#allocation6 + $0x1d08] sm:$0xff]  ;;  %v10108_v20 = vld [vmem:[#allocation6 + $0x1d00] sm:$0xff] }
 0xf06   :  { %9970 = vmatpush1.bf16.msra.mxu0 %v9777_v15  ;;  %v15910_v15 = vsel %vm15576_vm1, %v10046_v12, %v10064_v23  ;;  %v10104_v12 = vld [vmem:[#allocation6 + $0x1ce0] sm:$0xff] }
 0xf07   :  { %10011 = vmatpush1.bf16.msra.mxu1 %v9841_v43  ;;  %9971 = vmatprep.subr.bf16.mxu0 %v9782_v9  ;;  %v10144_v43 = vld [vmem:[#allocation6 + $0x1e20] sm:$0xff]  ;;  %v10085_v9 = vld [vmem:[#allocation6 + $0x1c48] sm:$0xff] }
 0xf08   :  { %10012 = vmatprep.subr.bf16.mxu1 %v9846_v7  ;;  %v10149_v7 = vld [vmem:[#allocation6 + $0x1e48] sm:$0xff]  ;;  %v10168_v23 = vld [vmem:[#allocation6 + $0x1ee0] sm:$0xff] }
 0xf0a   :  { %9972 = vmatpush1.bf16.msra.mxu0 %v9781_v18  ;;  %v10089_v18 = vld [vmem:[#allocation6 + $0x1c68] sm:$0xff] }
 0xf0b   :  { %10013 = vmatpush1.bf16.msra.mxu1 %v9845_v33  ;;  %9973 = vmatprep.subr.bf16.mxu0 %v9786_v32  ;;  %v10153_v33 = vld [vmem:[#allocation6 + $0x1e68] sm:$0xff]  ;;  %v10088_v32 = vld [vmem:[#allocation6 + $0x1c60] sm:$0xff] }
 0xf0c   :  { %10014 = vmatprep.subr.bf16.mxu1 %v9850_v10  ;;  %v10152_v10 = vld [vmem:[#allocation6 + $0x1e60] sm:$0xff] }
 0xf0e   :  { %9974 = vmatpush1.bf16.msra.mxu0 %v9785_v21  ;;  %v10093_v21 = vld [vmem:[#allocation6 + $0x1c88] sm:$0xff] }
 0xf0f   :  { %10015 = vmatpush1.bf16.msra.mxu1 %v9849_v14  ;;  %9975 = vmatprep.subr.bf16.mxu0 %v9790_v37  ;;  %v10157_v14 = vld [vmem:[#allocation6 + $0x1e88] sm:$0xff]  ;;  %v10092_v37 = vld [vmem:[#allocation6 + $0x1c80] sm:$0xff] }
 0xf10   :  { %10016 = vmatprep.subr.bf16.mxu1 %v9854_v54  ;;  %v10156_v54 = vld [vmem:[#allocation6 + $0x1e80] sm:$0xff] }
 0xf12   :  { %9976 = vmatpush1.bf16.msra.mxu0 %v9789_v57  ;;  %v10097_v57 = vld [vmem:[#allocation6 + $0x1ca8] sm:$0xff] }
 0xf13   :  { %10017 = vmatpush1.bf16.msra.mxu1 %v9853_v47  ;;  %9977 = vmatprep.subr.bf16.mxu0 %v9794_v31  ;;  %v10161_v47 = vld [vmem:[#allocation6 + $0x1ea8] sm:$0xff]  ;;  %v10096_v31 = vld [vmem:[#allocation6 + $0x1ca0] sm:$0xff] }
 0xf14   :  { %10018 = vmatprep.subr.bf16.mxu1 %v9858_v36  ;;  %v10160_v36 = vld [vmem:[#allocation6 + $0x1ea0] sm:$0xff] }
 0xf16   :  { %9978 = vmatpush1.bf16.msra.mxu0 %v9793_v60 }
 0xf17   :  { %10019 = vmatpush1.bf16.msra.mxu1 %v9857_v5  ;;  %9979 = vmatprep.subr.bf16.mxu0 %v9798_v40  ;;  %v10101_v40 = vld [vmem:[#allocation6 + $0x1cc8] sm:$0xff] }
 0xf18   :  { %10020 = vmatprep.subr.bf16.mxu1 %v9862_v35  ;;  %v10165_v35 = vld [vmem:[#allocation6 + $0x1ec8] sm:$0xff] }
 0xf1a   :  { %9980 = vmatpush1.bf16.msra.mxu0 %v9797_v56 }
 0xf1b   :  { %10021 = vmatpush1.bf16.msra.mxu1 %v9861_v26  ;;  %9981 = vmatprep.subr.bf16.mxu0 %v9802_v52 }
 0xf1c   :  { %10022 = vmatprep.subr.bf16.mxu1 %v9866_v44 }
 0xf1e   :  { %9982 = vmatpush1.bf16.msra.mxu0 %v9801_v4 }
 0xf1f   :  { %10023 = vmatpush1.bf16.msra.mxu1 %v9865_v34  ;;  %9983 = vmatprep.subr.bf16.mxu0 %v9806_v39 }
 0xf20   :  { %10024 = vmatprep.subr.bf16.mxu1 %v9870_v17 }
 0xf22   :  { %9984 = vmatpush1.bf16.msra.mxu0 %v9805_v29  ;;  %v10164_v29 = vld [vmem:[#allocation6 + $0x1ec0] sm:$0xff] }
 0xf23   :  { %10025 = vmatpush1.bf16.msra.mxu1 %v9869_v51  ;;  %10204 = vmatprep.subr.bf16.mxu0 %v10077_v53  ;;  %v10105_v53 = vld [vmem:[#allocation6 + $0x1ce8] sm:$0xff] }
 0xf24   :  { %10245 = vmatprep.subr.bf16.mxu1 %v10141_v48  ;;  %v10169_v48 = vld [vmem:[#allocation6 + $0x1ee8] sm:$0xff] }
 0xf25   :  { %9986 = vmatmul.mubr.bf16.vlgmr.msra.gmra.mrb[152].mxu0 %v15886_v24  ;;  %v10084_v24 = vld [vmem:[#allocation6 + $0x1c40] sm:$0xff] }
 0xf26   :  { %10027 = vmatmul.mubr.bf16.vlgmr.msra.gmra.mrb[176].mxu1 %v15890_v25  ;;  %10205 = vmatpush1.bf16.msra.mxu0 %v10076_v27  ;;  %v10148_v25 = vld [vmem:[#allocation6 + $0x1e40] sm:$0xff] }
 0xf27   :  { %10246 = vmatpush1.bf16.msra.mxu1 %v10140_v3  ;;  %10206 = vmatprep.subr.bf16.mxu0 %v10081_v22  ;;  %v10172_v27 = vld [vmem:[#allocation6 + $0x1f00] sm:$0xff]  ;;  %v10113_v3 = vld [vmem:[#allocation6 + $0x1d28] sm:$0xff] }
 0xf28   :  { %10247 = vmatprep.subr.bf16.mxu1 %v10145_v11  ;;  %10236 = vmatprep.mubr.bf16.mxu0 %v15910_v15  ;;  %v10177_v22 = vld [vmem:[#allocation6 + $0x1f28] sm:$0xff]  ;;  %v10176_v11 = vld [vmem:[#allocation6 + $0x1f20] sm:$0xff] }
 0xf29   :  { %10277 = vmatprep.mubr.bf16.mxu1 %v15914_v41 }
 0xf2a   :  { %10207 = vmatpush1.bf16.msra.mxu0 %v10080_v38  ;;  %v10117_v38 = vld [vmem:[#allocation6 + $0x1d48] sm:$0xff] }
 0xf2b   :  { %10248 = vmatpush1.bf16.msra.mxu1 %v10144_v43  ;;  %10208 = vmatprep.subr.bf16.mxu0 %v10085_v9  ;;  %v10181_v43 = vld [vmem:[#allocation6 + $0x1f48] sm:$0xff]  ;;  %v10116_v9 = vld [vmem:[#allocation6 + $0x1d40] sm:$0xff] }
 0xf2c   :  { %10249 = vmatprep.subr.bf16.mxu1 %v10149_v7  ;;  %v10180_v7 = vld [vmem:[#allocation6 + $0x1f40] sm:$0xff] }
 0xf2e   :  { %10209 = vmatpush1.bf16.msra.mxu0 %v10084_v24  ;;  %v10121_v24 = vld [vmem:[#allocation6 + $0x1d68] sm:$0xff] }
 0xf2f   :  { %10250 = vmatpush1.bf16.msra.mxu1 %v10148_v25  ;;  %10210 = vmatprep.subr.bf16.mxu0 %v10089_v18  ;;  %v10185_v25 = vld [vmem:[#allocation6 + $0x1f68] sm:$0xff]  ;;  %v10120_v18 = vld [vmem:[#allocation6 + $0x1d60] sm:$0xff] }
 0xf30   :  { %10251 = vmatprep.subr.bf16.mxu1 %v10153_v33  ;;  %v10184_v33 = vld [vmem:[#allocation6 + $0x1f60] sm:$0xff] }
 0xf32   :  { %10211 = vmatpush1.bf16.msra.mxu0 %v10088_v32  ;;  %v10125_v32 = vld [vmem:[#allocation6 + $0x1d88] sm:$0xff] }
 0xf33   :  { %10252 = vmatpush1.bf16.msra.mxu1 %v10152_v10  ;;  %10212 = vmatprep.subr.bf16.mxu0 %v10093_v21  ;;  %v10189_v10 = vld [vmem:[#allocation6 + $0x1f88] sm:$0xff]  ;;  %v10124_v21 = vld [vmem:[#allocation6 + $0x1d80] sm:$0xff] }
 0xf34   :  { %10253 = vmatprep.subr.bf16.mxu1 %v10157_v14  ;;  %v10188_v14 = vld [vmem:[#allocation6 + $0x1f80] sm:$0xff] }
 0xf36   :  { %10213 = vmatpush1.bf16.msra.mxu0 %v10092_v37  ;;  %v10129_v37 = vld [vmem:[#allocation6 + $0x1da8] sm:$0xff] }
 0xf37   :  { %10254 = vmatpush1.bf16.msra.mxu1 %v10156_v54  ;;  %10214 = vmatprep.subr.bf16.mxu0 %v10097_v57  ;;  %v10193_v54 = vld [vmem:[#allocation6 + $0x1fa8] sm:$0xff]  ;;  %v10128_v57 = vld [vmem:[#allocation6 + $0x1da0] sm:$0xff] }
 0xf38   :  { %10255 = vmatprep.subr.bf16.mxu1 %v10161_v47  ;;  %v9564_v60 = vpop.f32.mrb[140].mxu0  ;;  %v10192_v47 = vld [vmem:[#allocation6 + $0x1fa0] sm:$0xff] }
 0xf39   :  { %v9605_v5 = vpop.f32.mrb[164].mxu1  ;;  %v9566_v26 = vpop.f32.mrb[141].mxu0 }
 0xf3a   :  { %v9606_v56 = vadd.f32 %v9605_v5, %v9564_v60  ;;  %v9607_v52 = vpop.f32.mrb[165].mxu1  ;;  %v9568_v4 = vpop.f32.mrb[142].mxu0  ;;  %10215 = vmatpush1.bf16.msra.mxu0 %v10096_v31  ;;  %v10133_v31 = vld [vmem:[#allocation6 + $0x1dc8] sm:$0xff]  ;;  %v10040_v60 = vshrl.u32 %v15878_v8, 16  ;;  %v10048_v5 = vshrl.u32 %v15880_v30, 16  ;;  %v10200_v8 = vld [vmem:[#allocation6 + $0x1fe0] sm:$0xff] }
 0xf3b   :  { %v9608_v44 = vadd.f32 %v9607_v52, %v9566_v26  ;;  %v9609_v34 = vpop.f32.mrb[166].mxu1  ;;  %10256 = vmatpush1.bf16.msra.mxu1 %v10160_v36  ;;  %v9569_v17 = vpop.f32.mrb[143].mxu0  ;;  %10216 = vmatprep.subr.bf16.mxu0 %v10101_v40  ;;  %v10197_v36 = vld [vmem:[#allocation6 + $0x1fc8] sm:$0xff]  ;;  %v10132_v40 = vld [vmem:[#allocation6 + $0x1dc0] sm:$0xff]  ;;  %v10143_v30 = vld [vmem:[#allocation6 + $0x1e18] sm:$0xff] }
 0xf3c   :  { %v15919_v39 = vadd.f32 %v9606_v56, %v15867_v6  ;;  %v9610_v63 = vpop.f32.mrb[167].mxu1  ;;  %10257 = vmatprep.subr.bf16.mxu1 %v10165_v35  ;;  %v10173_v6 = vld [vmem:[#allocation6 + $0x1f08] sm:$0xff]  ;;  %v10196_v35 = vld [vmem:[#allocation6 + $0x1fc0] sm:$0xff]  ;;  %v10042_v52 = vrot.slane %v10040_v60, 3  ;;  %v10050_v4 = vrot.slane %v10048_v5, 3  ;;  %v10065_v34 = vrot.slane %v15874_v55, 3 }
 0xf3d   :  { %v15922_v51 = vadd.f32 %v9608_v44, %v15870_v42  ;;  %v10112_v42 = vld [vmem:[#allocation6 + $0x1d20] sm:$0xff]  ;;  %v10137_v56 = vld [vmem:[#allocation6 + $0x1de8] sm:$0xff]  ;;  %v10063_v44 = vrot.slane %v15872_v49, 3  ;;  %v10079_v63 = vld [vmem:[#allocation6 + $0x1c18] sm:$0xff] }
 0xf3e   :  { %10217 = vmatpush1.bf16.msra.mxu0 %v10100_v28  ;;  %v10201_v26 = vld [vmem:[#allocation6 + $0x1fe8] sm:$0xff]  ;;  %v10136_v17 = vld [vmem:[#allocation6 + $0x1de0] sm:$0xff]  ;;  %v10078_v49 = vld [vmem:[#allocation6 + $0x1c10] sm:$0xff] }
 0xf3f   :  { %10258 = vmatpush1.bf16.msra.mxu1 %v10164_v29  ;;  %10218 = vmatprep.subr.bf16.mxu0 %v10105_v53  ;;  %v15930_v28 = vsel %vm15576_vm1, %v10042_v52, %v10063_v44  ;;  %v15934_v29 = vsel %vm15576_vm1, %v10050_v4, %v10065_v34  ;;  %v10142_v55 = vld [vmem:[#allocation6 + $0x1e10] sm:$0xff]  ;;  %v10083_v53 = vld [vmem:[#allocation6 + $0x1c38] sm:$0xff] }
 0xf40   :  { %10259 = vmatprep.subr.bf16.mxu1 %v10169_v48  ;;  %v10147_v48 = vld [vmem:[#allocation6 + $0x1e38] sm:$0xff]  ;;  %v10102_v60 = vld [vmem:[#allocation6 + $0x1cd0] sm:$0xff] }
 0xf41   :  { %v10166_v5 = vld [vmem:[#allocation6 + $0x1ed0] sm:$0xff]  ;;  %v10111_v44 = vld [vmem:[#allocation6 + $0x1d18] sm:$0xff] }
 0xf42   :  { %10219 = vmatpush1.bf16.msra.mxu0 %v10104_v12  ;;  %v10082_v12 = vld [vmem:[#allocation6 + $0x1c30] sm:$0xff] }
 0xf43   :  { %10260 = vmatpush1.bf16.msra.mxu1 %v10168_v23  ;;  %10220 = vmatprep.subr.bf16.mxu0 %v10109_v13  ;;  %v10146_v23 = vld [vmem:[#allocation6 + $0x1e30] sm:$0xff]  ;;  %v10087_v13 = vld [vmem:[#allocation6 + $0x1c58] sm:$0xff] }
 0xf44   :  { %10261 = vmatprep.subr.bf16.mxu1 %v10173_v6  ;;  %v10086_v6 = vld [vmem:[#allocation6 + $0x1c50] sm:$0xff] }
 0xf45   :  { %v10170_v52 = vld [vmem:[#allocation6 + $0x1ef0] sm:$0xff] }
 0xf46   :  { %10221 = vmatpush1.bf16.msra.mxu0 %v10108_v20  ;;  %v10150_v20 = vld [vmem:[#allocation6 + $0x1e50] sm:$0xff] }
 0xf47   :  { %10262 = vmatpush1.bf16.msra.mxu1 %v10172_v27  ;;  %10222 = vmatprep.subr.bf16.mxu0 %v10113_v3  ;;  %v10091_v27 = vld [vmem:[#allocation6 + $0x1c78] sm:$0xff]  ;;  %v10110_v4 = vld [vmem:[#allocation6 + $0x1d10] sm:$0xff] }
 0xf48   :  { %10263 = vmatprep.subr.bf16.mxu1 %v10177_v22  ;;  %v10155_v3 = vld [vmem:[#allocation6 + $0x1e78] sm:$0xff]  ;;  %v10090_v22 = vld [vmem:[#allocation6 + $0x1c70] sm:$0xff] }
 0xf49   :  { %v10174_v34 = vld [vmem:[#allocation6 + $0x1f10] sm:$0xff] }
 0xf4a   :  { %10223 = vmatpush1.bf16.msra.mxu0 %v10112_v42  ;;  %v10154_v42 = vld [vmem:[#allocation6 + $0x1e70] sm:$0xff] }
 0xf4b   :  { %10264 = vmatpush1.bf16.msra.mxu1 %v10176_v11  ;;  %10224 = vmatprep.subr.bf16.mxu0 %v10117_v38  ;;  %v10095_v11 = vld [vmem:[#allocation6 + $0x1c98] sm:$0xff] }
 0xf4c   :  { %10265 = vmatprep.subr.bf16.mxu1 %v10181_v43  ;;  %v10159_v38 = vld [vmem:[#allocation6 + $0x1e98] sm:$0xff] }
 0xf4d   :  { %v10099_v43 = vld [vmem:[#allocation6 + $0x1cb8] sm:$0xff] }
 0xf4e   :  { %10225 = vmatpush1.bf16.msra.mxu0 %v10116_v9  ;;  %v10163_v9 = vld [vmem:[#allocation6 + $0x1eb8] sm:$0xff] }
 0xf4f   :  { %10266 = vmatpush1.bf16.msra.mxu1 %v10180_v7  ;;  %10226 = vmatprep.subr.bf16.mxu0 %v10121_v24  ;;  %v10098_v7 = vld [vmem:[#allocation6 + $0x1cb0] sm:$0xff] }
 0xf50   :  { %10267 = vmatprep.subr.bf16.mxu1 %v10185_v25  ;;  %v10162_v24 = vld [vmem:[#allocation6 + $0x1eb0] sm:$0xff] }
 0xf52   :  { %10227 = vmatpush1.bf16.msra.mxu0 %v10120_v18 }
 0xf53   :  { %10268 = vmatpush1.bf16.msra.mxu1 %v10184_v33  ;;  %10228 = vmatprep.subr.bf16.mxu0 %v10125_v32  ;;  %v10103_v33 = vld [vmem:[#allocation6 + $0x1cd8] sm:$0xff] }
 0xf54   :  { %10269 = vmatprep.subr.bf16.mxu1 %v10189_v10  ;;  %v10167_v32 = vld [vmem:[#allocation6 + $0x1ed8] sm:$0xff] }
 0xf56   :  { %10229 = vmatpush1.bf16.msra.mxu0 %v10124_v21 }
 0xf57   :  { %10270 = vmatpush1.bf16.msra.mxu1 %v10188_v14  ;;  %10230 = vmatprep.subr.bf16.mxu0 %v10129_v37 }
 0xf58   :  { %10271 = vmatprep.subr.bf16.mxu1 %v10193_v54 }
 0xf5a   :  { %10231 = vmatpush1.bf16.msra.mxu0 %v10128_v57 }
 0xf5b   :  { %10272 = vmatpush1.bf16.msra.mxu1 %v10192_v47  ;;  %10232 = vmatprep.subr.bf16.mxu0 %v10133_v31 }
 0xf5c   :  { %10273 = vmatprep.subr.bf16.mxu1 %v10197_v36 }
 0xf5e   :  { %10233 = vmatpush1.bf16.msra.mxu0 %v10132_v40 }
 0xf5f   :  { %10274 = vmatpush1.bf16.msra.mxu1 %v10196_v35  ;;  %10234 = vmatprep.subr.bf16.mxu0 %v10137_v56  ;;  %v10107_v35 = vld [vmem:[#allocation6 + $0x1cf8] sm:$0xff] }
 0xf60   :  { %10275 = vmatprep.subr.bf16.mxu1 %v10201_v26  ;;  %v10171_v56 = vld [vmem:[#allocation6 + $0x1ef8] sm:$0xff]  ;;  %v10106_v26 = vld [vmem:[#allocation6 + $0x1cf0] sm:$0xff] }
 0xf62   :  { %10235 = vmatpush1.bf16.msra.mxu0 %v10136_v17  ;;  %v10115_v17 = vld [vmem:[#allocation6 + $0x1d38] sm:$0xff] }
 0xf63   :  { %10276 = vmatpush1.bf16.msra.mxu1 %v10200_v8  ;;  %10286 = vmatprep.subr.bf16.mxu0 %v10079_v63  ;;  %v10179_v8 = vld [vmem:[#allocation6 + $0x1f38] sm:$0xff]  ;;  %v10178_v63 = vld [vmem:[#allocation6 + $0x1f30] sm:$0xff] }
 0xf64   :  { %10327 = vmatprep.subr.bf16.mxu1 %v10143_v30  ;;  %v10119_v30 = vld [vmem:[#allocation6 + $0x1d58] sm:$0xff] }
 0xf65   :  { %10237 = vmatmul.mubr.bf16.vlgmr.msra.gmra.mrb[156].mxu0 %v15930_v28 }
 0xf66   :  { %10278 = vmatmul.mubr.bf16.vlgmr.msra.gmra.mrb[180].mxu1 %v15934_v29  ;;  %10287 = vmatpush1.bf16.msra.mxu0 %v10078_v49  ;;  %v10183_v49 = vld [vmem:[#allocation6 + $0x1f58] sm:$0xff] }
 0xf67   :  { %10328 = vmatpush1.bf16.msra.mxu1 %v10142_v55  ;;  %10288 = vmatprep.subr.bf16.mxu0 %v10083_v53  ;;  %v10118_v55 = vld [vmem:[#allocation6 + $0x1d50] sm:$0xff] }
 0xf68   :  { %10329 = vmatprep.subr.bf16.mxu1 %v10147_v48  ;;  %10318 = vmatprep.mubr.bf16.mxu0 %v15910_v15  ;;  %v10094_v15 = vld [vmem:[#allocation6 + $0x1c90] sm:$0xff]  ;;  %v10123_v48 = vld [vmem:[#allocation6 + $0x1d78] sm:$0xff] }
 0xf69   :  { %10359 = vmatprep.mubr.bf16.mxu1 %v15914_v41  ;;  %v10158_v41 = vld [vmem:[#allocation6 + $0x1e90] sm:$0xff] }
 0xf6a   :  { %10289 = vmatpush1.bf16.msra.mxu0 %v10082_v12  ;;  %v10182_v53 = vld [vmem:[#allocation6 + $0x1f50] sm:$0xff]  ;;  %v10187_v12 = vld [vmem:[#allocation6 + $0x1f78] sm:$0xff] }
 0xf6b   :  { %10330 = vmatpush1.bf16.msra.mxu1 %v10146_v23  ;;  %10290 = vmatprep.subr.bf16.mxu0 %v10087_v13  ;;  %v10122_v23 = vld [vmem:[#allocation6 + $0x1d70] sm:$0xff] }
 0xf6c   :  { %10331 = vmatprep.subr.bf16.mxu1 %v10151_v19  ;;  %v10186_v13 = vld [vmem:[#allocation6 + $0x1f70] sm:$0xff]  ;;  %v10127_v19 = vld [vmem:[#allocation6 + $0x1d98] sm:$0xff] }
 0xf6e   :  { %10291 = vmatpush1.bf16.msra.mxu0 %v10086_v6  ;;  %v10191_v6 = vld [vmem:[#allocation6 + $0x1f98] sm:$0xff] }
 0xf6f   :  { %10332 = vmatpush1.bf16.msra.mxu1 %v10150_v20  ;;  %10292 = vmatprep.subr.bf16.mxu0 %v10091_v27  ;;  %v10126_v20 = vld [vmem:[#allocation6 + $0x1d90] sm:$0xff] }
 0xf70   :  { %10333 = vmatprep.subr.bf16.mxu1 %v10155_v3  ;;  %v10190_v27 = vld [vmem:[#allocation6 + $0x1f90] sm:$0xff]  ;;  %v10131_v3 = vld [vmem:[#allocation6 + $0x1db8] sm:$0xff] }
 0xf72   :  { %10293 = vmatpush1.bf16.msra.mxu0 %v10090_v22  ;;  %v10195_v22 = vld [vmem:[#allocation6 + $0x1fb8] sm:$0xff] }
 0xf73   :  { %10334 = vmatpush1.bf16.msra.mxu1 %v10154_v42  ;;  %10294 = vmatprep.subr.bf16.mxu0 %v10095_v11  ;;  %v10130_v42 = vld [vmem:[#allocation6 + $0x1db0] sm:$0xff] }
 0xf74   :  { %10335 = vmatprep.subr.bf16.mxu1 %v10159_v38  ;;  %v10194_v11 = vld [vmem:[#allocation6 + $0x1fb0] sm:$0xff]  ;;  %v10135_v38 = vld [vmem:[#allocation6 + $0x1dd8] sm:$0xff] }
 0xf76   :  { %10295 = vmatpush1.bf16.msra.mxu0 %v10094_v15  ;;  %v10199_v15 = vld [vmem:[#allocation6 + $0x1fd8] sm:$0xff] }
 0xf77   :  { %10336 = vmatpush1.bf16.msra.mxu1 %v10158_v41  ;;  %10296 = vmatprep.subr.bf16.mxu0 %v10099_v43  ;;  %v10134_v41 = vld [vmem:[#allocation6 + $0x1dd0] sm:$0xff] }
 0xf78   :  { %10337 = vmatprep.subr.bf16.mxu1 %v10163_v9  ;;  %v9646_v25 = vpop.f32.mrb[144].mxu0  ;;  %v10198_v43 = vld [vmem:[#allocation6 + $0x1fd0] sm:$0xff]  ;;  %v10139_v9 = vld [vmem:[#allocation6 + $0x1df8] sm:$0xff] }
 0xf79   :  { %v9687_v18 = vpop.f32.mrb[168].mxu1  ;;  %v9648_v21 = vpop.f32.mrb[145].mxu0 }
 0xf7a   :  { %v9688_v10 = vadd.f32 %v9687_v18, %v9646_v25  ;;  %v9689_v14 = vpop.f32.mrb[169].mxu1  ;;  %v9650_v54 = vpop.f32.mrb[146].mxu0  ;;  %10297 = vmatpush1.bf16.msra.mxu0 %v10098_v7  ;;  %v10203_v7 = vld [vmem:[#allocation6 + $0x1ff8] sm:$0xff]  ;;  %v10202_v25 = vld [vmem:[#allocation6 + $0x1ff0] sm:$0xff] }
 0xf7b   :  { %v9690_v37 = vadd.f32 %v9689_v14, %v9648_v21  ;;  %v9691_v57 = vpop.f32.mrb[170].mxu1  ;;  %10338 = vmatpush1.bf16.msra.mxu1 %v10162_v24  ;;  %v9651_v31 = vpop.f32.mrb[147].mxu0  ;;  %10298 = vmatprep.subr.bf16.mxu0 %v10103_v33  ;;  %v10138_v24 = vld [vmem:[#allocation6 + $0x1df0] sm:$0xff]  ;;  %v13578_v21 = vld [vmem:[#allocation13 + $0x50] sm:$0xff]   ;;  %v13581_v54 = vld [vmem:[#allocation13 + $0x18] sm:$0xff]  }
 0xf7c   :  { %v15941_v47 = vadd.f32 %v9688_v10, %v15897_v45  ;;  %v9692_v36 = vpop.f32.mrb[171].mxu1  ;;  %10339 = vmatprep.subr.bf16.mxu1 %v10167_v32  ;;  %v10175_v45 = vld [vmem:[#allocation6 + $0x1f18] sm:$0xff]  ;;  %v13574_v18 = vld [vmem:[#allocation13 + $0x40] sm:$0xff]   ;;  %v13579_v14 = vld [vmem:[#allocation13 + $0x10] sm:$0xff]  }
 0xf7d   :  { %v15944_v40 = vadd.f32 %v9690_v37, %v15900_v50  ;;  %v10114_v50 = vld [vmem:[#allocation6 + $0x1d30] sm:$0xff]  ;;  %v13576_v32 = vld [vmem:[#allocation13 + $0x48] sm:$0xff]   ;;  %v13580_v37 = vld [vmem:[#allocation13 + $0x58] sm:$0xff]  }
 0xf7e   :  { %10299 = vmatpush1.bf16.msra.mxu0 %v10102_v60  ;;  %v13575_v33 = vld [vmem:[#allocation13] sm:$0xff]   ;;  %v13577_v10 = vld [vmem:[#allocation13 + $0x8] sm:$0xff]  }
 0xf7f   :  { %10340 = vmatpush1.bf16.msra.mxu1 %v10166_v5  ;;  %10300 = vmatprep.subr.bf16.mxu0 %v10107_v35  ;;  %v13582_v57 = vld [vmem:[#allocation13 + $0x60] sm:$0xff]   ;;  %v13584_v36 = vld [vmem:[#allocation13 + $0x68] sm:$0xff]  }
 0xf80   :  { %10341 = vmatprep.subr.bf16.mxu1 %v10171_v56  ;;  %v13583_v31 = vld [vmem:[#allocation13 + $0x20] sm:$0xff]  }
 0xf82   :  { %10301 = vmatpush1.bf16.msra.mxu0 %v10106_v26 }
 0xf83   :  { %10342 = vmatpush1.bf16.msra.mxu1 %v10170_v52  ;;  %10302 = vmatprep.subr.bf16.mxu0 %v10111_v44 }
 0xf84   :  { %10343 = vmatprep.subr.bf16.mxu1 %v10175_v45 }
 0xf86   :  { %10303 = vmatpush1.bf16.msra.mxu0 %v10110_v4 }
 0xf87   :  { %10344 = vmatpush1.bf16.msra.mxu1 %v10174_v34  ;;  %10304 = vmatprep.subr.bf16.mxu0 %v10115_v17  ;;  %v13586_v17 = vld [vmem:[#allocation13 + $0x70] sm:$0xff]  }
 0xf88   :  { %10345 = vmatprep.subr.bf16.mxu1 %v10179_v8 }
 0xf8a   :  { %10305 = vmatpush1.bf16.msra.mxu0 %v10114_v50  ;;  %v13587_v50 = vld [vmem:[#allocation13 + $0x30] sm:$0xff]  }
 0xf8b   :  { %10346 = vmatpush1.bf16.msra.mxu1 %v10178_v63  ;;  %10306 = vmatprep.subr.bf16.mxu0 %v10119_v30  ;;  %v13588_v63 = vld [vmem:[#allocation13 + $0x78] sm:$0xff]  }
 0xf8c   :  { %10347 = vmatprep.subr.bf16.mxu1 %v10183_v49  ;;  %v13589_v30 = vld [vmem:[#allocation13 + $0x38] sm:$0xff]   ;;  %v13590_v49 = vld [vmem:[#allocation13 + $0xc0] sm:$0xff]  }
 0xf8e   :  { %10307 = vmatpush1.bf16.msra.mxu0 %v10118_v55  ;;  %v13591_v55 = vld [vmem:[#allocation13 + $0x80] sm:$0xff]  }
 0xf8f   :  { %10348 = vmatpush1.bf16.msra.mxu1 %v10182_v53  ;;  %10308 = vmatprep.subr.bf16.mxu0 %v10123_v48  ;;  %v13592_v53 = vld [vmem:[#allocation13 + $0xc8] sm:$0xff]   ;;  %v13594_v48 = vld [vmem:[#allocation13 + $0xd0] sm:$0xff]  }
 0xf90   :  { %10349 = vmatprep.subr.bf16.mxu1 %v10187_v12  ;;  %v13596_v12 = vld [vmem:[#allocation13 + $0xd8] sm:$0xff]  }
 0xf92   :  { %10309 = vmatpush1.bf16.msra.mxu0 %v10122_v23  ;;  %v13597_v23 = vld [vmem:[#allocation13 + $0x98] sm:$0xff]  }
 0xf93   :  { %10350 = vmatpush1.bf16.msra.mxu1 %v10186_v13  ;;  %10310 = vmatprep.subr.bf16.mxu0 %v10127_v19  ;;  %v13598_v13 = vld [vmem:[#allocation13 + $0xe0] sm:$0xff]  }
 0xf94   :  { %10351 = vmatprep.subr.bf16.mxu1 %v10191_v6  ;;  %v13599_v19 = vld [vmem:[#allocation13 + $0xa0] sm:$0xff]   ;;  %v13600_v6 = vld [vmem:[#allocation13 + $0xe8] sm:$0xff]  }
 0xf96   :  { %10311 = vmatpush1.bf16.msra.mxu0 %v10126_v20 }
 0xf97   :  { %10352 = vmatpush1.bf16.msra.mxu1 %v10190_v27  ;;  %10312 = vmatprep.subr.bf16.mxu0 %v10131_v3  ;;  %v13601_v3 = vld [vmem:[#allocation13 + $0xa8] sm:$0xff]  }
 0xf98   :  { %10353 = vmatprep.subr.bf16.mxu1 %v10195_v22 }
 0xf9a   :  { %10313 = vmatpush1.bf16.msra.mxu0 %v10130_v42 }
 0xf9b   :  { %10354 = vmatpush1.bf16.msra.mxu1 %v10194_v11  ;;  %10314 = vmatprep.subr.bf16.mxu0 %v10135_v38 }
 0xf9c   :  { %10355 = vmatprep.subr.bf16.mxu1 %v10199_v15 }
 0xf9e   :  { %10315 = vmatpush1.bf16.msra.mxu0 %v10134_v41 }
 0xf9f   :  { %10356 = vmatpush1.bf16.msra.mxu1 %v10198_v43  ;;  %10316 = vmatprep.subr.bf16.mxu0 %v10139_v9 }
 0xfa0   :  { %10357 = vmatprep.subr.bf16.mxu1 %v10203_v7 }
 0xfa2   :  { %10317 = vmatpush1.bf16.msra.mxu0 %v10138_v24  ;;  %v13602_v24 = vld [vmem:[#allocation13 + $0xf0] sm:$0xff]  }
 0xfa3   :  { %10358 = vmatpush1.bf16.msra.mxu1 %v10202_v25  ;;  %12147 = vmatprep.subr.bf16.mxu0 %v13574_v18  ;;  %v13603_v18 = vld [vmem:[#allocation13 + $0xb0] sm:$0xff]  }
 0xfa4   :  { %12169 = vmatprep.subr.bf16.mxu1 %v13590_v49 }
 0xfa5   :  { %10319 = vmatmul.mubr.bf16.vlgmr.msra.gmra.mrb[160].mxu0 %v15930_v28 }
 0xfa6   :  { %10360 = vmatmul.mubr.bf16.vlgmr.msra.gmra.mrb[184].mxu1 %v15934_v29  ;;  %12148 = vmatpush3.bf16.msra.mxu0 %v13575_v33  ;;  %v13585_v29 = vld [vmem:[#allocation13 + $0x28] sm:$0xff]   ;;  %v13604_v33 = vld [vmem:[#allocation13 + $0xf8] sm:$0xff]  }
 0xfa7   :  { %12149 = vmatprep.subr.bf16.mxu0 %v13576_v32  ;;  %12170 = vmatpush3.bf16.msra.mxu1 %v13591_v55  ;;  %v13605_v32 = vld [vmem:[#allocation13 + $0xb8] sm:$0xff]  }
 0xfa8   :  { %12171 = vmatprep.subr.bf16.mxu1 %v13592_v53 }
 0xfaa   :  { %12150 = vmatpush3.bf16.msra.mxu0 %v13577_v10 }
 0xfab   :  { %12151 = vmatprep.subr.bf16.mxu0 %v13578_v21 }
 0xfae   :  { %12152 = vmatpush3.bf16.msra.mxu0 %v13579_v14 }
 0xfaf   :  { %12153 = vmatprep.subr.bf16.mxu0 %v13580_v37  ;;  %v10376_v37 = vrot.slane %v13871_v0, %v14343_v59 }
 0xfb2   :  { %12154 = vmatpush3.bf16.msra.mxu0 %v13581_v54 }
 0xfb3   :  { %12155 = vmatprep.subr.bf16.mxu0 %v13582_v57 }
 0xfb6   :  { %12156 = vmatpush3.bf16.msra.mxu0 %v13583_v31  ;;  %v10380_v31 = vrot.slane %v13871_v0, %v14346_v61 }
 0xfb7   :  { %12157 = vmatprep.subr.bf16.mxu0 %v13584_v36 }
 0xfb8   :  { %v9905_v28 = vpop.f32.mrb[148].mxu0 }
 0xfb9   :  { %v9946_v60 = vpop.f32.mrb[172].mxu1  ;;  %v9907_v35 = vpop.f32.mrb[149].mxu0 }
 0xfba   :  { %v9947_v5 = vadd.f32 %v9946_v60, %v9905_v28  ;;  %v9948_v56 = vpop.f32.mrb[173].mxu1  ;;  %v9909_v52 = vpop.f32.mrb[150].mxu0  ;;  %12158 = vmatpush3.bf16.msra.mxu0 %v13585_v29 }
 0xfbb   :  { %v9949_v26 = vadd.f32 %v9948_v56, %v9907_v35  ;;  %v9950_v44 = vpop.f32.mrb[174].mxu1  ;;  %v9910_v4 = vpop.f32.mrb[151].mxu0  ;;  %12159 = vmatprep.subr.bf16.mxu0 %v13586_v17 }
 0xfbc   :  { %v15949_v45 = vadd.f32 %v9947_v5, %v15919_v39  ;;  %v9951_v34 = vpop.f32.mrb[175].mxu1  ;;  %v13593_v39 = vld [vmem:[#allocation13 + $0x88] sm:$0xff]  }
 0xfbd   :  { %v15952_v8 = vadd.f32 %v9949_v26, %v15922_v51  ;;  %12172 = vmatpush3.bf16.msra.mxu1 %v13593_v39  ;;  %v13595_v51 = vld [vmem:[#allocation13 + $0x90] sm:$0xff]  }
 0xfbe   :  { %12160 = vmatpush3.bf16.msra.mxu0 %v13587_v50  ;;  %12173 = vmatprep.subr.bf16.mxu1 %v13594_v48 }
 0xfbf   :  { %12161 = vmatprep.subr.bf16.mxu0 %v13588_v63  ;;  %v10388_v63 = vrot.slane %v13871_v0, %v3933_v46  ;;  %v13609_v46 = vld [vmem:[%s16023_s8 + $0x18] sm:$0xff]  }
 0xfc1   :  { %12174 = vmatpush3.bf16.msra.mxu1 %v13595_v51 }
 0xfc2   :  { %12162 = vmatpush3.bf16.msra.mxu0 %v13589_v30  ;;  %12175 = vmatprep.subr.bf16.mxu1 %v13596_v12 }
 0xfc3   :  { %12512 = vmatprep.subr.bf16.mxu0 %v13749_v16 }
 0xfc5   :  { %12176 = vmatpush3.bf16.msra.mxu1 %v13597_v23 }
 0xfc6   :  { %12177 = vmatprep.subr.bf16.mxu1 %v13598_v13 }
 0xfc9   :  { %12178 = vmatpush3.bf16.msra.mxu1 %v13599_v19 }
 0xfca   :  { %12179 = vmatprep.subr.bf16.mxu1 %v13600_v6 }
 0xfcd   :  { %12180 = vmatpush3.bf16.msra.mxu1 %v13601_v3  ;;  %v13612_v3 = vld [vmem:[%s16023_s8 + $0x30] sm:$0xff]  }
 0xfce   :  { %12181 = vmatprep.subr.bf16.mxu1 %v13602_v24 }
 0xfd1   :  { %12182 = vmatpush3.bf16.msra.mxu1 %v13603_v18 }
 0xfd2   :  { %12183 = vmatprep.subr.bf16.mxu1 %v13604_v33 }
 0xfd5   :  { %12184 = vmatpush3.bf16.msra.mxu1 %v13605_v32 }
 0xff8   :  { %v9987_v20 = vpop.f32.mrb[152].mxu0 }
 0xff9   :  { %v10028_v27 = vpop.f32.mrb[176].mxu1  ;;  %v9989_v42 = vpop.f32.mrb[153].mxu0 }
 0xffa   :  { %v10029_v22 = vadd.f32 %v10028_v27, %v9987_v20  ;;  %v10030_v11 = vpop.f32.mrb[177].mxu1  ;;  %v9991_v15 = vpop.f32.mrb[154].mxu0  ;;  %v13610_v20 = vld [vmem:[%s16023_s8 + $0x20] sm:$0xff]   ;;  %v13611_v27 = vld [vmem:[%s16023_s8 + $0x28] sm:$0xff]  }
 0xffb   :  { %v10031_v38 = vadd.f32 %v10030_v11, %v9989_v42  ;;  %v10032_v41 = vpop.f32.mrb[178].mxu1  ;;  %v9992_v9 = vpop.f32.mrb[155].mxu0 }
 0xffc   :  { %v10037_v43 = vadd.f32 %v10029_v22, %v15941_v47  ;;  %v10033_v7 = vpop.f32.mrb[179].mxu1  ;;  %v13613_v22 = vld [vmem:[%s16023_s8 + $0x38] sm:$0xff]  }
 0xffd   :  { %v10038_v25 = vadd.f32 %v10031_v38, %v15944_v40 }
0x1038   :  { %v10238_v10 = vpop.f32.mrb[156].mxu0 }
0x1039   :  { %v10279_v21 = vpop.f32.mrb[180].mxu1  ;;  %v10240_v54 = vpop.f32.mrb[157].mxu0 }
0x103a   :  { %v10280_v14 = vadd.f32 %v10279_v21, %v10238_v10  ;;  %v10281_v47 = vpop.f32.mrb[181].mxu1  ;;  %v10242_v40 = vpop.f32.mrb[158].mxu0 }
0x103b   :  { %v10282_v57 = vadd.f32 %v10281_v47, %v10240_v54  ;;  %v10283_v36 = vpop.f32.mrb[182].mxu1  ;;  %v10243_v60 = vpop.f32.mrb[159].mxu0 }
0x103c   :  { %v10368_v28 = vadd.f32 %v10280_v14, %v15949_v45  ;;  %v10284_v29 = vpop.f32.mrb[183].mxu1  ;;  %v10384_v45 = vrot.slane %v13871_v0, %v14349_v62  ;;  %v13607_v0 = vld [vmem:[%s16023_s8 + $0x8] sm:$0xff]   ;;  %v13608_v62 = vld [vmem:[%s16023_s8 + $0x10] sm:$0xff]   ;;  %s13702_s8 = scalar_lea.vmem %s10868_s4, 32 }
0x103d   :  { %v10369_v5 = vadd.f32 %v10282_v57, %v15952_v8  ;;  %p13703_p4 = scmp.ne.s32.totalorder %s10868_s4, %s13702_s8  ;;  %p13708_p6 = scmp.lt.s32.totalorder %s13702_s8, %s13702_s8 }
0x103e   :  { %v10393_v35 = vadd.f32 %v10376_v37, %v10368_v28 }
0x103f   :  { %v10394_v56 = vadd.f32 %v10380_v31, %v10369_v5  ;;  %p13709_p7 = por %p13708_p6, %p13707_p5 }
0x1040   :  { %v10397_v26 = vmax.f32 %v10393_v35, 0.0 }
0x1041   :  { %v10398_v52 = vmax.f32 %v10394_v56, 0.0  ;;  %p13710_p8 = pnand %p13709_p7, %p13703_p4 }
0x1042   :  { %v10465_v59 = vpack.c.bf16 %v10397_v26, %v10397_v26 }
0x1043   :  { %v10466_v44 = vpack.c.bf16 %v10398_v52, %v10398_v52 }
0x1045   :  { %10699 = vmatprep.mubr.bf16.mxu0 %v10466_v44 }
0x1046   :  { %10700 = vmatmul.mubr.bf16.vlgmr.msra.gmra.mrb[164].mxu0 %v10465_v59 }
0x1047   :  { %12528 = vmatprep.mubr.msk.bf16.mxu0 %vm13750_vm5, %v13749_v16  ;;  %12513 = vmatpush3.bf16.msra.mxu0 %v13606_v58 }
0x1048   :  { %12514 = vmatprep.subr.bf16.mxu0 %v13749_v16 }
0x104b   :  { %12515 = vmatpush3.bf16.msra.mxu0 %v13607_v0 }
0x104c   :  { %12516 = vmatprep.subr.bf16.mxu0 %v13749_v16 }
0x104f   :  { %12517 = vmatpush3.bf16.msra.mxu0 %v13608_v62 }
0x1050   :  { %12518 = vmatprep.subr.bf16.mxu0 %v13749_v16 }
0x1053   :  { %12519 = vmatpush3.bf16.msra.mxu0 %v13609_v46 }
0x1054   :  { %12520 = vmatprep.subr.bf16.mxu0 %v13749_v16 }
0x1057   :  { %12521 = vmatpush3.bf16.msra.mxu0 %v13610_v20 }
0x1058   :  { %12522 = vmatprep.subr.bf16.mxu0 %v13749_v16 }
0x105b   :  { %12523 = vmatpush3.bf16.msra.mxu0 %v13611_v27 }
0x105c   :  { %12524 = vmatprep.subr.bf16.mxu0 %v13749_v16 }
0x105f   :  { %12525 = vmatpush3.bf16.msra.mxu0 %v13612_v3 }
0x1060   :  { %12526 = vmatprep.subr.bf16.mxu0 %v13749_v16 }
0x1063   :  { %12527 = vmatpush3.bf16.msra.mxu0 %v13613_v22 }
0x1078   :  { %v10320_v61 = vpop.f32.mrb[160].mxu0 }
0x1079   :  { %v10361_v4 = vpop.f32.mrb[184].mxu1  ;;  %v10322_v17 = vpop.f32.mrb[161].mxu0 }
0x107a   :  { %v10362_v34 = vadd.f32 %v10361_v4, %v10320_v61  ;;  %v10363_v50 = vpop.f32.mrb[185].mxu1  ;;  %v10324_v30 = vpop.f32.mrb[162].mxu0 }
0x107b   :  { %v10364_v8 = vadd.f32 %v10363_v50, %v10322_v17  ;;  %v10365_v49 = vpop.f32.mrb[186].mxu1  ;;  %v10325_v53 = vpop.f32.mrb[163].mxu0 }
0x107c   :  { %v10370_v55 = vadd.f32 %v10362_v34, %v10037_v43  ;;  %v10366_v39 = vpop.f32.mrb[187].mxu1 }
0x107d   :  { %v10371_v48 = vadd.f32 %v10364_v8, %v10038_v25 }
0x107e   :  { %v10395_v51 = vadd.f32 %v10384_v45, %v10370_v55 }
0x107f   :  { %v10396_v12 = vadd.f32 %v10388_v63, %v10371_v48 }
0x1080   :  { %v10399_v23 = vmax.f32 %v10395_v51, 0.0 }
0x1081   :  { %v10400_v13 = vmax.f32 %v10396_v12, 0.0 }
0x1082   :  { %v10467_v6 = vpack.c.bf16 %v10399_v23, %v10399_v23 }
0x1083   :  { %v10468_v19 = vpack.c.bf16 %v10400_v13, %v10400_v13 }
0x1085   :  { %10739 = vmatprep.mubr.bf16.mxu1 %v10468_v19 }
0x1086   :  { %10740 = vmatmul.mubr.bf16.vlgmr.msra.gmra.mrb[188].mxu1 %v10467_v6 }
0x1119   :  { %v12163_v42 = vpop.f32.mrb[164].mxu0 }
0x111a   :  { %v12164_v11 = vpop.f32.mrb[165].mxu0 }
0x111b   :  { %v12165_v38 = vadd.f32 %v12164_v11, %v12163_v42  ;;  %v12166_v15 = vpop.f32.mrb[166].mxu0 }
0x111c   :  { %v12167_v41 = vpop.f32.mrb[167].mxu0 }
0x111d   :  { %v10702_v7 = vadd.f32 %v12165_v38, %v13873_v1 }
0x1159   :  { %v12185_v43 = vpop.f32.mrb[188].mxu1 }
0x115a   :  { %v12186_v9 = vpop.f32.mrb[189].mxu1 }
0x115b   :  { %v12187_v24 = vadd.f32 %v12186_v9, %v12185_v43  ;;  %v12188_v25 = vpop.f32.mrb[190].mxu1 }
0x115c   :  { %v12189_v18 = vpop.f32.mrb[191].mxu1 }
0x115d   :  { %v10742_v33 = vadd.f32 %v12187_v24, %v10702_v7 }
0x115f   :  { %v10747_v32 = vmax.f32 %v10742_v33, 0.0 }
0x1161   :  { %v10764_v16 = vpack.c.bf16 %v10747_v32, %v10747_v32 }
0x1163   :  { %12529 = vmatmul.mubr.bf16.vlgmr.msra.gmra.mrb[168].mxu0 %v10764_v16 }
0x1236   :  { %v10853_v10 = vpop.f32.mrb[168].mxu0 }
0x1237   :  { %v10854_v21 = vadd.f32 %v13875_v2, %v10853_v10  ;;  %v12530_v14 = vpop.f32.mrb[169].mxu0 }
0x1238   :  { %v10856_v37 = vpop.f32.mrb[170].mxu0 }
0x1239   :  { %v12531_v54 = vpop.f32.mrb[171].mxu0  ;;  %10860 = vst.msk [vmem:[#allocation16] sm:$0x3] %vm10859_vm2, %v10854_v21 }
0x123a   :  { %13713 = shalt.err (!%p13710_p8)
}
0x123b   :  { %s13714_s6 = scalar_lea.hbm %s16025_s10, 32 }
0x123c   :  { %p13715_p9 = scmp.ne.s32.totalorder %s16025_s10, %s13714_s6  ;;  %p13718_p10 = scmp.lt.u32.totalorder %s13714_s6, %s16025_s10 }
0x123e   :  { %p13720_p11 = pnand %p13718_p10, %p13715_p9 }
0x1240   :  { %13723 = shalt.err (!%p13720_p11)
}
0x1241   :  { %10870 = dma.vmem_to_hbm [thread:$0]  %s10868_s4, 32, %s16025_s10, [#allocation10]  }
0x1242   :  { %13732 = dma.done.wait [#allocation10], 32  }
0x1243   :  { %13733 = vsyncadd [#allocation10], 4294967264 }
0x1244   :  { %10874 = vsyncpa [#allocation9], 1 }
0x1245   :  { %10875 = vsyncpa [#allocation12], 1 }
0x1246   :  { %10876 = vsyncpa [#allocation15], 1 }
0x1247   :  { %10877 = vsyncpa [#allocation10], 1 }
0x1248   :  { %10878 = vsyncmov [#allocation7] }
0x124b   :  { %s10879_s0 = vpop.sfrf %10878 }
0x124c   :  { %p11994_p12 = scmp.ne.s32.totalorder %s10879_s0, 0 }
0x124e   :  { %10883 = shalt.err (%p11994_p12)  }

</bundles_post_ra>
